<compile_context>
chip_gen: v7x
topology: tpu7x:2x2x1
jax: 0.10.0
libtpu: 0.0.40
codegen_flags: <defaults>
</compile_context>

<pallas_src>
import jax
import jax.numpy as jnp
from jax.experimental import pallas as pl
from jax.experimental.pallas import tpu as pltpu

BN_EPS = 1e-5
BF16 = jnp.bfloat16


# ------------------------------------------------------------------ budgets
def _vmem_budgets():
    """Per-stage working-set target and scoped-VMEM limit from hardware info."""
    try:
        cap = int(pltpu.get_tpu_info().vmem_capacity_bytes)
    except Exception:
        cap = 64 * 1024 * 1024            # conservative fallback (v7x per-core)
    ws = min(24 * 1024 * 1024, cap // 3)
    limit = min(cap * 3 // 4, 100 * 1024 * 1024)
    return int(ws), int(limit)


VMEM_WS_BUDGET, VMEM_LIMIT = _vmem_budgets()


# ------------------------------------------------------------------ helpers
def _fold_bn(conv_bias, gamma, beta, mean, var):
    inv = gamma / jnp.sqrt(var + BN_EPS)
    return inv, (conv_bias - mean) * inv + beta


def _bilinear_matrix(out_size, in_size):
    # align_corners=True: src = dst * (in-1)/(out-1)
    if in_size == 1:
        return jnp.ones((out_size, 1), jnp.float32)
    pos = jnp.arange(out_size, dtype=jnp.float32) * (in_size - 1) / (out_size - 1)
    lo = jnp.clip(jnp.floor(pos).astype(jnp.int32), 0, in_size - 2)
    frac = pos - lo.astype(jnp.float32)
    rows = jnp.arange(out_size)
    A = jnp.zeros((out_size, in_size), jnp.float32)
    A = A.at[rows, lo].add(1.0 - frac)
    A = A.at[rows, lo + 1].add(frac)
    return A


def _pick_divisor(total, target):
    """Largest divisor of `total` that is <= target (>= 1)."""
    target = max(1, min(int(target), int(total)))
    for d in range(target, 0, -1):
        if total % d == 0:
            return d
    return 1


# ------------------------------------------ bilinear x2 upsample (align_corners)
def _upsample_kernel(x_ref, awt_ref, ah_ref, o_ref):
    ct, H, W = x_ref.shape
    # Width pass: one large lane-dense matmul over the whole channel block.
    t = jnp.dot(x_ref[...].reshape(ct * H, W), awt_ref[...],
                preferred_element_type=jnp.float32)            # (ct*H, Wo)
    t = t.astype(BF16).reshape(ct, H, -1)                      # (ct, H, Wo)
    ah = ah_ref[...]                                           # (Ho, H)
    for c in range(ct):                                        # height pass
        o_ref[c] = jnp.dot(ah, t[c],
                           preferred_element_type=jnp.float32).astype(o_ref.dtype)


def upsample_bilinear_x2(x_nchw):
    N, C, H, W = x_nchw.shape
    Ho, Wo = 2 * H, 2 * W
    ah = _bilinear_matrix(Ho, H).astype(BF16)           # (Ho, H)
    awt = _bilinear_matrix(Wo, W).T.astype(BF16)        # (W, Wo)
    NC = N * C
    # channel-batch size from the VMEM working-set budget (rough per-channel bytes)
    per_ch = 4 * H * W + 6 * H * Wo + 8 * Ho * Wo + 64
    ct_target = min(16, max(1, VMEM_WS_BUDGET // per_ch), NC)
    if NC >= 2:
        ct_target = min(ct_target, NC // 2)              # >=2 grid steps (megacore)
    ct = _pick_divisor(NC, max(1, ct_target))
    xr = x_nchw.reshape(NC, H, W).astype(BF16)
    out = pl.pallas_call(
        _upsample_kernel,
        out_shape=jax.ShapeDtypeStruct((NC, Ho, Wo), BF16),
        grid=(NC // ct,),
        in_specs=[
            pl.BlockSpec((ct, H, W), lambda i: (i, 0, 0)),
            pl.BlockSpec((W, Wo), lambda i: (0, 0)),
            pl.BlockSpec((Ho, H), lambda i: (0, 0)),
        ],
        out_specs=pl.BlockSpec((ct, Ho, Wo), lambda i: (i, 0, 0)),
        compiler_params=pltpu.CompilerParams(
            dimension_semantics=("parallel",), vmem_limit_bytes=VMEM_LIMIT),
    )(xr, awt, ah)
    return out.reshape(N, C, Ho, Wo)


# -------------------------------------------------- attention block (AttBlock)
def _att_kernel(g_ref, s_ref, wg_ref, sg_ref, bg_ref, wx_ref, sx_ref, bx_ref,
                wp_ref, sp_ref, bp_ref, o_ref):
    g1 = jnp.dot(g_ref[...], wg_ref[...], preferred_element_type=jnp.float32)
    g1 = g1 * sg_ref[...] + bg_ref[...]
    x1 = jnp.dot(s_ref[...], wx_ref[...], preferred_element_type=jnp.float32)
    x1 = x1 * sx_ref[...] + bx_ref[...]
    p = jnp.maximum(g1 + x1, 0.0)                                    # relu
    z = jnp.sum(p * wp_ref[...], axis=-1, keepdims=True)             # psi 1x1 conv
    z = z * sp_ref[...] + bp_ref[...]
    psi = 0.5 * (jnp.tanh(0.5 * z) + 1.0)                            # stable sigmoid
    o_ref[...] = (s_ref[...].astype(jnp.float32) * psi).astype(o_ref.dtype)


def att_block(g_flat, s_flat, p):
    M, Cg = g_flat.shape
    Cs = s_flat.shape[1]
    Fi = p["att_wg"].shape[1]
    # Row tile: large (up to 8192), bounded by the VMEM working-set budget,
    # multiple of 8, >=2 grid steps when possible; pad M (no divisor cliff).
    per_row = 4 * (Cg + 2 * Cs) + 8 * Fi + 64
    tm = min(8192, max(256, VMEM_WS_BUDGET // per_row))
    if M >= 16:
        tm = min(tm, M // 2)
    tm = min(tm, M)
    if M >= 8:
        tm = max(8, (tm // 8) * 8)
    else:
        tm = M
    Mp = pl.cdiv(M, tm) * tm
    if Mp != M:
        pad = Mp - M
        g_flat = jnp.pad(g_flat, ((0, pad), (0, 0)))
        s_flat = jnp.pad(s_flat, ((0, pad), (0, 0)))
    full = lambda i: (0, 0)
    out = pl.pallas_call(
        _att_kernel,
        out_shape=jax.ShapeDtypeStruct((Mp, Cs), BF16),
        grid=(Mp // tm,),
        in_specs=[
            pl.BlockSpec((tm, Cg), lambda i: (i, 0)),
            pl.BlockSpec((tm, Cs), lambda i: (i, 0)),
            pl.BlockSpec((Cg, Fi), full),
            pl.BlockSpec((1, Fi), full),
            pl.BlockSpec((1, Fi), full),
            pl.BlockSpec((Cs, Fi), full),
            pl.BlockSpec((1, Fi), full),
            pl.BlockSpec((1, Fi), full),
            pl.BlockSpec((1, Fi), full),
            pl.BlockSpec((1, 1), full),
            pl.BlockSpec((1, 1), full),
        ],
        out_specs=pl.BlockSpec((tm, Cs), lambda i: (i, 0)),
        compiler_params=pltpu.CompilerParams(
            dimension_semantics=("parallel",), vmem_limit_bytes=VMEM_LIMIT),
    )(g_flat, s_flat,
      p["att_wg"].astype(BF16), p["att_sg"], p["att_bg"],
      p["att_wx"].astype(BF16), p["att_sx"], p["att_bx"],
      p["att_wp"], p["att_sp"], p["att_bp"])
    return out[:M]


# ------------------ row-tiled 3x3 conv + BN + ReLU (multi-input, no concat)
def _make_conv_kernel(n_inputs):
    def kernel(*refs):
        centers = refs[0:3 * n_inputs:3]
        tops = refs[1:3 * n_inputs:3]
        bots = refs[2:3 * n_inputs:3]
        ws = refs[3 * n_inputs:4 * n_inputs]          # each (3, 3*Cin, Cout)
        s_ref, b_ref, o_ref = refs[4 * n_inputs:]
        th, Wo = centers[0].shape[1], centers[0].shape[2]
        Cout = s_ref.shape[-1]

        i = pl.program_id(1)
        top_ok = i > 0                          # row above exists in the image
        bot_ok = i < pl.num_programs(1) - 1     # row below exists in the image

        def xcat(rows):
            # rows: (r, Wo, Cin) -> (r, Wo, 3*Cin) holding [in[x-1], in[x], in[x+1]]
            # per output pixel (zero padding at the W borders): kx folded into K.
            r, _, cin = rows.shape
            zc = jnp.zeros((r, 1, cin), rows.dtype)
            left = jnp.concatenate([zc, rows[:, :Wo - 1, :]], axis=1)
            right = jnp.concatenate([rows[:, 1:, :], zc], axis=1)
            return jnp.concatenate([left, rows, right], axis=-1)

        # f32 partial sums per ky tap, summed over all inputs.
        acc_mid = jnp.zeros((th * Wo, Cout), jnp.float32)   # ky = 1 (same row)
        acc_top = jnp.zeros((th * Wo, Cout), jnp.float32)   # ky = 0, center rows
        acc_bot = jnp.zeros((th * Wo, Cout), jnp.float32)   # ky = 2, center rows
        halo_top = jnp.zeros((Wo, Cout), jnp.float32)       # ky = 0, row above tile
        halo_bot = jnp.zeros((Wo, Cout), jnp.float32)       # ky = 2, row below tile

        for idx in range(n_inputs):
            cin = centers[idx].shape[-1]
            w = ws[idx]                                     # ref: (3, 3*cin, Cout)
            cc = xcat(centers[idx][0]).reshape(th * Wo, 3 * cin)
            acc_top = acc_top + jnp.dot(cc, w[0], preferred_element_type=jnp.float32)
            acc_mid = acc_mid + jnp.dot(cc, w[1], preferred_element_type=jnp.float32)
            acc_bot = acc_bot + jnp.dot(cc, w[2], preferred_element_type=jnp.float32)
            ht = xcat(tops[idx][0]).reshape(Wo, 3 * cin)
            hb = xcat(bots[idx][0]).reshape(Wo, 3 * cin)
            halo_top = halo_top + jnp.dot(ht, w[0], preferred_element_type=jnp.float32)
            halo_bot = halo_bot + jnp.dot(hb, w[2], preferred_element_type=jnp.float32)

        # Mask the halo contributions at the image border (on f32 results).
        halo_top = jnp.where(top_ok, halo_top, 0.0)
        halo_bot = jnp.where(bot_ok, halo_bot, 0.0)

        # ky=0: output row r takes input row r-1 -> shift acc_top down one row,
        #       row 0 comes from the top halo.
        # ky=2: output row r takes input row r+1 -> shift acc_bot up one row,
        #       row th-1 comes from the bottom halo.
        acc = (acc_mid
               + jnp.concatenate([halo_top, acc_top[:(th - 1) * Wo]], axis=0)
               + jnp.concatenate([acc_bot[Wo:], halo_bot], axis=0))

        y = jnp.maximum(acc * s_ref[...] + b_ref[...], 0.0)   # folded BN + ReLU
        o_ref[0] = y.reshape(th, Wo, Cout).astype(o_ref.dtype)
    return kernel


def conv3x3_bn_relu(inputs, weights, scale, shift, out_dtype=BF16, row_tile=None):
    """3x3 'SAME' conv over the channel-concatenation of `inputs` without
    materializing the concat (one weight slab per input), + folded BN + ReLU."""
    N, Ho, Wo, _ = inputs[0].shape
    Cout = weights[0].shape[-1]
    cin_total = sum(x.shape[-1] for x in inputs)
    out_b = jnp.dtype(out_dtype).itemsize
    if row_tile is None:
        bytes_per_row = Wo * (10 * cin_total + (20 + 2 * out_b) * Cout) + 512
        fixed = 16 * Wo * cin_total + 12 * cin_total * Cout + (1 << 16)
        row_tile = max(8, (VMEM_WS_BUDGET - fixed) // bytes_per_row)
    target = min(int(row_tile), Ho)
    if N == 1 and Ho >= 4:
        target = min(target, Ho // 2)           # >=2 grid steps (megacore)
    th = max(2, _pick_divisor(Ho, max(2, target)))
    nrt = Ho // th

    in_specs, args = [], []
    for x in inputs:
        Cin = x.shape[-1]
        in_specs += [
            # center rows of the tile (auto-pipelined)
            pl.BlockSpec((1, th, Wo, Cin), lambda n, i: (n, i, 0, 0)),
            # one-row halos, clamped at the image border (masked in-kernel)
            pl.BlockSpec((1, 1, Wo, Cin),
                         lambda n, i: (n, jnp.maximum(i * th - 1, 0), 0, 0)),
            pl.BlockSpec((1, 1, Wo, Cin),
                         lambda n, i: (n, jnp.minimum(i * th + th, Ho - 1), 0, 0)),
        ]
        args += [x, x, x]
    for w in weights:
        kh, kw, ci, co = w.shape
        wf = w.reshape(kh, kw * ci, co).astype(BF16)     # tap-folded weights
        in_specs.append(pl.BlockSpec((kh, kw * ci, co), lambda n, i: (0, 0, 0)))
        args.append(wf)
    in_specs += [pl.BlockSpec((1, Cout), lambda n, i: (0, 0))] * 2
    args += [scale.reshape(1, Cout), shift.reshape(1, Cout)]

    return pl.pallas_call(
        _make_conv_kernel(len(inputs)),
        out_shape=jax.ShapeDtypeStruct((N, Ho, Wo, Cout), out_dtype),
        grid=(N, nrt),
        in_specs=in_specs,
        out_specs=pl.BlockSpec((1, th, Wo, Cout), lambda n, i: (n, i, 0, 0)),
        compiler_params=pltpu.CompilerParams(
            dimension_semantics=("parallel", "parallel"),
            vmem_limit_bytes=VMEM_LIMIT),
    )(*args)


# ------------------------------------------------------------ parameters
def init_params(key, in_channels, skip_channels, out_channels):
    Fi = in_channels  # F_int == in_channels in DecBlock
    keys = jax.random.split(key, 5)

    def conv_bn(k, kh, kw, cin, cout):
        k0, k1, k2, k3 = jax.random.split(k, 4)
        w = 0.1 * jax.random.normal(k0, (kh, kw, cin, cout), jnp.float32)
        b = 0.1 * jax.random.normal(k1, (cout,), jnp.float32)
        gamma = 1.0 + 0.1 * jax.random.normal(k2, (cout,), jnp.float32)
        beta = 0.1 * jax.random.normal(k3, (cout,), jnp.float32)
        scale, shift = _fold_bn(b, gamma, beta,
                                jnp.zeros((cout,), jnp.float32),
                                jnp.ones((cout,), jnp.float32))
        return w, scale, shift

    wg, sg, fg = conv_bn(keys[0], 1, 1, in_channels, Fi)       # W_g
    wx, sx, fx = conv_bn(keys[1], 1, 1, skip_channels, Fi)     # W_x
    wp, sp, fp = conv_bn(keys[2], 1, 1, Fi, 1)                 # psi
    w1, s1, f1 = conv_bn(keys[3], 3, 3, in_channels + skip_channels, out_channels)
    w2, s2, f2 = conv_bn(keys[4], 3, 3, out_channels, out_channels)
    return dict(
        att_wg=wg[0, 0], att_sg=sg.reshape(1, Fi), att_bg=fg.reshape(1, Fi),
        att_wx=wx[0, 0], att_sx=sx.reshape(1, Fi), att_bx=fx.reshape(1, Fi),
        att_wp=wp[0, 0].reshape(1, Fi), att_sp=sp.reshape(1, 1), att_bp=fp.reshape(1, 1),
        w1=w1, s1=s1, b1=f1,
        w2=w2, s2=s2, b2=f2,
    )


# ------------------------------------------------------------ DecBlock forward
def dec_block_forward(x, skip, params, conv_row_tile=None):
    # x: (N, Cin, H, W), skip: (N, Cs, 2H, 2W), NCHW like PyTorch.
    N, Cin, H, W = x.shape
    Cs = skip.shape[1]
    Ho, Wo = 2 * H, 2 * W

    # 1) bilinear x2 upsample, bf16
    g = upsample_bilinear_x2(x)                                  # (N, Cin, Ho, Wo)
    # TODO(synk): an NHWC-direct upsample would remove this transpose round trip.
    g_nhwc = jnp.transpose(g, (0, 2, 3, 1))
    skip_nhwc = jnp.transpose(skip, (0, 2, 3, 1)).astype(BF16)

    # 2) attention gate: skip * sigmoid(psi(relu(W_g(g) + W_x(skip))))
    M = N * Ho * Wo
    g_flat = g_nhwc.reshape(M, Cin)
    s_flat = skip_nhwc.reshape(M, Cs)
    s_att = att_block(g_flat, s_flat, params).reshape(N, Ho, Wo, Cs)

    # 3) conv1 on [g ; s_att] with SPLIT weights (no channel concat in HBM)
    w1g = params["w1"][:, :, :Cin, :]
    w1s = params["w1"][:, :, Cin:, :]
    y = conv3x3_bn_relu([g_nhwc, s_att], [w1g, w1s],
                        params["s1"], params["b1"],
                        out_dtype=BF16, row_tile=conv_row_tile)

    # 4) conv2
    y = conv3x3_bn_relu([y], [params["w2"]],
                        params["s2"], params["b2"],
                        out_dtype=jnp.float32, row_tile=conv_row_tile)
    return jnp.transpose(y, (0, 3, 1, 2))                        # back to NCHW


# ------------------------------------------------------------ pure-JAX reference
def reference_forward(x, skip, p):
    # Mirrors the kernel's bf16 operand quantization (q) so the comparison
    # isolates kernel bugs rather than precision policy; accumulation is f32.
    q = lambda a: a.astype(BF16).astype(jnp.float32)
    N, Cin, H, W = x.shape
    Cs = skip.shape[1]
    Ho, Wo = 2 * H, 2 * W

    aw = q(_bilinear_matrix(Wo, W))                              # (Wo, W)
    ah = q(_bilinear_matrix(Ho, H))                              # (Ho, H)
    t = jnp.einsum("vw,nchw->nchv", aw, q(x))                    # width pass first
    g = q(jnp.einsum("ph,nchv->ncpv", ah, q(t)))                 # stored bf16

    g_nhwc = jnp.transpose(g, (0, 2, 3, 1))
    s_nhwc = q(jnp.transpose(skip, (0, 2, 3, 1)))
    g_flat = g_nhwc.reshape(-1, Cin)
    s_flat = s_nhwc.reshape(-1, Cs)

    g1 = (g_flat @ q(p["att_wg"])) * p["att_sg"] + p["att_bg"]
    x1 = (s_flat @ q(p["att_wx"])) * p["att_sx"] + p["att_bx"]
    pr = jnp.maximum(g1 + x1, 0.0)
    z = jnp.sum(pr * p["att_wp"], axis=-1, keepdims=True) * p["att_sp"] + p["att_bp"]
    psi = jax.nn.sigmoid(z)
    s_att = q(s_flat * psi).reshape(N, Ho, Wo, Cs)

    feat = jnp.concatenate([g_nhwc, s_att], axis=-1)

    def conv(xh, w, sc, sh):
        y = jax.lax.conv_general_dilated(
            xh, q(w), (1, 1), "SAME",
            dimension_numbers=("NHWC", "HWIO", "NHWC"))
        return jnp.maximum(y * sc.reshape(1, 1, 1, -1) + sh.reshape(1, 1, 1, -1), 0.0)

    y1 = q(conv(feat, p["w1"], p["s1"], p["b1"]))                # intermediate in bf16
    y2 = conv(y1, p["w2"], p["s2"], p["b2"])
    return jnp.transpose(y2, (0, 3, 1, 2))


if __name__ == "__main__":
    N, Cin, Cs, Cout, H, W = 2, 4, 4, 8, 16, 16
    key = jax.random.PRNGKey(0)
    kx, ks, kp = jax.random.split(key, 3)
    x = jax.random.normal(kx, (N, Cin, H, W), jnp.float32)
    skip = jax.random.normal(ks, (N, Cs, 2 * H, 2 * W), jnp.float32)
    params = init_params(kp, Cin, Cs, Cout)

    # Force row_tile=8 so the conv halo / border-mask path is actually exercised
    # (Ho = 32 -> 4 row tiles per image).
    fwd = jax.jit(lambda a, b: dec_block_forward(a, b, params, conv_row_tile=8))
    out = jax.block_until_ready(fwd(x, skip))
    assert out.shape == (N, Cout, 2 * H, 2 * W), out.shape

    ref = jax.block_until_ready(reference_forward(x, skip, params))
    max_err = float(jnp.max(jnp.abs(out - ref)))
    if not bool(jnp.allclose(out, ref, atol=1e-2, rtol=1e-2)):
        raise AssertionError(
            f"Pallas output does not match JAX reference (max abs err {max_err:.3e})")
    print("KERNEL_OK")
</pallas_src>

<mosaic_0001>
module attributes {stable_mosaic.version = 11 : i64} {
  func.func private @main(%arg0: i32) attributes {dimension_semantics = [#tpu.dimension_semantics<core_parallel>], iteration_bounds = array<i64: 2>, tpu.core_type = #tpu.core_type<sc_scalar_subcore>, window_params = []} {
    return
  }
}

module attributes {stable_mosaic.version = 11 : i64} {
  func.func private @main(%arg0: i32) attributes {dimension_semantics = [#tpu.dimension_semantics<core_parallel>], iteration_bounds = array<i64: 2>, tpu.core_type = #tpu.core_type<sc_scalar_subcore>, window_params = []} {
    return
  }
}

module attributes {stable_mosaic.version = 11 : i64} {
  func.func @_upsample_kernel(%arg0: i32, %arg1: memref<4x16x16xbf16, #tpu.memory_space<vmem>>, %arg2: memref<16x32xbf16, #tpu.memory_space<vmem>>, %arg3: memref<32x16xbf16, #tpu.memory_space<vmem>>, %arg4: memref<4x32x32xbf16, #tpu.memory_space<vmem>>) attributes {dimension_semantics = [#tpu.dimension_semantics<parallel>], iteration_bounds = array<i64: 2>, scalar_prefetch = 0 : i64, scratch_operands = 0 : i64, tpu.core_type = #tpu.core_type<tc>, window_params = [{transform_indices = @transform_0, window_bounds = array<i64: 4, 16, 16>}, {pipeline_mode = #tpu.pipeline_mode<synchronous>, transform_indices = @transform_1, window_bounds = array<i64: 16, 32>}, {pipeline_mode = #tpu.pipeline_mode<synchronous>, transform_indices = @transform_2, window_bounds = array<i64: 32, 16>}, {transform_indices = @transform_3, window_bounds = array<i64: 4, 32, 32>}]} {
    %c0 = arith.constant 0 : index
    %c0_0 = arith.constant 0 : index
    %c0_1 = arith.constant 0 : index
    %0 = vector.load %arg1[%c0, %c0_0, %c0_1] : memref<4x16x16xbf16, #tpu.memory_space<vmem>>, vector<4x16x16xbf16>
    %1 = vector.shape_cast %0 : vector<4x16x16xbf16> to vector<64x16xbf16>
    %c0_2 = arith.constant 0 : index
    %c0_3 = arith.constant 0 : index
    %2 = vector.load %arg2[%c0_2, %c0_3] : memref<16x32xbf16, #tpu.memory_space<vmem>>, vector<16x32xbf16>
    %cst = arith.constant dense<0.000000e+00> : vector<64x32xf32>
    %3 = tpu.matmul %1, %2, %cst {dimension_numbers = #tpu.dot_dimension_numbers<[1], [0], [0], [1], [0, 0, 1, 1], [], []>} : vector<64x16xbf16>, vector<16x32xbf16>, vector<64x32xf32> -> vector<64x32xf32>
    %4 = arith.truncf %3 : vector<64x32xf32> to vector<64x32xbf16>
    %5 = vector.shape_cast %4 : vector<64x32xbf16> to vector<4x16x32xbf16>
    %c0_4 = arith.constant 0 : index
    %c0_5 = arith.constant 0 : index
    %6 = vector.load %arg3[%c0_4, %c0_5] : memref<32x16xbf16, #tpu.memory_space<vmem>>, vector<32x16xbf16>
    %7 = vector.extract_strided_slice %5 {offsets = [0, 0, 0], sizes = [1, 16, 32], strides = [1, 1, 1]} : vector<4x16x32xbf16> to vector<1x16x32xbf16>
    %8 = vector.shape_cast %7 : vector<1x16x32xbf16> to vector<16x32xbf16>
    %cst_6 = arith.constant dense<0.000000e+00> : vector<32x32xf32>
    %9 = tpu.matmul %6, %8, %cst_6 {dimension_numbers = #tpu.dot_dimension_numbers<[1], [0], [0], [1], [0, 0, 1, 1], [], []>} : vector<32x16xbf16>, vector<16x32xbf16>, vector<32x32xf32> -> vector<32x32xf32>
    %10 = arith.truncf %9 : vector<32x32xf32> to vector<32x32xbf16>
    %c0_7 = arith.constant 0 : index
    %c0_8 = arith.constant 0 : index
    %c0_9 = arith.constant 0 : index
    %11 = vector.load %arg4[%c0_7, %c0_8, %c0_9] : memref<4x32x32xbf16, #tpu.memory_space<vmem>>, vector<1x32x32xbf16>
    %12 = vector.shape_cast %11 : vector<1x32x32xbf16> to vector<32x32xbf16>
    %13 = vector.shape_cast %10 : vector<32x32xbf16> to vector<1x32x32xbf16>
    tpu.vector_store %arg4[%c0_7, %c0_8, %c0_9], %13 {strides = array<i32>} : memref<4x32x32xbf16, #tpu.memory_space<vmem>>, vector<1x32x32xbf16>,
    %14 = vector.extract_strided_slice %5 {offsets = [1, 0, 0], sizes = [1, 16, 32], strides = [1, 1, 1]} : vector<4x16x32xbf16> to vector<1x16x32xbf16>
    %15 = vector.shape_cast %14 : vector<1x16x32xbf16> to vector<16x32xbf16>
    %cst_10 = arith.constant dense<0.000000e+00> : vector<32x32xf32>
    %16 = tpu.matmul %6, %15, %cst_10 {dimension_numbers = #tpu.dot_dimension_numbers<[1], [0], [0], [1], [0, 0, 1, 1], [], []>} : vector<32x16xbf16>, vector<16x32xbf16>, vector<32x32xf32> -> vector<32x32xf32>
    %17 = arith.truncf %16 : vector<32x32xf32> to vector<32x32xbf16>
    %c1 = arith.constant 1 : index
    %c0_11 = arith.constant 0 : index
    %c0_12 = arith.constant 0 : index
    %18 = vector.load %arg4[%c1, %c0_11, %c0_12] : memref<4x32x32xbf16, #tpu.memory_space<vmem>>, vector<1x32x32xbf16>
    %19 = vector.shape_cast %18 : vector<1x32x32xbf16> to vector<32x32xbf16>
    %20 = vector.shape_cast %17 : vector<32x32xbf16> to vector<1x32x32xbf16>
    tpu.vector_store %arg4[%c1, %c0_11, %c0_12], %20 {strides = array<i32>} : memref<4x32x32xbf16, #tpu.memory_space<vmem>>, vector<1x32x32xbf16>,
    %21 = vector.extract_strided_slice %5 {offsets = [2, 0, 0], sizes = [1, 16, 32], strides = [1, 1, 1]} : vector<4x16x32xbf16> to vector<1x16x32xbf16>
    %22 = vector.shape_cast %21 : vector<1x16x32xbf16> to vector<16x32xbf16>
    %cst_13 = arith.constant dense<0.000000e+00> : vector<32x32xf32>
    %23 = tpu.matmul %6, %22, %cst_13 {dimension_numbers = #tpu.dot_dimension_numbers<[1], [0], [0], [1], [0, 0, 1, 1], [], []>} : vector<32x16xbf16>, vector<16x32xbf16>, vector<32x32xf32> -> vector<32x32xf32>
    %24 = arith.truncf %23 : vector<32x32xf32> to vector<32x32xbf16>
    %c2 = arith.constant 2 : index
    %c0_14 = arith.constant 0 : index
    %c0_15 = arith.constant 0 : index
    %25 = vector.load %arg4[%c2, %c0_14, %c0_15] : memref<4x32x32xbf16, #tpu.memory_space<vmem>>, vector<1x32x32xbf16>
    %26 = vector.shape_cast %25 : vector<1x32x32xbf16> to vector<32x32xbf16>
    %27 = vector.shape_cast %24 : vector<32x32xbf16> to vector<1x32x32xbf16>
    tpu.vector_store %arg4[%c2, %c0_14, %c0_15], %27 {strides = array<i32>} : memref<4x32x32xbf16, #tpu.memory_space<vmem>>, vector<1x32x32xbf16>,
    %28 = vector.extract_strided_slice %5 {offsets = [3, 0, 0], sizes = [1, 16, 32], strides = [1, 1, 1]} : vector<4x16x32xbf16> to vector<1x16x32xbf16>
    %29 = vector.shape_cast %28 : vector<1x16x32xbf16> to vector<16x32xbf16>
    %cst_16 = arith.constant dense<0.000000e+00> : vector<32x32xf32>
    %30 = tpu.matmul %6, %29, %cst_16 {dimension_numbers = #tpu.dot_dimension_numbers<[1], [0], [0], [1], [0, 0, 1, 1], [], []>} : vector<32x16xbf16>, vector<16x32xbf16>, vector<32x32xf32> -> vector<32x32xf32>
    %31 = arith.truncf %30 : vector<32x32xf32> to vector<32x32xbf16>
    %c3 = arith.constant 3 : index
    %c0_17 = arith.constant 0 : index
    %c0_18 = arith.constant 0 : index
    %32 = vector.load %arg4[%c3, %c0_17, %c0_18] : memref<4x32x32xbf16, #tpu.memory_space<vmem>>, vector<1x32x32xbf16>
    %33 = vector.shape_cast %32 : vector<1x32x32xbf16> to vector<32x32xbf16>
    %34 = vector.shape_cast %31 : vector<32x32xbf16> to vector<1x32x32xbf16>
    tpu.vector_store %arg4[%c3, %c0_17, %c0_18], %34 {strides = array<i32>} : memref<4x32x32xbf16, #tpu.memory_space<vmem>>, vector<1x32x32xbf16>,
    return
  }
  func.func @transform_0(%arg0: i32) -> (i32, i32, i32) {
    %c0_i32 = arith.constant 0 : i32
    %c0_i32_0 = arith.constant 0 : i32
    %c0_i32_1 = arith.constant 0 : i32
    return %arg0, %c0_i32, %c0_i32_0 : i32, i32, i32
  }
  func.func @transform_1(%arg0: i32) -> (i32, i32) {
    %c0_i32 = arith.constant 0 : i32
    %c0_i32_0 = arith.constant 0 : i32
    %c0_i32_1 = arith.constant 0 : i32
    return %c0_i32, %c0_i32_0 : i32, i32
  }
  func.func @transform_2(%arg0: i32) -> (i32, i32) {
    %c0_i32 = arith.constant 0 : i32
    %c0_i32_0 = arith.constant 0 : i32
    %c0_i32_1 = arith.constant 0 : i32
    return %c0_i32, %c0_i32_0 : i32, i32
  }
  func.func @transform_3(%arg0: i32) -> (i32, i32, i32) {
    %c0_i32 = arith.constant 0 : i32
    %c0_i32_0 = arith.constant 0 : i32
    %c0_i32_1 = arith.constant 0 : i32
    return %arg0, %c0_i32, %c0_i32_0 : i32, i32, i32
  }
}

module attributes {stable_mosaic.version = 11 : i64} {
  func.func @_att_kernel(%arg0: i32, %arg1: memref<1024x4xbf16, #tpu.memory_space<vmem>>, %arg2: memref<1024x4xbf16, #tpu.memory_space<vmem>>, %arg3: memref<4x4xbf16, #tpu.memory_space<vmem>>, %arg4: memref<1x4xf32, #tpu.memory_space<vmem>>, %arg5: memref<1x4xf32, #tpu.memory_space<vmem>>, %arg6: memref<4x4xbf16, #tpu.memory_space<vmem>>, %arg7: memref<1x4xf32, #tpu.memory_space<vmem>>, %arg8: memref<1x4xf32, #tpu.memory_space<vmem>>, %arg9: memref<1x4xf32, #tpu.memory_space<vmem>>, %arg10: memref<1x1xf32, #tpu.memory_space<vmem>>, %arg11: memref<1x1xf32, #tpu.memory_space<vmem>>, %arg12: memref<1024x4xbf16, #tpu.memory_space<vmem>>) attributes {dimension_semantics = [#tpu.dimension_semantics<parallel>], iteration_bounds = array<i64: 2>, scalar_prefetch = 0 : i64, scratch_operands = 0 : i64, tpu.core_type = #tpu.core_type<tc>, window_params = [{transform_indices = @transform_0, window_bounds = array<i64: 1024, 4>}, {transform_indices = @transform_1, window_bounds = array<i64: 1024, 4>}, {pipeline_mode = #tpu.pipeline_mode<synchronous>, transform_indices = @transform_2, window_bounds = array<i64: 4, 4>}, {pipeline_mode = #tpu.pipeline_mode<synchronous>, transform_indices = @transform_3, window_bounds = array<i64: 1, 4>}, {pipeline_mode = #tpu.pipeline_mode<synchronous>, transform_indices = @transform_4, window_bounds = array<i64: 1, 4>}, {pipeline_mode = #tpu.pipeline_mode<synchronous>, transform_indices = @transform_5, window_bounds = array<i64: 4, 4>}, {pipeline_mode = #tpu.pipeline_mode<synchronous>, transform_indices = @transform_6, window_bounds = array<i64: 1, 4>}, {pipeline_mode = #tpu.pipeline_mode<synchronous>, transform_indices = @transform_7, window_bounds = array<i64: 1, 4>}, {pipeline_mode = #tpu.pipeline_mode<synchronous>, transform_indices = @transform_8, window_bounds = array<i64: 1, 4>}, {pipeline_mode = #tpu.pipeline_mode<synchronous>, transform_indices = @transform_9, window_bounds = array<i64: 1, 1>}, {pipeline_mode = #tpu.pipeline_mode<synchronous>, transform_indices = @transform_10, window_bounds = array<i64: 1, 1>}, {transform_indices = @transform_11, window_bounds = array<i64: 1024, 4>}]} {
    %c0 = arith.constant 0 : index
    %c0_0 = arith.constant 0 : index
    %0 = vector.load %arg1[%c0, %c0_0] : memref<1024x4xbf16, #tpu.memory_space<vmem>>, vector<1024x4xbf16>
    %c0_1 = arith.constant 0 : index
    %c0_2 = arith.constant 0 : index
    %1 = vector.load %arg3[%c0_1, %c0_2] : memref<4x4xbf16, #tpu.memory_space<vmem>>, vector<4x4xbf16>
    %cst = arith.constant dense<0.000000e+00> : vector<1024x4xf32>
    %2 = tpu.matmul %0, %1, %cst {dimension_numbers = #tpu.dot_dimension_numbers<[1], [0], [0], [1], [0, 0, 1, 1], [], []>} : vector<1024x4xbf16>, vector<4x4xbf16>, vector<1024x4xf32> -> vector<1024x4xf32>
    %c0_3 = arith.constant 0 : index
    %c0_4 = arith.constant 0 : index
    %3 = vector.load %arg4[%c0_3, %c0_4] : memref<1x4xf32, #tpu.memory_space<vmem>>, vector<1x4xf32>
    %4 = vector.broadcast %3 : vector<1x4xf32> to vector<1024x4xf32>
    %5 = arith.mulf %2, %4 : vector<1024x4xf32>
    %c0_5 = arith.constant 0 : index
    %c0_6 = arith.constant 0 : index
    %6 = vector.load %arg5[%c0_5, %c0_6] : memref<1x4xf32, #tpu.memory_space<vmem>>, vector<1x4xf32>
    %7 = vector.broadcast %6 : vector<1x4xf32> to vector<1024x4xf32>
    %8 = arith.addf %5, %7 : vector<1024x4xf32>
    %c0_7 = arith.constant 0 : index
    %c0_8 = arith.constant 0 : index
    %9 = vector.load %arg2[%c0_7, %c0_8] : memref<1024x4xbf16, #tpu.memory_space<vmem>>, vector<1024x4xbf16>
    %c0_9 = arith.constant 0 : index
    %c0_10 = arith.constant 0 : index
    %10 = vector.load %arg6[%c0_9, %c0_10] : memref<4x4xbf16, #tpu.memory_space<vmem>>, vector<4x4xbf16>
    %cst_11 = arith.constant dense<0.000000e+00> : vector<1024x4xf32>
    %11 = tpu.matmul %9, %10, %cst_11 {dimension_numbers = #tpu.dot_dimension_numbers<[1], [0], [0], [1], [0, 0, 1, 1], [], []>} : vector<1024x4xbf16>, vector<4x4xbf16>, vector<1024x4xf32> -> vector<1024x4xf32>
    %c0_12 = arith.constant 0 : index
    %c0_13 = arith.constant 0 : index
    %12 = vector.load %arg7[%c0_12, %c0_13] : memref<1x4xf32, #tpu.memory_space<vmem>>, vector<1x4xf32>
    %13 = vector.broadcast %12 : vector<1x4xf32> to vector<1024x4xf32>
    %14 = arith.mulf %11, %13 : vector<1024x4xf32>
    %c0_14 = arith.constant 0 : index
    %c0_15 = arith.constant 0 : index
    %15 = vector.load %arg8[%c0_14, %c0_15] : memref<1x4xf32, #tpu.memory_space<vmem>>, vector<1x4xf32>
    %16 = vector.broadcast %15 : vector<1x4xf32> to vector<1024x4xf32>
    %17 = arith.addf %14, %16 : vector<1024x4xf32>
    %18 = arith.addf %8, %17 : vector<1024x4xf32>
    %cst_16 = arith.constant 0.000000e+00 : f32
    %19 = vector.broadcast %cst_16 : f32 to vector<1024x4xf32>
    %20 = arith.maximumf %18, %19 : vector<1024x4xf32>
    %c0_17 = arith.constant 0 : index
    %c0_18 = arith.constant 0 : index
    %21 = vector.load %arg9[%c0_17, %c0_18] : memref<1x4xf32, #tpu.memory_space<vmem>>, vector<1x4xf32>
    %22 = vector.broadcast %21 : vector<1x4xf32> to vector<1024x4xf32>
    %23 = arith.mulf %20, %22 : vector<1024x4xf32>
    %cst_19 = arith.constant dense<0.000000e+00> : vector<1024xf32>
    %24 = vector.multi_reduction <add>, %23, %cst_19 [1] : vector<1024x4xf32> to vector<1024xf32>
    %25 = vector.shape_cast %24 : vector<1024xf32> to vector<1024x1xf32>
    %c0_20 = arith.constant 0 : index
    %c0_21 = arith.constant 0 : index
    %26 = vector.load %arg10[%c0_20, %c0_21] : memref<1x1xf32, #tpu.memory_space<vmem>>, vector<1x1xf32>
    %27 = vector.broadcast %26 : vector<1x1xf32> to vector<1024x1xf32>
    %28 = arith.mulf %25, %27 : vector<1024x1xf32>
    %c0_22 = arith.constant 0 : index
    %c0_23 = arith.constant 0 : index
    %29 = vector.load %arg11[%c0_22, %c0_23] : memref<1x1xf32, #tpu.memory_space<vmem>>, vector<1x1xf32>
    %30 = vector.broadcast %29 : vector<1x1xf32> to vector<1024x1xf32>
    %31 = arith.addf %28, %30 : vector<1024x1xf32>
    %cst_24 = arith.constant 5.000000e-01 : f32
    %32 = vector.broadcast %cst_24 : f32 to vector<1024x1xf32>
    %33 = arith.mulf %32, %31 : vector<1024x1xf32>
    %34 = math.tanh %33 : vector<1024x1xf32>
    %cst_25 = arith.constant 1.000000e+00 : f32
    %35 = vector.broadcast %cst_25 : f32 to vector<1024x1xf32>
    %36 = arith.addf %34, %35 : vector<1024x1xf32>
    %cst_26 = arith.constant 5.000000e-01 : f32
    %37 = vector.broadcast %cst_26 : f32 to vector<1024x1xf32>
    %38 = arith.mulf %37, %36 : vector<1024x1xf32>
    %c0_27 = arith.constant 0 : index
    %c0_28 = arith.constant 0 : index
    %39 = vector.load %arg2[%c0_27, %c0_28] : memref<1024x4xbf16, #tpu.memory_space<vmem>>, vector<1024x4xbf16>
    %40 = arith.extf %39 : vector<1024x4xbf16> to vector<1024x4xf32>
    %41 = vector.broadcast %38 : vector<1024x1xf32> to vector<1024x4xf32>
    %42 = arith.mulf %40, %41 : vector<1024x4xf32>
    %43 = arith.truncf %42 : vector<1024x4xf32> to vector<1024x4xbf16>
    %c0_29 = arith.constant 0 : index
    %c0_30 = arith.constant 0 : index
    %44 = vector.load %arg12[%c0_29, %c0_30] : memref<1024x4xbf16, #tpu.memory_space<vmem>>, vector<1024x4xbf16>
    tpu.vector_store %arg12[%c0_29, %c0_30], %43 {strides = array<i32>} : memref<1024x4xbf16, #tpu.memory_space<vmem>>, vector<1024x4xbf16>,
    return
  }
  func.func @transform_0(%arg0: i32) -> (i32, i32) {
    %c0_i32 = arith.constant 0 : i32
    %c0_i32_0 = arith.constant 0 : i32
    return %arg0, %c0_i32 : i32, i32
  }
  func.func @transform_1(%arg0: i32) -> (i32, i32) {
    %c0_i32 = arith.constant 0 : i32
    %c0_i32_0 = arith.constant 0 : i32
    return %arg0, %c0_i32 : i32, i32
  }
  func.func @transform_2(%arg0: i32) -> (i32, i32) {
    %c0_i32 = arith.constant 0 : i32
    %c0_i32_0 = arith.constant 0 : i32
    %c0_i32_1 = arith.constant 0 : i32
    return %c0_i32, %c0_i32_0 : i32, i32
  }
  func.func @transform_3(%arg0: i32) -> (i32, i32) {
    %c0_i32 = arith.constant 0 : i32
    %c0_i32_0 = arith.constant 0 : i32
    %c0_i32_1 = arith.constant 0 : i32
    return %c0_i32, %c0_i32_0 : i32, i32
  }
  func.func @transform_4(%arg0: i32) -> (i32, i32) {
    %c0_i32 = arith.constant 0 : i32
    %c0_i32_0 = arith.constant 0 : i32
    %c0_i32_1 = arith.constant 0 : i32
    return %c0_i32, %c0_i32_0 : i32, i32
  }
  func.func @transform_5(%arg0: i32) -> (i32, i32) {
    %c0_i32 = arith.constant 0 : i32
    %c0_i32_0 = arith.constant 0 : i32
    %c0_i32_1 = arith.constant 0 : i32
    return %c0_i32, %c0_i32_0 : i32, i32
  }
  func.func @transform_6(%arg0: i32) -> (i32, i32) {
    %c0_i32 = arith.constant 0 : i32
    %c0_i32_0 = arith.constant 0 : i32
    %c0_i32_1 = arith.constant 0 : i32
    return %c0_i32, %c0_i32_0 : i32, i32
  }
  func.func @transform_7(%arg0: i32) -> (i32, i32) {
    %c0_i32 = arith.constant 0 : i32
    %c0_i32_0 = arith.constant 0 : i32
    %c0_i32_1 = arith.constant 0 : i32
    return %c0_i32, %c0_i32_0 : i32, i32
  }
  func.func @transform_8(%arg0: i32) -> (i32, i32) {
    %c0_i32 = arith.constant 0 : i32
    %c0_i32_0 = arith.constant 0 : i32
    %c0_i32_1 = arith.constant 0 : i32
    return %c0_i32, %c0_i32_0 : i32, i32
  }
  func.func @transform_9(%arg0: i32) -> (i32, i32) {
    %c0_i32 = arith.constant 0 : i32
    %c0_i32_0 = arith.constant 0 : i32
    %c0_i32_1 = arith.constant 0 : i32
    return %c0_i32, %c0_i32_0 : i32, i32
  }
  func.func @transform_10(%arg0: i32) -> (i32, i32) {
    %c0_i32 = arith.constant 0 : i32
    %c0_i32_0 = arith.constant 0 : i32
    %c0_i32_1 = arith.constant 0 : i32
    return %c0_i32, %c0_i32_0 : i32, i32
  }
  func.func @transform_11(%arg0: i32) -> (i32, i32) {
    %c0_i32 = arith.constant 0 : i32
    %c0_i32_0 = arith.constant 0 : i32
    return %arg0, %c0_i32 : i32, i32
  }
}

module attributes {stable_mosaic.version = 11 : i64} {
  func.func @kernel(%arg0: i32, %arg1: i32, %arg2: memref<1x8x32x4xbf16, #tpu.memory_space<vmem>>, %arg3: memref<1x1x32x4xbf16, #tpu.memory_space<vmem>>, %arg4: memref<1x1x32x4xbf16, #tpu.memory_space<vmem>>, %arg5: memref<1x8x32x4xbf16, #tpu.memory_space<vmem>>, %arg6: memref<1x1x32x4xbf16, #tpu.memory_space<vmem>>, %arg7: memref<1x1x32x4xbf16, #tpu.memory_space<vmem>>, %arg8: memref<3x12x8xbf16, #tpu.memory_space<vmem>>, %arg9: memref<3x12x8xbf16, #tpu.memory_space<vmem>>, %arg10: memref<1x8xf32, #tpu.memory_space<vmem>>, %arg11: memref<1x8xf32, #tpu.memory_space<vmem>>, %arg12: memref<1x8x32x8xbf16, #tpu.memory_space<vmem>>) attributes {dimension_semantics = [#tpu.dimension_semantics<parallel>, #tpu.dimension_semantics<parallel>], iteration_bounds = array<i64: 2, 4>, scalar_prefetch = 0 : i64, scratch_operands = 0 : i64, tpu.core_type = #tpu.core_type<tc>, window_params = [{transform_indices = @transform_0, window_bounds = array<i64: 1, 8, 32, 4>}, {transform_indices = @transform_1, window_bounds = array<i64: 1, 1, 32, 4>}, {transform_indices = @transform_2, window_bounds = array<i64: 1, 1, 32, 4>}, {transform_indices = @transform_3, window_bounds = array<i64: 1, 8, 32, 4>}, {transform_indices = @transform_4, window_bounds = array<i64: 1, 1, 32, 4>}, {transform_indices = @transform_5, window_bounds = array<i64: 1, 1, 32, 4>}, {pipeline_mode = #tpu.pipeline_mode<synchronous>, transform_indices = @transform_6, window_bounds = array<i64: 3, 12, 8>}, {pipeline_mode = #tpu.pipeline_mode<synchronous>, transform_indices = @transform_7, window_bounds = array<i64: 3, 12, 8>}, {pipeline_mode = #tpu.pipeline_mode<synchronous>, transform_indices = @transform_8, window_bounds = array<i64: 1, 8>}, {pipeline_mode = #tpu.pipeline_mode<synchronous>, transform_indices = @transform_9, window_bounds = array<i64: 1, 8>}, {transform_indices = @transform_10, window_bounds = array<i64: 1, 8, 32, 8>}]} {
    %c0_i32 = arith.constant 0 : i32
    %0 = arith.cmpi sgt, %arg1, %c0_i32 : i32
    %c3_i32 = arith.constant 3 : i32
    %1 = arith.cmpi slt, %arg1, %c3_i32 : i32
    %cst = arith.constant 0.000000e+00 : f32
    %2 = vector.broadcast %cst : f32 to vector<256x8xf32>
    %cst_0 = arith.constant 0.000000e+00 : f32
    %3 = vector.broadcast %cst_0 : f32 to vector<256x8xf32>
    %cst_1 = arith.constant 0.000000e+00 : f32
    %4 = vector.broadcast %cst_1 : f32 to vector<256x8xf32>
    %cst_2 = arith.constant 0.000000e+00 : f32
    %5 = vector.broadcast %cst_2 : f32 to vector<32x8xf32>
    %cst_3 = arith.constant 0.000000e+00 : f32
    %6 = vector.broadcast %cst_3 : f32 to vector<32x8xf32>
    %c0 = arith.constant 0 : index
    %c0_4 = arith.constant 0 : index
    %c0_5 = arith.constant 0 : index
    %c0_6 = arith.constant 0 : index
    %7 = vector.load %arg2[%c0, %c0_4, %c0_5, %c0_6] : memref<1x8x32x4xbf16, #tpu.memory_space<vmem>>, vector<1x8x32x4xbf16>
    %8 = vector.shape_cast %7 : vector<1x8x32x4xbf16> to vector<8x32x4xbf16>
    %cst_7 = arith.constant 0.000000e+00 : bf16
    %9 = vector.broadcast %cst_7 : bf16 to vector<8x1x4xbf16>
    %10 = vector.extract_strided_slice %8 {offsets = [0, 0, 0], sizes = [8, 31, 4], strides = [1, 1, 1]} : vector<8x32x4xbf16> to vector<8x31x4xbf16>
    %11 = tpu.concatenate %9, %10 in 1 : vector<8x1x4xbf16>, vector<8x31x4xbf16> -> vector<8x32x4xbf16>
    %12 = vector.extract_strided_slice %8 {offsets = [0, 1, 0], sizes = [8, 31, 4], strides = [1, 1, 1]} : vector<8x32x4xbf16> to vector<8x31x4xbf16>
    %13 = tpu.concatenate %12, %9 in 1 : vector<8x31x4xbf16>, vector<8x1x4xbf16> -> vector<8x32x4xbf16>
    %14 = tpu.concatenate %11, %8, %13 in 2 : vector<8x32x4xbf16>, vector<8x32x4xbf16>, vector<8x32x4xbf16> -> vector<8x32x12xbf16>
    %15 = vector.shape_cast %14 : vector<8x32x12xbf16> to vector<256x12xbf16>
    %c0_8 = arith.constant 0 : index
    %c0_9 = arith.constant 0 : index
    %c0_10 = arith.constant 0 : index
    %16 = vector.load %arg8[%c0_8, %c0_9, %c0_10] : memref<3x12x8xbf16, #tpu.memory_space<vmem>>, vector<1x12x8xbf16>
    %17 = vector.shape_cast %16 : vector<1x12x8xbf16> to vector<12x8xbf16>
    %cst_11 = arith.constant dense<0.000000e+00> : vector<256x8xf32>
    %18 = tpu.matmul %15, %17, %cst_11 {dimension_numbers = #tpu.dot_dimension_numbers<[1], [0], [0], [1], [0, 0, 1, 1], [], []>} : vector<256x12xbf16>, vector<12x8xbf16>, vector<256x8xf32> -> vector<256x8xf32>
    %19 = arith.addf %3, %18 : vector<256x8xf32>
    %c1 = arith.constant 1 : index
    %c0_12 = arith.constant 0 : index
    %c0_13 = arith.constant 0 : index
    %20 = vector.load %arg8[%c1, %c0_12, %c0_13] : memref<3x12x8xbf16, #tpu.memory_space<vmem>>, vector<1x12x8xbf16>
    %21 = vector.shape_cast %20 : vector<1x12x8xbf16> to vector<12x8xbf16>
    %cst_14 = arith.constant dense<0.000000e+00> : vector<256x8xf32>
    %22 = tpu.matmul %15, %21, %cst_14 {dimension_numbers = #tpu.dot_dimension_numbers<[1], [0], [0], [1], [0, 0, 1, 1], [], []>} : vector<256x12xbf16>, vector<12x8xbf16>, vector<256x8xf32> -> vector<256x8xf32>
    %23 = arith.addf %2, %22 : vector<256x8xf32>
    %c2 = arith.constant 2 : index
    %c0_15 = arith.constant 0 : index
    %c0_16 = arith.constant 0 : index
    %24 = vector.load %arg8[%c2, %c0_15, %c0_16] : memref<3x12x8xbf16, #tpu.memory_space<vmem>>, vector<1x12x8xbf16>
    %25 = vector.shape_cast %24 : vector<1x12x8xbf16> to vector<12x8xbf16>
    %cst_17 = arith.constant dense<0.000000e+00> : vector<256x8xf32>
    %26 = tpu.matmul %15, %25, %cst_17 {dimension_numbers = #tpu.dot_dimension_numbers<[1], [0], [0], [1], [0, 0, 1, 1], [], []>} : vector<256x12xbf16>, vector<12x8xbf16>, vector<256x8xf32> -> vector<256x8xf32>
    %27 = arith.addf %4, %26 : vector<256x8xf32>
    %c0_18 = arith.constant 0 : index
    %c0_19 = arith.constant 0 : index
    %c0_20 = arith.constant 0 : index
    %c0_21 = arith.constant 0 : index
    %28 = vector.load %arg3[%c0_18, %c0_19, %c0_20, %c0_21] : memref<1x1x32x4xbf16, #tpu.memory_space<vmem>>, vector<1x1x32x4xbf16>
    %29 = vector.shape_cast %28 : vector<1x1x32x4xbf16> to vector<1x32x4xbf16>
    %cst_22 = arith.constant 0.000000e+00 : bf16
    %30 = vector.broadcast %cst_22 : bf16 to vector<1x1x4xbf16>
    %31 = vector.extract_strided_slice %29 {offsets = [0, 0, 0], sizes = [1, 31, 4], strides = [1, 1, 1]} : vector<1x32x4xbf16> to vector<1x31x4xbf16>
    %32 = tpu.concatenate %30, %31 in 1 : vector<1x1x4xbf16>, vector<1x31x4xbf16> -> vector<1x32x4xbf16>
    %33 = vector.extract_strided_slice %29 {offsets = [0, 1, 0], sizes = [1, 31, 4], strides = [1, 1, 1]} : vector<1x32x4xbf16> to vector<1x31x4xbf16>
    %34 = tpu.concatenate %33, %30 in 1 : vector<1x31x4xbf16>, vector<1x1x4xbf16> -> vector<1x32x4xbf16>
    %35 = tpu.concatenate %32, %29, %34 in 2 : vector<1x32x4xbf16>, vector<1x32x4xbf16>, vector<1x32x4xbf16> -> vector<1x32x12xbf16>
    %36 = vector.shape_cast %35 : vector<1x32x12xbf16> to vector<32x12xbf16>
    %c0_23 = arith.constant 0 : index
    %c0_24 = arith.constant 0 : index
    %c0_25 = arith.constant 0 : index
    %c0_26 = arith.constant 0 : index
    %37 = vector.load %arg4[%c0_23, %c0_24, %c0_25, %c0_26] : memref<1x1x32x4xbf16, #tpu.memory_space<vmem>>, vector<1x1x32x4xbf16>
    %38 = vector.shape_cast %37 : vector<1x1x32x4xbf16> to vector<1x32x4xbf16>
    %cst_27 = arith.constant 0.000000e+00 : bf16
    %39 = vector.broadcast %cst_27 : bf16 to vector<1x1x4xbf16>
    %40 = vector.extract_strided_slice %38 {offsets = [0, 0, 0], sizes = [1, 31, 4], strides = [1, 1, 1]} : vector<1x32x4xbf16> to vector<1x31x4xbf16>
    %41 = tpu.concatenate %39, %40 in 1 : vector<1x1x4xbf16>, vector<1x31x4xbf16> -> vector<1x32x4xbf16>
    %42 = vector.extract_strided_slice %38 {offsets = [0, 1, 0], sizes = [1, 31, 4], strides = [1, 1, 1]} : vector<1x32x4xbf16> to vector<1x31x4xbf16>
    %43 = tpu.concatenate %42, %39 in 1 : vector<1x31x4xbf16>, vector<1x1x4xbf16> -> vector<1x32x4xbf16>
    %44 = tpu.concatenate %41, %38, %43 in 2 : vector<1x32x4xbf16>, vector<1x32x4xbf16>, vector<1x32x4xbf16> -> vector<1x32x12xbf16>
    %45 = vector.shape_cast %44 : vector<1x32x12xbf16> to vector<32x12xbf16>
    %c0_28 = arith.constant 0 : index
    %c0_29 = arith.constant 0 : index
    %c0_30 = arith.constant 0 : index
    %46 = vector.load %arg8[%c0_28, %c0_29, %c0_30] : memref<3x12x8xbf16, #tpu.memory_space<vmem>>, vector<1x12x8xbf16>
    %47 = vector.shape_cast %46 : vector<1x12x8xbf16> to vector<12x8xbf16>
    %cst_31 = arith.constant dense<0.000000e+00> : vector<32x8xf32>
    %48 = tpu.matmul %36, %47, %cst_31 {dimension_numbers = #tpu.dot_dimension_numbers<[1], [0], [0], [1], [0, 0, 1, 1], [], []>} : vector<32x12xbf16>, vector<12x8xbf16>, vector<32x8xf32> -> vector<32x8xf32>
    %49 = arith.addf %5, %48 : vector<32x8xf32>
    %c2_32 = arith.constant 2 : index
    %c0_33 = arith.constant 0 : index
    %c0_34 = arith.constant 0 : index
    %50 = vector.load %arg8[%c2_32, %c0_33, %c0_34] : memref<3x12x8xbf16, #tpu.memory_space<vmem>>, vector<1x12x8xbf16>
    %51 = vector.shape_cast %50 : vector<1x12x8xbf16> to vector<12x8xbf16>
    %cst_35 = arith.constant dense<0.000000e+00> : vector<32x8xf32>
    %52 = tpu.matmul %45, %51, %cst_35 {dimension_numbers = #tpu.dot_dimension_numbers<[1], [0], [0], [1], [0, 0, 1, 1], [], []>} : vector<32x12xbf16>, vector<12x8xbf16>, vector<32x8xf32> -> vector<32x8xf32>
    %53 = arith.addf %6, %52 : vector<32x8xf32>
    %c0_36 = arith.constant 0 : index
    %c0_37 = arith.constant 0 : index
    %c0_38 = arith.constant 0 : index
    %c0_39 = arith.constant 0 : index
    %54 = vector.load %arg5[%c0_36, %c0_37, %c0_38, %c0_39] : memref<1x8x32x4xbf16, #tpu.memory_space<vmem>>, vector<1x8x32x4xbf16>
    %55 = vector.shape_cast %54 : vector<1x8x32x4xbf16> to vector<8x32x4xbf16>
    %cst_40 = arith.constant 0.000000e+00 : bf16
    %56 = vector.broadcast %cst_40 : bf16 to vector<8x1x4xbf16>
    %57 = vector.extract_strided_slice %55 {offsets = [0, 0, 0], sizes = [8, 31, 4], strides = [1, 1, 1]} : vector<8x32x4xbf16> to vector<8x31x4xbf16>
    %58 = tpu.concatenate %56, %57 in 1 : vector<8x1x4xbf16>, vector<8x31x4xbf16> -> vector<8x32x4xbf16>
    %59 = vector.extract_strided_slice %55 {offsets = [0, 1, 0], sizes = [8, 31, 4], strides = [1, 1, 1]} : vector<8x32x4xbf16> to vector<8x31x4xbf16>
    %60 = tpu.concatenate %59, %56 in 1 : vector<8x31x4xbf16>, vector<8x1x4xbf16> -> vector<8x32x4xbf16>
    %61 = tpu.concatenate %58, %55, %60 in 2 : vector<8x32x4xbf16>, vector<8x32x4xbf16>, vector<8x32x4xbf16> -> vector<8x32x12xbf16>
    %62 = vector.shape_cast %61 : vector<8x32x12xbf16> to vector<256x12xbf16>
    %c0_41 = arith.constant 0 : index
    %c0_42 = arith.constant 0 : index
    %c0_43 = arith.constant 0 : index
    %63 = vector.load %arg9[%c0_41, %c0_42, %c0_43] : memref<3x12x8xbf16, #tpu.memory_space<vmem>>, vector<1x12x8xbf16>
    %64 = vector.shape_cast %63 : vector<1x12x8xbf16> to vector<12x8xbf16>
    %cst_44 = arith.constant dense<0.000000e+00> : vector<256x8xf32>
    %65 = tpu.matmul %62, %64, %cst_44 {dimension_numbers = #tpu.dot_dimension_numbers<[1], [0], [0], [1], [0, 0, 1, 1], [], []>} : vector<256x12xbf16>, vector<12x8xbf16>, vector<256x8xf32> -> vector<256x8xf32>
    %66 = arith.addf %19, %65 : vector<256x8xf32>
    %c1_45 = arith.constant 1 : index
    %c0_46 = arith.constant 0 : index
    %c0_47 = arith.constant 0 : index
    %67 = vector.load %arg9[%c1_45, %c0_46, %c0_47] : memref<3x12x8xbf16, #tpu.memory_space<vmem>>, vector<1x12x8xbf16>
    %68 = vector.shape_cast %67 : vector<1x12x8xbf16> to vector<12x8xbf16>
    %cst_48 = arith.constant dense<0.000000e+00> : vector<256x8xf32>
    %69 = tpu.matmul %62, %68, %cst_48 {dimension_numbers = #tpu.dot_dimension_numbers<[1], [0], [0], [1], [0, 0, 1, 1], [], []>} : vector<256x12xbf16>, vector<12x8xbf16>, vector<256x8xf32> -> vector<256x8xf32>
    %70 = arith.addf %23, %69 : vector<256x8xf32>
    %c2_49 = arith.constant 2 : index
    %c0_50 = arith.constant 0 : index
    %c0_51 = arith.constant 0 : index
    %71 = vector.load %arg9[%c2_49, %c0_50, %c0_51] : memref<3x12x8xbf16, #tpu.memory_space<vmem>>, vector<1x12x8xbf16>
    %72 = vector.shape_cast %71 : vector<1x12x8xbf16> to vector<12x8xbf16>
    %cst_52 = arith.constant dense<0.000000e+00> : vector<256x8xf32>
    %73 = tpu.matmul %62, %72, %cst_52 {dimension_numbers = #tpu.dot_dimension_numbers<[1], [0], [0], [1], [0, 0, 1, 1], [], []>} : vector<256x12xbf16>, vector<12x8xbf16>, vector<256x8xf32> -> vector<256x8xf32>
    %74 = arith.addf %27, %73 : vector<256x8xf32>
    %c0_53 = arith.constant 0 : index
    %c0_54 = arith.constant 0 : index
    %c0_55 = arith.constant 0 : index
    %c0_56 = arith.constant 0 : index
    %75 = vector.load %arg6[%c0_53, %c0_54, %c0_55, %c0_56] : memref<1x1x32x4xbf16, #tpu.memory_space<vmem>>, vector<1x1x32x4xbf16>
    %76 = vector.shape_cast %75 : vector<1x1x32x4xbf16> to vector<1x32x4xbf16>
    %cst_57 = arith.constant 0.000000e+00 : bf16
    %77 = vector.broadcast %cst_57 : bf16 to vector<1x1x4xbf16>
    %78 = vector.extract_strided_slice %76 {offsets = [0, 0, 0], sizes = [1, 31, 4], strides = [1, 1, 1]} : vector<1x32x4xbf16> to vector<1x31x4xbf16>
    %79 = tpu.concatenate %77, %78 in 1 : vector<1x1x4xbf16>, vector<1x31x4xbf16> -> vector<1x32x4xbf16>
    %80 = vector.extract_strided_slice %76 {offsets = [0, 1, 0], sizes = [1, 31, 4], strides = [1, 1, 1]} : vector<1x32x4xbf16> to vector<1x31x4xbf16>
    %81 = tpu.concatenate %80, %77 in 1 : vector<1x31x4xbf16>, vector<1x1x4xbf16> -> vector<1x32x4xbf16>
    %82 = tpu.concatenate %79, %76, %81 in 2 : vector<1x32x4xbf16>, vector<1x32x4xbf16>, vector<1x32x4xbf16> -> vector<1x32x12xbf16>
    %83 = vector.shape_cast %82 : vector<1x32x12xbf16> to vector<32x12xbf16>
    %c0_58 = arith.constant 0 : index
    %c0_59 = arith.constant 0 : index
    %c0_60 = arith.constant 0 : index
    %c0_61 = arith.constant 0 : index
    %84 = vector.load %arg7[%c0_58, %c0_59, %c0_60, %c0_61] : memref<1x1x32x4xbf16, #tpu.memory_space<vmem>>, vector<1x1x32x4xbf16>
    %85 = vector.shape_cast %84 : vector<1x1x32x4xbf16> to vector<1x32x4xbf16>
    %cst_62 = arith.constant 0.000000e+00 : bf16
    %86 = vector.broadcast %cst_62 : bf16 to vector<1x1x4xbf16>
    %87 = vector.extract_strided_slice %85 {offsets = [0, 0, 0], sizes = [1, 31, 4], strides = [1, 1, 1]} : vector<1x32x4xbf16> to vector<1x31x4xbf16>
    %88 = tpu.concatenate %86, %87 in 1 : vector<1x1x4xbf16>, vector<1x31x4xbf16> -> vector<1x32x4xbf16>
    %89 = vector.extract_strided_slice %85 {offsets = [0, 1, 0], sizes = [1, 31, 4], strides = [1, 1, 1]} : vector<1x32x4xbf16> to vector<1x31x4xbf16>
    %90 = tpu.concatenate %89, %86 in 1 : vector<1x31x4xbf16>, vector<1x1x4xbf16> -> vector<1x32x4xbf16>
    %91 = tpu.concatenate %88, %85, %90 in 2 : vector<1x32x4xbf16>, vector<1x32x4xbf16>, vector<1x32x4xbf16> -> vector<1x32x12xbf16>
    %92 = vector.shape_cast %91 : vector<1x32x12xbf16> to vector<32x12xbf16>
    %c0_63 = arith.constant 0 : index
    %c0_64 = arith.constant 0 : index
    %c0_65 = arith.constant 0 : index
    %93 = vector.load %arg9[%c0_63, %c0_64, %c0_65] : memref<3x12x8xbf16, #tpu.memory_space<vmem>>, vector<1x12x8xbf16>
    %94 = vector.shape_cast %93 : vector<1x12x8xbf16> to vector<12x8xbf16>
    %cst_66 = arith.constant dense<0.000000e+00> : vector<32x8xf32>
    %95 = tpu.matmul %83, %94, %cst_66 {dimension_numbers = #tpu.dot_dimension_numbers<[1], [0], [0], [1], [0, 0, 1, 1], [], []>} : vector<32x12xbf16>, vector<12x8xbf16>, vector<32x8xf32> -> vector<32x8xf32>
    %96 = arith.addf %49, %95 : vector<32x8xf32>
    %c2_67 = arith.constant 2 : index
    %c0_68 = arith.constant 0 : index
    %c0_69 = arith.constant 0 : index
    %97 = vector.load %arg9[%c2_67, %c0_68, %c0_69] : memref<3x12x8xbf16, #tpu.memory_space<vmem>>, vector<1x12x8xbf16>
    %98 = vector.shape_cast %97 : vector<1x12x8xbf16> to vector<12x8xbf16>
    %cst_70 = arith.constant dense<0.000000e+00> : vector<32x8xf32>
    %99 = tpu.matmul %92, %98, %cst_70 {dimension_numbers = #tpu.dot_dimension_numbers<[1], [0], [0], [1], [0, 0, 1, 1], [], []>} : vector<32x12xbf16>, vector<12x8xbf16>, vector<32x8xf32> -> vector<32x8xf32>
    %100 = arith.addf %53, %99 : vector<32x8xf32>
    %cst_71 = arith.constant 0.000000e+00 : f32
    %101 = vector.broadcast %cst_71 : f32 to vector<32x8xf32>
    %102 = arith.select %0, %96, %101 : vector<32x8xf32>
    %cst_72 = arith.constant 0.000000e+00 : f32
    %103 = vector.broadcast %cst_72 : f32 to vector<32x8xf32>
    %104 = arith.select %1, %100, %103 : vector<32x8xf32>
    %105 = vector.extract_strided_slice %66 {offsets = [0, 0], sizes = [224, 8], strides = [1, 1]} : vector<256x8xf32> to vector<224x8xf32>
    %106 = tpu.concatenate %102, %105 in 0 : vector<32x8xf32>, vector<224x8xf32> -> vector<256x8xf32>
    %107 = arith.addf %70, %106 : vector<256x8xf32>
    %108 = vector.extract_strided_slice %74 {offsets = [32, 0], sizes = [224, 8], strides = [1, 1]} : vector<256x8xf32> to vector<224x8xf32>
    %109 = tpu.concatenate %108, %104 in 0 : vector<224x8xf32>, vector<32x8xf32> -> vector<256x8xf32>
    %110 = arith.addf %107, %109 : vector<256x8xf32>
    %c0_73 = arith.constant 0 : index
    %c0_74 = arith.constant 0 : index
    %111 = vector.load %arg10[%c0_73, %c0_74] : memref<1x8xf32, #tpu.memory_space<vmem>>, vector<1x8xf32>
    %112 = vector.broadcast %111 : vector<1x8xf32> to vector<256x8xf32>
    %113 = arith.mulf %110, %112 : vector<256x8xf32>
    %c0_75 = arith.constant 0 : index
    %c0_76 = arith.constant 0 : index
    %114 = vector.load %arg11[%c0_75, %c0_76] : memref<1x8xf32, #tpu.memory_space<vmem>>, vector<1x8xf32>
    %115 = vector.broadcast %114 : vector<1x8xf32> to vector<256x8xf32>
    %116 = arith.addf %113, %115 : vector<256x8xf32>
    %cst_77 = arith.constant 0.000000e+00 : f32
    %117 = vector.broadcast %cst_77 : f32 to vector<256x8xf32>
    %118 = arith.maximumf %116, %117 : vector<256x8xf32>
    %119 = vector.shape_cast %118 : vector<256x8xf32> to vector<8x32x8xf32>
    %120 = arith.truncf %119 : vector<8x32x8xf32> to vector<8x32x8xbf16>
    %c0_78 = arith.constant 0 : index
    %c0_79 = arith.constant 0 : index
    %c0_80 = arith.constant 0 : index
    %c0_81 = arith.constant 0 : index
    %121 = vector.load %arg12[%c0_78, %c0_79, %c0_80, %c0_81] : memref<1x8x32x8xbf16, #tpu.memory_space<vmem>>, vector<1x8x32x8xbf16>
    %122 = vector.shape_cast %121 : vector<1x8x32x8xbf16> to vector<8x32x8xbf16>
    %123 = vector.shape_cast %120 : vector<8x32x8xbf16> to vector<1x8x32x8xbf16>
    tpu.vector_store %arg12[%c0_78, %c0_79, %c0_80, %c0_81], %123 {strides = array<i32>} : memref<1x8x32x8xbf16, #tpu.memory_space<vmem>>, vector<1x8x32x8xbf16>,
    return
  }
  func.func @transform_0(%arg0: i32, %arg1: i32) -> (i32, i32, i32, i32) {
    %c0_i32 = arith.constant 0 : i32
    %c0_i32_0 = arith.constant 0 : i32
    %c0_i32_1 = arith.constant 0 : i32
    return %arg0, %arg1, %c0_i32, %c0_i32_0 : i32, i32, i32, i32
  }
  func.func @transform_1(%arg0: i32, %arg1: i32) -> (i32, i32, i32, i32) {
    %c8_i32 = arith.constant 8 : i32
    %0 = arith.muli %arg1, %c8_i32 : i32
    %c1_i32 = arith.constant 1 : i32
    %1 = arith.subi %0, %c1_i32 : i32
    %c0_i32 = arith.constant 0 : i32
    %2 = arith.maxsi %1, %c0_i32 : i32
    %c0_i32_0 = arith.constant 0 : i32
    %c0_i32_1 = arith.constant 0 : i32
    %c0_i32_2 = arith.constant 0 : i32
    return %arg0, %2, %c0_i32_0, %c0_i32_1 : i32, i32, i32, i32
  }
  func.func @transform_2(%arg0: i32, %arg1: i32) -> (i32, i32, i32, i32) {
    %c8_i32 = arith.constant 8 : i32
    %0 = arith.muli %arg1, %c8_i32 : i32
    %c8_i32_0 = arith.constant 8 : i32
    %1 = arith.addi %0, %c8_i32_0 : i32
    %c31_i32 = arith.constant 31 : i32
    %2 = arith.minsi %1, %c31_i32 : i32
    %c0_i32 = arith.constant 0 : i32
    %c0_i32_1 = arith.constant 0 : i32
    %c0_i32_2 = arith.constant 0 : i32
    return %arg0, %2, %c0_i32, %c0_i32_1 : i32, i32, i32, i32
  }
  func.func @transform_3(%arg0: i32, %arg1: i32) -> (i32, i32, i32, i32) {
    %c0_i32 = arith.constant 0 : i32
    %c0_i32_0 = arith.constant 0 : i32
    %c0_i32_1 = arith.constant 0 : i32
    return %arg0, %arg1, %c0_i32, %c0_i32_0 : i32, i32, i32, i32
  }
  func.func @transform_4(%arg0: i32, %arg1: i32) -> (i32, i32, i32, i32) {
    %c8_i32 = arith.constant 8 : i32
    %0 = arith.muli %arg1, %c8_i32 : i32
    %c1_i32 = arith.constant 1 : i32
    %1 = arith.subi %0, %c1_i32 : i32
    %c0_i32 = arith.constant 0 : i32
    %2 = arith.maxsi %1, %c0_i32 : i32
    %c0_i32_0 = arith.constant 0 : i32
    %c0_i32_1 = arith.constant 0 : i32
    %c0_i32_2 = arith.constant 0 : i32
    return %arg0, %2, %c0_i32_0, %c0_i32_1 : i32, i32, i32, i32
  }
  func.func @transform_5(%arg0: i32, %arg1: i32) -> (i32, i32, i32, i32) {
    %c8_i32 = arith.constant 8 : i32
    %0 = arith.muli %arg1, %c8_i32 : i32
    %c8_i32_0 = arith.constant 8 : i32
    %1 = arith.addi %0, %c8_i32_0 : i32
    %c31_i32 = arith.constant 31 : i32
    %2 = arith.minsi %1, %c31_i32 : i32
    %c0_i32 = arith.constant 0 : i32
    %c0_i32_1 = arith.constant 0 : i32
    %c0_i32_2 = arith.constant 0 : i32
    return %arg0, %2, %c0_i32, %c0_i32_1 : i32, i32, i32, i32
  }
  func.func @transform_6(%arg0: i32, %arg1: i32) -> (i32, i32, i32) {
    %c0_i32 = arith.constant 0 : i32
    %c0_i32_0 = arith.constant 0 : i32
    %c0_i32_1 = arith.constant 0 : i32
    %c0_i32_2 = arith.constant 0 : i32
    return %c0_i32, %c0_i32_0, %c0_i32_1 : i32, i32, i32
  }
  func.func @transform_7(%arg0: i32, %arg1: i32) -> (i32, i32, i32) {
    %c0_i32 = arith.constant 0 : i32
    %c0_i32_0 = arith.constant 0 : i32
    %c0_i32_1 = arith.constant 0 : i32
    %c0_i32_2 = arith.constant 0 : i32
    return %c0_i32, %c0_i32_0, %c0_i32_1 : i32, i32, i32
  }
  func.func @transform_8(%arg0: i32, %arg1: i32) -> (i32, i32) {
    %c0_i32 = arith.constant 0 : i32
    %c0_i32_0 = arith.constant 0 : i32
    %c0_i32_1 = arith.constant 0 : i32
    return %c0_i32, %c0_i32_0 : i32, i32
  }
  func.func @transform_9(%arg0: i32, %arg1: i32) -> (i32, i32) {
    %c0_i32 = arith.constant 0 : i32
    %c0_i32_0 = arith.constant 0 : i32
    %c0_i32_1 = arith.constant 0 : i32
    return %c0_i32, %c0_i32_0 : i32, i32
  }
  func.func @transform_10(%arg0: i32, %arg1: i32) -> (i32, i32, i32, i32) {
    %c0_i32 = arith.constant 0 : i32
    %c0_i32_0 = arith.constant 0 : i32
    %c0_i32_1 = arith.constant 0 : i32
    return %arg0, %arg1, %c0_i32, %c0_i32_0 : i32, i32, i32, i32
  }
}

module attributes {stable_mosaic.version = 11 : i64} {
  func.func @kernel(%arg0: i32, %arg1: i32, %arg2: memref<1x8x32x8xbf16, #tpu.memory_space<vmem>>, %arg3: memref<1x1x32x8xbf16, #tpu.memory_space<vmem>>, %arg4: memref<1x1x32x8xbf16, #tpu.memory_space<vmem>>, %arg5: memref<3x24x8xbf16, #tpu.memory_space<vmem>>, %arg6: memref<1x8xf32, #tpu.memory_space<vmem>>, %arg7: memref<1x8xf32, #tpu.memory_space<vmem>>, %arg8: memref<1x8x32x8xf32, #tpu.memory_space<vmem>>) attributes {dimension_semantics = [#tpu.dimension_semantics<parallel>, #tpu.dimension_semantics<parallel>], iteration_bounds = array<i64: 2, 4>, scalar_prefetch = 0 : i64, scratch_operands = 0 : i64, tpu.core_type = #tpu.core_type<tc>, window_params = [{transform_indices = @transform_0, window_bounds = array<i64: 1, 8, 32, 8>}, {transform_indices = @transform_1, window_bounds = array<i64: 1, 1, 32, 8>}, {transform_indices = @transform_2, window_bounds = array<i64: 1, 1, 32, 8>}, {pipeline_mode = #tpu.pipeline_mode<synchronous>, transform_indices = @transform_3, window_bounds = array<i64: 3, 24, 8>}, {pipeline_mode = #tpu.pipeline_mode<synchronous>, transform_indices = @transform_4, window_bounds = array<i64: 1, 8>}, {pipeline_mode = #tpu.pipeline_mode<synchronous>, transform_indices = @transform_5, window_bounds = array<i64: 1, 8>}, {transform_indices = @transform_6, window_bounds = array<i64: 1, 8, 32, 8>}]} {
    %c0_i32 = arith.constant 0 : i32
    %0 = arith.cmpi sgt, %arg1, %c0_i32 : i32
    %c3_i32 = arith.constant 3 : i32
    %1 = arith.cmpi slt, %arg1, %c3_i32 : i32
    %cst = arith.constant 0.000000e+00 : f32
    %2 = vector.broadcast %cst : f32 to vector<256x8xf32>
    %cst_0 = arith.constant 0.000000e+00 : f32
    %3 = vector.broadcast %cst_0 : f32 to vector<256x8xf32>
    %cst_1 = arith.constant 0.000000e+00 : f32
    %4 = vector.broadcast %cst_1 : f32 to vector<256x8xf32>
    %cst_2 = arith.constant 0.000000e+00 : f32
    %5 = vector.broadcast %cst_2 : f32 to vector<32x8xf32>
    %cst_3 = arith.constant 0.000000e+00 : f32
    %6 = vector.broadcast %cst_3 : f32 to vector<32x8xf32>
    %c0 = arith.constant 0 : index
    %c0_4 = arith.constant 0 : index
    %c0_5 = arith.constant 0 : index
    %c0_6 = arith.constant 0 : index
    %7 = vector.load %arg2[%c0, %c0_4, %c0_5, %c0_6] : memref<1x8x32x8xbf16, #tpu.memory_space<vmem>>, vector<1x8x32x8xbf16>
    %8 = vector.shape_cast %7 : vector<1x8x32x8xbf16> to vector<8x32x8xbf16>
    %cst_7 = arith.constant 0.000000e+00 : bf16
    %9 = vector.broadcast %cst_7 : bf16 to vector<8x1x8xbf16>
    %10 = vector.extract_strided_slice %8 {offsets = [0, 0, 0], sizes = [8, 31, 8], strides = [1, 1, 1]} : vector<8x32x8xbf16> to vector<8x31x8xbf16>
    %11 = tpu.concatenate %9, %10 in 1 : vector<8x1x8xbf16>, vector<8x31x8xbf16> -> vector<8x32x8xbf16>
    %12 = vector.extract_strided_slice %8 {offsets = [0, 1, 0], sizes = [8, 31, 8], strides = [1, 1, 1]} : vector<8x32x8xbf16> to vector<8x31x8xbf16>
    %13 = tpu.concatenate %12, %9 in 1 : vector<8x31x8xbf16>, vector<8x1x8xbf16> -> vector<8x32x8xbf16>
    %14 = tpu.concatenate %11, %8, %13 in 2 : vector<8x32x8xbf16>, vector<8x32x8xbf16>, vector<8x32x8xbf16> -> vector<8x32x24xbf16>
    %15 = vector.shape_cast %14 : vector<8x32x24xbf16> to vector<256x24xbf16>
    %c0_8 = arith.constant 0 : index
    %c0_9 = arith.constant 0 : index
    %c0_10 = arith.constant 0 : index
    %16 = vector.load %arg5[%c0_8, %c0_9, %c0_10] : memref<3x24x8xbf16, #tpu.memory_space<vmem>>, vector<1x24x8xbf16>
    %17 = vector.shape_cast %16 : vector<1x24x8xbf16> to vector<24x8xbf16>
    %cst_11 = arith.constant dense<0.000000e+00> : vector<256x8xf32>
    %18 = tpu.matmul %15, %17, %cst_11 {dimension_numbers = #tpu.dot_dimension_numbers<[1], [0], [0], [1], [0, 0, 1, 1], [], []>} : vector<256x24xbf16>, vector<24x8xbf16>, vector<256x8xf32> -> vector<256x8xf32>
    %19 = arith.addf %3, %18 : vector<256x8xf32>
    %c1 = arith.constant 1 : index
    %c0_12 = arith.constant 0 : index
    %c0_13 = arith.constant 0 : index
    %20 = vector.load %arg5[%c1, %c0_12, %c0_13] : memref<3x24x8xbf16, #tpu.memory_space<vmem>>, vector<1x24x8xbf16>
    %21 = vector.shape_cast %20 : vector<1x24x8xbf16> to vector<24x8xbf16>
    %cst_14 = arith.constant dense<0.000000e+00> : vector<256x8xf32>
    %22 = tpu.matmul %15, %21, %cst_14 {dimension_numbers = #tpu.dot_dimension_numbers<[1], [0], [0], [1], [0, 0, 1, 1], [], []>} : vector<256x24xbf16>, vector<24x8xbf16>, vector<256x8xf32> -> vector<256x8xf32>
    %23 = arith.addf %2, %22 : vector<256x8xf32>
    %c2 = arith.constant 2 : index
    %c0_15 = arith.constant 0 : index
    %c0_16 = arith.constant 0 : index
    %24 = vector.load %arg5[%c2, %c0_15, %c0_16] : memref<3x24x8xbf16, #tpu.memory_space<vmem>>, vector<1x24x8xbf16>
    %25 = vector.shape_cast %24 : vector<1x24x8xbf16> to vector<24x8xbf16>
    %cst_17 = arith.constant dense<0.000000e+00> : vector<256x8xf32>
    %26 = tpu.matmul %15, %25, %cst_17 {dimension_numbers = #tpu.dot_dimension_numbers<[1], [0], [0], [1], [0, 0, 1, 1], [], []>} : vector<256x24xbf16>, vector<24x8xbf16>, vector<256x8xf32> -> vector<256x8xf32>
    %27 = arith.addf %4, %26 : vector<256x8xf32>
    %c0_18 = arith.constant 0 : index
    %c0_19 = arith.constant 0 : index
    %c0_20 = arith.constant 0 : index
    %c0_21 = arith.constant 0 : index
    %28 = vector.load %arg3[%c0_18, %c0_19, %c0_20, %c0_21] : memref<1x1x32x8xbf16, #tpu.memory_space<vmem>>, vector<1x1x32x8xbf16>
    %29 = vector.shape_cast %28 : vector<1x1x32x8xbf16> to vector<1x32x8xbf16>
    %cst_22 = arith.constant 0.000000e+00 : bf16
    %30 = vector.broadcast %cst_22 : bf16 to vector<1x1x8xbf16>
    %31 = vector.extract_strided_slice %29 {offsets = [0, 0, 0], sizes = [1, 31, 8], strides = [1, 1, 1]} : vector<1x32x8xbf16> to vector<1x31x8xbf16>
    %32 = tpu.concatenate %30, %31 in 1 : vector<1x1x8xbf16>, vector<1x31x8xbf16> -> vector<1x32x8xbf16>
    %33 = vector.extract_strided_slice %29 {offsets = [0, 1, 0], sizes = [1, 31, 8], strides = [1, 1, 1]} : vector<1x32x8xbf16> to vector<1x31x8xbf16>
    %34 = tpu.concatenate %33, %30 in 1 : vector<1x31x8xbf16>, vector<1x1x8xbf16> -> vector<1x32x8xbf16>
    %35 = tpu.concatenate %32, %29, %34 in 2 : vector<1x32x8xbf16>, vector<1x32x8xbf16>, vector<1x32x8xbf16> -> vector<1x32x24xbf16>
    %36 = vector.shape_cast %35 : vector<1x32x24xbf16> to vector<32x24xbf16>
    %c0_23 = arith.constant 0 : index
    %c0_24 = arith.constant 0 : index
    %c0_25 = arith.constant 0 : index
    %c0_26 = arith.constant 0 : index
    %37 = vector.load %arg4[%c0_23, %c0_24, %c0_25, %c0_26] : memref<1x1x32x8xbf16, #tpu.memory_space<vmem>>, vector<1x1x32x8xbf16>
    %38 = vector.shape_cast %37 : vector<1x1x32x8xbf16> to vector<1x32x8xbf16>
    %cst_27 = arith.constant 0.000000e+00 : bf16
    %39 = vector.broadcast %cst_27 : bf16 to vector<1x1x8xbf16>
    %40 = vector.extract_strided_slice %38 {offsets = [0, 0, 0], sizes = [1, 31, 8], strides = [1, 1, 1]} : vector<1x32x8xbf16> to vector<1x31x8xbf16>
    %41 = tpu.concatenate %39, %40 in 1 : vector<1x1x8xbf16>, vector<1x31x8xbf16> -> vector<1x32x8xbf16>
    %42 = vector.extract_strided_slice %38 {offsets = [0, 1, 0], sizes = [1, 31, 8], strides = [1, 1, 1]} : vector<1x32x8xbf16> to vector<1x31x8xbf16>
    %43 = tpu.concatenate %42, %39 in 1 : vector<1x31x8xbf16>, vector<1x1x8xbf16> -> vector<1x32x8xbf16>
    %44 = tpu.concatenate %41, %38, %43 in 2 : vector<1x32x8xbf16>, vector<1x32x8xbf16>, vector<1x32x8xbf16> -> vector<1x32x24xbf16>
    %45 = vector.shape_cast %44 : vector<1x32x24xbf16> to vector<32x24xbf16>
    %c0_28 = arith.constant 0 : index
    %c0_29 = arith.constant 0 : index
    %c0_30 = arith.constant 0 : index
    %46 = vector.load %arg5[%c0_28, %c0_29, %c0_30] : memref<3x24x8xbf16, #tpu.memory_space<vmem>>, vector<1x24x8xbf16>
    %47 = vector.shape_cast %46 : vector<1x24x8xbf16> to vector<24x8xbf16>
    %cst_31 = arith.constant dense<0.000000e+00> : vector<32x8xf32>
    %48 = tpu.matmul %36, %47, %cst_31 {dimension_numbers = #tpu.dot_dimension_numbers<[1], [0], [0], [1], [0, 0, 1, 1], [], []>} : vector<32x24xbf16>, vector<24x8xbf16>, vector<32x8xf32> -> vector<32x8xf32>
    %49 = arith.addf %5, %48 : vector<32x8xf32>
    %c2_32 = arith.constant 2 : index
    %c0_33 = arith.constant 0 : index
    %c0_34 = arith.constant 0 : index
    %50 = vector.load %arg5[%c2_32, %c0_33, %c0_34] : memref<3x24x8xbf16, #tpu.memory_space<vmem>>, vector<1x24x8xbf16>
    %51 = vector.shape_cast %50 : vector<1x24x8xbf16> to vector<24x8xbf16>
    %cst_35 = arith.constant dense<0.000000e+00> : vector<32x8xf32>
    %52 = tpu.matmul %45, %51, %cst_35 {dimension_numbers = #tpu.dot_dimension_numbers<[1], [0], [0], [1], [0, 0, 1, 1], [], []>} : vector<32x24xbf16>, vector<24x8xbf16>, vector<32x8xf32> -> vector<32x8xf32>
    %53 = arith.addf %6, %52 : vector<32x8xf32>
    %cst_36 = arith.constant 0.000000e+00 : f32
    %54 = vector.broadcast %cst_36 : f32 to vector<32x8xf32>
    %55 = arith.select %0, %49, %54 : vector<32x8xf32>
    %cst_37 = arith.constant 0.000000e+00 : f32
    %56 = vector.broadcast %cst_37 : f32 to vector<32x8xf32>
    %57 = arith.select %1, %53, %56 : vector<32x8xf32>
    %58 = vector.extract_strided_slice %19 {offsets = [0, 0], sizes = [224, 8], strides = [1, 1]} : vector<256x8xf32> to vector<224x8xf32>
    %59 = tpu.concatenate %55, %58 in 0 : vector<32x8xf32>, vector<224x8xf32> -> vector<256x8xf32>
    %60 = arith.addf %23, %59 : vector<256x8xf32>
    %61 = vector.extract_strided_slice %27 {offsets = [32, 0], sizes = [224, 8], strides = [1, 1]} : vector<256x8xf32> to vector<224x8xf32>
    %62 = tpu.concatenate %61, %57 in 0 : vector<224x8xf32>, vector<32x8xf32> -> vector<256x8xf32>
    %63 = arith.addf %60, %62 : vector<256x8xf32>
    %c0_38 = arith.constant 0 : index
    %c0_39 = arith.constant 0 : index
    %64 = vector.load %arg6[%c0_38, %c0_39] : memref<1x8xf32, #tpu.memory_space<vmem>>, vector<1x8xf32>
    %65 = vector.broadcast %64 : vector<1x8xf32> to vector<256x8xf32>
    %66 = arith.mulf %63, %65 : vector<256x8xf32>
    %c0_40 = arith.constant 0 : index
    %c0_41 = arith.constant 0 : index
    %67 = vector.load %arg7[%c0_40, %c0_41] : memref<1x8xf32, #tpu.memory_space<vmem>>, vector<1x8xf32>
    %68 = vector.broadcast %67 : vector<1x8xf32> to vector<256x8xf32>
    %69 = arith.addf %66, %68 : vector<256x8xf32>
    %cst_42 = arith.constant 0.000000e+00 : f32
    %70 = vector.broadcast %cst_42 : f32 to vector<256x8xf32>
    %71 = arith.maximumf %69, %70 : vector<256x8xf32>
    %72 = vector.shape_cast %71 : vector<256x8xf32> to vector<8x32x8xf32>
    %c0_43 = arith.constant 0 : index
    %c0_44 = arith.constant 0 : index
    %c0_45 = arith.constant 0 : index
    %c0_46 = arith.constant 0 : index
    %73 = vector.load %arg8[%c0_43, %c0_44, %c0_45, %c0_46] : memref<1x8x32x8xf32, #tpu.memory_space<vmem>>, vector<1x8x32x8xf32>
    %74 = vector.shape_cast %73 : vector<1x8x32x8xf32> to vector<8x32x8xf32>
    %75 = vector.shape_cast %72 : vector<8x32x8xf32> to vector<1x8x32x8xf32>
    tpu.vector_store %arg8[%c0_43, %c0_44, %c0_45, %c0_46], %75 {strides = array<i32>} : memref<1x8x32x8xf32, #tpu.memory_space<vmem>>, vector<1x8x32x8xf32>,
    return
  }
  func.func @transform_0(%arg0: i32, %arg1: i32) -> (i32, i32, i32, i32) {
    %c0_i32 = arith.constant 0 : i32
    %c0_i32_0 = arith.constant 0 : i32
    %c0_i32_1 = arith.constant 0 : i32
    return %arg0, %arg1, %c0_i32, %c0_i32_0 : i32, i32, i32, i32
  }
  func.func @transform_1(%arg0: i32, %arg1: i32) -> (i32, i32, i32, i32) {
    %c8_i32 = arith.constant 8 : i32
    %0 = arith.muli %arg1, %c8_i32 : i32
    %c1_i32 = arith.constant 1 : i32
    %1 = arith.subi %0, %c1_i32 : i32
    %c0_i32 = arith.constant 0 : i32
    %2 = arith.maxsi %1, %c0_i32 : i32
    %c0_i32_0 = arith.constant 0 : i32
    %c0_i32_1 = arith.constant 0 : i32
    %c0_i32_2 = arith.constant 0 : i32
    return %arg0, %2, %c0_i32_0, %c0_i32_1 : i32, i32, i32, i32
  }
  func.func @transform_2(%arg0: i32, %arg1: i32) -> (i32, i32, i32, i32) {
    %c8_i32 = arith.constant 8 : i32
    %0 = arith.muli %arg1, %c8_i32 : i32
    %c8_i32_0 = arith.constant 8 : i32
    %1 = arith.addi %0, %c8_i32_0 : i32
    %c31_i32 = arith.constant 31 : i32
    %2 = arith.minsi %1, %c31_i32 : i32
    %c0_i32 = arith.constant 0 : i32
    %c0_i32_1 = arith.constant 0 : i32
    %c0_i32_2 = arith.constant 0 : i32
    return %arg0, %2, %c0_i32, %c0_i32_1 : i32, i32, i32, i32
  }
  func.func @transform_3(%arg0: i32, %arg1: i32) -> (i32, i32, i32) {
    %c0_i32 = arith.constant 0 : i32
    %c0_i32_0 = arith.constant 0 : i32
    %c0_i32_1 = arith.constant 0 : i32
    %c0_i32_2 = arith.constant 0 : i32
    return %c0_i32, %c0_i32_0, %c0_i32_1 : i32, i32, i32
  }
  func.func @transform_4(%arg0: i32, %arg1: i32) -> (i32, i32) {
    %c0_i32 = arith.constant 0 : i32
    %c0_i32_0 = arith.constant 0 : i32
    %c0_i32_1 = arith.constant 0 : i32
    return %c0_i32, %c0_i32_0 : i32, i32
  }
  func.func @transform_5(%arg0: i32, %arg1: i32) -> (i32, i32) {
    %c0_i32 = arith.constant 0 : i32
    %c0_i32_0 = arith.constant 0 : i32
    %c0_i32_1 = arith.constant 0 : i32
    return %c0_i32, %c0_i32_0 : i32, i32
  }
  func.func @transform_6(%arg0: i32, %arg1: i32) -> (i32, i32, i32, i32) {
    %c0_i32 = arith.constant 0 : i32
    %c0_i32_0 = arith.constant 0 : i32
    %c0_i32_1 = arith.constant 0 : i32
    return %arg0, %arg1, %c0_i32, %c0_i32_0 : i32, i32, i32, i32
  }
}

</mosaic_0001>

<bundles_post_ra>
// kernel: _lambda_.4
= control target key start
LH: loop header
LB: loop body
LE: loop exit
PB: predicated region body
PF: predicated region fallthrough
CT: control target
= control target key end

     0   :  { %s828_s12 = smov 0   ;;  %s904_s0 = inlined_call_operand.vmem [shape: bf16[8,16,16], index: 0, kind: input, shape index: {}]   ;;  %s905_s1 = inlined_call_operand.vmem [shape: bf16[16,32], index: 1, kind: input, shape index: {}]   ;;  %s906_s2 = inlined_call_operand.vmem [shape: bf16[32,16], index: 2, kind: input, shape index: {}]   ;;  %s907_s3 = inlined_call_operand.vmem [shape: bf16[8,32,32], index: 3, kind: output, shape index: {}]  }
   0x1 LB: > { %s656_s13 = sadd.s32 4294967295, %s806_s12   ;;  %p660_p0 = scmp.ge.s32.totalorder %s806_s12, 1  ;;  %s806_s12 = sphi %s828_s12, %s13_s12  }
   0x2   : > { %p139_p1 = scmp.lt.s32.totalorder %s806_s12, 3 }
   0x4   : > { %p140_p2 = pnand %p660_p0, %p139_p1 }
   0x5   : > { %v793_v0 = vld [vmem:[%s905_s1] sm:$0xff] (!%p140_p2)   ;;  %s661_s16 = sshll.u32 (!%p140_p2), %s656_s13, 2  ;;  %vm216_vm0 = vcmask (!%p140_p2), 130048   ;;  %v799_v12 = vld [vmem:[%s906_s2 + $0x8] sm:$0xff] (!%p140_p2)   ;;  %vm383_vm1 = vcmask (!%p140_p2), 257024  }
   0x6   : > { %143 = sbr.rel (%p140_p2) target bundleno = 473 (0x1d9), region = 32  ;;  %p166_p3 = scmp.lt.s32.totalorder (!%p140_p2), %s661_s16, 7  ;;  %751 = vmatprep.subr.bf16.mxu0 (!%p140_p2), %v793_v0  ;;  %v798_v5 = vld [vmem:[%s906_s2] sm:$0xff] (!%p140_p2)  }
   0x7   : > { %752 = vmatpush3.bf16.msra.mxu0 (!%p140_p2), %v793_v0  ;;  %763 = vmatprep.mubr.msk.bf16.mxu1 (!%p140_p2), %vm216_vm0, %v798_v5 }
   0xd   : > { %s909_s16 = smov (!%p166_p3, %s661_s16), 7 }
   0xe   : > { %s716_s17 = sshll.u32 %s909_s16, 3  ;;  %s717_s25 = sshll.u32 %s909_s16, 4 }
   0xf   : > { %s170_s20 = scalar_lea.vmem %s904_s0, %s716_s17  ;;  %s867_s28 = scalar_lea.vmem %s907_s3, %s717_s25 }
  0x10   : > { %v794_v1 = vld [vmem:[%s170_s20] sm:$0xff]   ;;  %v795_v2 = vld [vmem:[%s170_s20 + $0x8] sm:$0xff]   ;;  %v796_v3 = vld [vmem:[%s170_s20 + $0x10] sm:$0xff]  }
  0x11   : > { %753 = vmatprep.mubr.msk.bf16.mxu0 %vm216_vm0, %v794_v1  ;;  %v797_v4 = vld [vmem:[%s170_s20 + $0x18] sm:$0xff]  }
  0x12   : > { %754 = vmatmul.mubr.msk.bf16.vlgmr.msra.gmra.mrb[0].mxu0 %vm216_vm0, %v795_v2 }
  0x13   : > { %757 = vmatprep.mubr.msk.bf16.mxu0 %vm216_vm0, %v796_v3 }
  0x1a   : > { %758 = vmatmul.mubr.msk.bf16.gmra.mrb[4].mxu0 %vm216_vm0, %v797_v4 }
  0x1b   : > { %775 = vmatprep.mubr.msk.bf16.mxu0 %vm216_vm0, %v798_v5 }
  0xe5   : > { %v755_v6 = vpop.f32.mrb[0].mxu0 }
  0xe6   : > { %v263_v7 = vpop.f32.mrb[1].mxu0 }
  0xe7   : > { %v756_v8 = vpop.f32.mrb[2].mxu0 }
  0xe8   : > { %v295_v9 = vpack.c.bf16 %v756_v8, %v755_v6  ;;  %v266_v10 = vpop.f32.mrb[3].mxu0 }
  0xe9   : > { %v294_v11 = vpack.c.bf16 %v266_v10, %v263_v7 }
  0xeb   : > { %761 = vmatprep.subr.bf16.mxu1 %v294_v11 }
  0xec   : > { %762 = vmatpush3.bf16.msra.mxu1 %v294_v11 }
  0xed   : > { %v759_v13 = vpop.f32.mrb[4].mxu0  ;;  %767 = vmatprep.subr.bf16.mxu1 %v295_v9 }
  0xee   : > { %v279_v14 = vpop.f32.mrb[5].mxu0 }
  0xef   : > { %v760_v15 = vpop.f32.mrb[6].mxu0  ;;  %764 = vmatmul.mubr.msk.bf16.vlgmr.msra.gmra.mrb[0].mxu1 %vm216_vm0, %v799_v12 }
  0xf0   : > { %v297_v16 = vpack.c.bf16 %v760_v15, %v759_v13  ;;  %v282_v17 = vpop.f32.mrb[7].mxu0  ;;  %768 = vmatpush3.bf16.msra.mxu1 %v295_v9  ;;  %769 = vmatprep.mubr.msk.bf16.mxu1 %vm216_vm0, %v798_v5 }
  0xf1   : > { %v296_v18 = vpack.c.bf16 %v282_v17, %v279_v14 }
  0xf2   : > { %779 = vmatprep.subr.bf16.mxu1 %v297_v16 }
  0xf3   : > { %773 = vmatprep.subr.bf16.mxu0 %v296_v18 }
  0xf4   : > { %774 = vmatpush3.bf16.msra.mxu0 %v296_v18 }
  0xf7   : > { %770 = vmatmul.mubr.msk.bf16.vlgmr.msra.gmra.mrb[4].mxu1 %vm216_vm0, %v799_v12  ;;  %776 = vmatmul.mubr.msk.bf16.vlgmr.msra.gmra.mrb[8].mxu0 %vm216_vm0, %v799_v12 }
  0xf8   : > { %780 = vmatpush3.bf16.msra.mxu1 %v297_v16  ;;  %781 = vmatprep.mubr.msk.bf16.mxu1 %vm216_vm0, %v798_v5 }
  0xff   : > { %782 = vmatmul.mubr.msk.bf16.vlgmr.msra.gmra.mrb[8].mxu1 %vm216_vm0, %v799_v12 }
 0x1c2   : > { %v765_v19 = vpop.f32.mrb[0].mxu1 }
 0x1c3   : > { %v720_v20 = vpack.c.bf16 %v765_v19, %v765_v19  ;;  %v352_v21 = vpop.f32.mrb[1].mxu1 }
 0x1c4   : > { %v718_v22 = vpack.c.bf16 %v352_v21, %v352_v21  ;;  %v766_v23 = vpop.f32.mrb[2].mxu1 }
 0x1c5   : > { %386 = vst.msk [vmem:[%s867_s28 + $0x8] sm:$0xf] %vm383_vm1, %v720_v20  ;;  %v721_v24 = vpack.c.bf16 %v766_v23, %v766_v23  ;;  %v355_v25 = vpop.f32.mrb[3].mxu1 }
 0x1c6   : > { %384 = vst.msk [vmem:[%s867_s28] sm:$0xf] %vm383_vm1, %v718_v22  ;;  %v719_v26 = vpack.c.bf16 %v355_v25, %v355_v25 }
 0x1c7   : > { %387 = vst.msk [vmem:[%s867_s28 + $0xc] sm:$0xf] %vm383_vm1, %v721_v24 }
 0x1c8   : > { %385 = vst.msk [vmem:[%s867_s28 + $0x4] sm:$0xf] %vm383_vm1, %v719_v26 }
 0x1ca   : > { %v771_v27 = vpop.f32.mrb[4].mxu1  ;;  %v777_v28 = vpop.f32.mrb[8].mxu0 }
 0x1cb   : > { %v724_v29 = vpack.c.bf16 %v771_v27, %v771_v27  ;;  %v422_v30 = vpop.f32.mrb[5].mxu1  ;;  %v728_v31 = vpack.c.bf16 %v777_v28, %v777_v28  ;;  %v492_v32 = vpop.f32.mrb[9].mxu0 }
 0x1cc   : > { %v722_v33 = vpack.c.bf16 %v422_v30, %v422_v30  ;;  %v772_v34 = vpop.f32.mrb[6].mxu1  ;;  %v726_v35 = vpack.c.bf16 %v492_v32, %v492_v32  ;;  %v778_v36 = vpop.f32.mrb[10].mxu0 }
 0x1cd   : > { %692 = vst.msk [vmem:[%s867_s28 + $0x18] sm:$0xf] %vm383_vm1, %v724_v29  ;;  %v725_v37 = vpack.c.bf16 %v772_v34, %v772_v34  ;;  %v425_v38 = vpop.f32.mrb[7].mxu1  ;;  %v729_v39 = vpack.c.bf16 %v778_v36, %v778_v36  ;;  %v495_v40 = vpop.f32.mrb[11].mxu0  ;;  %702 = vst.msk [vmem:[%s867_s28 + $0x28] sm:$0xf] %vm383_vm1, %v728_v31 }
 0x1ce   : > { %690 = vst.msk [vmem:[%s867_s28 + $0x10] sm:$0xf] %vm383_vm1, %v722_v33  ;;  %v723_v41 = vpack.c.bf16 %v425_v38, %v425_v38  ;;  %v727_v42 = vpack.c.bf16 %v495_v40, %v495_v40  ;;  %700 = vst.msk [vmem:[%s867_s28 + $0x20] sm:$0xf] %vm383_vm1, %v726_v35 }
 0x1cf   : > { %693 = vst.msk [vmem:[%s867_s28 + $0x1c] sm:$0xf] %vm383_vm1, %v725_v37  ;;  %703 = vst.msk [vmem:[%s867_s28 + $0x2c] sm:$0xf] %vm383_vm1, %v729_v39 }
 0x1d0   : > { %691 = vst.msk [vmem:[%s867_s28 + $0x14] sm:$0xf] %vm383_vm1, %v723_v41  ;;  %701 = vst.msk [vmem:[%s867_s28 + $0x24] sm:$0xf] %vm383_vm1, %v727_v42 }
 0x1d2   : > { %v783_v43 = vpop.f32.mrb[8].mxu1 }
 0x1d3   : > { %v732_v44 = vpack.c.bf16 %v783_v43, %v783_v43  ;;  %v562_v45 = vpop.f32.mrb[9].mxu1 }
 0x1d4   : > { %v730_v46 = vpack.c.bf16 %v562_v45, %v562_v45  ;;  %v784_v47 = vpop.f32.mrb[10].mxu1 }
 0x1d5   : > { %712 = vst.msk [vmem:[%s867_s28 + $0x38] sm:$0xf] %vm383_vm1, %v732_v44  ;;  %v733_v48 = vpack.c.bf16 %v784_v47, %v784_v47  ;;  %v565_v49 = vpop.f32.mrb[11].mxu1 }
 0x1d6   : > { %710 = vst.msk [vmem:[%s867_s28 + $0x30] sm:$0xf] %vm383_vm1, %v730_v46  ;;  %v731_v50 = vpack.c.bf16 %v565_v49, %v565_v49 }
 0x1d7   : > { %713 = vst.msk [vmem:[%s867_s28 + $0x3c] sm:$0xf] %vm383_vm1, %v733_v48 }
 0x1d8   : > { %711 = vst.msk [vmem:[%s867_s28 + $0x34] sm:$0xf] %vm383_vm1, %v731_v50 }
 0x1d9 PF: > { %s13_s12 = sadd.s32 1, %s806_s12  }
 0x1da   : > { %p10_p4 = scmp.ge.s32.totalorder %s13_s12, 4  }
 0x1dc   :  { %12 = sbr.rel (!%p10_p4) target bundleno = 1 (0x1), region = 65 }

// kernel: _lambda_.6
= control target key start
LH: loop header
LB: loop body
LE: loop exit
PB: predicated region body
PF: predicated region fallthrough
CT: control target
= control target key end

     0   :  { %s4678_s13 = smov 0   ;;  %s4680_s14 = smov 0   ;;  %s6138_s0 = inlined_call_operand.vmem [shape: bf16[2,32,32,4], index: 0, kind: input, shape index: {}, may-alias: {0,1,2}]   ;;  %s6139_s1 = inlined_call_operand.vmem [shape: bf16[2,32,32,4], index: 1, kind: input, shape index: {}, may-alias: {0,1,2}]   ;;  %s6140_s2 = inlined_call_operand.vmem [shape: bf16[2,32,32,4], index: 2, kind: input, shape index: {}, may-alias: {0,1,2}]   ;;  %s6141_s3 = inlined_call_operand.vmem [shape: bf16[2,32,32,4], index: 3, kind: input, shape index: {}, may-alias: {3,4,5}]   ;;  %s6142_s4 = inlined_call_operand.vmem [shape: bf16[2,32,32,4], index: 4, kind: input, shape index: {}, may-alias: {3,4,5}]   ;;  %s6143_s5 = inlined_call_operand.vmem [shape: bf16[2,32,32,4], index: 5, kind: input, shape index: {}, may-alias: {3,4,5}]   ;;  %s6144_s6 = inlined_call_operand.vmem [shape: bf16[3,12,8], index: 6, kind: input, shape index: {}]   ;;  %s6145_s7 = inlined_call_operand.vmem [shape: bf16[3,12,8], index: 7, kind: input, shape index: {}]   ;;  %s6146_s8 = inlined_call_operand.vmem [shape: f32[1,8], index: 8, kind: input, shape index: {}]   ;;  %s6147_s9 = inlined_call_operand.vmem [shape: f32[1,8], index: 9, kind: input, shape index: {}]   ;;  %s6148_s10 = inlined_call_operand.vmem [shape: bf16[2,32,32,8], index: 10, kind: output, shape index: {}]  }
   0x1   :  { %s4682_s15 = smov 0   ;;  %s4684_s16 = smov 0  }
   0x2   :  { %s4686_s17 = smov 0  }
   0x3 LB: > { %s29_s18 = sadd.s32 1, %s4611_s15  ;;  %s32_s19 = sadd.s32 1, %s4615_s16  ;;  %s4619_s17 = sphi %s4686_s17, %s20_s17   ;;  %s4615_s16 = sphi %s4684_s16, %s6185_s16   ;;  %s4611_s15 = sphi %s4682_s15, %s6184_s15   ;;  %s4607_s14 = sphi %s4680_s14, %s6183_s14   ;;  %s4603_s13 = sphi %s4678_s13, %s6182_s13  }
   0x4   : > { %p30_p0 = scmp.ge.s32.totalorder %s29_s18, 4  ;;  %p3703_p1 = scmp.ge.s32.totalorder %s4619_s17, 1 }
   0x5   : > { %p480_p2 = scmp.lt.s32.totalorder %s4619_s17, 9 }
   0x6   : > { %s6187_s18 = smov (%p30_p0, %s29_s18), 0  ;;  %s6189_s19 = smov (!%p30_p0, %s32_s19), %s4615_s16 }
   0x7   : > { %p481_p3 = pnand %p3703_p1, %p480_p2  ;;  %p34_p4 = scmp.ge.s32.totalorder %s6189_s19, 2 }
   0x8   : > { %s4711_s20 = sshll.u32 (!%p481_p3), %s4603_s13, 3  ;;  %p591_p5 = scmp.lt.s32.totalorder (!%p481_p3), %s4607_s14, 1  ;;  %v4565_v0 = vld [vmem:[%s6145_s7] sm:$0x3f] (!%p481_p3)   ;;  %v4724_v1 = vld [vmem:[%s6145_s7 + $0x8] sm:$0x3f] (!%p481_p3)  }
   0x9   : > { %s6191_s19 = smov (%p34_p4, %s6189_s19), 0  ;;  %484 = sbr.rel (%p481_p3) target bundleno = 623 (0x26f), region = 60 }
   0xa   : > { %p593_p6 = scmp.lt.s32.totalorder (!%p481_p3), %s4711_s20, 31  ;;  %vm1776_vm0 = vcmask (!%p481_p3), 1045504   ;;  %vm994_vm1 = vcmask (!%p481_p3), 1047552   ;;  %vm945_vm2 = vsmask.f32 (!%p481_p3), 7424  ;;  %s4622_s25 = smov (!%p481_p3), 8  }
   0xb   : > { %4480 = vmatprep.subr.msk.bf16.mxu1 (!%p481_p3), %vm1776_vm0, %v4565_v0  ;;  %4482 = vmatprep.subr.msk.bf16.mxu0 (!%p481_p3), %vm1776_vm0, %v4724_v1  ;;  %v4738_v2 = vsel (!%p481_p3), %vm1776_vm0, %v4565_v0, 0  ;;  %v4742_v3 = vsel (!%p481_p3), %vm1776_vm0, %v4724_v1, 0  ;;  %vm4789_vm3 = vmand (!%p481_p3), %vm994_vm1, %vm945_vm2  ;;  %vm806_vm4 = vsmask.f32 (!%p481_p3), 256  ;;  %s3709_s11 = sadd.s32 (!%p481_p3), 4294967295, %s4711_s20  ;;  %vm935_vm5 = vcmask (!%p481_p3), 1040384  }
   0xc   : > { %4095 = vmatpush3.bf16.msra.mxu1 (!%p481_p3), %v4738_v2  ;;  %4163 = vmatpush3.bf16.msra.mxu0 (!%p481_p3), %v4742_v3  ;;  %p603_p7 = scmp.gt.s32.totalorder (!%p481_p3), %s3709_s11, 0  ;;  %p3710_p8 = scmp.lt.s32.totalorder (!%p481_p3), %s3709_s11, 31  ;;  %vm5241_vm6 = vmand (!%p481_p3), %vm935_vm5, %vm806_vm4  ;;  %vm1076_vm7 = vcmask (!%p481_p3), 31744   ;;  %vm1125_vm8 = vcmask (!%p481_p3), 64512   ;;  %vm1743_vm9 = vcmask (!%p481_p3), 97280   ;;  %vm3450_vm10 = vcmask (!%p481_p3), 60416  }
   0xd   : > { %p692_p10 = scmp.gt.s32.totalorder (!%p481_p3), %s4603_s13, 0  ;;  %p693_p11 = scmp.lt.s32.totalorder (!%p481_p3), %s4603_s13, 3 }
  0x10   : > { %s6193_s14 = smov (!%p591_p5, %s4607_s14), 1 }
  0x11   : > { %s594_s21 = scalar_select %p593_p6, %s4711_s20, 31 }
  0x12   : > { %s4715_s22 = sshll.u32 %s6193_s14, 7  ;;  %s4621_s14 = smov 4  }
  0x13   : > { %s3705_s23 = sshll.u32 %s594_s21, 2 }
  0x14   : > { %s597_s24 = sadd.s32 %s4715_s22, %s3705_s23 }
  0x15   : > { %s4726_s29 = sshll.u32 %s597_s24, 2 }
  0x16   : > { %s4732_s12 = scalar_lea.vmem %s6141_s3, %s4726_s29  ;;  %s4800_s24 = scalar_lea.vmem %s6138_s0, %s4726_s29 }
  0x17   : > { %v4745_v4 = vld [vmem:[%s4732_s12 + $0x18] sm:$0xff]   ;;  %v4750_v5 = vld [vmem:[%s4732_s12] sm:$0xff]   ;;  %v4755_v6 = vld [vmem:[%s4732_s12 + $0x28] sm:$0xff]  }
  0x18   : > { %1590 = vrot.lane.b32.xlu1 %v4745_v4, %s4621_s14  ;;  %v1418_v7 = vshll.u32 %v4745_v4, 16  ;;  %1584 = vrot.lane.b32.xlu0 %v4750_v5, %s4621_s14  ;;  %v1396_v8 = vshll.u32 %v4750_v5, 16  ;;  %v4762_v9 = vld [vmem:[%s4732_s12 + $0x8] sm:$0xff]   ;;  %v4765_v10 = vld [vmem:[%s4732_s12 + $0x10] sm:$0xff]   ;;  %v1393_v11 = vshrl.u32 %v4750_v5, 16  ;;  %v1415_v20 = vshrl.u32 %v4745_v4, 16 }
  0x19   : > { %v1403_v12 = vshll.u32 %v4762_v9, 16  ;;  %v1411_v14 = vshll.u32 %v4765_v10, 16  ;;  %v4775_v15 = vld [vmem:[%s4732_s12 + $0x20] sm:$0xff]   ;;  %v1400_v16 = vshrl.u32 %v4762_v9, 16  ;;  %v1433_v21 = vshll.u32 %v4755_v6, 16  ;;  %v4810_v32 = vld [vmem:[%s4732_s12 + $0x30] sm:$0xff]  }
  0x1a   : > { %v1528_v13 = vrot.slane %v1396_v8, 1  ;;  %v1535_v17 = vrot.slane %v1418_v7, 1  ;;  %v1426_v22 = vshll.u32 %v4775_v15, 16  ;;  %v1408_v24 = vshrl.u32 %v4765_v10, 16  ;;  %v4819_v36 = vld [vmem:[%s4800_s24] sm:$0xff]   ;;  %v4541_v40 = vld [vmem:[%s4732_s12 + $0x38] sm:$0xff]  }
  0x1b   : > { %v1530_v19 = vrot.slane %v1403_v12, 1  ;;  %v1533_v25 = vrot.slane %v1411_v14, 1  ;;  %v1540_v30 = vrot.slane %v1433_v21, 1  ;;  %v1430_v31 = vshrl.u32 %v4755_v6, 16  ;;  %v4542_v44 = vld [vmem:[%s4800_s24 + $0x8] sm:$0xff]   ;;  %v4856_v0 = vld [vmem:[%s4732_s12 + $0x40] sm:$0xff]  }
  0x1c   : > { %1594 = vrot.lane.b32.xlu1 %v4755_v6, %s4621_s14  ;;  %1586 = vrot.lane.b32.xlu0 %v4762_v9, %s4621_s14  ;;  %v1529_v18 = vor.u32 %v1528_v13, %v1393_v11  ;;  %v1537_v29 = vor.u32 %v1535_v17, %v1415_v20  ;;  %v1423_v34 = vshrl.u32 %v4775_v15, 16  ;;  %v1538_v35 = vrot.slane %v1426_v22, 1  ;;  %v4859_v4 = vld [vmem:[%s4732_s12 + $0x48] sm:$0xff]   ;;  %v4955_v5 = vld [vmem:[%s6144_s6] sm:$0x3f]  }
  0x1d   : > { %v1532_v27 = vor.u32 %v1530_v19, %v1400_v16  ;;  %v1534_v33 = vor.u32 %v1533_v25, %v1408_v24  ;;  %v1542_v38 = vor.u32 %v1540_v30, %v1430_v31  ;;  %v1441_v39 = vshll.u32 %v4810_v32, 16  ;;  %4481 = vmatprep.subr.msk.bf16.mxu1 %vm1776_vm0, %v4955_v5 }
  0x1e   : > { %v1531_v26 = vsel %vm945_vm2, %v1529_v18, %v1530_v19  ;;  %v1577_v37 = vsel %vm4789_vm3, %v1537_v29, 0  ;;  %v1539_v42 = vor.u32 %v1538_v35, %v1423_v34  ;;  %v1417_v43 = vrot.slane %v1415_v20, 7  ;;  %v4870_v19 = vld [vmem:[%s4800_s24 + $0x10] sm:$0xff]  }
  0x1f   : > { %v1576_v28 = vsel %vm4789_vm3, %v1532_v27, 0  ;;  %v1536_v41 = vsel %vm945_vm2, %v1534_v33, %v1535_v17  ;;  %v1432_v45 = vrot.slane %v1430_v31, 7  ;;  %v811_v46 = vshll.u32 %v4819_v36, 16  ;;  %v4546_v27 = vld [vmem:[%s4800_s24 + $0x18] sm:$0xff]  }
  0x20   : > { %1624 = vrot.lane.b32.xlu1 %v1531_v26, %s4622_s25  ;;  %1588 = vrot.lane.b32.xlu0 %v4765_v10, %s4621_s14  ;;  %v1578_v47 = vsel %vm4789_vm3, %v1542_v38, 0  ;;  %v1438_v48 = vshrl.u32 %v4810_v32, 16  ;;  %v1448_v49 = vshll.u32 %v4541_v40, 16  ;;  %v1543_v50 = vrot.slane %v1441_v39, 1 }
  0x21   : > { %v1541_v51 = vsel %vm945_vm2, %v1539_v42, %v1540_v30  ;;  %v1402_v52 = vrot.slane %v1400_v16, 7  ;;  %v808_v53 = vshrl.u32 %v4819_v36, 16  ;;  %v1445_v54 = vshrl.u32 %v4541_v40, 16 }
  0x22   : > { %v4841_v55 = vor.u32 %v1418_v7, %v1417_v43  ;;  %v818_v56 = vshll.u32 %v4542_v44, 16  ;;  %v946_v57 = vrot.slane %v811_v46, 1  ;;  %v4846_v58 = vor.u32 %v1433_v21, %v1432_v45  ;;  %v4895_v43 = vld [vmem:[%s4732_s12 + $0x50] sm:$0xff]  }
  0x23   : > { %v1544_v59 = vor.u32 %v1543_v50, %v1438_v48  ;;  %v1545_v60 = vrot.slane %v1448_v49, 1  ;;  %v1447_v61 = vrot.slane %v1445_v54, 7  ;;  %v815_v63 = vshrl.u32 %v4542_v44, 16  ;;  %v4905_v50 = vld [vmem:[%s4800_s24 + $0x20] sm:$0xff]  }
  0x24   : > { %1626 = vrot.lane.b32.xlu1 %v1576_v28, %s4622_s25  ;;  %1592 = vrot.lane.b32.xlu0 %v4775_v15, %s4621_s14  ;;  %v947_v62 = vor.u32 %v946_v57, %v808_v53  ;;  %v948_v7 = vrot.slane %v818_v56, 1  ;;  %v1405_v13 = vor.u32 %v1403_v12, %v1402_v52  ;;  %v1460_v17 = vshrl.u32 %v4859_v4, 16  ;;  %v4911_v52 = vld [vmem:[%s4732_s12 + $0x58] sm:$0xff]   ;;  %v4996_v15 = vld [vmem:[%s4732_s12 + $0x68] sm:$0xff]  }
  0x25   : > { %v1546_v6 = vsel %vm945_vm2, %v1544_v59, %v1545_v60  ;;  %v4866_v16 = vor.u32 %v1448_v49, %v1447_v61  ;;  %v817_v18 = vrot.slane %v815_v63, 7  ;;  %v1456_v20 = vshll.u32 %v4856_v0, 16 }
  0x26   : > { %v1462_v21 = vrot.slane %v1460_v17, 7  ;;  %v949_v25 = vsel %vm945_vm2, %v947_v62, %v948_v7  ;;  %v950_v26 = vor.u32 %v948_v7, %v815_v63  ;;  %v1547_v9 = vor.u32 %v1545_v60, %v1445_v54  ;;  %v4925_v63 = vld [vmem:[%s4800_s24 + $0x28] sm:$0xff]  }
  0x27   : > { %v1463_v12 = vshll.u32 %v4859_v4, 16  ;;  %v826_v28 = vshll.u32 %v4870_v19, 16  ;;  %v830_v29 = vshrl.u32 %v4546_v27, 16  ;;  %v4879_v30 = vor.u32 %v818_v56, %v817_v18 }
  0x28   : > { %1630 = vrot.lane.b32.xlu1 %v1577_v37, %s4622_s25  ;;  %1628 = vrot.lane.b32.xlu0 %v1536_v41, %s4622_s25  ;;  %v1453_v31 = vshrl.u32 %v4856_v0, 16  ;;  %v1548_v33 = vrot.slane %v1456_v20, 1  ;;  %v996_v37 = vsel %vm4789_vm3, %v950_v26, 0  ;;  %v833_v41 = vshll.u32 %v4546_v27, 16 }
  0x29   : > { %v4885_v35 = vor.u32 %v1463_v12, %v1462_v21  ;;  %v832_v38 = vrot.slane %v830_v29, 7  ;;  %v823_v42 = vshrl.u32 %v4870_v19, 16  ;;  %v1550_v45 = vrot.slane %v1463_v12, 1 }
  0x2a   : > { %v953_v57 = vrot.slane %v833_v41, 1  ;;  %v1410_v59 = vrot.slane %v1408_v24, 7  ;;  %v841_v60 = vshll.u32 %v4905_v50, 16  ;;  %v1395_v61 = vrot.slane %v1393_v11, 7  ;;  %v4942_v11 = vld [vmem:[%s6144_s6 + $0x8] sm:$0x3f]  }
  0x2b   : > { %v4902_v49 = vor.u32 %v833_v41, %v832_v38  ;;  %v1468_v62 = vshrl.u32 %v4895_v43, 16  ;;  %v1478_v7 = vshll.u32 %v4911_v52, 16  ;;  %4484 = vmatprep.subr.msk.bf16.mxu0 %vm1776_vm0, %v4942_v11  ;;  %v4989_v41 = vld [vmem:[%s4800_s24 + $0x30] sm:$0xff]  }
  0x2c   : > { %1634 = vrot.lane.b32.xlu1 %v1578_v47, %s4622_s25  ;;  %1632 = vrot.lane.b32.xlu0 %v1541_v51, %s4622_s25  ;;  %v951_v47 = vrot.slane %v826_v28, 1  ;;  %v1471_v51 = vshll.u32 %v4895_v43, 16  ;;  %v4937_v18 = vor.u32 %v1396_v8, %v1395_v61  ;;  %v955_v21 = vor.u32 %v953_v57, %v830_v29 }
  0x2d   : > { %v4950_v26 = vsel %vm806_vm4, %v1395_v61, %v1405_v13  ;;  %v1552_v8 = vor.u32 %v1550_v45, %v1460_v17  ;;  %v4969_v12 = vor.u32 %v1411_v14, %v1410_v59  ;;  %v1555_v29 = vrot.slane %v1478_v7, 1 }
  0x2e   : > { %v952_v56 = vor.u32 %v951_v47, %v823_v42  ;;  %v1553_v24 = vrot.slane %v1471_v51, 1 }
  0x2f   : > { %v1580_v14 = vsel %vm4789_vm3, %v1552_v8, 0  ;;  %v1493_v8 = vshll.u32 %v4996_v15, 16 }
  0x30   : > { %1004 = vrot.lane.b32.xlu1 %v4819_v36, %s4621_s14  ;;  %1596 = vrot.lane.b32.xlu0 %v4810_v32, %s4621_s14  ;;  %v1554_v17 = vor.u32 %v1553_v24, %v1468_v62  ;;  %v825_v36 = vrot.slane %v823_v42, 7  ;;  %v5034_v24 = vld [vmem:[%s4800_s24 + $0x38] sm:$0xff]  }
  0x32   : > { %v5045_v42 = vsel %vm806_vm4, %v825_v36, %v4902_v49 }
  0x34   : > { %1636 = vrot.lane.b32.xlu1 %v1546_v6, %s4622_s25  ;;  %1598 = vrot.lane.b32.xlu0 %v4541_v40, %s4621_s14  ;;  %v1579_v40 = vsel %vm4789_vm3, %v1547_v9, 0  ;;  %v4929_v6 = vsel %vm806_vm4, %v1410_v59, %v4841_v55  ;;  %v954_v55 = vsel %vm945_vm2, %v952_v56, %v953_v57  ;;  %v838_v9 = vshrl.u32 %v4905_v50, 16 }
  0x35   : > { %v1556_v56 = vsel %vm945_vm2, %v1554_v17, %v1555_v29 }
  0x38   : > { %1044 = vrot.lane.b32.xlu1 %v949_v25, %s4622_s25  ;;  %1006 = vrot.lane.b32.xlu0 %v4542_v44, %s4621_s14  ;;  %v1549_v44 = vor.u32 %v1548_v33, %v1453_v31  ;;  %v1425_v25 = vrot.slane %v1423_v34, 7  ;;  %v848_v34 = vshll.u32 %v4925_v63, 16  ;;  %v997_v33 = vsel %vm4789_vm3, %v955_v21, 0 }
  0x3a   : > { %v1551_v54 = vsel %vm945_vm2, %v1549_v44, %v1550_v45  ;;  %v4965_v13 = vsel %vm806_vm4, %v1425_v25, %v4846_v58  ;;  %v1475_v58 = vshrl.u32 %v4911_v52, 16  ;;  %v4981_v10 = vor.u32 %v1426_v22, %v1425_v25 }
  0x3b   : > { %v810_v44 = vrot.slane %v808_v53, 7  ;;  %v958_v45 = vrot.slane %v848_v34, 1  ;;  %v1455_v22 = vrot.slane %v1453_v31, 7  ;;  %v1490_v31 = vshrl.u32 %v4996_v15, 16 }
  0x3c   : > { %1046 = vrot.lane.b32.xlu1 %v996_v37, %s4622_s25  ;;  %1638 = vrot.lane.b32.xlu0 %v1579_v40, %s4622_s25  ;;  %v845_v37 = vshrl.u32 %v4925_v63, 16  ;;  %v4986_v40 = vld [vmem:[%s4732_s12 + $0x60] sm:$0xff]   ;;  %v1477_v47 = vrot.slane %v1475_v58, 7 }
  0x3d   : > { %v5018_v59 = vsel %vm806_vm4, %v810_v44, %v4879_v30  ;;  %v5022_v32 = vor.u32 %v1456_v20, %v1455_v22  ;;  %v5031_v61 = vsel %vm806_vm4, %v1455_v22, %v4885_v35  ;;  %v853_v30 = vshrl.u32 %v4989_v41, 16 }
  0x3e   : > { %v5041_v20 = vor.u32 %v826_v28, %v825_v36  ;;  %v1470_v35 = vrot.slane %v1468_v62, 7  ;;  %v1480_v21 = vor.u32 %v1478_v7, %v1477_v47 }
  0x40   : > { %1008 = vrot.lane.b32.xlu1 %v4870_v19, %s4621_s14  ;;  %1600 = vrot.lane.b32.xlu0 %v4856_v0, %s4621_s14  ;;  %v1492_v0 = vrot.slane %v1490_v31, 7  ;;  %v860_v19 = vshrl.u32 %v5034_v24, 16  ;;  %v5055_v49 = vor.u32 %v1471_v51, %v1470_v35  ;;  %v5062_v62 = vsel %vm806_vm4, %v1470_v35, %v1480_v21  ;;  %v5109_v21 = vld [vmem:[%s4800_s24 + $0x48] sm:$0xff]  }
  0x42   : > { %v1495_v51 = vor.u32 %v1493_v8, %v1492_v0 }
  0x44   : > { %1640 = vrot.lane.b32.xlu1 %v1551_v54, %s4622_s25  ;;  %1602 = vrot.lane.b32.xlu0 %v4859_v4, %s4621_s14  ;;  %v956_v4 = vrot.slane %v841_v60, 1  ;;  %v847_v54 = vrot.slane %v845_v37, 7 }
  0x46   : > { %v957_v38 = vor.u32 %v956_v4, %v838_v9  ;;  %v850_v25 = vor.u32 %v848_v34, %v847_v54  ;;  %v855_v4 = vrot.slane %v853_v30, 7  ;;  %v1560_v54 = vrot.slane %v1493_v8, 1 }
  0x48   : > { %1048 = vrot.lane.b32.xlu1 %v954_v55, %s4622_s25  ;;  %1010 = vrot.lane.b32.xlu0 %v4546_v27, %s4621_s14  ;;  %v1440_v27 = vrot.slane %v1438_v48, 7  ;;  %v5008_v48 = vor.u32 %v811_v46, %v810_v44  ;;  %v856_v46 = vshll.u32 %v4989_v41, 16  ;;  %v840_v55 = vrot.slane %v838_v9, 7 }
  0x4a   : > { %v5004_v57 = vor.u32 %v1441_v39, %v1440_v27  ;;  %v5012_v53 = vsel %vm806_vm4, %v1440_v27, %v4866_v16  ;;  %v1486_v39 = vshll.u32 %v4986_v40, 16  ;;  %v1483_v16 = vshrl.u32 %v4986_v40, 16 }
  0x4b   : > { %v5059_v17 = vor.u32 %v841_v60, %v840_v55  ;;  %v5065_v7 = vsel %vm806_vm4, %v840_v55, %v850_v25  ;;  %v5069_v34 = vor.u32 %v856_v46, %v855_v4  ;;  %v960_v60 = vor.u32 %v958_v45, %v845_v37 }
  0x4c   : > { %1050 = vrot.lane.b32.xlu1 %v997_v33, %s4622_s25  ;;  %1642 = vrot.lane.b32.xlu0 %v1580_v14, %s4622_s25  ;;  %v1485_v28 = vrot.slane %v1483_v16, 7  ;;  %v1557_v33 = vor.u32 %v1555_v29, %v1475_v58  ;;  %v863_v14 = vshll.u32 %v5034_v24, 16  ;;  %v1558_v47 = vrot.slane %v1486_v39, 1  ;;  %v5090_v58 = vld [vmem:[%s4732_s12 + $0x70] sm:$0xff]  }
  0x4d   : > { %v961_v22 = vrot.slane %v856_v46, 1  ;;  %v1501_v0 = vshll.u32 %v5090_v58, 16 }
  0x4e   : > { %v5067_v9 = vor.u32 %v1486_v39, %v1485_v28  ;;  %v5077_v27 = vsel %vm806_vm4, %v1485_v28, %v1495_v51  ;;  %v1581_v37 = vsel %vm4789_vm3, %v1557_v33, 0  ;;  %v963_v28 = vrot.slane %v863_v14, 1 }
  0x4f   : > { %v962_v8 = vor.u32 %v961_v22, %v853_v30  ;;  %v1562_v33 = vor.u32 %v1560_v54, %v1490_v31  ;;  %v1563_v31 = vrot.slane %v1501_v0, 1 }
  0x50   : > { %1012 = vrot.lane.b32.xlu1 %v4905_v50, %s4621_s14  ;;  %1604 = vrot.lane.b32.xlu0 %v4895_v43, %s4621_s14  ;;  %v862_v43 = vrot.slane %v860_v19, 7  ;;  %v959_v50 = vsel %vm945_vm2, %v957_v38, %v958_v45  ;;  %v5094_v38 = vld [vmem:[%s4800_s24 + $0x40] sm:$0xff]   ;;  %v5097_v45 = vld [vmem:[%s4732_s12 + $0x78] sm:$0xff]   ;;  %s604_s12 = scalar_select %p603_p7, %s3709_s11, 0  ;;  %v965_v30 = vor.u32 %v963_v28, %v860_v19 }
  0x51   : > { %v868_v36 = vshrl.u32 %v5094_v38, 16  ;;  %v1505_v39 = vshrl.u32 %v5097_v45, 16  ;;  %v871_v55 = vshll.u32 %v5094_v38, 16  ;;  %v1582_v19 = vsel %vm4789_vm3, %v1562_v33, 0  ;;  %s619_s11 = sadd.s32 8, %s4711_s20 }
  0x52   : > { %v865_v44 = vor.u32 %v863_v14, %v862_v43  ;;  %v875_v43 = vshrl.u32 %v5109_v21, 16  ;;  %s6195_s12 = smov (!%p3710_p8, %s604_s12), 31  ;;  %v878_v14 = vshll.u32 %v5109_v21, 16  ;;  %p5173_p9 = scmp.lt.s32.totalorder %s619_s11, 31 }
  0x53   : > { %v1507_v46 = vrot.slane %v1505_v39, 7  ;;  %s3715_s21 = sshll.u32 %s6195_s12, 2 }
  0x54   : > { %1644 = vrot.lane.b32.xlu1 %v1556_v56, %s4622_s25  ;;  %1606 = vrot.lane.b32.xlu0 %v4911_v52, %s4621_s14  ;;  %v998_v52 = vsel %vm4789_vm3, %v960_v60, 0  ;;  %v5087_v29 = vsel %vm806_vm4, %v855_v4, %v865_v44  ;;  %v1498_v56 = vshrl.u32 %v5090_v58, 16  ;;  %s5133_s23 = sadd.s32 %s3715_s21, %s4715_s22  ;;  %s6197_s11 = smov (!%p5173_p9, %s619_s11), 31 }
  0x55   : > { %s3717_s26 = sshll.u32 %s5133_s23, 2  ;;  %s6199_s11 = smov (!%p5173_p9, %s6197_s11), 31 }
  0x56   : > { %v1500_v35 = vrot.slane %v1498_v56, 7  ;;  %s5142_s30 = scalar_lea.vmem %s6142_s4, %s3717_s26  ;;  %v1564_v22 = vor.u32 %v1563_v31, %v1498_v56  ;;  %v968_v56 = vrot.slane %v878_v14, 1  ;;  %s5171_s27 = scalar_lea.vmem %s6139_s1, %s3717_s26 }
  0x57   : > { %s3722_s20 = sshll.u32 %s6199_s11, 2 }
  0x58   : > { %1052 = vrot.lane.b32.xlu1 %v959_v50, %s4622_s25  ;;  %1014 = vrot.lane.b32.xlu0 %v4925_v63, %s4621_s14  ;;  %v1559_v63 = vor.u32 %v1558_v47, %v1483_v16  ;;  %v870_v16 = vrot.slane %v868_v36, 7  ;;  %v5116_v4 = vor.u32 %v1501_v0, %v1500_v35  ;;  %v877_v50 = vrot.slane %v875_v43, 7  ;;  %v4560_v47 = vld [vmem:[%s4800_s24 + $0x58] sm:$0xff]   ;;  %s628_s23 = sadd.s32 %s3722_s20, %s4715_s22  ;;  %s5941_s20 = scalar_lea.vmem %s6148_s10, %s4726_s29 }
  0x59   : > { %s3724_s26 = sshll.u32 %s628_s23, 2 }
  0x5a   : > { %v1561_v25 = vsel %vm945_vm2, %v1559_v63, %v1560_v54  ;;  %v5120_v51 = vor.u32 %v871_v55, %v870_v16  ;;  %v4559_v63 = vld [vmem:[%s4800_s24 + $0x50] sm:$0xff]   ;;  %v890_v54 = vshrl.u32 %v4560_v47, 16  ;;  %s5207_s28 = scalar_lea.vmem %s6143_s5, %s3724_s26  ;;  %s5229_s11 = scalar_lea.vmem %s6140_s2, %s3724_s26 }
  0x5b   : > { %v883_v0 = vshrl.u32 %v4559_v63, 16  ;;  %s6009_s29 = scalar_select %p693_p11, 1, 0 }
  0x5c   : > { %1054 = vrot.lane.b32.xlu1 %v998_v52, %s4622_s25  ;;  %1646 = vrot.lane.b32.xlu0 %v1581_v37, %s4622_s25  ;;  %v880_v52 = vor.u32 %v878_v14, %v877_v50 }
  0x5e   : > { %v5152_v37 = vsel %vm806_vm4, %v870_v16, %v880_v52  ;;  %v893_v16 = vshll.u32 %v4560_v47, 16 }
  0x60   : > { %1016 = vrot.lane.b32.xlu1 %v4989_v41, %s4621_s14  ;;  %1608 = vrot.lane.b32.xlu0 %v4986_v40, %s4621_s14  ;;  %v1508_v41 = vshll.u32 %v5097_v45, 16  ;;  %v964_v40 = vsel %vm945_vm2, %v962_v8, %v963_v28  ;;  %v885_v8 = vrot.slane %v883_v0, 7 }
  0x62   : > { %v1510_v60 = vor.u32 %v1508_v41, %v1507_v46  ;;  %v892_v46 = vrot.slane %v890_v54, 7 }
  0x64   : > { %1648 = vrot.lane.b32.xlu1 %v1561_v25, %s4622_s25  ;;  %1610 = vrot.lane.b32.xlu0 %v4996_v15, %s4621_s14  ;;  %v5130_v44 = vsel %vm806_vm4, %v1500_v35, %v1510_v60  ;;  %v999_v15 = vsel %vm4789_vm3, %v965_v30, 0  ;;  %v966_v35 = vrot.slane %v871_v55, 1  ;;  %v886_v25 = vshll.u32 %v4559_v63, 16  ;;  %v4562_v55 = vld [vmem:[%s4800_s24 + $0x68] sm:$0xff]  }
  0x65   : > { %v905_v30 = vshrl.u32 %v4562_v55, 16 }
  0x66   : > { %v967_v50 = vor.u32 %v966_v35, %v868_v36  ;;  %v5162_v60 = vor.u32 %v886_v25, %v885_v8  ;;  %v4564_v35 = vld [vmem:[%s4800_s24 + $0x78] sm:$0xff]  }
  0x67   : > { %v907_v52 = vrot.slane %v905_v30, 7 }
  0x68   : > { %1056 = vrot.lane.b32.xlu1 %v964_v40, %s4622_s25  ;;  %1018 = vrot.lane.b32.xlu0 %v5034_v24, %s4621_s14  ;;  %v1565_v24 = vrot.slane %v1508_v41, 1  ;;  %v895_v41 = vor.u32 %v893_v16, %v892_v46  ;;  %v969_v36 = vsel %vm945_vm2, %v967_v50, %v968_v56  ;;  %v970_v40 = vor.u32 %v968_v56, %v875_v43 }
  0x6a   : > { %v1566_v28 = vsel %vm945_vm2, %v1564_v22, %v1565_v24  ;;  %v1567_v33 = vor.u32 %v1565_v24, %v1505_v39  ;;  %v1000_v43 = vsel %vm4789_vm3, %v970_v40, 0  ;;  %v971_v22 = vrot.slane %v886_v25, 1 }
  0x6c   : > { %1058 = vrot.lane.b32.xlu1 %v999_v15, %s4622_s25  ;;  %1650 = vrot.lane.b32.xlu0 %v1582_v19, %s4622_s25  ;;  %v973_v19 = vrot.slane %v893_v16, 1  ;;  %v1583_v39 = vsel %vm4789_vm3, %v1567_v33, 0  ;;  %v920_v16 = vshrl.u32 %v4564_v35, 16 }
  0x6e   : > { %v922_v56 = vrot.slane %v920_v16, 7 }
  0x70   : > { %1020 = vrot.lane.b32.xlu1 %v5094_v38, %s4621_s14  ;;  %1612 = vrot.lane.b32.xlu0 %v5090_v58, %s4621_s14  ;;  %v4561_v58 = vld [vmem:[%s4800_s24 + $0x60] sm:$0xff]   ;;  %v5180_v38 = vsel %vm806_vm4, %v885_v8, %v895_v41  ;;  %v4563_v8 = vld [vmem:[%s4800_s24 + $0x70] sm:$0xff]  }
  0x71   : > { %v898_v14 = vshrl.u32 %v4561_v58, 16  ;;  %v901_v15 = vshll.u32 %v4561_v58, 16  ;;  %v913_v50 = vshrl.u32 %v4563_v8, 16  ;;  %v916_v41 = vshll.u32 %v4563_v8, 16 }
  0x73   : > { %v900_v31 = vrot.slane %v898_v14, 7 }
  0x74   : > { %1652 = vrot.lane.b32.xlu1 %v1566_v28, %s4622_s25  ;;  %1614 = vrot.lane.b32.xlu0 %v5097_v45, %s4621_s14  ;;  %v908_v45 = vshll.u32 %v4562_v55, 16  ;;  %v972_v28 = vor.u32 %v971_v22, %v883_v0 }
  0x75   : > { %v5198_v24 = vor.u32 %v901_v15, %v900_v31 }
  0x76   : > { %v910_v46 = vor.u32 %v908_v45, %v907_v52  ;;  %v978_v33 = vrot.slane %v908_v45, 1  ;;  %v923_v52 = vshll.u32 %v4564_v35, 16  ;;  %v981_v45 = vrot.slane %v916_v41, 1 }
  0x78   : > { %1060 = vrot.lane.b32.xlu1 %v969_v36, %s4622_s25  ;;  %1022 = vrot.lane.b32.xlu0 %v5109_v21, %s4621_s14  ;;  %v975_v21 = vor.u32 %v973_v19, %v890_v54  ;;  %v5211_v25 = vsel %vm806_vm4, %v900_v31, %v910_v46  ;;  %v915_v36 = vrot.slane %v913_v50, 7  ;;  %v974_v54 = vsel %vm945_vm2, %v972_v28, %v973_v19  ;;  %v5238_v46 = vld [vmem:[%s5142_s30] sm:$0xff]  }
  0x79   : > { %v925_v31 = vor.u32 %v923_v52, %v922_v56  ;;  %v983_v22 = vrot.slane %v923_v52, 1  ;;  %v982_v28 = vor.u32 %v981_v45, %v913_v50 }
  0x7a   : > { %v1001_v40 = vsel %vm4789_vm3, %v975_v21, 0 }
  0x7b   : > { %v985_v56 = vor.u32 %v983_v22, %v920_v16  ;;  %v984_v52 = vsel %vm945_vm2, %v982_v28, %v983_v22  ;;  %v2312_v22 = vsel %vm1776_vm0, %v4942_v11, 0  ;;  %v5295_v28 = vld [vmem:[%s6145_s7 + $0x10] sm:$0x3f]   ;;  %v1521_v11 = vsel %vm5241_vm6, 0, %v4969_v12 }
  0x7c   : > { %1062 = vrot.lane.b32.xlu1 %v1000_v43, %s4622_s25  ;;  %1654 = vrot.lane.b32.xlu0 %v1583_v39, %s4622_s25  ;;  %v976_v43 = vrot.slane %v901_v15, 1  ;;  %v5218_v39 = vor.u32 %v916_v41, %v915_v36  ;;  %v1520_v41 = vsel %vm5241_vm6, 0, %v4937_v18 }
  0x7d   : > { %v1003_v18 = vsel %vm4789_vm3, %v985_v56, 0 }
  0x7e   : > { %v977_v0 = vor.u32 %v976_v43, %v898_v14 }
  0x80   : > { %1026 = vrot.lane.b32.xlu1 %v4560_v47, %s4621_s14  ;;  %1024 = vrot.lane.b32.xlu0 %v4559_v63, %s4621_s14  ;;  %v980_v47 = vor.u32 %v978_v33, %v905_v30  ;;  %v5223_v63 = vsel %vm806_vm4, %v915_v36, %v925_v31  ;;  %v979_v30 = vsel %vm945_vm2, %v977_v0, %v978_v33 }
  0x82   : > { %v1002_v15 = vsel %vm4789_vm3, %v980_v47, 0  ;;  %v5270_v47 = vld [vmem:[%s5171_s27] sm:$0xff]  }
  0x84   : > { %1066 = vrot.lane.b32.xlu1 %v1001_v40, %s4622_s25  ;;  %1064 = vrot.lane.b32.xlu0 %v974_v54, %s4622_s25  ;;  %v6157_v40 = vshll.u32 %v5238_v46, 16 }
  0x86   : > { %v2839_v31 = vrot.slane %v6157_v40, 1 }
  0x88   : > { %1030 = vrot.lane.b32.xlu1 %v4562_v55, %s4621_s14  ;;  %1028 = vrot.lane.b32.xlu0 %v4561_v58, %s4621_s14  ;;  %v5247_v58 = vld [vmem:[%s5142_s30 + $0x8] sm:$0xff]  }
  0x89   : > { %v6150_v33 = vshll.u32 %v5247_v58, 16  ;;  %v6152_v0 = vshrl.u32 %v5247_v58, 16 }
  0x8a   : > { %v5234_v19 = vpop.permute.xlu1 %1590  ;;  %v1585_v14 = vpop.permute.xlu0 %1584 }
  0x8b   : > { %v1658_v16 = vsel %vm1076_vm7, %v1520_v41, %v1585_v14  ;;  %v5290_v14 = vsel %vm1776_vm0, %v4955_v5, 0 }
  0x8c   : > { %1070 = vrot.lane.b32.xlu1 %v1002_v15, %s4622_s25  ;;  %1068 = vrot.lane.b32.xlu0 %v979_v30, %s4622_s25  ;;  %v5280_v15 = vld [vmem:[%s5171_s27 + $0x8] sm:$0xff]   ;;  %s3134_s27 = scalar_select %p692_p10, 1, 0 }
  0x8e   : > { %v5250_v21 = vpop.permute.xlu1 %1594  ;;  %v1587_v36 = vpop.permute.xlu0 %1586 }
  0x8f   : > { %v1661_v30 = vsel %vm1076_vm7, %v4950_v26, %v1587_v36  ;;  %v6151_v36 = vshll.u32 %v5270_v47, 16 }
  0x90   : > { %1034 = vrot.lane.b32.xlu1 %v4564_v35, %s4621_s14  ;;  %1032 = vrot.lane.b32.xlu0 %v4563_v8, %s4621_s14  ;;  %v2823_v35 = vshrl.u32 %v5238_v46, 16  ;;  %v2841_v8 = vrot.slane %v6150_v33, 1 }
  0x92   : > { %v1625_v50 = vpop.permute.xlu1 %1624  ;;  %v1589_v54 = vpop.permute.xlu0 %1588  ;;  %v2840_v26 = vor.u32 %v2839_v31, %v2823_v35  ;;  %v2843_v5 = vor.u32 %v2841_v8, %v6152_v0 }
  0x93   : > { %v5264_v43 = vsel %vm1125_vm8, %v1658_v16, %v1625_v50  ;;  %v6149_v16 = vshll.u32 %v5280_v15, 16  ;;  %v1522_v50 = vsel %vm5241_vm6, 0, %v4981_v10  ;;  %v6155_v10 = vshrl.u32 %v5270_v47, 16 }
  0x94   : > { %4096 = vmatprep.mubr.msk.bf16.mxu1 %vm1743_vm9, %v5264_v43  ;;  %4164 = vmatprep.mubr.msk.bf16.mxu0 %vm1743_vm9, %v5264_v43  ;;  %v2842_v31 = vsel %vm945_vm2, %v2840_v26, %v2841_v8  ;;  %v6153_v8 = vshrl.u32 %v5280_v15, 16  ;;  %v5342_v26 = vld [vmem:[%s5207_s28 + $0x8] sm:$0xff]  }
  0x95   : > { %1072 = vrot.lane.b32.xlu0 %v984_v52, %s4622_s25  ;;  %1074 = vrot.lane.b32.xlu1 %v1003_v18, %s4622_s25  ;;  %v1664_v52 = vsel %vm1076_vm7, %v1521_v11, %v1589_v54  ;;  %v2845_v54 = vsel %vm4789_vm3, %v2843_v5, 0  ;;  %v1199_v11 = vrot.slane %v6149_v16, 1 }
  0x96   : > { %v1627_v45 = vpop.permute.xlu1 %1626  ;;  %v1593_v56 = vpop.permute.xlu0 %1592 }
  0x97   : > { %v5298_v41 = vsel %vm1125_vm8, %v1661_v30, %v1627_v45  ;;  %v1197_v30 = vrot.slane %v6151_v36, 1  ;;  %v5331_v45 = vld [vmem:[%s5207_s28] sm:$0xff]   ;;  %v1670_v5 = vsel %vm1076_vm7, %v1522_v50, %v1593_v56 }
  0x98   : > { %4097 = vmatmul.mubr.msk.bf16.vlgmr.msra.gmra.mrb[0].mxu1 %vm1743_vm9, %v5298_v41  ;;  %4165 = vmatmul.mubr.msk.bf16.vlgmr.msra.gmra.mrb[0].mxu0 %vm1743_vm9, %v5298_v41  ;;  %v6154_v36 = vshll.u32 %v5331_v45, 16 }
  0x99   : > { %4197 = vmatpush3.bf16.msra.mxu0 %v2312_v22  ;;  %4129 = vmatpush3.bf16.msra.mxu1 %v5290_v14  ;;  %v1198_v33 = vor.u32 %v1197_v30, %v6155_v10 }
  0x9a   : > { %v1631_v12 = vpop.permute.xlu1 %1630  ;;  %4485 = vmatprep.subr.msk.bf16.mxu0 %vm1776_vm0, %v5295_v28  ;;  %2846 = vrot.lane.b32.xlu0 %v5238_v46, %s4621_s14  ;;  %v1629_v18 = vpop.permute.xlu0 %1628  ;;  %v2896_v30 = vrot.slane %v6154_v36, 1  ;;  %v937_v36 = vsel %vm5241_vm6, 0, %v5008_v48 }
  0x9b   : > { %2848 = vrot.lane.b32.xlu1 %v5247_v58, %s4621_s14  ;;  %4483 = vmatprep.subr.msk.bf16.mxu1 %vm1776_vm0, %v4724_v1  ;;  %v5334_v22 = vsel %vm1125_vm8, %v1664_v52, %v1629_v18  ;;  %v1667_v1 = vsel %vm1076_vm7, %v4929_v6, %v5234_v19  ;;  %v1201_v6 = vor.u32 %v1199_v11, %v6153_v8  ;;  %v6156_v19 = vshll.u32 %v5342_v26, 16  ;;  %v5392_v8 = vld [vmem:[%s5229_s11 + $0x8] sm:$0xff]  }
  0x9c   : > { %4100 = vmatprep.mubr.msk.bf16.mxu1 %vm1743_vm9, %v5334_v22  ;;  %4168 = vmatprep.mubr.msk.bf16.mxu0 %vm1743_vm9, %v5334_v22  ;;  %v5354_v18 = vsel %vm1125_vm8, %v1667_v1, %v1631_v12  ;;  %v1200_v12 = vsel %vm945_vm2, %v1198_v33, %v1199_v11  ;;  %v1673_v33 = vsel %vm1076_vm7, %v4965_v13, %v5250_v21 }
  0x9d   : > { %v1203_v1 = vsel %vm4789_vm3, %v1201_v6, 0 }
  0x9e   : > { %v1635_v52 = vpop.permute.xlu1 %1634  ;;  %2851 = vrot.lane.b32.xlu0 %v2842_v31, %s4622_s25  ;;  %v1633_v16 = vpop.permute.xlu0 %1632  ;;  %v2880_v31 = vshrl.u32 %v5331_v45, 16 }
  0x9f   : > { %2853 = vrot.lane.b32.xlu1 %v2845_v54, %s4622_s25  ;;  %v5361_v0 = vsel %vm1125_vm8, %v1670_v5, %v1633_v16  ;;  %v1523_v16 = vsel %vm5241_vm6, 0, %v5004_v57  ;;  %v5384_v54 = vld [vmem:[%s5229_s11] sm:$0xff]   ;;  %v2898_v5 = vrot.slane %v6156_v19, 1  ;;  %v2887_v57 = vshrl.u32 %v5342_v26, 16 }
  0xa0   : > { %4101 = vmatmul.mubr.msk.bf16.gmra.mrb[4].mxu1 %vm1743_vm9, %v5354_v18  ;;  %4169 = vmatmul.mubr.msk.bf16.gmra.mrb[4].mxu0 %vm1743_vm9, %v5354_v18  ;;  %v5403_v6 = vsel %vm1125_vm8, %v1673_v33, %v1635_v52  ;;  %v2897_v13 = vor.u32 %v2896_v30, %v2880_v31  ;;  %v6159_v21 = vshll.u32 %v5384_v54, 16  ;;  %v6158_v52 = vshll.u32 %v5392_v8, 16 }
  0xa1   : > { %4104 = vmatprep.mubr.msk.bf16.mxu1 %vm1743_vm9, %v5361_v0  ;;  %v2900_v48 = vor.u32 %v2898_v5, %v2887_v57 }
  0xa2   : > { %v1005_v56 = vpop.permute.xlu1 %1004  ;;  %1204 = vrot.lane.b32.xlu0 %v5270_v47, %s4621_s14  ;;  %v1597_v50 = vpop.permute.xlu0 %1596  ;;  %v2899_v30 = vsel %vm945_vm2, %v2897_v13, %v2898_v5  ;;  %v1254_v33 = vrot.slane %v6159_v21, 1  ;;  %v5442_v13 = vsel %vm1776_vm0, %v5295_v28, 0 }
  0xa3   : > { %1206 = vrot.lane.b32.xlu1 %v5280_v15, %s4621_s14  ;;  %v1676_v11 = vsel %vm1076_vm7, %v1523_v16, %v1597_v50 }
  0xa6   : > { %v1637_v10 = vpop.permute.xlu1 %1636  ;;  %1209 = vrot.lane.b32.xlu0 %v1200_v12, %s4622_s25  ;;  %v1599_v19 = vpop.permute.xlu0 %1598 }
  0xa7   : > { %v5406_v40 = vsel %vm1125_vm8, %v1676_v11, %v1637_v10  ;;  %1211 = vrot.lane.b32.xlu1 %v1203_v1, %s4622_s25  ;;  %v1079_v10 = vsel %vm1076_vm7, %v937_v36, %v1005_v56  ;;  %v1238_v1 = vshrl.u32 %v5384_v54, 16  ;;  %v2902_v36 = vsel %vm4789_vm3, %v2900_v48, 0 }
  0xa8   : > { %4105 = vmatmul.mubr.msk.bf16.gmra.mrb[8].mxu1 %vm1743_vm9, %v5403_v6  ;;  %v1256_v56 = vrot.slane %v6158_v52, 1  ;;  %v6160_v11 = vshrl.u32 %v5392_v8, 16  ;;  %v1679_v48 = vsel %vm1076_vm7, %v5012_v53, %v1599_v19  ;;  %v1524_v19 = vsel %vm5241_vm6, 0, %v5022_v32 }
  0xa9   : > { %4108 = vmatprep.mubr.msk.bf16.mxu1 %vm1743_vm9, %v5406_v40 }
  0xaa   : > { %v1045_v16 = vpop.permute.xlu1 %1044  ;;  %2903 = vrot.lane.b32.xlu0 %v5331_v45, %s4621_s14  ;;  %v1007_v50 = vpop.permute.xlu0 %1006 }
  0xab   : > { %v5423_v12 = vsel %vm1125_vm8, %v1079_v10, %v1045_v16  ;;  %2905 = vrot.lane.b32.xlu1 %v5342_v26, %s4621_s14  ;;  %v1082_v10 = vsel %vm1076_vm7, %v5018_v59, %v1007_v50  ;;  %v5448_v16 = vld [vmem:[%s6144_s6 + $0x10] sm:$0x3f]   ;;  %v1255_v59 = vor.u32 %v1254_v33, %v1238_v1 }
  0xac   : > { %4198 = vmatprep.mubr.msk.bf16.mxu0 %vm1743_vm9, %v5423_v12 }
  0xad   : > { %v1257_v33 = vsel %vm945_vm2, %v1255_v59, %v1256_v56 }
  0xae   : > { %v1047_v5 = vpop.permute.xlu1 %1046  ;;  %2908 = vrot.lane.b32.xlu0 %v2899_v30, %s4622_s25  ;;  %v1639_v52 = vpop.permute.xlu0 %1638  ;;  %v1258_v30 = vor.u32 %v1256_v56, %v6160_v11 }
  0xaf   : > { %v5453_v21 = vsel %vm1125_vm8, %v1082_v10, %v1047_v5  ;;  %2910 = vrot.lane.b32.xlu1 %v2902_v36, %s4622_s25  ;;  %v5459_v50 = vsel %vm1125_vm8, %v1679_v48, %v1639_v52  ;;  %v938_v48 = vsel %vm5241_vm6, 0, %v5041_v20 }
  0xb0   : > { %4199 = vmatmul.mubr.msk.bf16.vlgmr.msra.gmra.mrb[0].mxu0 %vm1743_vm9, %v5453_v21  ;;  %4109 = vmatmul.mubr.msk.bf16.gmra.mrb[12].mxu1 %vm1743_vm9, %v5459_v50  ;;  %v1260_v36 = vsel %vm4789_vm3, %v1258_v30, 0 }
  0xb1   : > { %4231 = vmatpush3.bf16.msra.mxu0 %v5442_v13 }
  0xb2   : > { %v1009_v53 = vpop.permute.xlu1 %1008  ;;  %1261 = vrot.lane.b32.xlu0 %v5384_v54, %s4621_s14  ;;  %4486 = vmatprep.subr.msk.bf16.mxu0 %vm1776_vm0, %v5448_v16  ;;  %v1601_v52 = vpop.permute.xlu0 %1600 }
  0xb3   : > { %1263 = vrot.lane.b32.xlu1 %v5392_v8, %s4621_s14  ;;  %v1682_v10 = vsel %vm1076_vm7, %v1524_v19, %v1601_v52  ;;  %v1085_v23 = vsel %vm1076_vm7, %v938_v48, %v1009_v53  ;;  %v939_v48 = vsel %vm5241_vm6, 0, %v5059_v17 }
  0xb6   : > { %v1641_v5 = vpop.permute.xlu1 %1640  ;;  %1266 = vrot.lane.b32.xlu0 %v1257_v33, %s4622_s25  ;;  %v1603_v11 = vpop.permute.xlu0 %1602 }
  0xb7   : > { %v5486_v32 = vsel %vm1125_vm8, %v1682_v10, %v1641_v5  ;;  %1268 = vrot.lane.b32.xlu1 %v1260_v36, %s4622_s25  ;;  %v1685_v52 = vsel %vm1076_vm7, %v5031_v61, %v1603_v11 }
  0xb8   : > { %4112 = vmatprep.mubr.msk.bf16.mxu1 %vm1743_vm9, %v5486_v32 }
  0xba   : > { %v1049_v56 = vpop.permute.xlu1 %1048  ;;  %v1011_v59 = vpop.permute.xlu0 %1010 }
  0xbb   : > { %v5493_v30 = vsel %vm1125_vm8, %v1085_v23, %v1049_v56  ;;  %v1088_v20 = vsel %vm1076_vm7, %v5045_v42, %v1011_v59  ;;  %v1525_v42 = vsel %vm5241_vm6, 0, %v5055_v49 }
  0xbc   : > { %4202 = vmatprep.mubr.msk.bf16.mxu0 %vm1743_vm9, %v5493_v30 }
  0xbe   : > { %v1051_v19 = vpop.permute.xlu1 %1050  ;;  %v1643_v33 = vpop.permute.xlu0 %1642 }
  0xbf   : > { %v5502_v36 = vsel %vm1125_vm8, %v1088_v20, %v1051_v19  ;;  %v5505_v53 = vsel %vm1125_vm8, %v1685_v52, %v1643_v33 }
  0xc0   : > { %4203 = vmatmul.mubr.msk.bf16.gmra.mrb[4].mxu0 %vm1743_vm9, %v5502_v36  ;;  %4113 = vmatmul.mubr.msk.bf16.gmra.mrb[16].mxu1 %vm1743_vm9, %v5505_v53 }
  0xc2   : > { %v1013_v10 = vpop.permute.xlu1 %1012  ;;  %v1605_v5 = vpop.permute.xlu0 %1604 }
  0xc3   : > { %v1688_v61 = vsel %vm1076_vm7, %v1525_v42, %v1605_v5  ;;  %v1091_v59 = vsel %vm1076_vm7, %v939_v48, %v1013_v10 }
  0xc6   : > { %v1645_v11 = vpop.permute.xlu1 %1644  ;;  %v1607_v23 = vpop.permute.xlu0 %1606 }
  0xc7   : > { %v5519_v56 = vsel %vm1125_vm8, %v1688_v61, %v1645_v11  ;;  %v1691_v33 = vsel %vm1076_vm7, %v5062_v62, %v1607_v23  ;;  %v940_v23 = vsel %vm5241_vm6, 0, %v5069_v34 }
  0xc8   : > { %4116 = vmatprep.mubr.msk.bf16.mxu1 %vm1743_vm9, %v5519_v56 }
  0xca   : > { %v1053_v20 = vpop.permute.xlu1 %1052  ;;  %v1015_v19 = vpop.permute.xlu0 %1014 }
  0xcb   : > { %v5525_v49 = vsel %vm1125_vm8, %v1091_v59, %v1053_v20  ;;  %v1094_v17 = vsel %vm1076_vm7, %v5065_v7, %v1015_v19  ;;  %v1526_v7 = vsel %vm5241_vm6, 0, %v5067_v9 }
  0xcc   : > { %4206 = vmatprep.mubr.msk.bf16.mxu0 %vm1743_vm9, %v5525_v49 }
  0xce   : > { %v1055_v52 = vpop.permute.xlu1 %1054  ;;  %v1647_v42 = vpop.permute.xlu0 %1646 }
  0xcf   : > { %v5534_v5 = vsel %vm1125_vm8, %v1094_v17, %v1055_v52  ;;  %v5537_v10 = vsel %vm1125_vm8, %v1691_v33, %v1647_v42 }
  0xd0   : > { %4207 = vmatmul.mubr.msk.bf16.gmra.mrb[8].mxu0 %vm1743_vm9, %v5534_v5  ;;  %4117 = vmatmul.mubr.msk.bf16.gmra.mrb[20].mxu1 %vm1743_vm9, %v5537_v10 }
  0xd2   : > { %v1017_v61 = vpop.permute.xlu1 %1016  ;;  %v1609_v11 = vpop.permute.xlu0 %1608 }
  0xd3   : > { %v1694_v62 = vsel %vm1076_vm7, %v1526_v7, %v1609_v11  ;;  %v1097_v19 = vsel %vm1076_vm7, %v940_v23, %v1017_v61 }
  0xd6   : > { %v1649_v48 = vpop.permute.xlu1 %1648  ;;  %v1611_v59 = vpop.permute.xlu0 %1610 }
  0xd7   : > { %v5551_v20 = vsel %vm1125_vm8, %v1694_v62, %v1649_v48  ;;  %v1697_v42 = vsel %vm1076_vm7, %v5077_v27, %v1611_v59  ;;  %v941_v59 = vsel %vm5241_vm6, 0, %v5120_v51 }
  0xd8   : > { %4120 = vmatprep.mubr.msk.bf16.mxu1 %vm1743_vm9, %v5551_v20 }
  0xda   : > { %v1057_v17 = vpop.permute.xlu1 %1056  ;;  %v1019_v52 = vpop.permute.xlu0 %1018 }
  0xdb   : > { %v5557_v9 = vsel %vm1125_vm8, %v1097_v19, %v1057_v17  ;;  %v1100_v34 = vsel %vm1076_vm7, %v5087_v29, %v1019_v52  ;;  %v1527_v29 = vsel %vm5241_vm6, 0, %v5116_v4 }
  0xdc   : > { %4210 = vmatprep.mubr.msk.bf16.mxu0 %vm1743_vm9, %v5557_v9 }
  0xde   : > { %v1059_v33 = vpop.permute.xlu1 %1058  ;;  %v1651_v7 = vpop.permute.xlu0 %1650 }
  0xdf   : > { %v5566_v11 = vsel %vm1125_vm8, %v1100_v34, %v1059_v33  ;;  %v5569_v61 = vsel %vm1125_vm8, %v1697_v42, %v1651_v7 }
  0xe0   : > { %4211 = vmatmul.mubr.msk.bf16.gmra.mrb[12].mxu0 %vm1743_vm9, %v5566_v11  ;;  %4121 = vmatmul.mubr.msk.bf16.gmra.mrb[24].mxu1 %vm1743_vm9, %v5569_v61 }
  0xe2   : > { %v1021_v62 = vpop.permute.xlu1 %1020  ;;  %v1613_v48 = vpop.permute.xlu0 %1612 }
  0xe3   : > { %v1700_v27 = vsel %vm1076_vm7, %v1527_v29, %v1613_v48  ;;  %v1103_v52 = vsel %vm1076_vm7, %v941_v59, %v1021_v62 }
  0xe6   : > { %v1653_v23 = vpop.permute.xlu1 %1652  ;;  %v1615_v19 = vpop.permute.xlu0 %1614 }
  0xe7   : > { %v5583_v17 = vsel %vm1125_vm8, %v1700_v27, %v1653_v23  ;;  %v1703_v7 = vsel %vm1076_vm7, %v5130_v44, %v1615_v19  ;;  %v942_v44 = vsel %vm5241_vm6, 0, %v5162_v60 }
  0xe8   : > { %4124 = vmatprep.mubr.msk.bf16.mxu1 %vm1743_vm9, %v5583_v17 }
  0xea   : > { %v1061_v34 = vpop.permute.xlu1 %1060  ;;  %v1023_v33 = vpop.permute.xlu0 %1022 }
  0xeb   : > { %v5589_v4 = vsel %vm1125_vm8, %v1103_v52, %v1061_v34  ;;  %v1106_v51 = vsel %vm1076_vm7, %v5152_v37, %v1023_v33 }
  0xec   : > { %4214 = vmatprep.mubr.msk.bf16.mxu0 %vm1743_vm9, %v5589_v4 }
  0xee   : > { %v1063_v42 = vpop.permute.xlu1 %1062  ;;  %v1655_v29 = vpop.permute.xlu0 %1654 }
  0xef   : > { %v5598_v48 = vsel %vm1125_vm8, %v1106_v51, %v1063_v42  ;;  %v5601_v62 = vsel %vm1125_vm8, %v1703_v7, %v1655_v29  ;;  %v4579_v51 = vld [vmem:[%s6145_s7] sm:$0x3f]   ;;  %v943_v42 = vsel %vm5241_vm6, 0, %v5198_v24 }
  0xf0   : > { %4215 = vmatmul.mubr.msk.bf16.gmra.mrb[16].mxu0 %vm1743_vm9, %v5598_v48  ;;  %4125 = vmatmul.mubr.msk.bf16.gmra.mrb[28].mxu1 %vm1743_vm9, %v5601_v62 }
  0xf1   : > { %4130 = vmatprep.mubr.msk.bf16.mxu1 %vm1743_vm9, %v5423_v12 }
  0xf2   : > { %v1027_v37 = vpop.permute.xlu1 %1026  ;;  %v1025_v27 = vpop.permute.xlu0 %1024 }
  0xf3   : > { %v1109_v59 = vsel %vm1076_vm7, %v942_v44, %v1025_v27  ;;  %v1112_v19 = vsel %vm1076_vm7, %v5180_v38, %v1027_v37 }
  0xf6   : > { %v1067_v23 = vpop.permute.xlu1 %1066  ;;  %v1065_v52 = vpop.permute.xlu0 %1064 }
  0xf7   : > { %v5616_v34 = vsel %vm1125_vm8, %v1109_v59, %v1065_v52  ;;  %v5619_v33 = vsel %vm1125_vm8, %v1112_v19, %v1067_v23  ;;  %v944_v23 = vsel %vm5241_vm6, 0, %v5218_v39  ;;  %v5680_v39 = vsel %vm1776_vm0, %v5448_v16, 0 }
  0xf8   : > { %4131 = vmatmul.mubr.msk.bf16.vlgmr.msra.gmra.mrb[0].mxu1 %vm1743_vm9, %v5453_v21  ;;  %4218 = vmatprep.mubr.msk.bf16.mxu0 %vm1743_vm9, %v5616_v34 }
  0xf9   : > { %4323 = vmatpush3.bf16.msra.mxu1 %v4742_v3  ;;  %4134 = vmatprep.mubr.msk.bf16.mxu1 %vm1743_vm9, %v5493_v30 }
  0xfa   : > { %v1031_v60 = vpop.permute.xlu1 %1030  ;;  %4219 = vmatmul.mubr.msk.bf16.gmra.mrb[20].mxu0 %vm1743_vm9, %v5619_v33  ;;  %v1029_v38 = vpop.permute.xlu0 %1028  ;;  %4487 = vmatprep.subr.msk.bf16.mxu1 %vm1776_vm0, %v4579_v51 }
  0xfb   : > { %v1115_v3 = vsel %vm1076_vm7, %v943_v42, %v1029_v38  ;;  %v1118_v29 = vsel %vm1076_vm7, %v5211_v25, %v1031_v60 }
  0xfe   : > { %v1071_v7 = vpop.permute.xlu1 %1070  ;;  %v1069_v37 = vpop.permute.xlu0 %1068 }
  0xff   : > { %v5641_v27 = vsel %vm1125_vm8, %v1115_v3, %v1069_v37  ;;  %v5644_v44 = vsel %vm1125_vm8, %v1118_v29, %v1071_v7 }
 0x100   : > { %4135 = vmatmul.mubr.msk.bf16.gmra.mrb[4].mxu1 %vm1743_vm9, %v5502_v36  ;;  %4222 = vmatprep.mubr.msk.bf16.mxu0 %vm1743_vm9, %v5641_v27 }
 0x101   : > { %4138 = vmatprep.mubr.msk.bf16.mxu1 %vm1743_vm9, %v5525_v49 }
 0x102   : > { %v1035_v24 = vpop.permute.xlu1 %1034  ;;  %4223 = vmatmul.mubr.msk.bf16.gmra.mrb[24].mxu0 %vm1743_vm9, %v5644_v44  ;;  %v1033_v25 = vpop.permute.xlu0 %1032 }
 0x103   : > { %v1121_v59 = vsel %vm1076_vm7, %v944_v23, %v1033_v25  ;;  %v1124_v19 = vsel %vm1076_vm7, %v5223_v63, %v1035_v24  ;;  %v4580_v63 = vld [vmem:[%s6144_s6] sm:$0x3f]   ;;  %v6173_v24 = vshll.u32 %v5280_v15, 16 }
 0x107   : > { %v1073_v52 = vpop.permute.xlu0 %1072  ;;  %v1075_v60 = vpop.permute.xlu1 %1074 }
 0x108   : > { %v5661_v38 = vsel %vm1125_vm8, %v1121_v59, %v1073_v52  ;;  %v5664_v51 = vsel %vm1125_vm8, %v1124_v19, %v1075_v60  ;;  %4139 = vmatmul.mubr.msk.bf16.gmra.mrb[8].mxu1 %vm1743_vm9, %v5534_v5  ;;  %v6174_v19 = vshll.u32 %v5384_v54, 16  ;;  %v6175_v52 = vshll.u32 %v5342_v26, 16 }
 0x109   : > { %4226 = vmatprep.mubr.msk.bf16.mxu0 %vm1743_vm9, %v5661_v38  ;;  %4142 = vmatprep.mubr.msk.bf16.mxu1 %vm1743_vm9, %v5557_v9 }
 0x10a   : > { %4227 = vmatmul.mubr.msk.bf16.gmra.mrb[28].mxu0 %vm1743_vm9, %v5664_v51 }
 0x10b   : > { %4232 = vmatprep.mubr.msk.bf16.mxu0 %vm1743_vm9, %v5264_v43  ;;  %v6166_v43 = vshll.u32 %v5238_v46, 16 }
 0x110   : > { %4143 = vmatmul.mubr.msk.bf16.gmra.mrb[12].mxu1 %vm1743_vm9, %v5566_v11 }
 0x111   : > { %4146 = vmatprep.mubr.msk.bf16.mxu1 %vm1743_vm9, %v5589_v4 }
 0x112   : > { %4233 = vmatmul.mubr.msk.bf16.vlgmr.msra.gmra.mrb[32].mxu0 %vm1743_vm9, %v5298_v41 }
 0x113   : > { %4265 = vmatpush3.bf16.msra.mxu0 %v5680_v39  ;;  %4236 = vmatprep.mubr.msk.bf16.mxu0 %vm1743_vm9, %v5334_v22  ;;  %v6167_v22 = vshrl.u32 %v5270_v47, 16 }
 0x118   : > { %4147 = vmatmul.mubr.msk.bf16.gmra.mrb[16].mxu1 %vm1743_vm9, %v5598_v48 }
 0x119   : > { %4150 = vmatprep.mubr.msk.bf16.mxu1 %vm1743_vm9, %v5616_v34 }
 0x11a   : > { %4237 = vmatmul.mubr.msk.bf16.gmra.mrb[0].mxu0 %vm1743_vm9, %v5354_v18  ;;  %v1183_v18 = vrot.slane %v6167_v22, 7 }
 0x11b   : > { %4240 = vmatprep.mubr.msk.bf16.mxu0 %vm1743_vm9, %v5361_v0 }
 0x120   : > { %4151 = vmatmul.mubr.msk.bf16.gmra.mrb[20].mxu1 %vm1743_vm9, %v5619_v33 }
 0x121   : > { %4154 = vmatprep.mubr.msk.bf16.mxu1 %vm1743_vm9, %v5641_v27 }
 0x122   : > { %4241 = vmatmul.mubr.msk.bf16.gmra.mrb[4].mxu0 %vm1743_vm9, %v5403_v6 }
 0x123   : > { %4244 = vmatprep.mubr.msk.bf16.mxu0 %vm1743_vm9, %v5406_v40 }
 0x128   : > { %4155 = vmatmul.mubr.msk.bf16.gmra.mrb[24].mxu1 %vm1743_vm9, %v5644_v44 }
 0x129   : > { %4158 = vmatprep.mubr.msk.bf16.mxu1 %vm1743_vm9, %v5661_v38 }
 0x12a   : > { %4245 = vmatmul.mubr.msk.bf16.gmra.mrb[8].mxu0 %vm1743_vm9, %v5459_v50 }
 0x12b   : > { %4248 = vmatprep.mubr.msk.bf16.mxu0 %vm1743_vm9, %v5486_v32 }
 0x130   : > { %4159 = vmatmul.mubr.msk.bf16.gmra.mrb[32].mxu1 %vm1743_vm9, %v5664_v51 }
 0x131   : > { %4172 = vmatprep.mubr.msk.bf16.mxu1 %vm1743_vm9, %v5361_v0 }
 0x132   : > { %4249 = vmatmul.mubr.msk.bf16.gmra.mrb[12].mxu0 %vm1743_vm9, %v5505_v53 }
 0x133   : > { %4252 = vmatprep.mubr.msk.bf16.mxu0 %vm1743_vm9, %v5519_v56 }
 0x138   : > { %4173 = vmatmul.mubr.msk.bf16.vlgmr.msra.gmra.mrb[4].mxu1 %vm1743_vm9, %v5403_v6  ;;  %v6168_v6 = vshrl.u32 %v5247_v58, 16 }
 0x139   : > { %4299 = vmatpush3.bf16.msra.mxu1 %v4738_v2  ;;  %4176 = vmatprep.mubr.msk.bf16.mxu1 %vm1743_vm9, %v5406_v40  ;;  %v2825_v2 = vrot.slane %v2823_v35, 7  ;;  %v2847_v40 = vpop.permute.xlu0 %2846 }
 0x13a   : > { %4253 = vmatmul.mubr.msk.bf16.gmra.mrb[16].mxu0 %vm1743_vm9, %v5537_v10  ;;  %4488 = vmatprep.subr.msk.bf16.mxu1 %vm1776_vm0, %v4580_v63 }
 0x13b   : > { %4256 = vmatprep.mubr.msk.bf16.mxu0 %vm1743_vm9, %v5551_v20  ;;  %v2828_v0 = vor.u32 %v6166_v43, %v2825_v2 }
 0x13d   : > { %v2852_v41 = vpop.permute.xlu0 %2851  ;;  %v2838_v35 = vsel %vm5241_vm6, 0, %v2828_v0  ;;  %v6176_v0 = vshrl.u32 %v5392_v8, 16 }
 0x13e   : > { %v2857_v46 = vsel %vm1076_vm7, %v2838_v35, %v2847_v40 }
 0x140   : > { %4177 = vmatmul.mubr.msk.bf16.gmra.mrb[8].mxu1 %vm1743_vm9, %v5459_v50  ;;  %v2849_v50 = vpop.permute.xlu1 %2848 }
 0x141   : > { %4180 = vmatprep.mubr.msk.bf16.mxu1 %vm1743_vm9, %v5486_v32  ;;  %v6169_v32 = vshll.u32 %v5270_v47, 16 }
 0x142   : > { %4257 = vmatmul.mubr.msk.bf16.gmra.mrb[20].mxu0 %vm1743_vm9, %v5569_v61 }
 0x143   : > { %4260 = vmatprep.mubr.msk.bf16.mxu0 %vm1743_vm9, %v5583_v17 }
 0x144   : > { %v2854_v47 = vpop.permute.xlu1 %2853 }
 0x148   : > { %4181 = vmatmul.mubr.msk.bf16.gmra.mrb[12].mxu1 %vm1743_vm9, %v5505_v53  ;;  %v6170_v53 = vshll.u32 %v5247_v58, 16  ;;  %v1207_v7 = vpop.permute.xlu1 %1206 }
 0x149   : > { %4184 = vmatprep.mubr.msk.bf16.mxu1 %vm1743_vm9, %v5519_v56 }
 0x14a   : > { %4261 = vmatmul.mubr.msk.bf16.gmra.mrb[24].mxu0 %vm1743_vm9, %v5601_v62 }
 0x14b   : > { %4266 = vmatprep.mubr.msk.bf16.mxu0 %vm1743_vm9, %v5423_v12  ;;  %v2832_v12 = vrot.slane %v6168_v6, 7 }
 0x14d   : > { %v2835_v56 = vor.u32 %v6170_v53, %v2832_v12 }
 0x150   : > { %4185 = vmatmul.mubr.msk.bf16.gmra.mrb[16].mxu1 %vm1743_vm9, %v5537_v10  ;;  %v2862_v10 = vsel %vm1125_vm8, %v2857_v46, %v2852_v41  ;;  %v1247_v41 = vrot.slane %v6176_v0, 7  ;;  %v5918_v0 = vld [vmem:[%s6146_s8] ss:$0 sm:$0xff] }
 0x151   : > { %4188 = vmatprep.mubr.msk.bf16.mxu1 %vm1743_vm9, %v5551_v20 }
 0x152   : > { %4267 = vmatmul.mubr.msk.bf16.vlgmr.msra.gmra.mrb[36].mxu0 %vm1743_vm9, %v5453_v21  ;;  %v1205_v21 = vpop.permute.xlu0 %1204 }
 0x153   : > { %4270 = vmatprep.mubr.msk.bf16.mxu0 %vm1743_vm9, %v5493_v30  ;;  %v1186_v30 = vor.u32 %v6169_v32, %v1183_v18 }
 0x156   : > { %v1210_v20 = vpop.permute.xlu0 %1209 }
 0x158   : > { %4189 = vmatmul.mubr.msk.bf16.gmra.mrb[20].mxu1 %vm1743_vm9, %v5569_v61 }
 0x159   : > { %4192 = vmatprep.mubr.msk.bf16.mxu1 %vm1743_vm9, %v5583_v17  ;;  %v2882_v17 = vrot.slane %v2880_v31, 7  ;;  %v1212_v31 = vpop.permute.xlu1 %1211 }
 0x15a   : > { %4271 = vmatmul.mubr.msk.bf16.gmra.mrb[0].mxu0 %vm1743_vm9, %v5502_v36  ;;  %v1196_v36 = vsel %vm5241_vm6, 0, %v1186_v30 }
 0x15b   : > { %4274 = vmatprep.mubr.msk.bf16.mxu0 %vm1743_vm9, %v5525_v49  ;;  %v2836_v49 = vsel %vm806_vm4, %v2825_v2, %v2835_v56  ;;  %v1215_v58 = vsel %vm1076_vm7, %v1196_v36, %v1205_v21 }
 0x15c   : > { %v2860_v61 = vsel %vm1076_vm7, %v2836_v49, %v2849_v50  ;;  %v1220_v3 = vsel %vm1125_vm8, %v1215_v58, %v1210_v20 }
 0x15d   : > { %v2864_v29 = vsel %vm1125_vm8, %v2860_v61, %v2854_v47 }
 0x160   : > { %4193 = vmatmul.mubr.msk.bf16.gmra.mrb[24].mxu1 %vm1743_vm9, %v5601_v62  ;;  %v6171_v62 = vshrl.u32 %v5280_v15, 16  ;;  %v2889_v15 = vrot.slane %v2887_v57, 7 }
 0x161   : > { %4300 = vmatprep.mubr.msk.bf16.mxu1 %vm1743_vm9, %v2862_v10 }
 0x162   : > { %4275 = vmatmul.mubr.msk.bf16.gmra.mrb[4].mxu0 %vm1743_vm9, %v5534_v5  ;;  %v1190_v42 = vrot.slane %v6171_v62, 7  ;;  %v2904_v5 = vpop.permute.xlu0 %2903  ;;  %v2892_v60 = vor.u32 %v6175_v52, %v2889_v15 }
 0x163   : > { %4278 = vmatprep.mubr.msk.bf16.mxu0 %vm1743_vm9, %v5557_v9  ;;  %v6172_v9 = vshll.u32 %v5331_v45, 16 }
 0x164   : > { %v1193_v25 = vor.u32 %v6173_v24, %v1190_v42  ;;  %v2893_v26 = vsel %vm806_vm4, %v2882_v17, %v2892_v60 }
 0x165   : > { %v2885_v37 = vor.u32 %v6172_v9, %v2882_v17 }
 0x166   : > { %v1194_v23 = vsel %vm806_vm4, %v1183_v18, %v1193_v25  ;;  %v2909_v59 = vpop.permute.xlu0 %2908 }
 0x167   : > { %v2895_v45 = vsel %vm5241_vm6, 0, %v2885_v37 }
 0x168   : > { %4301 = vmatmul.mubr.msk.bf16.vlgmr.msra.gmra.mrb[36].mxu1 %vm1743_vm9, %v2864_v29 }
 0x169   : > { %4305 = vmatpush3.bf16.msra.mxu1 %v5290_v14  ;;  %4306 = vmatprep.mubr.msk.bf16.mxu1 %vm1743_vm9, %v1220_v3  ;;  %v1240_v14 = vrot.slane %v1238_v1, 7  ;;  %v2906_v1 = vpop.permute.xlu1 %2905 }
 0x16a   : > { %4279 = vmatmul.mubr.msk.bf16.gmra.mrb[8].mxu0 %vm1743_vm9, %v5566_v11  ;;  %4489 = vmatprep.subr.msk.bf16.mxu1 %vm1776_vm0, %v5295_v28  ;;  %v2914_v11 = vsel %vm1076_vm7, %v2895_v45, %v2904_v5  ;;  %v1218_v28 = vsel %vm1076_vm7, %v1194_v23, %v1207_v7  ;;  %v1262_v63 = vpop.permute.xlu0 %1261  ;;  %v2917_v43 = vsel %vm1076_vm7, %v2893_v26, %v2906_v1 }
 0x16b   : > { %4282 = vmatprep.mubr.msk.bf16.mxu0 %vm1743_vm9, %v5589_v4  ;;  %v1243_v4 = vor.u32 %v6174_v19, %v1240_v14  ;;  %v2919_v57 = vsel %vm1125_vm8, %v2914_v11, %v2909_v59  ;;  %v1222_v2 = vsel %vm1125_vm8, %v1218_v28, %v1212_v31 }
 0x16d   : > { %v1253_v54 = vsel %vm5241_vm6, 0, %v1243_v4 }
 0x16e   : > { %v1267_v40 = vpop.permute.xlu0 %1266 }
 0x172   : > { %4283 = vmatmul.mubr.msk.bf16.gmra.mrb[12].mxu0 %vm1743_vm9, %v5598_v48  ;;  %v1272_v48 = vsel %vm1076_vm7, %v1253_v54, %v1262_v63 }
 0x173   : > { %4286 = vmatprep.mubr.msk.bf16.mxu0 %vm1743_vm9, %v5616_v34  ;;  %v2911_v34 = vpop.permute.xlu1 %2910  ;;  %v1277_v55 = vsel %vm1125_vm8, %v1272_v48, %v1267_v40 }
 0x174   : > { %4307 = vmatmul.mubr.msk.bf16.vlgmr.msra.gmra.mrb[36].mxu1 %vm1743_vm9, %v1222_v2 }
 0x175   : > { %4311 = vmatpush3.bf16.msra.mxu1 %v5442_v13  ;;  %4312 = vmatprep.mubr.msk.bf16.mxu1 %vm1743_vm9, %v2919_v57  ;;  %v2921_v13 = vsel %vm1125_vm8, %v2917_v43, %v2911_v34 }
 0x176   : > { %4490 = vmatprep.subr.msk.bf16.mxu1 %vm1776_vm0, %v5448_v16  ;;  %v6177_v16 = vshll.u32 %v5392_v8, 16 }
 0x177   : > { %v1264_v22 = vpop.permute.xlu1 %1263 }
 0x178   : > { %v1250_v35 = vor.u32 %v6177_v16, %v1247_v41 }
 0x17a   : > { %4287 = vmatmul.mubr.msk.bf16.gmra.mrb[16].mxu0 %vm1743_vm9, %v5619_v33  ;;  %v1251_v18 = vsel %vm806_vm4, %v1240_v14, %v1250_v35 }
 0x17b   : > { %4290 = vmatprep.mubr.msk.bf16.mxu0 %vm1743_vm9, %v5641_v27  ;;  %v1275_v33 = vsel %vm1076_vm7, %v1251_v18, %v1264_v22  ;;  %v1269_v27 = vpop.permute.xlu1 %1268  ;;  %v5925_v22 = vld [vmem:[%s6147_s9] ss:$0 sm:$0xff] }
 0x17c   : > { %4313 = vmatmul.mubr.msk.bf16.vlgmr.msra.gmra.mrb[40].mxu1 %vm1743_vm9, %v2921_v13  ;;  %v1279_v6 = vsel %vm1125_vm8, %v1275_v33, %v1269_v27 }
 0x17d   : > { %4317 = vmatpush3.bf16.msra.mxu1 %v5680_v39  ;;  %4318 = vmatprep.mubr.msk.bf16.mxu1 %vm1743_vm9, %v1277_v55 }
 0x182   : > { %4291 = vmatmul.mubr.msk.bf16.gmra.mrb[20].mxu0 %vm1743_vm9, %v5644_v44 }
 0x183   : > { %4294 = vmatprep.mubr.msk.bf16.mxu0 %vm1743_vm9, %v5661_v38 }
 0x188   : > { %4319 = vmatmul.mubr.msk.bf16.vlgmr.msra.gmra.mrb[40].mxu1 %vm1743_vm9, %v1279_v6 }
 0x18a   : > { %4295 = vmatmul.mubr.msk.bf16.gmra.mrb[24].mxu0 %vm1743_vm9, %v5664_v51 }
 0x1c3   : > { %v4126_v8 = vpop.f32.mrb[28].mxu1 }
 0x1c4   : > { %v1926_v39 = vpop.f32.mrb[29].mxu1 }
 0x1c5   : > { %v4127_v12 = vpop.f32.mrb[30].mxu1 }
 0x1c6   : > { %v1928_v46 = vpop.f32.mrb[31].mxu1 }
 0x1cb   : > { %v4132_v21 = vpop.f32.mrb[0].mxu1 }
 0x1cc   : > { %v2011_v50 = vpop.f32.mrb[1].mxu1 }
 0x1cd   : > { %v4133_v44 = vpop.f32.mrb[2].mxu1 }
 0x1ce   : > { %v2014_v32 = vpop.f32.mrb[3].mxu1 }
 0x1dd   : > { %v4228_v30 = vpop.f32.mrb[28].mxu0 }
 0x1de   : > { %v2460_v38 = vpop.f32.mrb[29].mxu0 }
 0x1df   : > { %v4229_v53 = vpop.f32.mrb[30].mxu0 }
 0x1e0   : > { %v2463_v56 = vpop.f32.mrb[31].mxu0 }
 0x1e5   : > { %v4234_v10 = vpop.f32.mrb[32].mxu0 }
 0x1e6   : > { %v2520_v36 = vpop.f32.mrb[33].mxu0 }
 0x1e7   : > { %v4235_v49 = vpop.f32.mrb[34].mxu0 }
 0x1e8   : > { %v2522_v20 = vpop.f32.mrb[35].mxu0 }
 0x203   : > { %v4160_v47 = vpop.f32.mrb[32].mxu1 }
 0x204   : > { %v2123_v58 = vpop.f32.mrb[33].mxu1 }
 0x205   : > { %v4161_v61 = vpop.f32.mrb[34].mxu1 }
 0x206   : > { %v2125_v51 = vpop.f32.mrb[35].mxu1 }
 0x20b   : > { %v4174_v17 = vpop.f32.mrb[4].mxu1 }
 0x20c   : > { %v5865_v62 = vpop.f32.mrb[5].mxu1 }
 0x20d   : > { %v5867_v42 = vpop.f32.mrb[6].mxu1 }
 0x20e   : > { %v5869_v7 = vpop.f32.mrb[7].mxu1 }
 0x213   : > { %v5871_v3 = vpop.f32.mrb[8].mxu1 }
 0x214   : > { %v5873_v29 = vpop.f32.mrb[9].mxu1 }
 0x215   : > { %v5875_v5 = vpop.f32.mrb[10].mxu1 }
 0x216   : > { %v5877_v9 = vpop.f32.mrb[11].mxu1 }
 0x21b   : > { %v5879_v37 = vpop.f32.mrb[12].mxu1 }
 0x21c   : > { %v5881_v24 = vpop.f32.mrb[13].mxu1 }
 0x21d   : > { %v5883_v25 = vpop.f32.mrb[14].mxu1 }
 0x21e   : > { %v5885_v31 = vpop.f32.mrb[15].mxu1 }
 0x223   : > { %v5887_v45 = vpop.f32.mrb[16].mxu1 }
 0x224   : > { %v5889_v14 = vpop.f32.mrb[17].mxu1 }
 0x225   : > { %v4268_v15 = vpop.f32.mrb[36].mxu0  ;;  %v5891_v23 = vpop.f32.mrb[18].mxu1 }
 0x226   : > { %v2685_v59 = vpop.f32.mrb[37].mxu0  ;;  %v5893_v11 = vpop.f32.mrb[19].mxu1 }
 0x227   : > { %v4269_v28 = vpop.f32.mrb[38].mxu0 }
 0x228   : > { %v2687_v19 = vpop.f32.mrb[39].mxu0 }
 0x22b   : > { %v5895_v4 = vpop.f32.mrb[20].mxu1 }
 0x22c   : > { %v5897_v52 = vpop.f32.mrb[21].mxu1 }
 0x22d   : > { %v5899_v60 = vpop.f32.mrb[0].mxu0  ;;  %v5901_v63 = vpop.f32.mrb[22].mxu1 }
 0x22e   : > { %v5903_v1 = vpop.f32.mrb[1].mxu0  ;;  %v5905_v57 = vpop.f32.mrb[23].mxu1 }
 0x22f   : > { %v5907_v2 = vpop.f32.mrb[2].mxu0 }
 0x230   : > { %v5909_v54 = vpop.f32.mrb[3].mxu0 }
 0x233   : > { %v4194_v26 = vpop.f32.mrb[24].mxu1 }
 0x234   : > { %v5911_v48 = vadd.f32 %v4228_v30, %v4194_v26  ;;  %v2291_v40 = vpop.f32.mrb[25].mxu1 }
 0x235   : > { %v5913_v43 = vadd.f32 %v2460_v38, %v2291_v40  ;;  %v4276_v34 = vpop.f32.mrb[4].mxu0  ;;  %v4195_v41 = vpop.f32.mrb[26].mxu1 }
 0x236   : > { %v4324_v55 = vadd.f32 %v4276_v34, %v4132_v21  ;;  %v5920_v13 = vadd.f32 %v4229_v53, %v4195_v41  ;;  %v2713_v16 = vpop.f32.mrb[5].mxu0  ;;  %v2294_v35 = vpop.f32.mrb[27].mxu1 }
 0x237   : > { %v4325_v18 = vadd.f32 %v2713_v16, %v2011_v50  ;;  %v5927_v33 = vadd.f32 %v2463_v56, %v2294_v35  ;;  %v4277_v27 = vpop.f32.mrb[6].mxu0 }
 0x238   : > { %v3225_v6 = vmul.f32 %v4324_v55, %v5918_v0  ;;  %v4326_v8 = vadd.f32 %v4277_v27, %v4133_v44  ;;  %v2716_v39 = vpop.f32.mrb[7].mxu0  ;;  %v3135_v55 = vstv %s3134_s27 }
 0x239   : > { %v3223_v12 = vmul.f32 %v4325_v18, %v5918_v0  ;;  %v4327_v46 = vadd.f32 %v2716_v39, %v2014_v32  ;;  %vm5965_vm11 = vcmp.eq.s32.totalorder %v3135_v55, 1 }
 0x23a   : > { %v3264_v21 = vadd.f32 %v5925_v22, %v3225_v6  ;;  %v3226_v30 = vmul.f32 %v4326_v8, %v5918_v0 }
 0x23b   : > { %v3262_v38 = vadd.f32 %v5925_v22, %v3223_v12  ;;  %v3224_v50 = vmul.f32 %v4327_v46, %v5918_v0 }
 0x23c   : > { %v3296_v53 = vmax.f32 %v3264_v21, 0.0  ;;  %v3265_v56 = vadd.f32 %v5925_v22, %v3226_v30 }
 0x23d   : > { %v3294_v44 = vmax.f32 %v3262_v38, 0.0  ;;  %v3263_v32 = vadd.f32 %v5925_v22, %v3224_v50  ;;  %v4280_v10 = vpop.f32.mrb[8].mxu0 }
 0x23e   : > { %v3954_v36 = vpack.c.bf16 %v3296_v53, %v3296_v53  ;;  %v3297_v49 = vmax.f32 %v3265_v56, 0.0  ;;  %v4328_v20 = vadd.f32 %v4280_v10, %v4174_v17  ;;  %v2729_v47 = vpop.f32.mrb[9].mxu0 }
 0x23f   : > { %v3952_v58 = vpack.c.bf16 %v3294_v44, %v3294_v44  ;;  %v3295_v61 = vmax.f32 %v3263_v32, 0.0  ;;  %v4329_v51 = vadd.f32 %v2729_v47, %v5865_v62  ;;  %v4281_v15 = vpop.f32.mrb[10].mxu0 }
 0x240   : > { %3457 = vst.msk [vmem:[%s5941_s20 + $0x18] sm:$0xf] %vm3450_vm10, %v3954_v36  ;;  %v3955_v59 = vpack.c.bf16 %v3297_v49, %v3297_v49  ;;  %v3229_v28 = vmul.f32 %v4328_v20, %v5918_v0  ;;  %v4330_v19 = vadd.f32 %v4281_v15, %v5867_v42  ;;  %v2732_v26 = vpop.f32.mrb[11].mxu0 }
 0x241   : > { %3455 = vst.msk [vmem:[%s5941_s20 + $0x10] sm:$0xf] %vm3450_vm10, %v3952_v58  ;;  %v3953_v17 = vpack.c.bf16 %v3295_v61, %v3295_v61  ;;  %v3227_v40 = vmul.f32 %v4329_v51, %v5918_v0  ;;  %v4331_v34 = vadd.f32 %v2732_v26, %v5869_v7 }
 0x242   : > { %3458 = vst.msk [vmem:[%s5941_s20 + $0x1c] sm:$0xf] %vm3450_vm10, %v3955_v59  ;;  %v3268_v62 = vadd.f32 %v5925_v22, %v3229_v28  ;;  %v3230_v41 = vmul.f32 %v4330_v19, %v5918_v0 }
 0x243   : > { %3456 = vst.msk [vmem:[%s5941_s20 + $0x14] sm:$0xf] %vm3450_vm10, %v3953_v17  ;;  %v3266_v16 = vadd.f32 %v5925_v22, %v3227_v40  ;;  %v3228_v42 = vmul.f32 %v4331_v34, %v5918_v0 }
 0x244   : > { %v3300_v35 = vmax.f32 %v3268_v62, 0.0  ;;  %v3269_v18 = vadd.f32 %v5925_v22, %v3230_v41 }
 0x245   : > { %v3298_v27 = vmax.f32 %v3266_v16, 0.0  ;;  %v3267_v7 = vadd.f32 %v5925_v22, %v3228_v42  ;;  %v4284_v6 = vpop.f32.mrb[12].mxu0 }
 0x246   : > { %v3958_v39 = vpack.c.bf16 %v3300_v35, %v3300_v35  ;;  %v3301_v12 = vmax.f32 %v3269_v18, 0.0  ;;  %v4332_v46 = vadd.f32 %v4284_v6, %v5871_v3  ;;  %v2745_v21 = vpop.f32.mrb[13].mxu0 }
 0x247   : > { %v3956_v30 = vpack.c.bf16 %v3298_v27, %v3298_v27  ;;  %v3299_v38 = vmax.f32 %v3267_v7, 0.0  ;;  %v4333_v50 = vadd.f32 %v2745_v21, %v5873_v29  ;;  %v4285_v53 = vpop.f32.mrb[14].mxu0  ;;  %v4308_v56 = vpop.f32.mrb[36].mxu1 }
 0x248   : > { %3461 = vst.msk [vmem:[%s5941_s20 + $0x28] sm:$0xf] %vm3450_vm10, %v3958_v39  ;;  %v3959_v44 = vpack.c.bf16 %v3301_v12, %v3301_v12  ;;  %v3233_v32 = vmul.f32 %v4332_v46, %v5918_v0  ;;  %v4334_v10 = vadd.f32 %v4285_v53, %v5875_v5  ;;  %v2748_v36 = vpop.f32.mrb[15].mxu0  ;;  %v3139_v3 = vsel %vm5965_vm11, %v4308_v56, 0.0  ;;  %v3013_v49 = vpop.f32.mrb[37].mxu1 }
 0x249   : > { %3459 = vst.msk [vmem:[%s5941_s20 + $0x20] sm:$0xf] %vm3450_vm10, %v3956_v30  ;;  %v3957_v20 = vpack.c.bf16 %v3299_v38, %v3299_v38  ;;  %v3231_v29 = vmul.f32 %v4333_v50, %v5918_v0  ;;  %v4335_v47 = vadd.f32 %v2748_v36, %v5877_v9  ;;  %v4352_v58 = vadd.f32 %v5899_v60, %v3139_v3  ;;  %v4309_v61 = vpop.f32.mrb[38].mxu1 }
 0x24a   : > { %3462 = vst.msk [vmem:[%s5941_s20 + $0x2c] sm:$0xf] %vm3450_vm10, %v3959_v44  ;;  %v3272_v5 = vadd.f32 %v5925_v22, %v3233_v32  ;;  %v3234_v51 = vmul.f32 %v4334_v10, %v5918_v0  ;;  %v3137_v15 = vsel %vm5965_vm11, %v3013_v49, 0.0  ;;  %v3140_v59 = vsel %vm5965_vm11, %v4309_v61, 0.0  ;;  %v3016_v28 = vpop.f32.mrb[39].mxu1 }
 0x24b   : > { %3460 = vst.msk [vmem:[%s5941_s20 + $0x24] sm:$0xf] %vm3450_vm10, %v3957_v20  ;;  %v3270_v9 = vadd.f32 %v5925_v22, %v3231_v29  ;;  %v3232_v60 = vmul.f32 %v4335_v47, %v5918_v0  ;;  %v3221_v19 = vmul.f32 %v4352_v58, %v5918_v0  ;;  %v4353_v26 = vadd.f32 %v3137_v15, %v5903_v1 }
 0x24c   : > { %v3304_v17 = vmax.f32 %v3272_v5, 0.0  ;;  %v3273_v40 = vadd.f32 %v5925_v22, %v3234_v51  ;;  %v4354_v34 = vadd.f32 %v5907_v2, %v3140_v59  ;;  %v3138_v62 = vsel %vm5965_vm11, %v3016_v28, 0.0 }
 0x24d   : > { %v3302_v41 = vmax.f32 %v3270_v9, 0.0  ;;  %v3271_v55 = vadd.f32 %v5925_v22, %v3232_v60  ;;  %v3260_v16 = vadd.f32 %v5925_v22, %v3221_v19  ;;  %v3219_v42 = vmul.f32 %v4353_v26, %v5918_v0  ;;  %v4288_v35 = vpop.f32.mrb[16].mxu0 }
 0x24e   : > { %v3962_v1 = vpack.c.bf16 %v3304_v17, %v3304_v17  ;;  %v3305_v18 = vmax.f32 %v3273_v40, 0.0  ;;  %v3222_v27 = vmul.f32 %v4354_v34, %v5918_v0  ;;  %v4355_v2 = vadd.f32 %v3138_v62, %v5909_v54  ;;  %v2761_v7 = vpop.f32.mrb[17].mxu0 }
 0x24f   : > { %v3960_v6 = vpack.c.bf16 %v3302_v41, %v3302_v41  ;;  %v3303_v8 = vmax.f32 %v3271_v55, 0.0  ;;  %v3292_v39 = vmax.f32 %v3260_v16, 0.0  ;;  %v3258_v12 = vadd.f32 %v5925_v22, %v3219_v42  ;;  %v4289_v46 = vpop.f32.mrb[18].mxu0 }
 0x250   : > { %3465 = vst.msk [vmem:[%s5941_s20 + $0x38] sm:$0xf] %vm3450_vm10, %v3962_v1  ;;  %v3963_v21 = vpack.c.bf16 %v3305_v18, %v3305_v18  ;;  %v3261_v30 = vadd.f32 %v5925_v22, %v3222_v27  ;;  %v3220_v54 = vmul.f32 %v4355_v2, %v5918_v0  ;;  %v4336_v38 = vadd.f32 %v4288_v35, %v5879_v37  ;;  %v2764_v50 = vpop.f32.mrb[19].mxu0 }
 0x251   : > { %3463 = vst.msk [vmem:[%s5941_s20 + $0x30] sm:$0xf] %vm3450_vm10, %v3960_v6  ;;  %v3961_v53 = vpack.c.bf16 %v3303_v8, %v3303_v8  ;;  %v3950_v56 = vpack.c.bf16 %v3292_v39, %v3292_v39  ;;  %v3290_v44 = vmax.f32 %v3258_v12, 0.0  ;;  %v4337_v32 = vadd.f32 %v2761_v7, %v5881_v24 }
 0x252   : > { %3466 = vst.msk [vmem:[%s5941_s20 + $0x3c] sm:$0xf] %vm3450_vm10, %v3963_v21  ;;  %v3293_v10 = vmax.f32 %v3261_v30, 0.0  ;;  %v3259_v36 = vadd.f32 %v5925_v22, %v3220_v54  ;;  %v3237_v3 = vmul.f32 %v4336_v38, %v5918_v0  ;;  %v4338_v37 = vadd.f32 %v4289_v46, %v5883_v25 }
 0x253   : > { %3464 = vst.msk [vmem:[%s5941_s20 + $0x34] sm:$0xf] %vm3450_vm10, %v3961_v53  ;;  %3453 = vst.msk [vmem:[%s5941_s20 + $0x8] sm:$0xf] %vm3450_vm10, %v3950_v56  ;;  %v3948_v49 = vpack.c.bf16 %v3290_v44, %v3290_v44  ;;  %v3235_v20 = vmul.f32 %v4337_v32, %v5918_v0  ;;  %v4339_v24 = vadd.f32 %v2764_v50, %v5885_v31  ;;  %v3142_v29 = vstv %s6009_s29 }
 0x254   : > { %v3951_v47 = vpack.c.bf16 %v3293_v10, %v3293_v10  ;;  %v3291_v58 = vmax.f32 %v3259_v36, 0.0  ;;  %v3276_v61 = vadd.f32 %v5925_v22, %v3237_v3  ;;  %v3238_v5 = vmul.f32 %v4338_v37, %v5918_v0 }
 0x255   : > { %3451 = vst.msk [vmem:[%s5941_s20] sm:$0xf] %vm3450_vm10, %v3948_v49  ;;  %v3274_v25 = vadd.f32 %v5925_v22, %v3235_v20  ;;  %v3236_v51 = vmul.f32 %v4339_v24, %v5918_v0  ;;  %v4292_v15 = vpop.f32.mrb[20].mxu0  ;;  %vm6043_vm12 = vcmp.eq.s32.totalorder %v3142_v29, 1 }
 0x256   : > { %3454 = vst.msk [vmem:[%s5941_s20 + $0xc] sm:$0xf] %vm3450_vm10, %v3951_v47  ;;  %v3949_v59 = vpack.c.bf16 %v3291_v58, %v3291_v58  ;;  %v3308_v28 = vmax.f32 %v3276_v61, 0.0  ;;  %v3277_v31 = vadd.f32 %v5925_v22, %v3238_v5  ;;  %v4340_v9 = vadd.f32 %v4292_v15, %v5887_v45  ;;  %v2777_v60 = vpop.f32.mrb[21].mxu0 }
 0x257   : > { %v3306_v19 = vmax.f32 %v3274_v25, 0.0  ;;  %v3275_v26 = vadd.f32 %v5925_v22, %v3236_v51  ;;  %v4341_v17 = vadd.f32 %v2777_v60, %v5889_v14  ;;  %v4293_v40 = vpop.f32.mrb[22].mxu0 }
 0x258   : > { %3452 = vst.msk [vmem:[%s5941_s20 + $0x4] sm:$0xf] %vm3450_vm10, %v3949_v59  ;;  %v3966_v62 = vpack.c.bf16 %v3308_v28, %v3308_v28  ;;  %v3309_v41 = vmax.f32 %v3277_v31, 0.0  ;;  %v3241_v55 = vmul.f32 %v4340_v9, %v5918_v0  ;;  %v4342_v45 = vadd.f32 %v4293_v40, %v5891_v23  ;;  %v2780_v16 = vpop.f32.mrb[23].mxu0 }
 0x259   : > { %v3964_v42 = vpack.c.bf16 %v3306_v19, %v3306_v19  ;;  %v3307_v35 = vmax.f32 %v3275_v26, 0.0  ;;  %v3239_v14 = vmul.f32 %v4341_v17, %v5918_v0  ;;  %v4343_v1 = vadd.f32 %v2780_v16, %v5893_v11 }
 0x25a   : > { %3469 = vst.msk [vmem:[%s5941_s20 + $0x48] sm:$0xf] %vm3450_vm10, %v3966_v62  ;;  %v3967_v18 = vpack.c.bf16 %v3309_v41, %v3309_v41  ;;  %v3280_v27 = vadd.f32 %v5925_v22, %v3241_v55  ;;  %v3242_v2 = vmul.f32 %v4342_v45, %v5918_v0 }
 0x25b   : > { %3467 = vst.msk [vmem:[%s5941_s20 + $0x40] sm:$0xf] %vm3450_vm10, %v3964_v42  ;;  %v3965_v7 = vpack.c.bf16 %v3307_v35, %v3307_v35  ;;  %v3278_v23 = vadd.f32 %v5925_v22, %v3239_v14  ;;  %v3240_v6 = vmul.f32 %v4343_v1, %v5918_v0  ;;  %v4320_v8 = vpop.f32.mrb[40].mxu1 }
 0x25c   : > { %3470 = vst.msk [vmem:[%s5941_s20 + $0x4c] sm:$0xf] %vm3450_vm10, %v3967_v18  ;;  %v3312_v39 = vmax.f32 %v3280_v27, 0.0  ;;  %v3281_v11 = vadd.f32 %v5925_v22, %v3242_v2  ;;  %v3146_v12 = vsel %vm6043_vm12, %v4320_v8, 0.0  ;;  %v3119_v46 = vpop.f32.mrb[41].mxu1 }
 0x25d   : > { %3468 = vst.msk [vmem:[%s5941_s20 + $0x44] sm:$0xf] %vm3450_vm10, %v3965_v7  ;;  %v3310_v21 = vmax.f32 %v3278_v23, 0.0  ;;  %v3279_v30 = vadd.f32 %v5925_v22, %v3240_v6  ;;  %v3210_v54 = vadd.f32 %v3146_v12, %v5911_v48  ;;  %v4296_v38 = vpop.f32.mrb[24].mxu0  ;;  %v3144_v50 = vsel %vm6043_vm12, %v3119_v46, 0.0  ;;  %v4321_v53 = vpop.f32.mrb[42].mxu1 }
 0x25e   : > { %v3970_v56 = vpack.c.bf16 %v3312_v39, %v3312_v39  ;;  %v3313_v44 = vmax.f32 %v3281_v11, 0.0  ;;  %v4344_v32 = vadd.f32 %v4296_v38, %v5895_v4  ;;  %v3208_v10 = vadd.f32 %v3144_v50, %v5913_v43  ;;  %v2793_v36 = vpop.f32.mrb[25].mxu0  ;;  %v3122_v3 = vpop.f32.mrb[43].mxu1 }
 0x25f   : > { %v3968_v37 = vpack.c.bf16 %v3310_v21, %v3310_v21  ;;  %v3311_v49 = vmax.f32 %v3279_v30, 0.0  ;;  %v3249_v20 = vmul.f32 %v5918_v0, %v3210_v54  ;;  %v4345_v48 = vadd.f32 %v2793_v36, %v5897_v52  ;;  %v4297_v24 = vpop.f32.mrb[26].mxu0 }
 0x260   : > { %3473 = vst.msk [vmem:[%s5941_s20 + $0x58] sm:$0xf] %vm3450_vm10, %v3970_v56  ;;  %v3971_v29 = vpack.c.bf16 %v3313_v44, %v3313_v44  ;;  %v3245_v47 = vmul.f32 %v4344_v32, %v5918_v0  ;;  %v3247_v4 = vmul.f32 %v5918_v0, %v3208_v10  ;;  %v3147_v43 = vsel %vm6043_vm12, %v4321_v53, 0.0  ;;  %v2796_v58 = vpop.f32.mrb[27].mxu0 }
 0x261   : > { %3471 = vst.msk [vmem:[%s5941_s20 + $0x50] sm:$0xf] %vm3450_vm10, %v3968_v37  ;;  %v3969_v61 = vpack.c.bf16 %v3311_v49, %v3311_v49  ;;  %v3288_v5 = vadd.f32 %v5925_v22, %v3249_v20  ;;  %v3243_v52 = vmul.f32 %v4345_v48, %v5918_v0  ;;  %v3211_v25 = vadd.f32 %v3147_v43, %v5920_v13 }
 0x262   : > { %3474 = vst.msk [vmem:[%s5941_s20 + $0x5c] sm:$0xf] %vm3450_vm10, %v3971_v29  ;;  %v3284_v51 = vadd.f32 %v5925_v22, %v3245_v47  ;;  %v3286_v15 = vadd.f32 %v5925_v22, %v3247_v4  ;;  %v4346_v59 = vadd.f32 %v4297_v24, %v5901_v63  ;;  %v3145_v28 = vsel %vm6043_vm12, %v3122_v3, 0.0 }
 0x263   : > { %3472 = vst.msk [vmem:[%s5941_s20 + $0x54] sm:$0xf] %vm3450_vm10, %v3969_v61  ;;  %v3320_v31 = vmax.f32 %v3288_v5, 0.0  ;;  %v3282_v9 = vadd.f32 %v5925_v22, %v3243_v52  ;;  %v3250_v60 = vmul.f32 %v5918_v0, %v3211_v25  ;;  %v3209_v13 = vadd.f32 %v3145_v28, %v5927_v33 }
 0x264   : > { %v3316_v19 = vmax.f32 %v3284_v51, 0.0  ;;  %v3318_v26 = vmax.f32 %v3286_v15, 0.0  ;;  %v3246_v17 = vmul.f32 %v4346_v59, %v5918_v0  ;;  %v4347_v63 = vadd.f32 %v2796_v58, %v5905_v57 }
 0x265   : > { %v3978_v40 = vpack.c.bf16 %v3320_v31, %v3320_v31  ;;  %v3314_v34 = vmax.f32 %v3282_v9, 0.0  ;;  %v3289_v62 = vadd.f32 %v5925_v22, %v3250_v60  ;;  %v3248_v41 = vmul.f32 %v5918_v0, %v3209_v13 }
 0x266   : > { %v3974_v55 = vpack.c.bf16 %v3316_v19, %v3316_v19  ;;  %v3976_v45 = vpack.c.bf16 %v3318_v26, %v3318_v26  ;;  %v3285_v33 = vadd.f32 %v5925_v22, %v3246_v17  ;;  %v3244_v16 = vmul.f32 %v4347_v63, %v5918_v0 }
 0x267   : > { %3481 = vst.msk [vmem:[%s5941_s20 + $0x78] sm:$0xf] %vm3450_vm10, %v3978_v40  ;;  %v3972_v42 = vpack.c.bf16 %v3314_v34, %v3314_v34  ;;  %v3321_v57 = vmax.f32 %v3289_v62, 0.0  ;;  %v3287_v35 = vadd.f32 %v5925_v22, %v3248_v41 }
 0x268   : > { %3477 = vst.msk [vmem:[%s5941_s20 + $0x68] sm:$0xf] %vm3450_vm10, %v3974_v55  ;;  %3479 = vst.msk [vmem:[%s5941_s20 + $0x70] sm:$0xf] %vm3450_vm10, %v3976_v45  ;;  %v3317_v14 = vmax.f32 %v3285_v33, 0.0  ;;  %v3283_v1 = vadd.f32 %v5925_v22, %v3244_v16 }
 0x269   : > { %3475 = vst.msk [vmem:[%s5941_s20 + $0x60] sm:$0xf] %vm3450_vm10, %v3972_v42  ;;  %v3979_v18 = vpack.c.bf16 %v3321_v57, %v3321_v57  ;;  %v3319_v0 = vmax.f32 %v3287_v35, 0.0 }
 0x26a   : > { %v3975_v27 = vpack.c.bf16 %v3317_v14, %v3317_v14  ;;  %v3315_v2 = vmax.f32 %v3283_v1, 0.0 }
 0x26b   : > { %3482 = vst.msk [vmem:[%s5941_s20 + $0x7c] sm:$0xf] %vm3450_vm10, %v3979_v18  ;;  %v3977_v7 = vpack.c.bf16 %v3319_v0, %v3319_v0 }
 0x26c   : > { %3478 = vst.msk [vmem:[%s5941_s20 + $0x6c] sm:$0xf] %vm3450_vm10, %v3975_v27  ;;  %v3973_v23 = vpack.c.bf16 %v3315_v2, %v3315_v2 }
 0x26d   : > { %3480 = vst.msk [vmem:[%s5941_s20 + $0x74] sm:$0xf] %vm3450_vm10, %v3977_v7 }
 0x26e   : > { %3476 = vst.msk [vmem:[%s5941_s20 + $0x64] sm:$0xf] %vm3450_vm10, %v3973_v23 }
 0x26f PF: > { %s20_s17 = sadd.s32 1, %s4619_s17   ;;  %s6182_s13 = smov %s4611_s15 }
 0x270   : > { %p17_p12 = scmp.ge.s32.totalorder %s20_s17, 10   ;;  %s6183_s14 = smov %s4615_s16 }
 0x271   : > { %s6184_s15 = smov %s6187_s18  ;;  %s6185_s16 = smov %s6191_s19 }
 0x272   :  { %19 = sbr.rel (!%p17_p12) target bundleno = 3 (0x3), region = 109 }

// kernel: _lambda_.7
= control target key start
LH: loop header
LB: loop body
LE: loop exit
PB: predicated region body
PF: predicated region fallthrough
CT: control target
= control target key end

     0   :  { %s2519_s21 = smov 0   ;;  %s2521_s22 = smov 0   ;;  %s3276_s0 = inlined_call_operand.vmem [shape: bf16[2,32,32,8], index: 0, kind: input, shape index: {}, may-alias: {0,1,2}]   ;;  %s3277_s1 = inlined_call_operand.vmem [shape: bf16[2,32,32,8], index: 1, kind: input, shape index: {}, may-alias: {0,1,2}]   ;;  %s3278_s2 = inlined_call_operand.vmem [shape: bf16[2,32,32,8], index: 2, kind: input, shape index: {}, may-alias: {0,1,2}]   ;;  %s3279_s3 = inlined_call_operand.vmem [shape: bf16[3,24,8], index: 3, kind: input, shape index: {}]   ;;  %s3280_s4 = inlined_call_operand.vmem [shape: f32[1,8], index: 4, kind: input, shape index: {}]   ;;  %s3281_s5 = inlined_call_operand.vmem [shape: f32[1,8], index: 5, kind: input, shape index: {}]   ;;  %s3282_s6 = inlined_call_operand.vmem [shape: f32[2,32,32,8], index: 6, kind: output, shape index: {}]  }
   0x1   :  { %s2523_s23 = smov 0   ;;  %s2525_s24 = smov 0  }
   0x2   :  { %s2527_s25 = smov 0  }
   0x3 LB: > { %s25_s26 = sadd.s32 1, %s2472_s23  ;;  %s28_s27 = sadd.s32 1, %s2476_s24  ;;  %s2480_s25 = sphi %s2527_s25, %s16_s25   ;;  %s2476_s24 = sphi %s2525_s24, %s3295_s24   ;;  %s2472_s23 = sphi %s2523_s23, %s3294_s23   ;;  %s2468_s22 = sphi %s2521_s22, %s3293_s22   ;;  %s2464_s21 = sphi %s2519_s21, %s3292_s21  }
   0x4   : > { %p26_p0 = scmp.ge.s32.totalorder %s25_s26, 4  ;;  %p2002_p1 = scmp.ge.s32.totalorder %s2480_s25, 1 }
   0x5   : > { %p298_p2 = scmp.lt.s32.totalorder %s2480_s25, 9 }
   0x6   : > { %s3297_s26 = smov (%p26_p0, %s25_s26), 0  ;;  %s3299_s27 = smov (!%p26_p0, %s28_s27), %s2476_s24 }
   0x7   : > { %p299_p3 = pnand %p2002_p1, %p298_p2  ;;  %p30_p4 = scmp.ge.s32.totalorder %s3299_s27, 2 }
   0x8   : > { %s2552_s28 = sshll.u32 (!%p299_p3), %s2464_s21, 3  ;;  %p365_p5 = scmp.lt.s32.totalorder (!%p299_p3), %s2468_s22, 1  ;;  %v2558_v0 = vld [vmem:[%s3279_s3 + $0x18] sm:$0xff] (!%p299_p3)   ;;  %v2565_v1 = vld [vmem:[%s3279_s3] sm:$0xff] (!%p299_p3)   ;;  %vm932_vm0 = vcmask (!%p299_p3), 1043456   ;;  %vm723_vm2 = vcmask (!%p299_p3), 1047552  }
   0x9   : > { %s3301_s27 = smov (%p30_p4, %s3299_s27), 0  ;;  %302 = sbr.rel (%p299_p3) target bundleno = 473 (0x1d9), region = 44 }
   0xa   : > { %p367_p6 = scmp.lt.s32.totalorder (!%p299_p3), %s2552_s28, 31  ;;  %2216 = vmatprep.subr.bf16.mxu0 (!%p299_p3), %v2558_v0  ;;  %2180 = vmatprep.subr.bf16.mxu1 (!%p299_p3), %v2565_v1  ;;  %v2574_v2 = vld [vmem:[%s3279_s3 + $0x20] ss:$0 sps:$4 sm:$0xff] (!%p299_p3)   ;;  %v2583_v3 = vld [vmem:[%s3279_s3 + $0x8] ss:$0 sps:$4 sm:$0xff] (!%p299_p3)   ;;  %s2483_s29 = smov (!%p299_p3), 16  }
   0xb   : > { %2217 = vmatpush3.bf16.msra.mxu0 (!%p299_p3), %v2558_v0  ;;  %2181 = vmatpush3.bf16.msra.mxu1 (!%p299_p3), %v2565_v1  ;;  %v2590_v4 = vsel (!%p299_p3), %vm932_vm0, %v2574_v2, 0  ;;  %vm674_vm1 = vsmask.f32 (!%p299_p3), 7424  ;;  %v2602_v5 = vsel (!%p299_p3), %vm932_vm0, %v2583_v3, 0  ;;  %s2643_s30 = sadd.s32 (!%p299_p3), 4294967295, %s2552_s28  ;;  %s393_s8 = sadd.s32 (!%p299_p3), 8, %s2552_s28 }
   0xc   : > { %2369 = vmatprep.subr.msk.bf16.mxu0 (!%p299_p3), %vm932_vm0, %v2574_v2  ;;  %2368 = vmatprep.subr.msk.bf16.mxu1 (!%p299_p3), %vm932_vm0, %v2583_v3  ;;  %vm2631_vm3 = vmand (!%p299_p3), %vm723_vm2, %vm674_vm1  ;;  %p377_p7 = scmp.gt.s32.totalorder (!%p299_p3), %s2643_s30, 0  ;;  %p2009_p8 = scmp.lt.s32.totalorder (!%p299_p3), %s2643_s30, 31  ;;  %v2692_v61 = vld [vmem:[%s3279_s3 + $0xc] sm:$0xff] (!%p299_p3)   ;;  %vm535_vm4 = vsmask.f32 (!%p299_p3), 256  ;;  %vm664_vm5 = vcmask (!%p299_p3), 1040384  }
   0xd   : > { %p2705_p9 = scmp.lt.s32.totalorder (!%p299_p3), %s393_s8, 31  ;;  %vm2849_vm6 = vmand (!%p299_p3), %vm664_vm5, %vm535_vm4  ;;  %vm805_vm7 = vcmask (!%p299_p3), 64512   ;;  %vm854_vm8 = vcmask (!%p299_p3), 130048   ;;  %vm899_vm9 = vcmask (!%p299_p3), 195584   ;;  %p421_p10 = scmp.gt.s32.totalorder (!%p299_p3), %s2464_s21, 0 }
   0xe   : > { %p422_p11 = scmp.lt.s32.totalorder (!%p299_p3), %s2464_s21, 3 }
   0xf   : > { %2219 = vmatpush3.bf16.msra.mxu0 (!%p299_p3), %v2590_v4  ;;  %2183 = vmatpush3.bf16.msra.mxu1 (!%p299_p3), %v2602_v5 }
  0x10   : > { %s3303_s22 = smov (!%p365_p5, %s2468_s22), 1  ;;  %2304 = vmatprep.subr.bf16.mxu1 %v2558_v0  ;;  %2268 = vmatprep.subr.bf16.mxu0 %v2692_v61  ;;  %s3307_s8 = smov (!%p2705_p9, %s393_s8), 31 }
  0x11   : > { %s368_s7 = scalar_select %p367_p6, %s2552_s28, 31 }
  0x12   : > { %s2567_s10 = sshll.u32 %s3303_s22, 7  ;;  %s2482_s22 = smov 8  }
  0x13   : > { %s2004_s11 = sshll.u32 %s368_s7, 2  ;;  %s3309_s8 = smov (!%p2705_p9, %s3307_s8), 31 }
  0x14   : > { %s2577_s14 = sadd.s32 %s2567_s10, %s2004_s11  ;;  %s2021_s28 = sshll.u32 %s3309_s8, 2 }
  0x15   : > { %s2006_s17 = sshll.u32 %s2577_s14, 2  ;;  %s2027_s15 = sshll.u32 %s2577_s14, 3 }
  0x16   : > { %s2595_s20 = scalar_lea.vmem %s3276_s0, %s2006_s17  ;;  %s3095_s18 = scalar_lea.vmem %s3282_s6, %s2027_s15 }
  0x17   : > { %v2605_v6 = vld [vmem:[%s2595_s20] sm:$0xff]   ;;  %v2417_v7 = vld [vmem:[%s2595_s20 + $0x8] sm:$0xff]   ;;  %v2615_v11 = vld [vmem:[%s2595_s20 + $0x10] sm:$0xff]   ;;  %s378_s7 = scalar_select %p377_p7, %s2643_s30, 0 }
  0x18   : > { %733 = vrot.lane.b32.xlu0 %v2605_v6, %s2482_s22  ;;  %v540_v8 = vshll.u32 %v2605_v6, 16  ;;  %v537_v9 = vshrl.u32 %v2605_v6, 16  ;;  %v547_v10 = vshll.u32 %v2417_v7, 16  ;;  %v544_v12 = vshrl.u32 %v2417_v7, 16  ;;  %v2419_v13 = vld [vmem:[%s2595_s20 + $0x18] sm:$0xff]   ;;  %v2621_v15 = vld [vmem:[%s2595_s20 + $0x20] sm:$0xff]   ;;  %s402_s30 = sadd.s32 %s2021_s28, %s2567_s10 }
  0x19   : > { %v555_v17 = vshll.u32 %v2615_v11, 16  ;;  %v552_v19 = vshrl.u32 %v2615_v11, 16  ;;  %v562_v21 = vshll.u32 %v2419_v13, 16  ;;  %v2421_v22 = vld [vmem:[%s2595_s20 + $0x28] sm:$0xff]   ;;  %v570_v26 = vshll.u32 %v2621_v15, 16  ;;  %v2654_v37 = vld [vmem:[%s2595_s20 + $0x30] sm:$0xff]  }
  0x1a   : > { %v675_v14 = vrot.slane %v540_v8, 1  ;;  %v677_v16 = vrot.slane %v547_v10, 1  ;;  %v546_v18 = vrot.slane %v544_v12, 7  ;;  %v559_v32 = vshrl.u32 %v2419_v13, 16  ;;  %v2661_v44 = vld [vmem:[%s2595_s20 + $0x38] sm:$0xff]   ;;  %v2672_v48 = vld [vmem:[%s2595_s20 + $0x40] sm:$0xff]  }
  0x1b   : > { %v680_v25 = vrot.slane %v555_v17, 1  ;;  %v682_v29 = vrot.slane %v562_v21, 1  ;;  %v567_v33 = vshrl.u32 %v2621_v15, 16  ;;  %v577_v34 = vshll.u32 %v2421_v22, 16  ;;  %v2680_v55 = vld [vmem:[%s2595_s20 + $0x48] sm:$0xff]   ;;  %s3305_s7 = smov (!%p2009_p8, %s378_s7), 31 }
  0x1c   : > { %735 = vrot.lane.b32.xlu0 %v2417_v7, %s2482_s22  ;;  %v676_v20 = vor.u32 %v675_v14, %v537_v9  ;;  %v679_v23 = vor.u32 %v677_v16, %v544_v12  ;;  %v2638_v27 = vor.u32 %v547_v10, %v546_v18  ;;  %v685_v36 = vrot.slane %v570_v26, 1  ;;  %s2014_s12 = sshll.u32 %s3305_s7, 2  ;;  %v2426_v18 = vld [vmem:[%s2595_s20 + $0x50] sm:$0xff]   ;;  %s2023_s7 = sshll.u32 %s402_s30, 2 }
  0x1d   : > { %v681_v30 = vor.u32 %v680_v25, %v552_v19  ;;  %v684_v38 = vor.u32 %v682_v29, %v559_v32  ;;  %v574_v39 = vshrl.u32 %v2421_v22, 16  ;;  %v561_v40 = vrot.slane %v559_v32, 7  ;;  %s385_s13 = sadd.s32 %s2014_s12, %s2567_s10  ;;  %s2782_s11 = scalar_lea.vmem %s3278_s2, %s2023_s7 }
  0x1e   : > { %v678_v28 = vsel %vm674_vm1, %v676_v20, %v677_v16  ;;  %v725_v31 = vsel %vm2631_vm3, %v679_v23, 0  ;;  %v686_v41 = vor.u32 %v685_v36, %v567_v33  ;;  %v687_v42 = vrot.slane %v577_v34, 1  ;;  %s2016_s16 = sshll.u32 %s385_s13, 2 }
  0x1f   : > { %773 = vrot.lane.b32.xlu1 %v678_v28, %s2483_s29  ;;  %v683_v35 = vsel %vm674_vm1, %v681_v30, %v682_v29  ;;  %v585_v43 = vshll.u32 %v2654_v37, 16  ;;  %v576_v45 = vrot.slane %v574_v39, 7  ;;  %v582_v46 = vshrl.u32 %v2654_v37, 16  ;;  %s2729_s19 = scalar_lea.vmem %s3277_s1, %s2016_s16 }
  0x20   : > { %737 = vrot.lane.b32.xlu0 %v2615_v11, %s2482_s22  ;;  %v726_v47 = vsel %vm2631_vm3, %v684_v38, 0  ;;  %v688_v49 = vsel %vm674_vm1, %v686_v41, %v687_v42  ;;  %v592_v50 = vshll.u32 %v2661_v44, 16  ;;  %v564_v52 = vor.u32 %v562_v21, %v561_v40  ;;  %v2429_v40 = vld [vmem:[%s2595_s20 + $0x68] sm:$0xff]   ;;  %s1490_s14 = scalar_select %p421_p10, 1, 0 }
  0x21   : > { %v690_v51 = vrot.slane %v585_v43, 1  ;;  %v579_v53 = vor.u32 %v577_v34, %v576_v45  ;;  %v689_v54 = vor.u32 %v687_v42, %v574_v39  ;;  %v600_v56 = vshll.u32 %v2672_v48, 16  ;;  %v2428_v45 = vld [vmem:[%s2595_s20 + $0x60] sm:$0xff]  }
  0x22   : > { %v589_v57 = vshrl.u32 %v2661_v44, 16  ;;  %v692_v59 = vrot.slane %v592_v50, 1  ;;  %v604_v60 = vshrl.u32 %v2680_v55, 16  ;;  %v539_v63 = vrot.slane %v537_v9, 7 }
  0x23   : > { %775 = vrot.lane.b32.xlu1 %v725_v31, %s2483_s29  ;;  %v691_v58 = vor.u32 %v690_v51, %v582_v46  ;;  %v554_v7 = vrot.slane %v552_v19, 7  ;;  %v727_v10 = vsel %vm2631_vm3, %v689_v54, 0  ;;  %v597_v12 = vshrl.u32 %v2672_v48, 16 }
  0x24   : > { %777 = vrot.lane.b32.xlu0 %v683_v35, %s2483_s29  ;;  %v591_v62 = vrot.slane %v589_v57, 7  ;;  %v569_v9 = vrot.slane %v567_v33, 7  ;;  %v607_v14 = vshll.u32 %v2680_v55, 16  ;;  %v695_v16 = vrot.slane %v600_v56, 1 }
  0x25   : > { %v2716_v19 = vor.u32 %v540_v8, %v539_v63  ;;  %v2720_v20 = vsel %vm535_vm4, %v539_v63, %v2638_v27  ;;  %v693_v21 = vsel %vm674_vm1, %v691_v58, %v692_v59  ;;  %v2733_v23 = vor.u32 %v555_v17, %v554_v7 }
  0x26   : > { %v2736_v6 = vsel %vm535_vm4, %v554_v7, %v564_v52  ;;  %v2740_v8 = vor.u32 %v570_v26, %v569_v9  ;;  %v2743_v25 = vsel %vm535_vm4, %v569_v9, %v579_v53  ;;  %v594_v27 = vor.u32 %v592_v50, %v591_v62  ;;  %v2431_v62 = vld [vmem:[%s2595_s20 + $0x78] sm:$0xff]  }
  0x27   : > { %739 = vrot.lane.b32.xlu1 %v2419_v13, %s2482_s22  ;;  %v606_v13 = vrot.slane %v604_v60, 7  ;;  %v694_v17 = vor.u32 %v692_v59, %v589_v57  ;;  %v615_v29 = vshll.u32 %v2426_v18, 16  ;;  %v696_v26 = vor.u32 %v695_v16, %v597_v12 }
  0x28   : > { %741 = vrot.lane.b32.xlu0 %v2621_v15, %s2482_s22  ;;  %v612_v15 = vshrl.u32 %v2426_v18, 16  ;;  %v697_v30 = vrot.slane %v607_v14, 1  ;;  %v584_v32 = vrot.slane %v582_v46, 7  ;;  %v599_v33 = vrot.slane %v597_v12, 7 }
  0x29   : > { %v609_v11 = vor.u32 %v607_v14, %v606_v13  ;;  %v728_v39 = vsel %vm2631_vm3, %v694_v17, 0  ;;  %v630_v54 = vshll.u32 %v2428_v45, 16  ;;  %v637_v57 = vshll.u32 %v2429_v40, 16 }
  0x2a   : > { %v614_v34 = vrot.slane %v612_v15, 7  ;;  %v2759_v36 = vor.u32 %v585_v43, %v584_v32  ;;  %v2762_v38 = vsel %vm535_vm4, %v584_v32, %v594_v27  ;;  %v2770_v41 = vor.u32 %v600_v56, %v599_v33 }
  0x2b   : > { %779 = vrot.lane.b32.xlu1 %v726_v47, %s2483_s29  ;;  %v2773_v42 = vsel %vm535_vm4, %v599_v33, %v609_v11  ;;  %v700_v43 = vrot.slane %v615_v29, 1  ;;  %v634_v47 = vshrl.u32 %v2429_v40, 16  ;;  %v699_v50 = vor.u32 %v697_v30, %v604_v60 }
  0x2c   : > { %781 = vrot.lane.b32.xlu0 %v688_v49, %s2483_s29  ;;  %v705_v7 = vrot.slane %v630_v54, 1  ;;  %v649_v12 = vshrl.u32 %v2431_v62, 16  ;;  %v652_v11 = vshll.u32 %v2431_v62, 16  ;;  %v666_v24 = vsel %vm2849_vm6, 0, %v2716_v19 }
  0x2d   : > { %v636_v51 = vrot.slane %v634_v47, 7  ;;  %v701_v52 = vor.u32 %v700_v43, %v612_v15  ;;  %v729_v59 = vsel %vm2631_vm3, %v699_v50, 0 }
  0x2e   : > { %v651_v14 = vrot.slane %v649_v12, 7  ;;  %v712_v33 = vrot.slane %v652_v11, 1 }
  0x2f   : > { %743 = vrot.lane.b32.xlu1 %v2421_v22, %s2482_s22  ;;  %v2724_v22 = vld [vmem:[%s2595_s20 + $0x58] sm:$0xff]   ;;  %v639_v63 = vor.u32 %v637_v57, %v636_v51 }
  0x30   : > { %745 = vrot.lane.b32.xlu0 %v2654_v37, %s2482_s22  ;;  %v619_v28 = vshrl.u32 %v2724_v22, 16  ;;  %v622_v35 = vshll.u32 %v2724_v22, 16  ;;  %v698_v37 = vsel %vm674_vm1, %v696_v26, %v697_v30  ;;  %v654_v15 = vor.u32 %v652_v11, %v651_v14  ;;  %v2432_v30 = vld [vmem:[%s2729_s19] sm:$0xff]  }
  0x31   : > { %v1285_v43 = vshrl.u32 %v2432_v30, 16 }
  0x32   : > { %v621_v31 = vrot.slane %v619_v28, 7  ;;  %v702_v53 = vrot.slane %v622_v35, 1 }
  0x33   : > { %783 = vrot.lane.b32.xlu1 %v727_v10, %s2483_s29  ;;  %v2430_v10 = vld [vmem:[%s2595_s20 + $0x70] sm:$0xff]  }
  0x34   : > { %785 = vrot.lane.b32.xlu0 %v693_v21, %s2483_s29  ;;  %v624_v46 = vor.u32 %v622_v35, %v621_v31  ;;  %v703_v60 = vsel %vm674_vm1, %v701_v52, %v702_v53  ;;  %v704_v9 = vor.u32 %v702_v53, %v619_v28  ;;  %v645_v21 = vshll.u32 %v2430_v10, 16  ;;  %v2433_v35 = vld [vmem:[%s2729_s19 + $0x8] sm:$0xff]   ;;  %s1497_s19 = scalar_select %p422_p11, 1, 0 }
  0x36   : > { %v2786_v49 = vsel %vm535_vm4, %v614_v34, %v624_v46  ;;  %v710_v26 = vrot.slane %v645_v21, 1 }
  0x37   : > { %747 = vrot.lane.b32.xlu1 %v2661_v44, %s2482_s22  ;;  %v2775_v44 = vor.u32 %v615_v29, %v614_v34  ;;  %v730_v29 = vsel %vm2631_vm3, %v704_v9, 0  ;;  %v1288_v34 = vshll.u32 %v2432_v30, 16  ;;  %v1287_v9 = vrot.slane %v1285_v43, 7 }
  0x38   : > { %749 = vrot.lane.b32.xlu0 %v2672_v48, %s2482_s22  ;;  %v627_v48 = vshrl.u32 %v2428_v45, 16 }
  0x39   : > { %v1301_v46 = vrot.slane %v1288_v34, 1 }
  0x3a   : > { %v629_v56 = vrot.slane %v627_v48, 7  ;;  %v706_v16 = vor.u32 %v705_v7, %v627_v48  ;;  %v2434_v48 = vld [vmem:[%s2782_s11] sm:$0xff]  }
  0x3b   : > { %787 = vrot.lane.b32.xlu1 %v728_v39, %s2483_s29  ;;  %v1302_v50 = vor.u32 %v1301_v46, %v1285_v43  ;;  %v1345_v52 = vshll.u32 %v2434_v48, 16  ;;  %v667_v43 = vsel %vm2849_vm6, 0, %v2733_v23  ;;  %v2441_v23 = vld [vmem:[%s3279_s3 + $0x14] ss:$0 sps:$4 sm:$0xff]  }
  0x3c   : > { %789 = vrot.lane.b32.xlu0 %v698_v37, %s2483_s29  ;;  %v2793_v58 = vor.u32 %v630_v54, %v629_v56  ;;  %v2802_v13 = vsel %vm535_vm4, %v629_v56, %v639_v63  ;;  %v1292_v54 = vshrl.u32 %v2433_v35, 16 }
  0x3d   : > { %v1358_v63 = vrot.slane %v1345_v52, 1 }
  0x3f   : > { %751 = vrot.lane.b32.xlu1 %v2680_v55, %s2482_s22  ;;  %v642_v55 = vshrl.u32 %v2430_v10, 16 }
  0x40   : > { %753 = vrot.lane.b32.xlu0 %v2426_v18, %s2482_s22  ;;  %v707_v18 = vrot.slane %v637_v57, 1  ;;  %v1342_v57 = vshrl.u32 %v2434_v48, 16 }
  0x41   : > { %v644_v27 = vrot.slane %v642_v55, 7  ;;  %v711_v32 = vor.u32 %v710_v26, %v642_v55 }
  0x42   : > { %v708_v28 = vsel %vm674_vm1, %v706_v16, %v707_v18  ;;  %v1344_v26 = vrot.slane %v1342_v57, 7 }
  0x43   : > { %791 = vrot.lane.b32.xlu1 %v729_v59, %s2483_s29  ;;  %v2808_v17 = vor.u32 %v645_v21, %v644_v27  ;;  %v2816_v31 = vsel %vm535_vm4, %v644_v27, %v654_v15  ;;  %v713_v37 = vsel %vm674_vm1, %v711_v32, %v712_v33 }
  0x44   : > { %793 = vrot.lane.b32.xlu0 %v703_v60, %s2483_s29  ;;  %v1294_v60 = vrot.slane %v1292_v54, 7 }
  0x47   : > { %755 = vrot.lane.b32.xlu1 %v2724_v22, %s2482_s22  ;;  %v709_v22 = vor.u32 %v707_v18, %v634_v47  ;;  %v714_v47 = vor.u32 %v712_v33, %v649_v12  ;;  %v2842_v18 = vor.u32 %v1288_v34, %v1287_v9 }
  0x48   : > { %757 = vrot.lane.b32.xlu0 %v2428_v45, %s2482_s22  ;;  %v1295_v45 = vshll.u32 %v2433_v35, 16 }
  0x49   : > { %v731_v39 = vsel %vm2631_vm3, %v709_v22, 0  ;;  %v732_v53 = vsel %vm2631_vm3, %v714_v47, 0  ;;  %v1300_v15 = vsel %vm2849_vm6, 0, %v2842_v18  ;;  %v2860_v22 = vor.u32 %v1345_v52, %v1344_v26 }
  0x4a   : > { %v1303_v51 = vrot.slane %v1295_v45, 1  ;;  %v1297_v14 = vor.u32 %v1295_v45, %v1294_v60  ;;  %v669_v60 = vsel %vm2849_vm6, 0, %v2759_v36 }
  0x4b   : > { %795 = vrot.lane.b32.xlu1 %v730_v29, %s2483_s29  ;;  %v1357_v33 = vsel %vm2849_vm6, 0, %v2860_v22 }
  0x4c   : > { %797 = vrot.lane.b32.xlu0 %v708_v28, %s2483_s29  ;;  %v1304_v56 = vsel %vm674_vm1, %v1302_v50, %v1303_v51  ;;  %v1305_v7 = vor.u32 %v1303_v51, %v1292_v54  ;;  %v2845_v21 = vsel %vm535_vm4, %v1287_v9, %v1297_v14 }
  0x4f   : > { %759 = vrot.lane.b32.xlu1 %v2429_v40, %s2482_s22  ;;  %v2435_v40 = vld [vmem:[%s2782_s11 + $0x8] sm:$0xff]  }
  0x50   : > { %761 = vrot.lane.b32.xlu0 %v2430_v10, %s2482_s22  ;;  %v1352_v59 = vshll.u32 %v2435_v40, 16  ;;  %v1359_v10 = vor.u32 %v1358_v63, %v1342_v57  ;;  %v1349_v55 = vshrl.u32 %v2435_v40, 16 }
  0x52   : > { %v1360_v12 = vrot.slane %v1352_v59, 1  ;;  %v1351_v11 = vrot.slane %v1349_v55, 7 }
  0x53   : > { %799 = vrot.lane.b32.xlu1 %v731_v39, %s2483_s29 }
  0x54   : > { %801 = vrot.lane.b32.xlu0 %v713_v37, %s2483_s29  ;;  %v1361_v16 = vsel %vm674_vm1, %v1359_v10, %v1360_v12  ;;  %v1362_v29 = vor.u32 %v1360_v12, %v1349_v55 }
  0x56   : > { %v1364_v28 = vsel %vm2631_vm3, %v1362_v29, 0 }
  0x57   : > { %763 = vrot.lane.b32.xlu1 %v2431_v62, %s2482_s22  ;;  %v1307_v62 = vsel %vm2631_vm3, %v1305_v7, 0 }
  0x58   : > { %1308 = vrot.lane.b32.xlu0 %v2432_v30, %s2482_s22  ;;  %v1354_v30 = vor.u32 %v1352_v59, %v1351_v11 }
  0x5a   : > { %v2863_v32 = vsel %vm535_vm4, %v1344_v26, %v1354_v30 }
  0x5b   : > { %803 = vrot.lane.b32.xlu1 %v732_v53, %s2483_s29  ;;  %v1514_v53 = vsel %vm932_vm0, %v2441_v23, 0 }
  0x5c   : > { %1313 = vrot.lane.b32.xlu0 %v1304_v56, %s2483_s29 }
  0x5f   : > { %1310 = vrot.lane.b32.xlu1 %v2433_v35, %s2482_s22 }
  0x60   : > { %1365 = vrot.lane.b32.xlu0 %v2434_v48, %s2482_s22 }
  0x63   : > { %1315 = vrot.lane.b32.xlu1 %v1307_v62, %s2483_s29 }
  0x64   : > { %1370 = vrot.lane.b32.xlu0 %v1361_v16, %s2483_s29 }
  0x67   : > { %1367 = vrot.lane.b32.xlu1 %v2435_v40, %s2482_s22  ;;  %v668_v40 = vsel %vm2849_vm6, 0, %v2740_v8 }
  0x6b   : > { %1372 = vrot.lane.b32.xlu1 %v1364_v28, %s2483_s29 }
  0x8a   : > { %v734_v34 = vpop.permute.xlu0 %733 }
  0x8b   : > { %v808_v39 = vsel %vm805_vm7, %v666_v24, %v734_v34  ;;  %v671_v24 = vsel %vm2849_vm6, 0, %v2775_v44 }
  0x8e   : > { %v736_v35 = vpop.permute.xlu0 %735 }
  0x8f   : > { %v811_v48 = vsel %vm805_vm7, %v2720_v20, %v736_v35 }
  0x91   : > { %v774_v37 = vpop.permute.xlu1 %773 }
  0x92   : > { %v2877_v45 = vsel %vm854_vm8, %v808_v39, %v774_v37  ;;  %v738_v46 = vpop.permute.xlu0 %737 }
  0x93   : > { %2184 = vmatprep.mubr.msk.bf16.mxu1 %vm899_vm9, %v2877_v45  ;;  %2220 = vmatprep.mubr.msk.bf16.mxu0 %vm899_vm9, %v2877_v45  ;;  %v814_v19 = vsel %vm805_vm7, %v667_v43, %v738_v46 }
  0x95   : > { %v776_v47 = vpop.permute.xlu1 %775 }
  0x96   : > { %v2890_v50 = vsel %vm854_vm8, %v811_v48, %v776_v47  ;;  %v778_v51 = vpop.permute.xlu0 %777 }
  0x97   : > { %2185 = vmatmul.mubr.msk.bf16.vlgmr.msra.gmra.mrb[0].mxu1 %vm899_vm9, %v2890_v50  ;;  %2221 = vmatmul.mubr.msk.bf16.vlgmr.msra.gmra.mrb[0].mxu0 %vm899_vm9, %v2890_v50  ;;  %v2897_v20 = vsel %vm854_vm8, %v814_v19, %v778_v51 }
  0x98   : > { %2269 = vmatpush3.bf16.msra.mxu0 %v2692_v61  ;;  %2306 = vmatpush3.bf16.msra.mxu1 %v2558_v0 }
  0x99   : > { %v740_v52 = vpop.permute.xlu1 %739  ;;  %2188 = vmatprep.mubr.msk.bf16.mxu1 %vm899_vm9, %v2897_v20  ;;  %2224 = vmatprep.mubr.msk.bf16.mxu0 %vm899_vm9, %v2897_v20 }
  0x9a   : > { %v742_v54 = vpop.permute.xlu0 %741  ;;  %2373 = vmatprep.subr.msk.bf16.mxu0 %vm932_vm0, %v2441_v23  ;;  %2370 = vmatprep.subr.msk.bf16.mxu1 %vm932_vm0, %v2574_v2  ;;  %v817_v56 = vsel %vm805_vm7, %v2736_v6, %v740_v52 }
  0x9b   : > { %v820_v61 = vsel %vm805_vm7, %v668_v40, %v742_v54 }
  0x9c   : > { %2271 = vmatpush3.bf16.msra.mxu0 %v1514_v53  ;;  %2307 = vmatpush3.bf16.msra.mxu1 %v2590_v4 }
  0x9d   : > { %v780_v57 = vpop.permute.xlu1 %779  ;;  %2252 = vmatprep.subr.bf16.mxu1 %v2565_v1 }
  0x9e   : > { %v2918_v8 = vsel %vm854_vm8, %v817_v56, %v780_v57  ;;  %v782_v59 = vpop.permute.xlu0 %781 }
  0x9f   : > { %2189 = vmatmul.mubr.msk.bf16.gmra.mrb[4].mxu1 %vm899_vm9, %v2918_v8  ;;  %2225 = vmatmul.mubr.msk.bf16.gmra.mrb[4].mxu0 %vm899_vm9, %v2918_v8  ;;  %v2925_v63 = vsel %vm854_vm8, %v820_v61, %v782_v59 }
  0xa0   : > { %2192 = vmatprep.mubr.msk.bf16.mxu1 %vm899_vm9, %v2925_v63  ;;  %2228 = vmatprep.mubr.msk.bf16.mxu0 %vm899_vm9, %v2925_v63 }
  0xa1   : > { %v744_v6 = vpop.permute.xlu1 %743 }
  0xa2   : > { %v746_v7 = vpop.permute.xlu0 %745  ;;  %v823_v12 = vsel %vm805_vm7, %v2743_v25, %v744_v6  ;;  %v670_v25 = vsel %vm2849_vm6, 0, %v2770_v41 }
  0xa3   : > { %v826_v10 = vsel %vm805_vm7, %v669_v60, %v746_v7 }
  0xa5   : > { %v784_v62 = vpop.permute.xlu1 %783 }
  0xa6   : > { %v2938_v55 = vsel %vm854_vm8, %v823_v12, %v784_v62  ;;  %v786_v9 = vpop.permute.xlu0 %785 }
  0xa7   : > { %2193 = vmatmul.mubr.msk.bf16.gmra.mrb[8].mxu1 %vm899_vm9, %v2938_v55  ;;  %2229 = vmatmul.mubr.msk.bf16.gmra.mrb[8].mxu0 %vm899_vm9, %v2938_v55  ;;  %v868_v14 = vsel %vm854_vm8, %v826_v10, %v786_v9 }
  0xa8   : > { %2196 = vmatprep.mubr.msk.bf16.mxu1 %vm899_vm9, %v868_v14  ;;  %2232 = vmatprep.mubr.msk.bf16.mxu0 %vm899_vm9, %v868_v14 }
  0xa9   : > { %v748_v36 = vpop.permute.xlu1 %747 }
  0xaa   : > { %v750_v16 = vpop.permute.xlu0 %749  ;;  %v829_v29 = vsel %vm805_vm7, %v2762_v38, %v748_v36 }
  0xab   : > { %v832_v11 = vsel %vm805_vm7, %v670_v25, %v750_v16 }
  0xad   : > { %v788_v28 = vpop.permute.xlu1 %787 }
  0xae   : > { %v870_v26 = vsel %vm854_vm8, %v829_v29, %v788_v28  ;;  %v790_v30 = vpop.permute.xlu0 %789 }
  0xaf   : > { %2197 = vmatmul.mubr.msk.bf16.gmra.mrb[12].mxu1 %vm899_vm9, %v870_v26  ;;  %2233 = vmatmul.mubr.msk.bf16.gmra.mrb[12].mxu0 %vm899_vm9, %v870_v26  ;;  %v872_v34 = vsel %vm854_vm8, %v832_v11, %v790_v30 }
  0xb0   : > { %2200 = vmatprep.mubr.msk.bf16.mxu1 %vm899_vm9, %v872_v34  ;;  %2236 = vmatprep.mubr.msk.bf16.mxu0 %vm899_vm9, %v872_v34 }
  0xb1   : > { %v752_v41 = vpop.permute.xlu1 %751 }
  0xb2   : > { %v754_v38 = vpop.permute.xlu0 %753  ;;  %v835_v39 = vsel %vm805_vm7, %v2773_v42, %v752_v41  ;;  %v672_v42 = vsel %vm2849_vm6, 0, %v2793_v58 }
  0xb3   : > { %v838_v35 = vsel %vm805_vm7, %v671_v24, %v754_v38 }
  0xb5   : > { %v792_v37 = vpop.permute.xlu1 %791 }
  0xb6   : > { %v874_v43 = vsel %vm854_vm8, %v835_v39, %v792_v37  ;;  %v794_v46 = vpop.permute.xlu0 %793  ;;  %v3074_v37 = vld [vmem:[%s3280_s4] ss:$0 sm:$0xff] }
  0xb7   : > { %2201 = vmatmul.mubr.msk.bf16.gmra.mrb[16].mxu1 %vm899_vm9, %v874_v43  ;;  %2237 = vmatmul.mubr.msk.bf16.gmra.mrb[16].mxu0 %vm899_vm9, %v874_v43  ;;  %v876_v48 = vsel %vm854_vm8, %v838_v35, %v794_v46 }
  0xb8   : > { %2272 = vmatprep.mubr.msk.bf16.mxu0 %vm899_vm9, %v2877_v45  ;;  %2204 = vmatprep.mubr.msk.bf16.mxu1 %vm899_vm9, %v876_v48 }
  0xb9   : > { %v756_v44 = vpop.permute.xlu1 %755 }
  0xba   : > { %v758_v19 = vpop.permute.xlu0 %757  ;;  %v841_v23 = vsel %vm805_vm7, %v2786_v49, %v756_v44  ;;  %v673_v49 = vsel %vm2849_vm6, 0, %v2808_v17  ;;  %v3081_v44 = vld [vmem:[%s3281_s5] ss:$0 sm:$0xff] }
  0xbb   : > { %v844_v47 = vsel %vm805_vm7, %v672_v42, %v758_v19 }
  0xbd   : > { %v796_v51 = vpop.permute.xlu1 %795 }
  0xbe   : > { %v878_v52 = vsel %vm854_vm8, %v841_v23, %v796_v51  ;;  %v798_v40 = vpop.permute.xlu0 %797 }
  0xbf   : > { %2205 = vmatmul.mubr.msk.bf16.gmra.mrb[20].mxu1 %vm899_vm9, %v878_v52  ;;  %2273 = vmatmul.mubr.msk.bf16.vlgmr.msra.gmra.mrb[4].mxu0 %vm899_vm9, %v2890_v50  ;;  %v880_v45 = vsel %vm854_vm8, %v844_v47, %v798_v40 }
  0xc0   : > { %2276 = vmatprep.mubr.msk.bf16.mxu0 %vm899_vm9, %v2897_v20  ;;  %2208 = vmatprep.mubr.msk.bf16.mxu1 %vm899_vm9, %v880_v45 }
  0xc1   : > { %v760_v58 = vpop.permute.xlu1 %759 }
  0xc2   : > { %v762_v53 = vpop.permute.xlu0 %761  ;;  %v847_v61 = vsel %vm805_vm7, %v2802_v13, %v760_v58 }
  0xc3   : > { %v850_v54 = vsel %vm805_vm7, %v673_v49, %v762_v53 }
  0xc5   : > { %v800_v56 = vpop.permute.xlu1 %799 }
  0xc6   : > { %v882_v50 = vsel %vm854_vm8, %v847_v61, %v800_v56  ;;  %v802_v57 = vpop.permute.xlu0 %801 }
  0xc7   : > { %2209 = vmatmul.mubr.msk.bf16.gmra.mrb[24].mxu1 %vm899_vm9, %v882_v50  ;;  %2277 = vmatmul.mubr.msk.bf16.gmra.mrb[8].mxu0 %vm899_vm9, %v2918_v8  ;;  %v884_v20 = vsel %vm854_vm8, %v850_v54, %v802_v57 }
  0xc8   : > { %2280 = vmatprep.mubr.msk.bf16.mxu0 %vm899_vm9, %v2925_v63  ;;  %2212 = vmatprep.mubr.msk.bf16.mxu1 %vm899_vm9, %v884_v20 }
  0xc9   : > { %v764_v17 = vpop.permute.xlu1 %763 }
  0xca   : > { %v853_v13 = vsel %vm805_vm7, %v2816_v31, %v764_v17  ;;  %v1309_v31 = vpop.permute.xlu0 %1308 }
  0xcd   : > { %v804_v59 = vpop.permute.xlu1 %803 }
  0xce   : > { %v886_v6 = vsel %vm854_vm8, %v853_v13, %v804_v59  ;;  %v1314_v8 = vpop.permute.xlu0 %1313 }
  0xcf   : > { %2213 = vmatmul.mubr.msk.bf16.gmra.mrb[28].mxu1 %vm899_vm9, %v886_v6  ;;  %2281 = vmatmul.mubr.msk.bf16.gmra.mrb[12].mxu0 %vm899_vm9, %v2938_v55 }
  0xd0   : > { %2240 = vmatprep.mubr.msk.bf16.mxu1 %vm899_vm9, %v876_v48  ;;  %2284 = vmatprep.mubr.msk.bf16.mxu0 %vm899_vm9, %v868_v14 }
  0xd2   : > { %v1366_v63 = vpop.permute.xlu0 %1365 }
  0xd3   : > { %v1376_v18 = vsel %vm805_vm7, %v1357_v33, %v1366_v63 }
  0xd7   : > { %2241 = vmatmul.mubr.msk.bf16.vlgmr.msra.gmra.mrb[12].mxu1 %vm899_vm9, %v878_v52  ;;  %2285 = vmatmul.mubr.msk.bf16.gmra.mrb[16].mxu0 %vm899_vm9, %v870_v26 }
  0xd8   : > { %2244 = vmatprep.mubr.msk.bf16.mxu1 %vm899_vm9, %v880_v45  ;;  %2253 = vmatpush3.bf16.msra.mxu1 %v2565_v1  ;;  %v1311_v1 = vpop.permute.xlu1 %1310 }
  0xd9   : > { %2288 = vmatprep.mubr.msk.bf16.mxu0 %vm899_vm9, %v872_v34  ;;  %2371 = vmatprep.subr.msk.bf16.mxu1 %vm932_vm0, %v2583_v3  ;;  %v1319_v3 = vsel %vm805_vm7, %v1300_v15, %v1309_v31  ;;  %v1322_v7 = vsel %vm805_vm7, %v2845_v21, %v1311_v1  ;;  %v1371_v15 = vpop.permute.xlu0 %1370 }
  0xda   : > { %v1381_v62 = vsel %vm854_vm8, %v1376_v18, %v1371_v15 }
  0xdc   : > { %2255 = vmatpush3.bf16.msra.mxu1 %v2602_v5  ;;  %v1324_v5 = vsel %vm854_vm8, %v1319_v3, %v1314_v8  ;;  %v1316_v60 = vpop.permute.xlu1 %1315 }
  0xdd   : > { %2260 = vmatprep.subr.bf16.mxu1 %v2558_v0  ;;  %v1326_v12 = vsel %vm854_vm8, %v1322_v7, %v1316_v60 }
  0xdf   : > { %2245 = vmatmul.mubr.msk.bf16.gmra.mrb[16].mxu1 %vm899_vm9, %v882_v50  ;;  %2289 = vmatmul.mubr.msk.bf16.gmra.mrb[20].mxu0 %vm899_vm9, %v874_v43 }
  0xe0   : > { %2248 = vmatprep.mubr.msk.bf16.mxu1 %vm899_vm9, %v884_v20  ;;  %2292 = vmatprep.mubr.msk.bf16.mxu0 %vm899_vm9, %v876_v48  ;;  %v1368_v10 = vpop.permute.xlu1 %1367 }
  0xe1   : > { %v1379_v21 = vsel %vm805_vm7, %v2863_v32, %v1368_v10 }
  0xe4   : > { %v1373_v27 = vpop.permute.xlu1 %1372 }
  0xe5   : > { %v1383_v22 = vsel %vm854_vm8, %v1379_v21, %v1373_v27 }
  0xe7   : > { %2249 = vmatmul.mubr.msk.bf16.gmra.mrb[20].mxu1 %vm899_vm9, %v886_v6  ;;  %2293 = vmatmul.mubr.msk.bf16.gmra.mrb[24].mxu0 %vm899_vm9, %v878_v52 }
  0xe8   : > { %2296 = vmatprep.mubr.msk.bf16.mxu0 %vm899_vm9, %v880_v45  ;;  %2256 = vmatprep.mubr.msk.bf16.mxu1 %vm899_vm9, %v1324_v5 }
  0xef   : > { %2257 = vmatmul.mubr.msk.bf16.vlgmr.msra.gmra.mrb[32].mxu1 %vm899_vm9, %v1326_v12  ;;  %2297 = vmatmul.mubr.msk.bf16.gmra.mrb[28].mxu0 %vm899_vm9, %v882_v50 }
  0xf0   : > { %2261 = vmatpush3.bf16.msra.mxu1 %v2558_v0  ;;  %2300 = vmatprep.mubr.msk.bf16.mxu0 %vm899_vm9, %v884_v20 }
  0xf1   : > { %2372 = vmatprep.subr.msk.bf16.mxu1 %vm932_vm0, %v2574_v2  ;;  %2264 = vmatprep.mubr.msk.bf16.mxu1 %vm899_vm9, %v1381_v62 }
  0xf4   : > { %2263 = vmatpush3.bf16.msra.mxu1 %v2590_v4 }
  0xf7   : > { %2265 = vmatmul.mubr.msk.bf16.vlgmr.msra.gmra.mrb[36].mxu1 %vm899_vm9, %v1383_v22  ;;  %2301 = vmatmul.mubr.msk.bf16.gmra.mrb[32].mxu0 %vm899_vm9, %v886_v6 }
 0x16a   : > { %v2186_v0 = vpop.f32.mrb[0].mxu1  ;;  %v2222_v33 = vpop.f32.mrb[0].mxu0 }
 0x16b   : > { %v970_v55 = vpop.f32.mrb[1].mxu1  ;;  %v1147_v9 = vpop.f32.mrb[1].mxu0 }
 0x16c   : > { %v2187_v14 = vpop.f32.mrb[2].mxu1  ;;  %v2223_v2 = vpop.f32.mrb[2].mxu0 }
 0x16d   : > { %v973_v36 = vpop.f32.mrb[3].mxu1  ;;  %v1149_v25 = vpop.f32.mrb[3].mxu0 }
 0x172   : > { %v2190_v16 = vpop.f32.mrb[4].mxu1 }
 0x173   : > { %v986_v11 = vpop.f32.mrb[5].mxu1 }
 0x174   : > { %v2191_v32 = vpop.f32.mrb[6].mxu1 }
 0x175   : > { %v989_v29 = vpop.f32.mrb[7].mxu1 }
 0x17a   : > { %v3053_v28 = vpop.f32.mrb[8].mxu1 }
 0x17b   : > { %v3055_v4 = vpop.f32.mrb[9].mxu1 }
 0x17c   : > { %v3057_v26 = vpop.f32.mrb[10].mxu1 }
 0x17d   : > { %v3059_v30 = vpop.f32.mrb[11].mxu1 }
 0x192   : > { %v3061_v34 = vpop.f32.mrb[4].mxu0 }
 0x193   : > { %v3063_v41 = vpop.f32.mrb[5].mxu0 }
 0x194   : > { %v3065_v24 = vpop.f32.mrb[6].mxu0 }
 0x195   : > { %v3067_v38 = vpop.f32.mrb[7].mxu0 }
 0x19a   : > { %v3069_v35 = vpop.f32.mrb[24].mxu1  ;;  %v2278_v39 = vpop.f32.mrb[8].mxu0 }
 0x19b   : > { %v1575_v43 = vadd.f32 %v2278_v39, %v2186_v0  ;;  %v3076_v46 = vpop.f32.mrb[25].mxu1  ;;  %v1566_v48 = vpop.f32.mrb[9].mxu0 }
 0x19c   : > { %v1567_v42 = vadd.f32 %v1566_v48, %v970_v55  ;;  %v3083_v19 = vpop.f32.mrb[26].mxu1  ;;  %v2279_v47 = vpop.f32.mrb[10].mxu0 }
 0x19d   : > { %v1722_v23 = vmul.f32 %v3074_v37, %v1575_v43  ;;  %v1578_v51 = vadd.f32 %v2279_v47, %v2187_v14  ;;  %v3087_v52 = vpop.f32.mrb[27].mxu1  ;;  %v1569_v40 = vpop.f32.mrb[11].mxu0 }
 0x19e   : > { %v1720_v45 = vmul.f32 %v3074_v37, %v1567_v42  ;;  %v1570_v58 = vadd.f32 %v1569_v40, %v973_v36 }
 0x19f   : > { %v1761_v49 = vadd.f32 %v3081_v44, %v1722_v23  ;;  %v1723_v53 = vmul.f32 %v3074_v37, %v1578_v51 }
 0x1a0   : > { %v1759_v54 = vadd.f32 %v3081_v44, %v1720_v45  ;;  %v1721_v61 = vmul.f32 %v3074_v37, %v1570_v58 }
 0x1a1   : > { %v1793_v56 = vmax.f32 %v1761_v49, 0.0  ;;  %v1762_v50 = vadd.f32 %v3081_v44, %v1723_v53 }
 0x1a2   : > { %v1791_v57 = vmax.f32 %v1759_v54, 0.0  ;;  %v1760_v20 = vadd.f32 %v3081_v44, %v1721_v61  ;;  %v2214_v17 = vpop.f32.mrb[28].mxu1  ;;  %v2282_v13 = vpop.f32.mrb[12].mxu0 }
 0x1a3   : > { %1825 = vst.msk [vmem:[%s3095_s18 + $0x30] sm:$0xff] %vm805_vm7, %v1793_v56  ;;  %v1794_v59 = vmax.f32 %v1762_v50, 0.0  ;;  %v1591_v6 = vadd.f32 %v2282_v13, %v2190_v16  ;;  %v1082_v31 = vpop.f32.mrb[29].mxu1  ;;  %v1582_v8 = vpop.f32.mrb[13].mxu0 }
 0x1a4   : > { %1823 = vst.msk [vmem:[%s3095_s18 + $0x20] sm:$0xff] %vm805_vm7, %v1791_v57  ;;  %v1792_v1 = vmax.f32 %v1760_v20, 0.0  ;;  %v1583_v3 = vadd.f32 %v1582_v8, %v986_v11  ;;  %v2215_v5 = vpop.f32.mrb[30].mxu1  ;;  %v2283_v63 = vpop.f32.mrb[14].mxu0 }
 0x1a5   : > { %1826 = vst.msk [vmem:[%s3095_s18 + $0x38] sm:$0xff] %vm805_vm7, %v1794_v59  ;;  %v1726_v60 = vmul.f32 %v3074_v37, %v1591_v6  ;;  %v1594_v7 = vadd.f32 %v2283_v63, %v2191_v32  ;;  %v1084_v18 = vpop.f32.mrb[31].mxu1  ;;  %v1585_v15 = vpop.f32.mrb[15].mxu0 }
 0x1a6   : > { %1824 = vst.msk [vmem:[%s3095_s18 + $0x28] sm:$0xff] %vm805_vm7, %v1792_v1  ;;  %v1724_v10 = vmul.f32 %v3074_v37, %v1583_v3  ;;  %v1586_v12 = vadd.f32 %v1585_v15, %v989_v29 }
 0x1a7   : > { %v1765_v62 = vadd.f32 %v3081_v44, %v1726_v60  ;;  %v1727_v21 = vmul.f32 %v3074_v37, %v1594_v7 }
 0x1a8   : > { %v1763_v27 = vadd.f32 %v3081_v44, %v1724_v10  ;;  %v1725_v22 = vmul.f32 %v3074_v37, %v1586_v12 }
 0x1a9   : > { %v1797_v0 = vmax.f32 %v1765_v62, 0.0  ;;  %v1766_v33 = vadd.f32 %v3081_v44, %v1727_v21 }
 0x1aa   : > { %v1795_v55 = vmax.f32 %v1763_v27, 0.0  ;;  %v1764_v9 = vadd.f32 %v3081_v44, %v1725_v22  ;;  %v2242_v14 = vpop.f32.mrb[12].mxu1  ;;  %v2286_v2 = vpop.f32.mrb[16].mxu0 }
 0x1ab   : > { %1829 = vst.msk [vmem:[%s3095_s18 + $0x50] sm:$0xff] %vm805_vm7, %v1797_v0  ;;  %v1798_v36 = vmax.f32 %v1766_v33, 0.0  ;;  %v1607_v25 = vadd.f32 %v2286_v2, %v3053_v28  ;;  %v1223_v16 = vpop.f32.mrb[13].mxu1  ;;  %v1598_v11 = vpop.f32.mrb[17].mxu0 }
 0x1ac   : > { %1827 = vst.msk [vmem:[%s3095_s18 + $0x40] sm:$0xff] %vm805_vm7, %v1795_v55  ;;  %v1796_v32 = vmax.f32 %v1764_v9, 0.0  ;;  %v1599_v29 = vadd.f32 %v1598_v11, %v3055_v4  ;;  %v2243_v39 = vpop.f32.mrb[14].mxu1  ;;  %v2287_v43 = vpop.f32.mrb[18].mxu0 }
 0x1ad   : > { %1830 = vst.msk [vmem:[%s3095_s18 + $0x58] sm:$0xff] %vm805_vm7, %v1798_v36  ;;  %v1730_v48 = vmul.f32 %v3074_v37, %v1607_v25  ;;  %v1610_v42 = vadd.f32 %v2287_v43, %v3057_v26  ;;  %v1226_v47 = vpop.f32.mrb[15].mxu1  ;;  %v1601_v23 = vpop.f32.mrb[19].mxu0 }
 0x1ae   : > { %1828 = vst.msk [vmem:[%s3095_s18 + $0x48] sm:$0xff] %vm805_vm7, %v1796_v32  ;;  %v1728_v28 = vmul.f32 %v3074_v37, %v1599_v29  ;;  %v1602_v51 = vadd.f32 %v1601_v23, %v3059_v30 }
 0x1af   : > { %v1769_v4 = vadd.f32 %v3081_v44, %v1730_v48  ;;  %v1731_v40 = vmul.f32 %v3074_v37, %v1610_v42 }
 0x1b0   : > { %v1767_v45 = vadd.f32 %v3081_v44, %v1728_v28  ;;  %v1729_v58 = vmul.f32 %v3074_v37, %v1602_v51 }
 0x1b1   : > { %v1801_v49 = vmax.f32 %v1769_v4, 0.0  ;;  %v1770_v26 = vadd.f32 %v3081_v44, %v1731_v40  ;;  %v1498_v4 = vstv %s1497_s19 }
 0x1b2   : > { %v1799_v53 = vmax.f32 %v1767_v45, 0.0  ;;  %v1768_v54 = vadd.f32 %v3081_v44, %v1729_v58  ;;  %v2246_v61 = vpop.f32.mrb[16].mxu1  ;;  %v2290_v56 = vpop.f32.mrb[20].mxu0  ;;  %vm3181_vm11 = vcmp.eq.s32.totalorder %v1498_v4, 1 }
 0x1b3   : > { %1833 = vst.msk [vmem:[%s3095_s18 + $0x70] sm:$0xff] %vm805_vm7, %v1801_v49  ;;  %v1802_v30 = vmax.f32 %v1770_v26, 0.0  ;;  %v2320_v50 = vadd.f32 %v2290_v56, %v2242_v14  ;;  %v1239_v57 = vpop.f32.mrb[17].mxu1  ;;  %v1614_v20 = vpop.f32.mrb[21].mxu0 }
 0x1b4   : > { %1831 = vst.msk [vmem:[%s3095_s18 + $0x60] sm:$0xff] %vm805_vm7, %v1799_v53  ;;  %v1800_v17 = vmax.f32 %v1768_v54, 0.0  ;;  %v2321_v13 = vadd.f32 %v1614_v20, %v1223_v16  ;;  %v2247_v59 = vpop.f32.mrb[18].mxu1  ;;  %v2291_v6 = vpop.f32.mrb[22].mxu0 }
 0x1b5   : > { %1834 = vst.msk [vmem:[%s3095_s18 + $0x78] sm:$0xff] %vm805_vm7, %v1802_v30  ;;  %v1734_v31 = vmul.f32 %v2320_v50, %v3074_v37  ;;  %v2322_v8 = vadd.f32 %v2291_v6, %v2243_v39  ;;  %v1242_v1 = vpop.f32.mrb[19].mxu1  ;;  %v1617_v3 = vpop.f32.mrb[23].mxu0  ;;  %v1491_v39 = vstv %s1490_s14 }
 0x1b6   : > { %1832 = vst.msk [vmem:[%s3095_s18 + $0x68] sm:$0xff] %vm805_vm7, %v1800_v17  ;;  %v1732_v5 = vmul.f32 %v2321_v13, %v3074_v37  ;;  %v2323_v63 = vadd.f32 %v1617_v3, %v1226_v47  ;;  %vm3171_vm10 = vcmp.eq.s32.totalorder %v1491_v39, 1 }
 0x1b7   : > { %v1773_v60 = vadd.f32 %v3081_v44, %v1734_v31  ;;  %v1735_v7 = vmul.f32 %v2322_v8, %v3074_v37 }
 0x1b8   : > { %v1771_v18 = vadd.f32 %v3081_v44, %v1732_v5  ;;  %v1733_v15 = vmul.f32 %v2323_v63, %v3074_v37 }
 0x1b9   : > { %v1805_v10 = vmax.f32 %v1773_v60, 0.0  ;;  %v1774_v12 = vadd.f32 %v3081_v44, %v1735_v7 }
 0x1ba   : > { %v1803_v62 = vmax.f32 %v1771_v18, 0.0  ;;  %v1772_v21 = vadd.f32 %v3081_v44, %v1733_v15  ;;  %v2250_v27 = vpop.f32.mrb[20].mxu1  ;;  %v2294_v22 = vpop.f32.mrb[24].mxu0 }
 0x1bb   : > { %1837 = vst.msk [vmem:[%s3095_s18 + $0x90] sm:$0xff] %vm805_vm7, %v1805_v10  ;;  %v1806_v0 = vmax.f32 %v1774_v12, 0.0  ;;  %v2324_v33 = vadd.f32 %v2294_v22, %v2246_v61  ;;  %v1255_v55 = vpop.f32.mrb[21].mxu1  ;;  %v1630_v9 = vpop.f32.mrb[25].mxu0 }
 0x1bc   : > { %1835 = vst.msk [vmem:[%s3095_s18 + $0x80] sm:$0xff] %vm805_vm7, %v1803_v62  ;;  %v1804_v14 = vmax.f32 %v1772_v21, 0.0  ;;  %v2325_v2 = vadd.f32 %v1630_v9, %v1239_v57  ;;  %v2251_v36 = vpop.f32.mrb[22].mxu1  ;;  %v2295_v25 = vpop.f32.mrb[26].mxu0 }
 0x1bd   : > { %1838 = vst.msk [vmem:[%s3095_s18 + $0x98] sm:$0xff] %vm805_vm7, %v1806_v0  ;;  %v1738_v16 = vmul.f32 %v2324_v33, %v3074_v37  ;;  %v2326_v11 = vadd.f32 %v2295_v25, %v2247_v59  ;;  %v1258_v32 = vpop.f32.mrb[23].mxu1  ;;  %v1633_v29 = vpop.f32.mrb[27].mxu0 }
 0x1be   : > { %1836 = vst.msk [vmem:[%s3095_s18 + $0x88] sm:$0xff] %vm805_vm7, %v1804_v14  ;;  %v1736_v43 = vmul.f32 %v2325_v2, %v3074_v37  ;;  %v2327_v48 = vadd.f32 %v1633_v29, %v1242_v1 }
 0x1bf   : > { %v1777_v42 = vadd.f32 %v3081_v44, %v1738_v16  ;;  %v1739_v47 = vmul.f32 %v2326_v11, %v3074_v37 }
 0x1c0   : > { %v1775_v23 = vadd.f32 %v3081_v44, %v1736_v43  ;;  %v1737_v28 = vmul.f32 %v2327_v48, %v3074_v37 }
 0x1c1   : > { %v1809_v40 = vmax.f32 %v1777_v42, 0.0  ;;  %v1778_v45 = vadd.f32 %v3081_v44, %v1739_v47 }
 0x1c2   : > { %v1807_v58 = vmax.f32 %v1775_v23, 0.0  ;;  %v1776_v49 = vadd.f32 %v3081_v44, %v1737_v28  ;;  %v2258_v26 = vpop.f32.mrb[32].mxu1  ;;  %v2298_v53 = vpop.f32.mrb[28].mxu0 }
 0x1c3   : > { %1841 = vst.msk [vmem:[%s3095_s18 + $0xb0] sm:$0xff] %vm805_vm7, %v1809_v40  ;;  %v1810_v54 = vmax.f32 %v1778_v45, 0.0  ;;  %v1495_v61 = vsel %vm3171_vm10, %v2258_v26, 0.0  ;;  %v2328_v56 = vadd.f32 %v2298_v53, %v2250_v27  ;;  %v1422_v30 = vpop.f32.mrb[33].mxu1  ;;  %v1646_v50 = vpop.f32.mrb[29].mxu0 }
 0x1c4   : > { %1839 = vst.msk [vmem:[%s3095_s18 + $0xa0] sm:$0xff] %vm805_vm7, %v1807_v58  ;;  %v1808_v20 = vmax.f32 %v1776_v49, 0.0  ;;  %v1559_v17 = vadd.f32 %v3061_v34, %v1495_v61  ;;  %v1493_v13 = vsel %vm3171_vm10, %v1422_v30, 0.0  ;;  %v2329_v59 = vadd.f32 %v1646_v50, %v1255_v55  ;;  %v2259_v6 = vpop.f32.mrb[34].mxu1  ;;  %v2299_v31 = vpop.f32.mrb[30].mxu0 }
 0x1c5   : > { %1842 = vst.msk [vmem:[%s3095_s18 + $0xb8] sm:$0xff] %vm805_vm7, %v1810_v54  ;;  %v1742_v8 = vmul.f32 %v2328_v56, %v3074_v37  ;;  %v1551_v1 = vadd.f32 %v3063_v41, %v1493_v13  ;;  %v1496_v3 = vsel %vm3171_vm10, %v2259_v6, 0.0  ;;  %v2330_v5 = vadd.f32 %v2299_v31, %v2251_v36  ;;  %v1425_v63 = vpop.f32.mrb[35].mxu1  ;;  %v1649_v60 = vpop.f32.mrb[31].mxu0 }
 0x1c6   : > { %1840 = vst.msk [vmem:[%s3095_s18 + $0xa8] sm:$0xff] %vm805_vm7, %v1808_v20  ;;  %v1718_v34 = vmul.f32 %v3074_v37, %v1559_v17  ;;  %v1740_v7 = vmul.f32 %v2329_v59, %v3074_v37  ;;  %v1562_v18 = vadd.f32 %v3065_v24, %v1496_v3  ;;  %v1494_v15 = vsel %vm3171_vm10, %v1425_v63, 0.0 }
 0x1c7   : > { %v1781_v10 = vadd.f32 %v3081_v44, %v1742_v8  ;;  %v1716_v41 = vmul.f32 %v3074_v37, %v1551_v1  ;;  %v1743_v12 = vmul.f32 %v2330_v5, %v3074_v37  ;;  %v1554_v62 = vadd.f32 %v3067_v38, %v1494_v15 }
 0x1c8   : > { %v1757_v21 = vadd.f32 %v3081_v44, %v1718_v34  ;;  %v1779_v27 = vadd.f32 %v3081_v44, %v1740_v7  ;;  %v1719_v22 = vmul.f32 %v3074_v37, %v1562_v18  ;;  %v2331_v0 = vadd.f32 %v1649_v60, %v1258_v32 }
 0x1c9   : > { %v1813_v24 = vmax.f32 %v1781_v10, 0.0  ;;  %v1755_v33 = vadd.f32 %v3081_v44, %v1716_v41  ;;  %v1782_v55 = vadd.f32 %v3081_v44, %v1743_v12  ;;  %v1717_v9 = vmul.f32 %v3074_v37, %v1554_v62 }
 0x1ca   : > { %v1789_v14 = vmax.f32 %v1757_v21, 0.0  ;;  %v1811_v2 = vmax.f32 %v1779_v27, 0.0  ;;  %v1758_v38 = vadd.f32 %v3081_v44, %v1719_v22  ;;  %v1741_v36 = vmul.f32 %v2331_v0, %v3074_v37  ;;  %v2266_v25 = vpop.f32.mrb[36].mxu1  ;;  %v2302_v16 = vpop.f32.mrb[32].mxu0 }
 0x1cb   : > { %1845 = vst.msk [vmem:[%s3095_s18 + $0xd0] sm:$0xff] %vm805_vm7, %v1813_v24  ;;  %v1787_v11 = vmax.f32 %v1755_v33, 0.0  ;;  %v1814_v32 = vmax.f32 %v1782_v55, 0.0  ;;  %v1756_v29 = vadd.f32 %v3081_v44, %v1717_v9  ;;  %v1502_v39 = vsel %vm3181_vm11, %v2266_v25, 0.0  ;;  %v1475_v43 = vpop.f32.mrb[37].mxu1  ;;  %v1662_v48 = vpop.f32.mrb[33].mxu0 }
 0x1cc   : > { %1821 = vst.msk [vmem:[%s3095_s18 + $0x10] sm:$0xff] %vm805_vm7, %v1789_v14  ;;  %1843 = vst.msk [vmem:[%s3095_s18 + $0xc0] sm:$0xff] %vm805_vm7, %v1811_v2  ;;  %v1790_v42 = vmax.f32 %v1758_v38, 0.0  ;;  %v1780_v47 = vadd.f32 %v3081_v44, %v1741_v36  ;;  %v1671_v23 = vadd.f32 %v2302_v16, %v3069_v35  ;;  %v1500_v28 = vsel %vm3181_vm11, %v1475_v43, 0.0  ;;  %v2267_v51 = vpop.f32.mrb[38].mxu1  ;;  %v2303_v4 = vpop.f32.mrb[34].mxu0 }
 0x1cd   : > { %1819 = vst.msk [vmem:[%s3095_s18] sm:$0xff] %vm805_vm7, %v1787_v11  ;;  %1846 = vst.msk [vmem:[%s3095_s18 + $0xd8] sm:$0xff] %vm805_vm7, %v1814_v32  ;;  %v1788_v40 = vmax.f32 %v1756_v29, 0.0  ;;  %v1663_v45 = vadd.f32 %v1662_v48, %v3076_v46  ;;  %v1503_v58 = vsel %vm3181_vm11, %v2267_v51, 0.0  ;;  %v1674_v49 = vadd.f32 %v2303_v4, %v3083_v19  ;;  %v1478_v35 = vpop.f32.mrb[39].mxu1  ;;  %v1665_v26 = vpop.f32.mrb[35].mxu0 }
 0x1ce   : > { %1822 = vst.msk [vmem:[%s3095_s18 + $0x18] sm:$0xff] %vm805_vm7, %v1790_v42  ;;  %v1812_v53 = vmax.f32 %v1780_v47, 0.0  ;;  %v1707_v54 = vadd.f32 %v1671_v23, %v1502_v39  ;;  %v1501_v61 = vsel %vm3181_vm11, %v1478_v35, 0.0  ;;  %v1666_v56 = vadd.f32 %v1665_v26, %v3087_v52 }
 0x1cf   : > { %1820 = vst.msk [vmem:[%s3095_s18 + $0x8] sm:$0xff] %vm805_vm7, %v1788_v40  ;;  %v1705_v46 = vadd.f32 %v1663_v45, %v1500_v28  ;;  %v1708_v30 = vadd.f32 %v1674_v49, %v1503_v58 }
 0x1d0   : > { %1844 = vst.msk [vmem:[%s3095_s18 + $0xc8] sm:$0xff] %vm805_vm7, %v1812_v53  ;;  %v1746_v19 = vmul.f32 %v3074_v37, %v1707_v54  ;;  %v1706_v50 = vadd.f32 %v1666_v56, %v1501_v61 }
 0x1d1   : > { %v1744_v20 = vmul.f32 %v3074_v37, %v1705_v46  ;;  %v1747_v57 = vmul.f32 %v3074_v37, %v1708_v30 }
 0x1d2   : > { %v1785_v17 = vadd.f32 %v3081_v44, %v1746_v19  ;;  %v1745_v52 = vmul.f32 %v3074_v37, %v1706_v50 }
 0x1d3   : > { %v1783_v13 = vadd.f32 %v3081_v44, %v1744_v20  ;;  %v1786_v59 = vadd.f32 %v3081_v44, %v1747_v57 }
 0x1d4   : > { %v1817_v6 = vmax.f32 %v1785_v17, 0.0  ;;  %v1784_v31 = vadd.f32 %v3081_v44, %v1745_v52 }
 0x1d5   : > { %v1815_v8 = vmax.f32 %v1783_v13, 0.0  ;;  %v1818_v1 = vmax.f32 %v1786_v59, 0.0 }
 0x1d6   : > { %1849 = vst.msk [vmem:[%s3095_s18 + $0xf0] sm:$0xff] %vm805_vm7, %v1817_v6  ;;  %v1816_v3 = vmax.f32 %v1784_v31, 0.0 }
 0x1d7   : > { %1847 = vst.msk [vmem:[%s3095_s18 + $0xe0] sm:$0xff] %vm805_vm7, %v1815_v8  ;;  %1850 = vst.msk [vmem:[%s3095_s18 + $0xf8] sm:$0xff] %vm805_vm7, %v1818_v1 }
 0x1d8   : > { %1848 = vst.msk [vmem:[%s3095_s18 + $0xe8] sm:$0xff] %vm805_vm7, %v1816_v3 }
 0x1d9 PF: > { %s16_s25 = sadd.s32 1, %s2480_s25   ;;  %s3292_s21 = smov %s2472_s23 }
 0x1da   : > { %p13_p12 = scmp.ge.s32.totalorder %s16_s25, 10   ;;  %s3293_s22 = smov %s2476_s24 }
 0x1db   : > { %s3294_s23 = smov %s3297_s26  ;;  %s3295_s24 = smov %s3301_s27 }
 0x1dc   :  { %15 = sbr.rel (!%p13_p12) target bundleno = 3 (0x3), region = 82 }

// kernel: _lambda_.5
= control target key start
LH: loop header
LB: loop body
LE: loop exit
PB: predicated region body
PF: predicated region fallthrough
CT: control target
= control target key end

     0   :  { %s8043_s21 = smov 0   ;;  %s10656_s0 = inlined_call_operand.vmem [shape: bf16[2048,4], index: 0, kind: input, shape index: {}]   ;;  %s10657_s1 = inlined_call_operand.vmem [shape: bf16[2048,4], index: 1, kind: input, shape index: {}]   ;;  %s10658_s2 = inlined_call_operand.vmem [shape: bf16[4,4], index: 2, kind: input, shape index: {}]   ;;  %s10659_s3 = inlined_call_operand.vmem [shape: f32[1,4], index: 3, kind: input, shape index: {}]   ;;  %s10660_s4 = inlined_call_operand.vmem [shape: f32[1,4], index: 4, kind: input, shape index: {}]   ;;  %s10661_s5 = inlined_call_operand.vmem [shape: bf16[4,4], index: 5, kind: input, shape index: {}]   ;;  %s10662_s6 = inlined_call_operand.vmem [shape: f32[1,4], index: 6, kind: input, shape index: {}]   ;;  %s10663_s7 = inlined_call_operand.vmem [shape: f32[1,4], index: 7, kind: input, shape index: {}]   ;;  %s10664_s8 = inlined_call_operand.vmem [shape: f32[1,4], index: 8, kind: input, shape index: {}]   ;;  %s10665_s9 = inlined_call_operand.<no memory space> [shape: f32[1,1], index: 9, kind: input, shape index: {}]   ;;  %s10666_s11 = inlined_call_operand.vmem [shape: bf16[2048,4], index: 11, kind: output, shape index: {}]   ;;  %s10667_s10 = inlined_call_operand.<no memory space> [shape: f32[1,1], index: 10, kind: input, shape index: {}]  }
   0x1   :  { %v16_v0 = vstv %s10665_s9  ;;  %v18_v1 = vstv %s10667_s10 }
   0x2   :  { %17 = vst [vmem:[#allocation2] sm:$0x1] %v16_v0  ;;  %19 = vst [vmem:[#allocation3] sm:$0x1] %v18_v1 }
   0x3 LB: > { %s6499_s22 = sadd.s32 4294967295, %s7974_s21   ;;  %p6503_p0 = scmp.ge.s32.totalorder %s7974_s21, 1  ;;  %s7974_s21 = sphi %s8043_s21, %s25_s21  }
   0x4   : > { %p353_p1 = scmp.lt.s32.totalorder %s7974_s21, 3 }
   0x6   : > { %p354_p2 = pnand %p6503_p0, %p353_p1 }
   0x8   : > { %357 = sbr.rel (%p354_p2) target bundleno = 1415 (0x587), region = 64 }
   0xf   : > { %v545_v2 = vld [vmem:[%s10658_s2] sm:$0x3]  ;;  %vm1059_vm0 = vcmask 1041408   ;;  %s6504_s25 = sshll.u32 %s6499_s22, 7  ;;  %vm866_vm1 = vcmask 31744   ;;  %vm6302_vm2 = vcmask 27648  }
  0x10   : > { %v2006_v3 = vld [vmem:[%s10661_s5] sm:$0x3]  ;;  %7421 = vmatprep.subr.msk.bf16.mxu0 %vm1059_vm0, %v545_v2  ;;  %v1061_v4 = vsel %vm1059_vm0, %v545_v2, 0  ;;  %p399_p3 = scmp.lt.s32.totalorder %s6504_s25, 255 }
  0x11   : > { %7422 = vmatprep.subr.msk.bf16.mxu1 %vm1059_vm0, %v2006_v3  ;;  %v2520_v5 = vsel %vm1059_vm0, %v2006_v3, 0  ;;  %7162 = vmatpush3.bf16.msra.mxu0 %v1061_v4 }
  0x12   : > { %7292 = vmatpush3.bf16.msra.mxu1 %v2520_v5  ;;  %s10767_s25 = smov (!%p399_p3, %s6504_s25), 255 }
  0x13   : > { %s8057_s26 = sshll.u32 %s10767_s25, 2 }
  0x14   : > { %s8063_s29 = scalar_lea.vmem %s10656_s0, %s8057_s26  ;;  %s8069_s13 = scalar_lea.vmem %s10657_s1, %s8057_s26 }
  0x15   : > { %v7434_v6 = vld [vmem:[%s8063_s29] sm:$0xff]   ;;  %v7436_v8 = vld [vmem:[%s8063_s29 + $0x8] sm:$0xff]   ;;  %v7438_v10 = vld [vmem:[%s8063_s29 + $0x10] sm:$0xff]   ;;  %s9345_s30 = scalar_lea.vmem %s10666_s11, %s8057_s26 }
  0x16   : > { %v1878_v7 = vld [vmem:[%s8069_s13] sm:$0xff]   ;;  %7163 = vmatprep.mubr.msk.bf16.mxu0 %vm866_vm1, %v7434_v6  ;;  %v1880_v9 = vld [vmem:[%s8069_s13 + $0x8] sm:$0xff]   ;;  %v1882_v11 = vld [vmem:[%s8069_s13 + $0x10] sm:$0xff]  }
  0x17   : > { %7293 = vmatprep.mubr.msk.bf16.mxu1 %vm866_vm1, %v1878_v7  ;;  %7164 = vmatmul.mubr.msk.bf16.vlgmr.msra.gmra.mrb[0].mxu0 %vm866_vm1, %v7436_v8  ;;  %v1884_v12 = vld [vmem:[%s8069_s13 + $0x18] sm:$0xff]   ;;  %v1886_v13 = vld [vmem:[%s8069_s13 + $0x20] sm:$0xff]   ;;  %v1888_v16 = vld [vmem:[%s8069_s13 + $0x28] sm:$0xff]  }
  0x18   : > { %7294 = vmatmul.mubr.msk.bf16.vlgmr.msra.gmra.mrb[0].mxu1 %vm866_vm1, %v1880_v9  ;;  %7167 = vmatprep.mubr.msk.bf16.mxu0 %vm866_vm1, %v7438_v10  ;;  %v7440_v14 = vld [vmem:[%s8063_s29 + $0x18] sm:$0xff]   ;;  %v7442_v15 = vld [vmem:[%s8063_s29 + $0x20] sm:$0xff]   ;;  %v1890_v17 = vld [vmem:[%s8069_s13 + $0x30] sm:$0xff]  }
  0x19   : > { %7297 = vmatprep.mubr.msk.bf16.mxu1 %vm866_vm1, %v1882_v11  ;;  %v7444_v18 = vld [vmem:[%s8063_s29 + $0x28] sm:$0xff]   ;;  %v7446_v19 = vld [vmem:[%s8063_s29 + $0x30] sm:$0xff]   ;;  %v1892_v20 = vld [vmem:[%s8069_s13 + $0x38] sm:$0xff]  }
  0x1a   : > { %v1894_v21 = vld [vmem:[%s8069_s13 + $0x40] sm:$0xff]   ;;  %v7448_v22 = vld [vmem:[%s8063_s29 + $0x38] sm:$0xff]   ;;  %v1896_v24 = vld [vmem:[%s8069_s13 + $0x48] sm:$0xff]  }
  0x1b   : > { %v7450_v23 = vld [vmem:[%s8063_s29 + $0x40] sm:$0xff]   ;;  %v1898_v25 = vld [vmem:[%s8069_s13 + $0x50] sm:$0xff]   ;;  %v7452_v26 = vld [vmem:[%s8063_s29 + $0x48] sm:$0xff]  }
  0x1c   : > { %v7454_v27 = vld [vmem:[%s8063_s29 + $0x50] sm:$0xff]   ;;  %v1900_v28 = vld [vmem:[%s8069_s13 + $0x58] sm:$0xff]   ;;  %v1902_v29 = vld [vmem:[%s8069_s13 + $0x60] sm:$0xff]  }
  0x1d   : > { %v7456_v30 = vld [vmem:[%s8063_s29 + $0x58] sm:$0xff]   ;;  %v7458_v31 = vld [vmem:[%s8063_s29 + $0x60] sm:$0xff]   ;;  %v1904_v32 = vld [vmem:[%s8069_s13 + $0x68] sm:$0xff]  }
  0x1e   : > { %v1906_v33 = vld [vmem:[%s8069_s13 + $0x70] sm:$0xff]   ;;  %v7460_v34 = vld [vmem:[%s8063_s29 + $0x68] sm:$0xff]   ;;  %v7464_v36 = vld [vmem:[%s8063_s29 + $0x78] sm:$0xff]  }
  0x1f   : > { %7168 = vmatmul.mubr.msk.bf16.gmra.mrb[4].mxu0 %vm866_vm1, %v7440_v14  ;;  %v7462_v35 = vld [vmem:[%s8063_s29 + $0x70] sm:$0xff]   ;;  %v1908_v37 = vld [vmem:[%s8069_s13 + $0x78] sm:$0xff]   ;;  %v7466_v38 = vld [vmem:[%s8063_s29 + $0x80] sm:$0xff]  }
  0x20   : > { %7298 = vmatmul.mubr.msk.bf16.gmra.mrb[4].mxu1 %vm866_vm1, %v1884_v12  ;;  %7171 = vmatprep.mubr.msk.bf16.mxu0 %vm866_vm1, %v7442_v15  ;;  %v1910_v39 = vld [vmem:[%s8069_s13 + $0x80] sm:$0xff]   ;;  %v1912_v40 = vld [vmem:[%s8069_s13 + $0x88] sm:$0xff]   ;;  %v1914_v41 = vld [vmem:[%s8069_s13 + $0x90] sm:$0xff]  }
  0x21   : > { %7301 = vmatprep.mubr.msk.bf16.mxu1 %vm866_vm1, %v1886_v13  ;;  %v7468_v42 = vld [vmem:[%s8063_s29 + $0x88] sm:$0xff]   ;;  %v7470_v43 = vld [vmem:[%s8063_s29 + $0x90] sm:$0xff]   ;;  %v1916_v44 = vld [vmem:[%s8069_s13 + $0x98] sm:$0xff]  }
  0x22   : > { %v1918_v45 = vld [vmem:[%s8069_s13 + $0xa0] sm:$0xff]   ;;  %v7472_v46 = vld [vmem:[%s8063_s29 + $0x98] sm:$0xff]   ;;  %v1920_v48 = vld [vmem:[%s8069_s13 + $0xa8] sm:$0xff]  }
  0x23   : > { %v7474_v47 = vld [vmem:[%s8063_s29 + $0xa0] sm:$0xff]   ;;  %v1922_v49 = vld [vmem:[%s8069_s13 + $0xb0] sm:$0xff]   ;;  %v7476_v50 = vld [vmem:[%s8063_s29 + $0xa8] sm:$0xff]  }
  0x24   : > { %v7478_v51 = vld [vmem:[%s8063_s29 + $0xb0] sm:$0xff]   ;;  %v1924_v52 = vld [vmem:[%s8069_s13 + $0xb8] sm:$0xff]   ;;  %v1926_v53 = vld [vmem:[%s8069_s13 + $0xc0] sm:$0xff]  }
  0x25   : > { %v7480_v54 = vld [vmem:[%s8063_s29 + $0xb8] sm:$0xff]   ;;  %v7482_v55 = vld [vmem:[%s8063_s29 + $0xc0] sm:$0xff]   ;;  %v1928_v56 = vld [vmem:[%s8069_s13 + $0xc8] sm:$0xff]  }
  0x26   : > { %v1930_v57 = vld [vmem:[%s8069_s13 + $0xd0] sm:$0xff]   ;;  %v7484_v58 = vld [vmem:[%s8063_s29 + $0xc8] sm:$0xff]   ;;  %v1932_v60 = vld [vmem:[%s8069_s13 + $0xd8] sm:$0xff]  }
  0x27   : > { %7172 = vmatmul.mubr.msk.bf16.gmra.mrb[8].mxu0 %vm866_vm1, %v7444_v18  ;;  %v7486_v59 = vld [vmem:[%s8063_s29 + $0xd0] sm:$0xff]   ;;  %v1934_v61 = vld [vmem:[%s8069_s13 + $0xe0] sm:$0xff]   ;;  %v7488_v62 = vld [vmem:[%s8063_s29 + $0xd8] sm:$0xff]  }
  0x28   : > { %7302 = vmatmul.mubr.msk.bf16.gmra.mrb[8].mxu1 %vm866_vm1, %v1888_v16  ;;  %7175 = vmatprep.mubr.msk.bf16.mxu0 %vm866_vm1, %v7446_v19  ;;  %v7490_v63 = vld [vmem:[%s8063_s29 + $0xe0] sm:$0xff]   ;;  %v1936_v0 = vld [vmem:[%s8069_s13 + $0xe8] sm:$0xff]   ;;  %v1938_v1 = vld [vmem:[%s8069_s13 + $0xf0] sm:$0xff]  }
  0x29   : > { %7305 = vmatprep.mubr.msk.bf16.mxu1 %vm866_vm1, %v1890_v17  ;;  %v7492_v2 = vld [vmem:[%s8063_s29 + $0xe8] sm:$0xff]   ;;  %v7494_v3 = vld [vmem:[%s8063_s29 + $0xf0] sm:$0xff]   ;;  %v1940_v4 = vld [vmem:[%s8069_s13 + $0xf8] sm:$0xff]  }
  0x2a   : > { %v1942_v5 = vld [vmem:[%s8069_s13 + $0x100] sm:$0xff]   ;;  %v7496_v6 = vld [vmem:[%s8063_s29 + $0xf8] sm:$0xff]   ;;  %v1944_v8 = vld [vmem:[%s8069_s13 + $0x108] sm:$0xff]  }
  0x2b   : > { %v7498_v7 = vld [vmem:[%s8063_s29 + $0x100] sm:$0xff]   ;;  %v1946_v9 = vld [vmem:[%s8069_s13 + $0x110] sm:$0xff]   ;;  %v7500_v10 = vld [vmem:[%s8063_s29 + $0x108] sm:$0xff]  }
  0x2c   : > { %v7502_v11 = vld [vmem:[%s8063_s29 + $0x110] sm:$0xff]   ;;  %v1948_v12 = vld [vmem:[%s8069_s13 + $0x118] sm:$0xff]   ;;  %v1950_v13 = vld [vmem:[%s8069_s13 + $0x120] sm:$0xff]  }
  0x2d   : > { %v7504_v14 = vld [vmem:[%s8063_s29 + $0x118] sm:$0xff]   ;;  %v7506_v15 = vld [vmem:[%s8063_s29 + $0x120] sm:$0xff]   ;;  %v1952_v16 = vld [vmem:[%s8069_s13 + $0x128] sm:$0xff]  }
  0x2e   : > { %v1954_v17 = vld [vmem:[%s8069_s13 + $0x130] sm:$0xff]   ;;  %v7508_v18 = vld [vmem:[%s8063_s29 + $0x128] sm:$0xff]  }
  0x2f   : > { %7176 = vmatmul.mubr.msk.bf16.gmra.mrb[12].mxu0 %vm866_vm1, %v7448_v22  ;;  %v7510_v19 = vld [vmem:[%s8063_s29 + $0x130] sm:$0xff]   ;;  %v7512_v22 = vld [vmem:[%s8063_s29 + $0x138] sm:$0xff]  }
  0x30   : > { %7306 = vmatmul.mubr.msk.bf16.gmra.mrb[12].mxu1 %vm866_vm1, %v1892_v20  ;;  %7179 = vmatprep.mubr.msk.bf16.mxu0 %vm866_vm1, %v7450_v23  ;;  %v1956_v20 = vld [vmem:[%s8069_s13 + $0x138] sm:$0xff]   ;;  %v7514_v23 = vld [vmem:[%s8063_s29 + $0x140] sm:$0xff]  }
  0x31   : > { %7309 = vmatprep.mubr.msk.bf16.mxu1 %vm866_vm1, %v1894_v21  ;;  %v1958_v21 = vld [vmem:[%s8069_s13 + $0x140] sm:$0xff]  }
  0x37   : > { %7180 = vmatmul.mubr.msk.bf16.gmra.mrb[16].mxu0 %vm866_vm1, %v7452_v26  ;;  %v7516_v26 = vld [vmem:[%s8063_s29 + $0x148] sm:$0xff]  }
  0x38   : > { %7310 = vmatmul.mubr.msk.bf16.gmra.mrb[16].mxu1 %vm866_vm1, %v1896_v24  ;;  %7183 = vmatprep.mubr.msk.bf16.mxu0 %vm866_vm1, %v7454_v27  ;;  %v1960_v24 = vld [vmem:[%s8069_s13 + $0x148] sm:$0xff]   ;;  %v7518_v27 = vld [vmem:[%s8063_s29 + $0x150] sm:$0xff]  }
  0x39   : > { %7313 = vmatprep.mubr.msk.bf16.mxu1 %vm866_vm1, %v1898_v25  ;;  %v1962_v25 = vld [vmem:[%s8069_s13 + $0x150] sm:$0xff]  }
  0x3f   : > { %7184 = vmatmul.mubr.msk.bf16.gmra.mrb[20].mxu0 %vm866_vm1, %v7456_v30  ;;  %v7520_v30 = vld [vmem:[%s8063_s29 + $0x158] sm:$0xff]  }
  0x40   : > { %7314 = vmatmul.mubr.msk.bf16.gmra.mrb[20].mxu1 %vm866_vm1, %v1900_v28  ;;  %7187 = vmatprep.mubr.msk.bf16.mxu0 %vm866_vm1, %v7458_v31  ;;  %v1964_v28 = vld [vmem:[%s8069_s13 + $0x158] sm:$0xff]   ;;  %v7522_v31 = vld [vmem:[%s8063_s29 + $0x160] sm:$0xff]  }
  0x41   : > { %7317 = vmatprep.mubr.msk.bf16.mxu1 %vm866_vm1, %v1902_v29  ;;  %v1966_v29 = vld [vmem:[%s8069_s13 + $0x160] sm:$0xff]  }
  0x47   : > { %7188 = vmatmul.mubr.msk.bf16.gmra.mrb[24].mxu0 %vm866_vm1, %v7460_v34  ;;  %v7524_v34 = vld [vmem:[%s8063_s29 + $0x168] sm:$0xff]  }
  0x48   : > { %7318 = vmatmul.mubr.msk.bf16.gmra.mrb[24].mxu1 %vm866_vm1, %v1904_v32  ;;  %7191 = vmatprep.mubr.msk.bf16.mxu0 %vm866_vm1, %v7462_v35  ;;  %v1968_v32 = vld [vmem:[%s8069_s13 + $0x168] sm:$0xff]   ;;  %v7526_v35 = vld [vmem:[%s8063_s29 + $0x170] sm:$0xff]  }
  0x49   : > { %7321 = vmatprep.mubr.msk.bf16.mxu1 %vm866_vm1, %v1906_v33  ;;  %v1970_v33 = vld [vmem:[%s8069_s13 + $0x170] sm:$0xff]  }
  0x4f   : > { %7192 = vmatmul.mubr.msk.bf16.gmra.mrb[28].mxu0 %vm866_vm1, %v7464_v36  ;;  %v1972_v36 = vld [vmem:[%s8069_s13 + $0x178] sm:$0xff]  }
  0x50   : > { %7322 = vmatmul.mubr.msk.bf16.gmra.mrb[28].mxu1 %vm866_vm1, %v1908_v37  ;;  %7195 = vmatprep.mubr.msk.bf16.mxu0 %vm866_vm1, %v7466_v38  ;;  %v7528_v37 = vld [vmem:[%s8063_s29 + $0x178] sm:$0xff]   ;;  %v8266_v38 = vld [vmem:[%s10659_s3] ss:$0 sm:$0xff] }
  0x51   : > { %7325 = vmatprep.mubr.msk.bf16.mxu1 %vm866_vm1, %v1910_v39  ;;  %v8271_v39 = vld [vmem:[%s10662_s6] ss:$0 sm:$0xff] }
  0x57   : > { %7196 = vmatmul.mubr.msk.bf16.gmra.mrb[32].mxu0 %vm866_vm1, %v7468_v42 }
  0x58   : > { %7326 = vmatmul.mubr.msk.bf16.gmra.mrb[32].mxu1 %vm866_vm1, %v1912_v40  ;;  %7199 = vmatprep.mubr.msk.bf16.mxu0 %vm866_vm1, %v7470_v43 }
  0x59   : > { %7329 = vmatprep.mubr.msk.bf16.mxu1 %vm866_vm1, %v1914_v41  ;;  %v8276_v41 = vld [vmem:[%s10660_s4] ss:$0 sm:$0xff] }
  0x5f   : > { %7200 = vmatmul.mubr.msk.bf16.gmra.mrb[36].mxu0 %vm866_vm1, %v7472_v46 }
  0x60   : > { %7330 = vmatmul.mubr.msk.bf16.gmra.mrb[36].mxu1 %vm866_vm1, %v1916_v44  ;;  %7203 = vmatprep.mubr.msk.bf16.mxu0 %vm866_vm1, %v7474_v47  ;;  %v8282_v44 = vld [vmem:[%s10663_s7] ss:$0 sm:$0xff] }
  0x61   : > { %7333 = vmatprep.mubr.msk.bf16.mxu1 %vm866_vm1, %v1918_v45 }
  0x67   : > { %7204 = vmatmul.mubr.msk.bf16.gmra.mrb[40].mxu0 %vm866_vm1, %v7476_v50 }
  0x68   : > { %7334 = vmatmul.mubr.msk.bf16.gmra.mrb[40].mxu1 %vm866_vm1, %v1920_v48  ;;  %7207 = vmatprep.mubr.msk.bf16.mxu0 %vm866_vm1, %v7478_v51 }
  0x69   : > { %7337 = vmatprep.mubr.msk.bf16.mxu1 %vm866_vm1, %v1922_v49 }
  0x6f   : > { %7208 = vmatmul.mubr.msk.bf16.gmra.mrb[44].mxu0 %vm866_vm1, %v7480_v54 }
  0x70   : > { %7338 = vmatmul.mubr.msk.bf16.gmra.mrb[44].mxu1 %vm866_vm1, %v1924_v52  ;;  %7211 = vmatprep.mubr.msk.bf16.mxu0 %vm866_vm1, %v7482_v55 }
  0x71   : > { %7341 = vmatprep.mubr.msk.bf16.mxu1 %vm866_vm1, %v1926_v53 }
  0x77   : > { %7212 = vmatmul.mubr.msk.bf16.gmra.mrb[48].mxu0 %vm866_vm1, %v7484_v58 }
  0x78   : > { %7342 = vmatmul.mubr.msk.bf16.gmra.mrb[48].mxu1 %vm866_vm1, %v1928_v56  ;;  %7215 = vmatprep.mubr.msk.bf16.mxu0 %vm866_vm1, %v7486_v59 }
  0x79   : > { %7345 = vmatprep.mubr.msk.bf16.mxu1 %vm866_vm1, %v1930_v57 }
  0x7f   : > { %7216 = vmatmul.mubr.msk.bf16.gmra.mrb[52].mxu0 %vm866_vm1, %v7488_v62 }
  0x80   : > { %7346 = vmatmul.mubr.msk.bf16.gmra.mrb[52].mxu1 %vm866_vm1, %v1932_v60  ;;  %7219 = vmatprep.mubr.msk.bf16.mxu0 %vm866_vm1, %v7490_v63 }
  0x81   : > { %7349 = vmatprep.mubr.msk.bf16.mxu1 %vm866_vm1, %v1934_v61 }
  0x87   : > { %7220 = vmatmul.mubr.msk.bf16.gmra.mrb[56].mxu0 %vm866_vm1, %v7492_v2 }
  0x88   : > { %7350 = vmatmul.mubr.msk.bf16.gmra.mrb[56].mxu1 %vm866_vm1, %v1936_v0  ;;  %7223 = vmatprep.mubr.msk.bf16.mxu0 %vm866_vm1, %v7494_v3  ;;  %v8302_v3 = vld [vmem:[%s10664_s8] ss:$0 sm:$0xff] }
  0x89   : > { %7353 = vmatprep.mubr.msk.bf16.mxu1 %vm866_vm1, %v1938_v1 }
  0x8f   : > { %7224 = vmatmul.mubr.msk.bf16.gmra.mrb[60].mxu0 %vm866_vm1, %v7496_v6 }
  0x90   : > { %7354 = vmatmul.mubr.msk.bf16.gmra.mrb[60].mxu1 %vm866_vm1, %v1940_v4  ;;  %7227 = vmatprep.mubr.msk.bf16.mxu0 %vm866_vm1, %v7498_v7 }
  0x91   : > { %7357 = vmatprep.mubr.msk.bf16.mxu1 %vm866_vm1, %v1942_v5 }
  0x97   : > { %7228 = vmatmul.mubr.msk.bf16.gmra.mrb[64].mxu0 %vm866_vm1, %v7500_v10 }
  0x98   : > { %7358 = vmatmul.mubr.msk.bf16.gmra.mrb[64].mxu1 %vm866_vm1, %v1944_v8  ;;  %7231 = vmatprep.mubr.msk.bf16.mxu0 %vm866_vm1, %v7502_v11 }
  0x99   : > { %7361 = vmatprep.mubr.msk.bf16.mxu1 %vm866_vm1, %v1946_v9 }
  0x9f   : > { %7232 = vmatmul.mubr.msk.bf16.gmra.mrb[68].mxu0 %vm866_vm1, %v7504_v14 }
  0xa0   : > { %7362 = vmatmul.mubr.msk.bf16.gmra.mrb[68].mxu1 %vm866_vm1, %v1948_v12  ;;  %7235 = vmatprep.mubr.msk.bf16.mxu0 %vm866_vm1, %v7506_v15 }
  0xa1   : > { %7365 = vmatprep.mubr.msk.bf16.mxu1 %vm866_vm1, %v1950_v13 }
  0xa7   : > { %7236 = vmatmul.mubr.msk.bf16.gmra.mrb[72].mxu0 %vm866_vm1, %v7508_v18 }
  0xa8   : > { %7366 = vmatmul.mubr.msk.bf16.gmra.mrb[72].mxu1 %vm866_vm1, %v1952_v16  ;;  %7239 = vmatprep.mubr.msk.bf16.mxu0 %vm866_vm1, %v7510_v19 }
  0xa9   : > { %7369 = vmatprep.mubr.msk.bf16.mxu1 %vm866_vm1, %v1954_v17 }
  0xaf   : > { %7240 = vmatmul.mubr.msk.bf16.gmra.mrb[76].mxu0 %vm866_vm1, %v7512_v22 }
  0xb0   : > { %7370 = vmatmul.mubr.msk.bf16.gmra.mrb[76].mxu1 %vm866_vm1, %v1956_v20  ;;  %7243 = vmatprep.mubr.msk.bf16.mxu0 %vm866_vm1, %v7514_v23 }
  0xb1   : > { %7373 = vmatprep.mubr.msk.bf16.mxu1 %vm866_vm1, %v1958_v21 }
  0xb7   : > { %7244 = vmatmul.mubr.msk.bf16.gmra.mrb[80].mxu0 %vm866_vm1, %v7516_v26 }
  0xb8   : > { %7374 = vmatmul.mubr.msk.bf16.gmra.mrb[80].mxu1 %vm866_vm1, %v1960_v24  ;;  %7247 = vmatprep.mubr.msk.bf16.mxu0 %vm866_vm1, %v7518_v27 }
  0xb9   : > { %7377 = vmatprep.mubr.msk.bf16.mxu1 %vm866_vm1, %v1962_v25  ;;  %v7530_v25 = vld [vmem:[%s8063_s29 + $0x180] sm:$0xff]  }
  0xbf   : > { %7248 = vmatmul.mubr.msk.bf16.gmra.mrb[84].mxu0 %vm866_vm1, %v7520_v30 }
  0xc0   : > { %7378 = vmatmul.mubr.msk.bf16.gmra.mrb[84].mxu1 %vm866_vm1, %v1964_v28  ;;  %7251 = vmatprep.mubr.msk.bf16.mxu0 %vm866_vm1, %v7522_v31 }
  0xc1   : > { %7381 = vmatprep.mubr.msk.bf16.mxu1 %vm866_vm1, %v1966_v29 }
  0xc7   : > { %7252 = vmatmul.mubr.msk.bf16.gmra.mrb[88].mxu0 %vm866_vm1, %v7524_v34 }
  0xc8   : > { %7382 = vmatmul.mubr.msk.bf16.gmra.mrb[88].mxu1 %vm866_vm1, %v1968_v32  ;;  %7255 = vmatprep.mubr.msk.bf16.mxu0 %vm866_vm1, %v7526_v35  ;;  %v1974_v35 = vld [vmem:[%s8069_s13 + $0x180] sm:$0xff]  }
  0xc9   : > { %7385 = vmatprep.mubr.msk.bf16.mxu1 %vm866_vm1, %v1970_v33 }
  0xcf   : > { %7256 = vmatmul.mubr.msk.bf16.gmra.mrb[92].mxu0 %vm866_vm1, %v7528_v37 }
  0xd0   : > { %7386 = vmatmul.mubr.msk.bf16.gmra.mrb[92].mxu1 %vm866_vm1, %v1972_v36  ;;  %7259 = vmatprep.mubr.msk.bf16.mxu0 %vm866_vm1, %v7530_v25  ;;  %v1976_v36 = vld [vmem:[%s8069_s13 + $0x188] sm:$0xff]  }
  0xd1   : > { %7389 = vmatprep.mubr.msk.bf16.mxu1 %vm866_vm1, %v1974_v35 }
  0xd8   : > { %7390 = vmatmul.mubr.msk.bf16.gmra.mrb[96].mxu1 %vm866_vm1, %v1976_v36 }
  0xea   : > { %v7165_v40 = vpop.f32.mrb[0].mxu0 }
  0xeb   : > { %v1617_v42 = vmul.f32 %v7165_v40, %v8266_v38  ;;  %v7295_v43 = vpop.f32.mrb[0].mxu1  ;;  %v1097_v45 = vpop.f32.mrb[1].mxu0 }
  0xec   : > { %v3076_v46 = vmul.f32 %v7295_v43, %v8271_v39  ;;  %v1615_v47 = vmul.f32 %v8266_v38, %v1097_v45  ;;  %v2556_v48 = vpop.f32.mrb[1].mxu1  ;;  %v7166_v49 = vpop.f32.mrb[2].mxu0  ;;  %v7532_v45 = vld [vmem:[%s8063_s29 + $0x188] sm:$0xff]  }
  0xed   : > { %v1752_v50 = vadd.f32 %v8276_v41, %v1617_v42  ;;  %v3074_v51 = vmul.f32 %v8271_v39, %v2556_v48  ;;  %v1618_v52 = vmul.f32 %v7166_v49, %v8266_v38  ;;  %v7296_v53 = vpop.f32.mrb[2].mxu1  ;;  %v1100_v54 = vpop.f32.mrb[3].mxu0  ;;  %7260 = vmatmul.mubr.msk.bf16.gmra.mrb[96].mxu0 %vm866_vm1, %v7532_v45 }
  0xee   : > { %v3211_v55 = vadd.f32 %v8282_v44, %v3076_v46  ;;  %v1750_v56 = vadd.f32 %v8276_v41, %v1615_v47  ;;  %v3077_v57 = vmul.f32 %v7296_v53, %v8271_v39  ;;  %v1616_v58 = vmul.f32 %v8266_v38, %v1100_v54  ;;  %v2559_v59 = vpop.f32.mrb[3].mxu1 }
  0xef   : > { %v3209_v60 = vadd.f32 %v8282_v44, %v3074_v51  ;;  %v1753_v61 = vadd.f32 %v8276_v41, %v1618_v52  ;;  %v3075_v62 = vmul.f32 %v8271_v39, %v2559_v59 }
  0xf0   : > { %v3212_v63 = vadd.f32 %v8282_v44, %v3077_v57  ;;  %v1751_v0 = vadd.f32 %v8276_v41, %v1616_v58  ;;  %v3339_v1 = vadd.f32 %v3211_v55, %v1752_v50 }
  0xf1   : > { %v3210_v2 = vadd.f32 %v8282_v44, %v3075_v62  ;;  %v3337_v4 = vadd.f32 %v3209_v60, %v1750_v56 }
  0xf2   : > { %v3340_v5 = vadd.f32 %v3212_v63, %v1753_v61  ;;  %v7169_v6 = vpop.f32.mrb[4].mxu0  ;;  %v3467_v7 = vmax.f32 %v3339_v1, 0.0 }
  0xf3   : > { %v3338_v8 = vadd.f32 %v3210_v2, %v1751_v0  ;;  %v1621_v9 = vmul.f32 %v7169_v6, %v8266_v38  ;;  %v7299_v10 = vpop.f32.mrb[4].mxu1  ;;  %v1113_v11 = vpop.f32.mrb[5].mxu0  ;;  %v3465_v12 = vmax.f32 %v3337_v4, 0.0 }
  0xf4   : > { %v3080_v13 = vmul.f32 %v7299_v10, %v8271_v39  ;;  %v1619_v14 = vmul.f32 %v8266_v38, %v1113_v11  ;;  %v2572_v15 = vpop.f32.mrb[5].mxu1  ;;  %v7170_v16 = vpop.f32.mrb[6].mxu0  ;;  %v3602_v17 = vmul.f32 %v8302_v3, %v3467_v7  ;;  %v3468_v18 = vmax.f32 %v3340_v5, 0.0 }
  0xf5   : > { %v1756_v19 = vadd.f32 %v8276_v41, %v1621_v9  ;;  %v3078_v20 = vmul.f32 %v8271_v39, %v2572_v15  ;;  %v1622_v21 = vmul.f32 %v7170_v16, %v8266_v38  ;;  %v7300_v22 = vpop.f32.mrb[6].mxu1  ;;  %v1116_v23 = vpop.f32.mrb[7].mxu0  ;;  %v3600_v24 = vmul.f32 %v8302_v3, %v3465_v12 }
  0xf6   : > { %v3215_v26 = vadd.f32 %v8282_v44, %v3080_v13  ;;  %v1754_v27 = vadd.f32 %v8276_v41, %v1619_v14  ;;  %v3081_v28 = vmul.f32 %v7300_v22, %v8271_v39  ;;  %v1620_v29 = vmul.f32 %v8266_v38, %v1116_v23  ;;  %v2575_v30 = vpop.f32.mrb[7].mxu1 }
  0xf7   : > { %v3213_v31 = vadd.f32 %v8282_v44, %v3078_v20  ;;  %v1757_v32 = vadd.f32 %v8276_v41, %v1622_v21  ;;  %v3079_v33 = vmul.f32 %v8271_v39, %v2575_v30  ;;  %v3734_v34 = vsel %vm866_vm1, %v3602_v17, 0.0 }
  0xf8   : > { %v3343_v37 = vadd.f32 %v3215_v26, %v1756_v19  ;;  %v3216_v40 = vadd.f32 %v8282_v44, %v3081_v28  ;;  %v1755_v42 = vadd.f32 %v8276_v41, %v1620_v29  ;;  %3735 = vadd.xlane.f32.xlu1 %v3734_v34  ;;  %v3728_v43 = vsel %vm866_vm1, %v3600_v24, 0.0 }
  0xf9   : > { %v3341_v46 = vadd.f32 %v3213_v31, %v1754_v27  ;;  %v3214_v47 = vadd.f32 %v8282_v44, %v3079_v33  ;;  %3729 = vadd.xlane.f32.xlu0 %v3728_v43  ;;  %v3603_v48 = vmul.f32 %v8302_v3, %v3468_v18  ;;  %v3466_v49 = vmax.f32 %v3338_v8, 0.0 }
  0xfa   : > { %v3344_v50 = vadd.f32 %v3216_v40, %v1757_v32  ;;  %v7173_v51 = vpop.f32.mrb[8].mxu0  ;;  %v3471_v52 = vmax.f32 %v3343_v37, 0.0 }
  0xfb   : > { %v3342_v53 = vadd.f32 %v3214_v47, %v1755_v42  ;;  %v7303_v54 = vpop.f32.mrb[8].mxu1  ;;  %v3737_v55 = vsel %vm866_vm1, %v3603_v48, 0.0  ;;  %v1625_v56 = vmul.f32 %v7173_v51, %v8266_v38  ;;  %v3601_v57 = vmul.f32 %v8302_v3, %v3466_v49  ;;  %v1129_v58 = vpop.f32.mrb[9].mxu0 }
  0xfc   : > { %v3084_v59 = vmul.f32 %v7303_v54, %v8271_v39  ;;  %3738 = vadd.xlane.f32.xlu1 %v3737_v55  ;;  %v2588_v60 = vpop.f32.mrb[9].mxu1  ;;  %v1623_v61 = vmul.f32 %v8266_v38, %v1129_v58  ;;  %v7174_v62 = vpop.f32.mrb[10].mxu0  ;;  %v3606_v63 = vmul.f32 %v8302_v3, %v3471_v52  ;;  %v3472_v0 = vmax.f32 %v3344_v50, 0.0 }
  0xfd   : > { %v1760_v1 = vadd.f32 %v8276_v41, %v1625_v56  ;;  %v3082_v2 = vmul.f32 %v8271_v39, %v2588_v60  ;;  %v3731_v4 = vsel %vm866_vm1, %v3601_v57, 0.0  ;;  %v1626_v5 = vmul.f32 %v7174_v62, %v8266_v38  ;;  %v7304_v6 = vpop.f32.mrb[10].mxu1  ;;  %v1132_v7 = vpop.f32.mrb[11].mxu0 }
  0xfe   : > { %v3219_v8 = vadd.f32 %v8282_v44, %v3084_v59  ;;  %3732 = vadd.xlane.f32.xlu0 %v3731_v4  ;;  %v1758_v9 = vadd.f32 %v8276_v41, %v1623_v61  ;;  %v3085_v10 = vmul.f32 %v7304_v6, %v8271_v39  ;;  %v1624_v11 = vmul.f32 %v8266_v38, %v1132_v7  ;;  %v2591_v12 = vpop.f32.mrb[11].mxu1 }
  0xff   : > { %v3217_v13 = vadd.f32 %v8282_v44, %v3082_v2  ;;  %v1761_v14 = vadd.f32 %v8276_v41, %v1626_v5  ;;  %v3083_v15 = vmul.f32 %v8271_v39, %v2591_v12  ;;  %v3746_v16 = vsel %vm866_vm1, %v3606_v63, 0.0 }
 0x100   : > { %v3347_v17 = vadd.f32 %v3219_v8, %v1760_v1  ;;  %v3220_v18 = vadd.f32 %v8282_v44, %v3085_v10  ;;  %v1759_v19 = vadd.f32 %v8276_v41, %v1624_v11  ;;  %v3607_v20 = vmul.f32 %v8302_v3, %v3472_v0 }
 0x101   : > { %v3345_v21 = vadd.f32 %v3217_v13, %v1758_v9  ;;  %v3218_v22 = vadd.f32 %v8282_v44, %v3083_v15  ;;  %v3469_v23 = vmax.f32 %v3341_v46, 0.0  ;;  %v3470_v24 = vmax.f32 %v3342_v53, 0.0 }
 0x102   : > { %v3348_v25 = vadd.f32 %v3220_v18, %v1761_v14  ;;  %3747 = vadd.xlane.f32.xlu0 %v3746_v16  ;;  %v3749_v26 = vsel %vm866_vm1, %v3607_v20, 0.0  ;;  %v7177_v27 = vpop.f32.mrb[12].mxu0  ;;  %v3475_v28 = vmax.f32 %v3347_v17, 0.0 }
 0x103   : > { %v3346_v29 = vadd.f32 %v3218_v22, %v1759_v19  ;;  %3750 = vadd.xlane.f32.xlu1 %v3749_v26  ;;  %v1629_v30 = vmul.f32 %v7177_v27, %v8266_v38  ;;  %v7307_v31 = vpop.f32.mrb[12].mxu1  ;;  %v3604_v32 = vmul.f32 %v8302_v3, %v3469_v23  ;;  %v1145_v33 = vpop.f32.mrb[13].mxu0  ;;  %v3605_v34 = vmul.f32 %v8302_v3, %v3470_v24 }
 0x104   : > { %v3088_v35 = vmul.f32 %v7307_v31, %v8271_v39  ;;  %v2604_v36 = vpop.f32.mrb[13].mxu1  ;;  %v1627_v37 = vmul.f32 %v8266_v38, %v1145_v33  ;;  %v7178_v40 = vpop.f32.mrb[14].mxu0  ;;  %v3610_v42 = vmul.f32 %v8302_v3, %v3475_v28  ;;  %v3476_v43 = vmax.f32 %v3348_v25, 0.0 }
 0x105   : > { %v1764_v45 = vadd.f32 %v8276_v41, %v1629_v30  ;;  %v3086_v46 = vmul.f32 %v8271_v39, %v2604_v36  ;;  %v3740_v47 = vsel %vm866_vm1, %v3604_v32, 0.0  ;;  %v7308_v48 = vpop.f32.mrb[14].mxu1  ;;  %v3743_v49 = vsel %vm866_vm1, %v3605_v34, 0.0  ;;  %v1148_v50 = vpop.f32.mrb[15].mxu0 }
 0x106   : > { %v3223_v51 = vadd.f32 %v8282_v44, %v3088_v35  ;;  %3741 = vadd.xlane.f32.xlu0 %v3740_v47  ;;  %v1762_v52 = vadd.f32 %v8276_v41, %v1627_v37  ;;  %v3089_v53 = vmul.f32 %v7308_v48, %v8271_v39  ;;  %v1630_v54 = vmul.f32 %v7178_v40, %v8266_v38  ;;  %v2607_v55 = vpop.f32.mrb[15].mxu1 }
 0x107   : > { %v3221_v56 = vadd.f32 %v8282_v44, %v3086_v46  ;;  %3744 = vadd.xlane.f32.xlu1 %v3743_v49  ;;  %v1628_v57 = vmul.f32 %v8266_v38, %v1148_v50  ;;  %v3087_v58 = vmul.f32 %v8271_v39, %v2607_v55  ;;  %v3758_v59 = vsel %vm866_vm1, %v3610_v42, 0.0 }
 0x108   : > { %v3351_v60 = vadd.f32 %v3223_v51, %v1764_v45  ;;  %v3224_v61 = vadd.f32 %v8282_v44, %v3089_v53  ;;  %v1765_v62 = vadd.f32 %v8276_v41, %v1630_v54  ;;  %v3611_v63 = vmul.f32 %v8302_v3, %v3476_v43 }
 0x109   : > { %v3349_v0 = vadd.f32 %v3221_v56, %v1762_v52  ;;  %v1763_v1 = vadd.f32 %v8276_v41, %v1628_v57  ;;  %v3222_v2 = vadd.f32 %v8282_v44, %v3087_v58  ;;  %v3473_v4 = vmax.f32 %v3345_v21, 0.0 }
 0x10a   : > { %v3352_v5 = vadd.f32 %v3224_v61, %v1765_v62  ;;  %3759 = vadd.xlane.f32.xlu0 %v3758_v59  ;;  %v3761_v6 = vsel %vm866_vm1, %v3611_v63, 0.0  ;;  %v7181_v7 = vpop.f32.mrb[16].mxu0  ;;  %v3474_v8 = vmax.f32 %v3346_v29, 0.0  ;;  %v3479_v9 = vmax.f32 %v3351_v60, 0.0 }
 0x10b   : > { %v3350_v10 = vadd.f32 %v3222_v2, %v1763_v1  ;;  %3762 = vadd.xlane.f32.xlu1 %v3761_v6  ;;  %v1633_v11 = vmul.f32 %v7181_v7, %v8266_v38  ;;  %v7311_v12 = vpop.f32.mrb[16].mxu1  ;;  %v3608_v13 = vmul.f32 %v8302_v3, %v3473_v4  ;;  %v1161_v14 = vpop.f32.mrb[17].mxu0  ;;  %v3477_v15 = vmax.f32 %v3349_v0, 0.0 }
 0x10c   : > { %v3092_v16 = vmul.f32 %v7311_v12, %v8271_v39  ;;  %v2620_v17 = vpop.f32.mrb[17].mxu1  ;;  %v1631_v18 = vmul.f32 %v8266_v38, %v1161_v14  ;;  %v3609_v19 = vmul.f32 %v8302_v3, %v3474_v8  ;;  %v7182_v20 = vpop.f32.mrb[18].mxu0  ;;  %v3614_v21 = vmul.f32 %v8302_v3, %v3479_v9 }
 0x10d   : > { %v1768_v22 = vadd.f32 %v8276_v41, %v1633_v11  ;;  %v3090_v23 = vmul.f32 %v8271_v39, %v2620_v17  ;;  %v3752_v24 = vsel %vm866_vm1, %v3608_v13, 0.0  ;;  %v7312_v25 = vpop.f32.mrb[18].mxu1  ;;  %v1634_v26 = vmul.f32 %v7182_v20, %v8266_v38  ;;  %v1164_v27 = vpop.f32.mrb[19].mxu0 }
 0x10e   : > { %v3227_v28 = vadd.f32 %v8282_v44, %v3092_v16  ;;  %3753 = vadd.xlane.f32.xlu0 %v3752_v24  ;;  %v1766_v29 = vadd.f32 %v8276_v41, %v1631_v18  ;;  %v3093_v30 = vmul.f32 %v7312_v25, %v8271_v39  ;;  %v3755_v31 = vsel %vm866_vm1, %v3609_v19, 0.0  ;;  %v2623_v32 = vpop.f32.mrb[19].mxu1 }
 0x10f   : > { %v3225_v33 = vadd.f32 %v8282_v44, %v3090_v23  ;;  %3756 = vadd.xlane.f32.xlu1 %v3755_v31  ;;  %v1769_v34 = vadd.f32 %v8276_v41, %v1634_v26  ;;  %v1632_v35 = vmul.f32 %v8266_v38, %v1164_v27  ;;  %v3091_v36 = vmul.f32 %v8271_v39, %v2623_v32 }
 0x110   : > { %v3355_v37 = vadd.f32 %v3227_v28, %v1768_v22  ;;  %v3228_v40 = vadd.f32 %v8282_v44, %v3093_v30  ;;  %v3770_v42 = vsel %vm866_vm1, %v3614_v21, 0.0  ;;  %v3480_v43 = vmax.f32 %v3352_v5, 0.0 }
 0x111   : > { %v3353_v45 = vadd.f32 %v3225_v33, %v1766_v29  ;;  %v1767_v46 = vadd.f32 %v8276_v41, %v1632_v35  ;;  %v3226_v47 = vadd.f32 %v8282_v44, %v3091_v36  ;;  %v3612_v48 = vmul.f32 %v8302_v3, %v3477_v15 }
 0x112   : > { %v3356_v49 = vadd.f32 %v3228_v40, %v1769_v34  ;;  %3771 = vadd.xlane.f32.xlu0 %v3770_v42  ;;  %v3615_v50 = vmul.f32 %v8302_v3, %v3480_v43  ;;  %v7185_v51 = vpop.f32.mrb[20].mxu0  ;;  %v3478_v52 = vmax.f32 %v3350_v10, 0.0  ;;  %v3483_v53 = vmax.f32 %v3355_v37, 0.0 }
 0x113   : > { %v3354_v54 = vadd.f32 %v3226_v47, %v1767_v46  ;;  %v1637_v55 = vmul.f32 %v7185_v51, %v8266_v38  ;;  %v7315_v56 = vpop.f32.mrb[20].mxu1  ;;  %v3764_v57 = vsel %vm866_vm1, %v3612_v48, 0.0  ;;  %v1177_v58 = vpop.f32.mrb[21].mxu0  ;;  %v3481_v59 = vmax.f32 %v3353_v45, 0.0 }
 0x114   : > { %v3773_v60 = vsel %vm866_vm1, %v3615_v50, 0.0  ;;  %v3096_v61 = vmul.f32 %v7315_v56, %v8271_v39  ;;  %v2636_v62 = vpop.f32.mrb[21].mxu1  ;;  %v1635_v63 = vmul.f32 %v8266_v38, %v1177_v58  ;;  %v3613_v0 = vmul.f32 %v8302_v3, %v3478_v52  ;;  %v7186_v1 = vpop.f32.mrb[22].mxu0 }
 0x115   : > { %3774 = vadd.xlane.f32.xlu1 %v3773_v60  ;;  %v1772_v2 = vadd.f32 %v8276_v41, %v1637_v55  ;;  %v3094_v4 = vmul.f32 %v8271_v39, %v2636_v62  ;;  %v7316_v5 = vpop.f32.mrb[22].mxu1  ;;  %v1638_v6 = vmul.f32 %v7186_v1, %v8266_v38  ;;  %v1180_v7 = vpop.f32.mrb[23].mxu0  ;;  %v3618_v8 = vmul.f32 %v8302_v3, %v3483_v53 }
 0x116   : > { %v3231_v9 = vadd.f32 %v8282_v44, %v3096_v61  ;;  %3765 = vadd.xlane.f32.xlu0 %v3764_v57  ;;  %v1770_v10 = vadd.f32 %v8276_v41, %v1635_v63  ;;  %v3097_v11 = vmul.f32 %v7316_v5, %v8271_v39  ;;  %v3767_v12 = vsel %vm866_vm1, %v3613_v0, 0.0  ;;  %v2639_v13 = vpop.f32.mrb[23].mxu1 }
 0x117   : > { %v3229_v14 = vadd.f32 %v8282_v44, %v3094_v4  ;;  %v1773_v15 = vadd.f32 %v8276_v41, %v1638_v6  ;;  %v1636_v16 = vmul.f32 %v8266_v38, %v1180_v7  ;;  %v3095_v17 = vmul.f32 %v8271_v39, %v2639_v13 }
 0x118   : > { %v3359_v18 = vadd.f32 %v3231_v9, %v1772_v2  ;;  %v3232_v19 = vadd.f32 %v8282_v44, %v3097_v11  ;;  %v3782_v20 = vsel %vm866_vm1, %v3618_v8, 0.0  ;;  %v3484_v21 = vmax.f32 %v3356_v49, 0.0 }
 0x119   : > { %v3357_v22 = vadd.f32 %v3229_v14, %v1770_v10  ;;  %3768 = vadd.xlane.f32.xlu1 %v3767_v12  ;;  %v1771_v23 = vadd.f32 %v8276_v41, %v1636_v16  ;;  %v3230_v24 = vadd.f32 %v8282_v44, %v3095_v17  ;;  %v3616_v25 = vmul.f32 %v8302_v3, %v3481_v59 }
 0x11a   : > { %v3360_v26 = vadd.f32 %v3232_v19, %v1773_v15  ;;  %3783 = vadd.xlane.f32.xlu0 %v3782_v20  ;;  %v3619_v27 = vmul.f32 %v8302_v3, %v3484_v21  ;;  %v7189_v28 = vpop.f32.mrb[24].mxu0  ;;  %v3482_v29 = vmax.f32 %v3354_v54, 0.0  ;;  %v3487_v30 = vmax.f32 %v3359_v18, 0.0 }
 0x11b   : > { %v3358_v31 = vadd.f32 %v3230_v24, %v1771_v23  ;;  %v1641_v32 = vmul.f32 %v7189_v28, %v8266_v38  ;;  %v7319_v33 = vpop.f32.mrb[24].mxu1  ;;  %v3776_v34 = vsel %vm866_vm1, %v3616_v25, 0.0  ;;  %v1193_v35 = vpop.f32.mrb[25].mxu0  ;;  %v3485_v36 = vmax.f32 %v3357_v22, 0.0 }
 0x11c   : > { %v3785_v37 = vsel %vm866_vm1, %v3619_v27, 0.0  ;;  %v3100_v40 = vmul.f32 %v7319_v33, %v8271_v39  ;;  %v2652_v42 = vpop.f32.mrb[25].mxu1  ;;  %v1639_v43 = vmul.f32 %v8266_v38, %v1193_v35  ;;  %v3617_v45 = vmul.f32 %v8302_v3, %v3482_v29  ;;  %v7190_v46 = vpop.f32.mrb[26].mxu0 }
 0x11d   : > { %3786 = vadd.xlane.f32.xlu1 %v3785_v37  ;;  %v1776_v47 = vadd.f32 %v8276_v41, %v1641_v32  ;;  %v3098_v48 = vmul.f32 %v8271_v39, %v2652_v42  ;;  %v7320_v49 = vpop.f32.mrb[26].mxu1  ;;  %v1642_v50 = vmul.f32 %v7190_v46, %v8266_v38  ;;  %v1196_v51 = vpop.f32.mrb[27].mxu0  ;;  %v3622_v52 = vmul.f32 %v8302_v3, %v3487_v30 }
 0x11e   : > { %v3235_v53 = vadd.f32 %v8282_v44, %v3100_v40  ;;  %3777 = vadd.xlane.f32.xlu0 %v3776_v34  ;;  %v1774_v54 = vadd.f32 %v8276_v41, %v1639_v43  ;;  %v3101_v55 = vmul.f32 %v7320_v49, %v8271_v39  ;;  %v3779_v56 = vsel %vm866_vm1, %v3617_v45, 0.0  ;;  %v2655_v57 = vpop.f32.mrb[27].mxu1 }
 0x11f   : > { %v3233_v58 = vadd.f32 %v8282_v44, %v3098_v48  ;;  %v1777_v59 = vadd.f32 %v8276_v41, %v1642_v50  ;;  %v1640_v60 = vmul.f32 %v8266_v38, %v1196_v51  ;;  %v3099_v61 = vmul.f32 %v8271_v39, %v2655_v57 }
 0x120   : > { %v3363_v62 = vadd.f32 %v3235_v53, %v1776_v47  ;;  %v3236_v63 = vadd.f32 %v8282_v44, %v3101_v55  ;;  %v3794_v0 = vsel %vm866_vm1, %v3622_v52, 0.0  ;;  %v3488_v1 = vmax.f32 %v3360_v26, 0.0 }
 0x121   : > { %v3361_v2 = vadd.f32 %v3233_v58, %v1774_v54  ;;  %3780 = vadd.xlane.f32.xlu1 %v3779_v56  ;;  %v1775_v4 = vadd.f32 %v8276_v41, %v1640_v60  ;;  %v3234_v5 = vadd.f32 %v8282_v44, %v3099_v61  ;;  %v3620_v6 = vmul.f32 %v8302_v3, %v3485_v36 }
 0x122   : > { %v3364_v7 = vadd.f32 %v3236_v63, %v1777_v59  ;;  %3795 = vadd.xlane.f32.xlu0 %v3794_v0  ;;  %v3623_v8 = vmul.f32 %v8302_v3, %v3488_v1  ;;  %v7193_v9 = vpop.f32.mrb[28].mxu0  ;;  %v3486_v10 = vmax.f32 %v3358_v31, 0.0  ;;  %v3491_v11 = vmax.f32 %v3363_v62, 0.0 }
 0x123   : > { %v3362_v12 = vadd.f32 %v3234_v5, %v1775_v4  ;;  %v1645_v13 = vmul.f32 %v7193_v9, %v8266_v38  ;;  %v7323_v14 = vpop.f32.mrb[28].mxu1  ;;  %v3788_v15 = vsel %vm866_vm1, %v3620_v6, 0.0  ;;  %v1209_v16 = vpop.f32.mrb[29].mxu0  ;;  %v3489_v17 = vmax.f32 %v3361_v2, 0.0 }
 0x124   : > { %v3797_v18 = vsel %vm866_vm1, %v3623_v8, 0.0  ;;  %v3104_v19 = vmul.f32 %v7323_v14, %v8271_v39  ;;  %v2668_v20 = vpop.f32.mrb[29].mxu1  ;;  %v1643_v21 = vmul.f32 %v8266_v38, %v1209_v16  ;;  %v3621_v22 = vmul.f32 %v8302_v3, %v3486_v10  ;;  %v7194_v23 = vpop.f32.mrb[30].mxu0 }
 0x125   : > { %3798 = vadd.xlane.f32.xlu1 %v3797_v18  ;;  %v1780_v24 = vadd.f32 %v8276_v41, %v1645_v13  ;;  %v3102_v25 = vmul.f32 %v8271_v39, %v2668_v20  ;;  %v7324_v26 = vpop.f32.mrb[30].mxu1  ;;  %v1646_v27 = vmul.f32 %v7194_v23, %v8266_v38  ;;  %v1212_v28 = vpop.f32.mrb[31].mxu0  ;;  %v3626_v29 = vmul.f32 %v8302_v3, %v3491_v11 }
 0x126   : > { %v3239_v30 = vadd.f32 %v8282_v44, %v3104_v19  ;;  %3789 = vadd.xlane.f32.xlu0 %v3788_v15  ;;  %v1778_v31 = vadd.f32 %v8276_v41, %v1643_v21  ;;  %v3105_v32 = vmul.f32 %v7324_v26, %v8271_v39  ;;  %v3791_v33 = vsel %vm866_vm1, %v3621_v22, 0.0  ;;  %v2671_v34 = vpop.f32.mrb[31].mxu1 }
 0x127   : > { %v3237_v35 = vadd.f32 %v8282_v44, %v3102_v25  ;;  %v1781_v36 = vadd.f32 %v8276_v41, %v1646_v27  ;;  %v1644_v37 = vmul.f32 %v8266_v38, %v1212_v28  ;;  %v3103_v40 = vmul.f32 %v8271_v39, %v2671_v34 }
 0x128   : > { %v3367_v42 = vadd.f32 %v3239_v30, %v1780_v24  ;;  %v3240_v43 = vadd.f32 %v8282_v44, %v3105_v32  ;;  %v3806_v45 = vsel %vm866_vm1, %v3626_v29, 0.0  ;;  %v3492_v46 = vmax.f32 %v3364_v7, 0.0 }
 0x129   : > { %v3365_v47 = vadd.f32 %v3237_v35, %v1778_v31  ;;  %3792 = vadd.xlane.f32.xlu1 %v3791_v33  ;;  %v1779_v48 = vadd.f32 %v8276_v41, %v1644_v37  ;;  %v3238_v49 = vadd.f32 %v8282_v44, %v3103_v40  ;;  %v3624_v50 = vmul.f32 %v8302_v3, %v3489_v17 }
 0x12a   : > { %v3368_v51 = vadd.f32 %v3240_v43, %v1781_v36  ;;  %3807 = vadd.xlane.f32.xlu0 %v3806_v45  ;;  %v3627_v52 = vmul.f32 %v8302_v3, %v3492_v46  ;;  %v7197_v53 = vpop.f32.mrb[32].mxu0  ;;  %v3490_v54 = vmax.f32 %v3362_v12, 0.0  ;;  %v3495_v55 = vmax.f32 %v3367_v42, 0.0 }
 0x12b   : > { %v3366_v56 = vadd.f32 %v3238_v49, %v1779_v48  ;;  %v1649_v57 = vmul.f32 %v7197_v53, %v8266_v38  ;;  %v7327_v58 = vpop.f32.mrb[32].mxu1  ;;  %v3800_v59 = vsel %vm866_vm1, %v3624_v50, 0.0  ;;  %v1225_v60 = vpop.f32.mrb[33].mxu0  ;;  %v3493_v61 = vmax.f32 %v3365_v47, 0.0 }
 0x12c   : > { %v3809_v62 = vsel %vm866_vm1, %v3627_v52, 0.0  ;;  %v3108_v63 = vmul.f32 %v7327_v58, %v8271_v39  ;;  %v2684_v0 = vpop.f32.mrb[33].mxu1  ;;  %v1647_v1 = vmul.f32 %v8266_v38, %v1225_v60  ;;  %v3625_v2 = vmul.f32 %v8302_v3, %v3490_v54  ;;  %v7198_v4 = vpop.f32.mrb[34].mxu0 }
 0x12d   : > { %3810 = vadd.xlane.f32.xlu1 %v3809_v62  ;;  %v1784_v5 = vadd.f32 %v8276_v41, %v1649_v57  ;;  %v3106_v6 = vmul.f32 %v8271_v39, %v2684_v0  ;;  %v7328_v7 = vpop.f32.mrb[34].mxu1  ;;  %v1650_v8 = vmul.f32 %v7198_v4, %v8266_v38  ;;  %v1228_v9 = vpop.f32.mrb[35].mxu0  ;;  %v3630_v10 = vmul.f32 %v8302_v3, %v3495_v55 }
 0x12e   : > { %v3243_v11 = vadd.f32 %v8282_v44, %v3108_v63  ;;  %3801 = vadd.xlane.f32.xlu0 %v3800_v59  ;;  %v1782_v12 = vadd.f32 %v8276_v41, %v1647_v1  ;;  %v3109_v13 = vmul.f32 %v7328_v7, %v8271_v39  ;;  %v3803_v14 = vsel %vm866_vm1, %v3625_v2, 0.0  ;;  %v2687_v15 = vpop.f32.mrb[35].mxu1 }
 0x12f   : > { %v3241_v16 = vadd.f32 %v8282_v44, %v3106_v6  ;;  %v1785_v17 = vadd.f32 %v8276_v41, %v1650_v8  ;;  %v1648_v18 = vmul.f32 %v8266_v38, %v1228_v9  ;;  %v3107_v19 = vmul.f32 %v8271_v39, %v2687_v15 }
 0x130   : > { %v3371_v20 = vadd.f32 %v3243_v11, %v1784_v5  ;;  %v3244_v21 = vadd.f32 %v8282_v44, %v3109_v13  ;;  %v3818_v22 = vsel %vm866_vm1, %v3630_v10, 0.0  ;;  %v3496_v23 = vmax.f32 %v3368_v51, 0.0 }
 0x131   : > { %v3369_v24 = vadd.f32 %v3241_v16, %v1782_v12  ;;  %3804 = vadd.xlane.f32.xlu1 %v3803_v14  ;;  %v1783_v25 = vadd.f32 %v8276_v41, %v1648_v18  ;;  %v3242_v26 = vadd.f32 %v8282_v44, %v3107_v19  ;;  %v3628_v27 = vmul.f32 %v8302_v3, %v3493_v61 }
 0x132   : > { %v3372_v28 = vadd.f32 %v3244_v21, %v1785_v17  ;;  %3819 = vadd.xlane.f32.xlu0 %v3818_v22  ;;  %v3631_v29 = vmul.f32 %v8302_v3, %v3496_v23  ;;  %v7201_v30 = vpop.f32.mrb[36].mxu0  ;;  %v3494_v31 = vmax.f32 %v3366_v56, 0.0  ;;  %v3499_v32 = vmax.f32 %v3371_v20, 0.0  ;;  %v7534_v20 = vld [vmem:[%s8063_s29 + $0x190] sm:$0xff]  }
 0x133   : > { %v3370_v33 = vadd.f32 %v3242_v26, %v1783_v25  ;;  %v1653_v34 = vmul.f32 %v7201_v30, %v8266_v38  ;;  %v7331_v35 = vpop.f32.mrb[36].mxu1  ;;  %v3812_v36 = vsel %vm866_vm1, %v3628_v27, 0.0  ;;  %v1241_v37 = vpop.f32.mrb[37].mxu0  ;;  %v3497_v40 = vmax.f32 %v3369_v24, 0.0  ;;  %v7536_v27 = vld [vmem:[%s8063_s29 + $0x198] sm:$0xff]   ;;  %7263 = vmatprep.mubr.msk.bf16.mxu0 %vm866_vm1, %v7534_v20 }
 0x134   : > { %v3821_v42 = vsel %vm866_vm1, %v3631_v29, 0.0  ;;  %v3112_v43 = vmul.f32 %v7331_v35, %v8271_v39  ;;  %v2700_v45 = vpop.f32.mrb[37].mxu1  ;;  %v1651_v46 = vmul.f32 %v8266_v38, %v1241_v37  ;;  %v3629_v47 = vmul.f32 %v8302_v3, %v3494_v31  ;;  %v7202_v48 = vpop.f32.mrb[38].mxu0  ;;  %7264 = vmatmul.mubr.msk.bf16.gmra.mrb[100].mxu0 %vm866_vm1, %v7536_v27 }
 0x135   : > { %3822 = vadd.xlane.f32.xlu1 %v3821_v42  ;;  %v1788_v49 = vadd.f32 %v8276_v41, %v1653_v34  ;;  %v3110_v50 = vmul.f32 %v8271_v39, %v2700_v45  ;;  %v7332_v51 = vpop.f32.mrb[38].mxu1  ;;  %v1654_v52 = vmul.f32 %v7202_v48, %v8266_v38  ;;  %v1244_v53 = vpop.f32.mrb[39].mxu0  ;;  %v3634_v54 = vmul.f32 %v8302_v3, %v3499_v32 }
 0x136   : > { %v3247_v55 = vadd.f32 %v8282_v44, %v3112_v43  ;;  %3813 = vadd.xlane.f32.xlu0 %v3812_v36  ;;  %v1786_v56 = vadd.f32 %v8276_v41, %v1651_v46  ;;  %v3113_v57 = vmul.f32 %v7332_v51, %v8271_v39  ;;  %v3815_v58 = vsel %vm866_vm1, %v3629_v47, 0.0  ;;  %v2703_v59 = vpop.f32.mrb[39].mxu1 }
 0x137   : > { %v3245_v60 = vadd.f32 %v8282_v44, %v3110_v50  ;;  %v1789_v61 = vadd.f32 %v8276_v41, %v1654_v52  ;;  %v1652_v62 = vmul.f32 %v8266_v38, %v1244_v53  ;;  %v3111_v63 = vmul.f32 %v8271_v39, %v2703_v59 }
 0x138   : > { %v3375_v0 = vadd.f32 %v3247_v55, %v1788_v49  ;;  %v3248_v1 = vadd.f32 %v8282_v44, %v3113_v57  ;;  %v3830_v2 = vsel %vm866_vm1, %v3634_v54, 0.0  ;;  %v3500_v4 = vmax.f32 %v3372_v28, 0.0 }
 0x139   : > { %v3373_v5 = vadd.f32 %v3245_v60, %v1786_v56  ;;  %3816 = vadd.xlane.f32.xlu1 %v3815_v58  ;;  %v1787_v6 = vadd.f32 %v8276_v41, %v1652_v62  ;;  %v3246_v7 = vadd.f32 %v8282_v44, %v3111_v63  ;;  %v3632_v8 = vmul.f32 %v8302_v3, %v3497_v40 }
 0x13a   : > { %v3376_v9 = vadd.f32 %v3248_v1, %v1789_v61  ;;  %3831 = vadd.xlane.f32.xlu0 %v3830_v2  ;;  %v3635_v10 = vmul.f32 %v8302_v3, %v3500_v4  ;;  %v7205_v11 = vpop.f32.mrb[40].mxu0  ;;  %v3498_v12 = vmax.f32 %v3370_v33, 0.0  ;;  %v3503_v13 = vmax.f32 %v3375_v0, 0.0 }
 0x13b   : > { %v3374_v14 = vadd.f32 %v3246_v7, %v1787_v6  ;;  %v1657_v15 = vmul.f32 %v7205_v11, %v8266_v38  ;;  %v7335_v16 = vpop.f32.mrb[40].mxu1  ;;  %v3824_v17 = vsel %vm866_vm1, %v3632_v8, 0.0  ;;  %v1257_v18 = vpop.f32.mrb[41].mxu0  ;;  %v3501_v19 = vmax.f32 %v3373_v5, 0.0 }
 0x13c   : > { %v3833_v21 = vsel %vm866_vm1, %v3635_v10, 0.0  ;;  %v3116_v22 = vmul.f32 %v7335_v16, %v8271_v39  ;;  %v2716_v23 = vpop.f32.mrb[41].mxu1  ;;  %v1655_v24 = vmul.f32 %v8266_v38, %v1257_v18  ;;  %v3633_v25 = vmul.f32 %v8302_v3, %v3498_v12  ;;  %v7206_v26 = vpop.f32.mrb[42].mxu0 }
 0x13d   : > { %3834 = vadd.xlane.f32.xlu1 %v3833_v21  ;;  %v1792_v28 = vadd.f32 %v8276_v41, %v1657_v15  ;;  %v3114_v29 = vmul.f32 %v8271_v39, %v2716_v23  ;;  %v7336_v30 = vpop.f32.mrb[42].mxu1  ;;  %v1658_v31 = vmul.f32 %v7206_v26, %v8266_v38  ;;  %v1260_v32 = vpop.f32.mrb[43].mxu0  ;;  %v3638_v33 = vmul.f32 %v8302_v3, %v3503_v13 }
 0x13e   : > { %v3251_v34 = vadd.f32 %v8282_v44, %v3116_v22  ;;  %3825 = vadd.xlane.f32.xlu0 %v3824_v17  ;;  %v1790_v35 = vadd.f32 %v8276_v41, %v1655_v24  ;;  %v3117_v36 = vmul.f32 %v7336_v30, %v8271_v39  ;;  %v3827_v37 = vsel %vm866_vm1, %v3633_v25, 0.0  ;;  %v2719_v40 = vpop.f32.mrb[43].mxu1 }
 0x13f   : > { %v3249_v42 = vadd.f32 %v8282_v44, %v3114_v29  ;;  %v1793_v43 = vadd.f32 %v8276_v41, %v1658_v31  ;;  %v1656_v45 = vmul.f32 %v8266_v38, %v1260_v32  ;;  %v3115_v46 = vmul.f32 %v8271_v39, %v2719_v40  ;;  %v8575_v29 = vld [vmem:[%s10660_s4] ss:$0 sm:$0xff] }
 0x140   : > { %v3379_v47 = vadd.f32 %v3251_v34, %v1792_v28  ;;  %v3252_v48 = vadd.f32 %v8282_v44, %v3117_v36  ;;  %v3842_v49 = vsel %vm866_vm1, %v3638_v33, 0.0  ;;  %v3504_v50 = vmax.f32 %v3376_v9, 0.0  ;;  %v8584_v36 = vld [vmem:[%s10659_s3] ss:$0 sm:$0xff] }
 0x141   : > { %v3377_v51 = vadd.f32 %v3249_v42, %v1790_v35  ;;  %3828 = vadd.xlane.f32.xlu1 %v3827_v37  ;;  %v1791_v52 = vadd.f32 %v8276_v41, %v1656_v45  ;;  %v3250_v53 = vadd.f32 %v8282_v44, %v3115_v46  ;;  %v3636_v54 = vmul.f32 %v8302_v3, %v3501_v19  ;;  %v8592_v46 = vld [vmem:[%s10662_s6] ss:$0 sm:$0xff] }
 0x142   : > { %v3380_v55 = vadd.f32 %v3252_v48, %v1793_v43  ;;  %3843 = vadd.xlane.f32.xlu0 %v3842_v49  ;;  %v3639_v56 = vmul.f32 %v8302_v3, %v3504_v50  ;;  %v7209_v57 = vpop.f32.mrb[44].mxu0  ;;  %v3502_v58 = vmax.f32 %v3374_v14, 0.0  ;;  %v3507_v59 = vmax.f32 %v3379_v47, 0.0 }
 0x143   : > { %v3378_v60 = vadd.f32 %v3250_v53, %v1791_v52  ;;  %v1661_v61 = vmul.f32 %v7209_v57, %v8266_v38  ;;  %v7339_v62 = vpop.f32.mrb[44].mxu1  ;;  %v3836_v63 = vsel %vm866_vm1, %v3636_v54, 0.0  ;;  %v1273_v0 = vpop.f32.mrb[45].mxu0  ;;  %v3505_v1 = vmax.f32 %v3377_v51, 0.0  ;;  %v8603_v57 = vld [vmem:[%s10664_s8] ss:$0 sm:$0xff] }
 0x144   : > { %v3845_v2 = vsel %vm866_vm1, %v3639_v56, 0.0  ;;  %v3120_v4 = vmul.f32 %v7339_v62, %v8271_v39  ;;  %v2732_v5 = vpop.f32.mrb[45].mxu1  ;;  %v1659_v6 = vmul.f32 %v8266_v38, %v1273_v0  ;;  %v3637_v7 = vmul.f32 %v8302_v3, %v3502_v58  ;;  %v7210_v8 = vpop.f32.mrb[46].mxu0 }
 0x145   : > { %3846 = vadd.xlane.f32.xlu1 %v3845_v2  ;;  %v1796_v9 = vadd.f32 %v8276_v41, %v1661_v61  ;;  %v3118_v10 = vmul.f32 %v8271_v39, %v2732_v5  ;;  %v7340_v11 = vpop.f32.mrb[46].mxu1  ;;  %v1662_v12 = vmul.f32 %v7210_v8, %v8266_v38  ;;  %v1276_v13 = vpop.f32.mrb[47].mxu0  ;;  %v3642_v14 = vmul.f32 %v8302_v3, %v3507_v59 }
 0x146   : > { %v3255_v15 = vadd.f32 %v8282_v44, %v3120_v4  ;;  %3837 = vadd.xlane.f32.xlu0 %v3836_v63  ;;  %v1794_v16 = vadd.f32 %v8276_v41, %v1659_v6  ;;  %v3121_v17 = vmul.f32 %v7340_v11, %v8271_v39  ;;  %v3839_v18 = vsel %vm866_vm1, %v3637_v7, 0.0  ;;  %v2735_v19 = vpop.f32.mrb[47].mxu1 }
 0x147   : > { %v3253_v20 = vadd.f32 %v8282_v44, %v3118_v10  ;;  %v1797_v21 = vadd.f32 %v8276_v41, %v1662_v12  ;;  %v1660_v22 = vmul.f32 %v8266_v38, %v1276_v13  ;;  %v3119_v23 = vmul.f32 %v8271_v39, %v2735_v19 }
 0x148   : > { %v3383_v24 = vadd.f32 %v3255_v15, %v1796_v9  ;;  %v3256_v25 = vadd.f32 %v8282_v44, %v3121_v17  ;;  %v3854_v26 = vsel %vm866_vm1, %v3642_v14, 0.0  ;;  %v3508_v27 = vmax.f32 %v3380_v55, 0.0 }
 0x149   : > { %v3381_v28 = vadd.f32 %v3253_v20, %v1794_v16  ;;  %3840 = vadd.xlane.f32.xlu1 %v3839_v18  ;;  %v1795_v30 = vadd.f32 %v8575_v29, %v1660_v22  ;;  %v3254_v41 = vadd.f32 %v8282_v44, %v3119_v23  ;;  %v3640_v38 = vmul.f32 %v8302_v3, %v3505_v1 }
 0x14a   : > { %v3384_v39 = vadd.f32 %v3256_v25, %v1797_v21  ;;  %3855 = vadd.xlane.f32.xlu0 %v3854_v26  ;;  %v3643_v31 = vmul.f32 %v8302_v3, %v3508_v27  ;;  %v7213_v32 = vpop.f32.mrb[48].mxu0  ;;  %v3506_v33 = vmax.f32 %v3378_v60, 0.0  ;;  %v3511_v34 = vmax.f32 %v3383_v24, 0.0 }
 0x14b   : > { %v3382_v35 = vadd.f32 %v3254_v41, %v1795_v30  ;;  %v1665_v37 = vmul.f32 %v8584_v36, %v7213_v32  ;;  %v7343_v40 = vpop.f32.mrb[48].mxu1  ;;  %v3848_v44 = vsel %vm866_vm1, %v3640_v38, 0.0  ;;  %v1289_v42 = vpop.f32.mrb[49].mxu0  ;;  %v3509_v43 = vmax.f32 %v3381_v28, 0.0 }
 0x14c   : > { %v3857_v45 = vsel %vm866_vm1, %v3643_v31, 0.0  ;;  %v3124_v47 = vmul.f32 %v8592_v46, %v7343_v40  ;;  %v2748_v48 = vpop.f32.mrb[49].mxu1  ;;  %v1663_v49 = vmul.f32 %v8584_v36, %v1289_v42  ;;  %v3641_v50 = vmul.f32 %v8302_v3, %v3506_v33  ;;  %v7214_v51 = vpop.f32.mrb[50].mxu0  ;;  %v8609_v3 = vld [vmem:[%s10663_s7] ss:$0 sm:$0xff] }
 0x14d   : > { %3858 = vadd.xlane.f32.xlu1 %v3857_v45  ;;  %v1800_v52 = vadd.f32 %v8575_v29, %v1665_v37  ;;  %v3122_v53 = vmul.f32 %v8592_v46, %v2748_v48  ;;  %v7344_v54 = vpop.f32.mrb[50].mxu1  ;;  %v1666_v55 = vmul.f32 %v8584_v36, %v7214_v51  ;;  %v1292_v56 = vpop.f32.mrb[51].mxu0  ;;  %v3646_v58 = vmul.f32 %v8603_v57, %v3511_v34 }
 0x14e   : > { %v3259_v59 = vadd.f32 %v8609_v3, %v3124_v47  ;;  %3849 = vadd.xlane.f32.xlu0 %v3848_v44  ;;  %v1798_v60 = vadd.f32 %v8575_v29, %v1663_v49  ;;  %v3125_v61 = vmul.f32 %v8592_v46, %v7344_v54  ;;  %v3851_v62 = vsel %vm866_vm1, %v3641_v50, 0.0  ;;  %v2751_v63 = vpop.f32.mrb[51].mxu1 }
 0x14f   : > { %v3257_v0 = vadd.f32 %v8609_v3, %v3122_v53  ;;  %v1801_v1 = vadd.f32 %v8575_v29, %v1666_v55  ;;  %v1664_v2 = vmul.f32 %v8584_v36, %v1292_v56  ;;  %v3123_v4 = vmul.f32 %v8592_v46, %v2751_v63 }
 0x150   : > { %v3387_v5 = vadd.f32 %v3259_v59, %v1800_v52  ;;  %v3260_v6 = vadd.f32 %v8609_v3, %v3125_v61  ;;  %v3866_v7 = vsel %vm866_vm1, %v3646_v58, 0.0  ;;  %v3512_v8 = vmax.f32 %v3384_v39, 0.0 }
 0x151   : > { %v3385_v9 = vadd.f32 %v3257_v0, %v1798_v60  ;;  %3852 = vadd.xlane.f32.xlu1 %v3851_v62  ;;  %v1799_v10 = vadd.f32 %v8575_v29, %v1664_v2  ;;  %v3258_v11 = vadd.f32 %v8609_v3, %v3123_v4  ;;  %v3644_v12 = vmul.f32 %v8603_v57, %v3509_v43 }
 0x152   : > { %v3388_v13 = vadd.f32 %v3260_v6, %v1801_v1  ;;  %3867 = vadd.xlane.f32.xlu0 %v3866_v7  ;;  %v3647_v14 = vmul.f32 %v8603_v57, %v3512_v8  ;;  %v7217_v15 = vpop.f32.mrb[52].mxu0  ;;  %v3510_v16 = vmax.f32 %v3382_v35, 0.0  ;;  %v3515_v17 = vmax.f32 %v3387_v5, 0.0 }
 0x153   : > { %v3386_v18 = vadd.f32 %v3258_v11, %v1799_v10  ;;  %v1669_v19 = vmul.f32 %v8584_v36, %v7217_v15  ;;  %v7347_v20 = vpop.f32.mrb[52].mxu1  ;;  %v3860_v21 = vsel %vm866_vm1, %v3644_v12, 0.0  ;;  %v1305_v22 = vpop.f32.mrb[53].mxu0  ;;  %v3513_v23 = vmax.f32 %v3385_v9, 0.0 }
 0x154   : > { %v3869_v24 = vsel %vm866_vm1, %v3647_v14, 0.0  ;;  %v3128_v25 = vmul.f32 %v8592_v46, %v7347_v20  ;;  %v2764_v26 = vpop.f32.mrb[53].mxu1  ;;  %v1667_v27 = vmul.f32 %v8584_v36, %v1305_v22  ;;  %v3645_v28 = vmul.f32 %v8603_v57, %v3510_v16  ;;  %v7218_v30 = vpop.f32.mrb[54].mxu0 }
 0x155   : > { %3870 = vadd.xlane.f32.xlu1 %v3869_v24  ;;  %v1804_v41 = vadd.f32 %v8575_v29, %v1669_v19  ;;  %v3126_v38 = vmul.f32 %v8592_v46, %v2764_v26  ;;  %v7348_v39 = vpop.f32.mrb[54].mxu1  ;;  %v1670_v31 = vmul.f32 %v8584_v36, %v7218_v30  ;;  %v1308_v32 = vpop.f32.mrb[55].mxu0  ;;  %v3650_v33 = vmul.f32 %v8603_v57, %v3515_v17 }
 0x156   : > { %v3263_v34 = vadd.f32 %v8609_v3, %v3128_v25  ;;  %3861 = vadd.xlane.f32.xlu0 %v3860_v21  ;;  %v1802_v35 = vadd.f32 %v8575_v29, %v1667_v27  ;;  %v3129_v37 = vmul.f32 %v8592_v46, %v7348_v39  ;;  %v3863_v40 = vsel %vm866_vm1, %v3645_v28, 0.0  ;;  %v2767_v44 = vpop.f32.mrb[55].mxu1 }
 0x157   : > { %v3261_v42 = vadd.f32 %v8609_v3, %v3126_v38  ;;  %v1805_v43 = vadd.f32 %v8575_v29, %v1670_v31  ;;  %v1668_v45 = vmul.f32 %v8584_v36, %v1308_v32  ;;  %v3127_v47 = vmul.f32 %v8592_v46, %v2767_v44 }
 0x158   : > { %v3391_v48 = vadd.f32 %v3263_v34, %v1804_v41  ;;  %v3264_v49 = vadd.f32 %v8609_v3, %v3129_v37  ;;  %v3878_v50 = vsel %vm866_vm1, %v3650_v33, 0.0  ;;  %v3516_v51 = vmax.f32 %v3388_v13, 0.0 }
 0x159   : > { %v3389_v52 = vadd.f32 %v3261_v42, %v1802_v35  ;;  %3864 = vadd.xlane.f32.xlu1 %v3863_v40  ;;  %v1803_v53 = vadd.f32 %v8575_v29, %v1668_v45  ;;  %v3262_v54 = vadd.f32 %v8609_v3, %v3127_v47  ;;  %v3648_v55 = vmul.f32 %v8603_v57, %v3513_v23 }
 0x15a   : > { %v3392_v56 = vadd.f32 %v3264_v49, %v1805_v43  ;;  %3879 = vadd.xlane.f32.xlu0 %v3878_v50  ;;  %v3651_v58 = vmul.f32 %v8603_v57, %v3516_v51  ;;  %v7221_v59 = vpop.f32.mrb[56].mxu0  ;;  %v3514_v60 = vmax.f32 %v3386_v18, 0.0  ;;  %v3519_v61 = vmax.f32 %v3391_v48, 0.0 }
 0x15b   : > { %v3390_v62 = vadd.f32 %v3262_v54, %v1803_v53  ;;  %v1673_v63 = vmul.f32 %v8584_v36, %v7221_v59  ;;  %v7351_v0 = vpop.f32.mrb[56].mxu1  ;;  %v3872_v1 = vsel %vm866_vm1, %v3648_v55, 0.0  ;;  %v1321_v2 = vpop.f32.mrb[57].mxu0  ;;  %v3517_v4 = vmax.f32 %v3389_v52, 0.0 }
 0x15c   : > { %v3881_v5 = vsel %vm866_vm1, %v3651_v58, 0.0  ;;  %v3132_v6 = vmul.f32 %v8592_v46, %v7351_v0  ;;  %v2780_v7 = vpop.f32.mrb[57].mxu1  ;;  %v1671_v8 = vmul.f32 %v8584_v36, %v1321_v2  ;;  %v3649_v9 = vmul.f32 %v8603_v57, %v3514_v60  ;;  %v7222_v10 = vpop.f32.mrb[58].mxu0 }
 0x15d   : > { %3882 = vadd.xlane.f32.xlu1 %v3881_v5  ;;  %v1808_v11 = vadd.f32 %v8575_v29, %v1673_v63  ;;  %v3130_v12 = vmul.f32 %v8592_v46, %v2780_v7  ;;  %v7352_v13 = vpop.f32.mrb[58].mxu1  ;;  %v1674_v14 = vmul.f32 %v8584_v36, %v7222_v10  ;;  %v1324_v15 = vpop.f32.mrb[59].mxu0  ;;  %v3654_v16 = vmul.f32 %v8603_v57, %v3519_v61 }
 0x15e   : > { %v3267_v17 = vadd.f32 %v8609_v3, %v3132_v6  ;;  %3873 = vadd.xlane.f32.xlu0 %v3872_v1  ;;  %v1806_v18 = vadd.f32 %v8575_v29, %v1671_v8  ;;  %v3133_v19 = vmul.f32 %v8592_v46, %v7352_v13  ;;  %v3875_v20 = vsel %vm866_vm1, %v3649_v9, 0.0  ;;  %v2783_v21 = vpop.f32.mrb[59].mxu1 }
 0x15f   : > { %v3265_v22 = vadd.f32 %v8609_v3, %v3130_v12  ;;  %v1809_v23 = vadd.f32 %v8575_v29, %v1674_v14  ;;  %v1672_v24 = vmul.f32 %v8584_v36, %v1324_v15  ;;  %v3131_v25 = vmul.f32 %v8592_v46, %v2783_v21 }
 0x160   : > { %v3395_v26 = vadd.f32 %v3267_v17, %v1808_v11  ;;  %v3268_v27 = vadd.f32 %v8609_v3, %v3133_v19  ;;  %v3890_v28 = vsel %vm866_vm1, %v3654_v16, 0.0  ;;  %v3520_v30 = vmax.f32 %v3392_v56, 0.0 }
 0x161   : > { %v3393_v41 = vadd.f32 %v3265_v22, %v1806_v18  ;;  %3876 = vadd.xlane.f32.xlu1 %v3875_v20  ;;  %v1807_v38 = vadd.f32 %v8575_v29, %v1672_v24  ;;  %v3266_v39 = vadd.f32 %v8609_v3, %v3131_v25  ;;  %v3652_v31 = vmul.f32 %v8603_v57, %v3517_v4 }
 0x162   : > { %v3396_v32 = vadd.f32 %v3268_v27, %v1809_v23  ;;  %3891 = vadd.xlane.f32.xlu0 %v3890_v28  ;;  %v3655_v33 = vmul.f32 %v8603_v57, %v3520_v30  ;;  %v7225_v34 = vpop.f32.mrb[60].mxu0  ;;  %v3518_v35 = vmax.f32 %v3390_v62, 0.0  ;;  %v3523_v37 = vmax.f32 %v3395_v26, 0.0 }
 0x163   : > { %v3394_v40 = vadd.f32 %v3266_v39, %v1807_v38  ;;  %v1677_v44 = vmul.f32 %v8584_v36, %v7225_v34  ;;  %v7355_v42 = vpop.f32.mrb[60].mxu1  ;;  %v3884_v43 = vsel %vm866_vm1, %v3652_v31, 0.0  ;;  %v1337_v45 = vpop.f32.mrb[61].mxu0  ;;  %v3521_v47 = vmax.f32 %v3393_v41, 0.0 }
 0x164   : > { %v3893_v48 = vsel %vm866_vm1, %v3655_v33, 0.0  ;;  %v3136_v49 = vmul.f32 %v8592_v46, %v7355_v42  ;;  %v2796_v50 = vpop.f32.mrb[61].mxu1  ;;  %v1675_v51 = vmul.f32 %v8584_v36, %v1337_v45  ;;  %v3653_v52 = vmul.f32 %v8603_v57, %v3518_v35  ;;  %v7226_v53 = vpop.f32.mrb[62].mxu0 }
 0x165   : > { %3894 = vadd.xlane.f32.xlu1 %v3893_v48  ;;  %v1812_v54 = vadd.f32 %v8575_v29, %v1677_v44  ;;  %v3134_v55 = vmul.f32 %v8592_v46, %v2796_v50  ;;  %v7356_v56 = vpop.f32.mrb[62].mxu1  ;;  %v1678_v58 = vmul.f32 %v8584_v36, %v7226_v53  ;;  %v1340_v59 = vpop.f32.mrb[63].mxu0  ;;  %v3658_v60 = vmul.f32 %v8603_v57, %v3523_v37 }
 0x166   : > { %v3271_v61 = vadd.f32 %v8609_v3, %v3136_v49  ;;  %3885 = vadd.xlane.f32.xlu0 %v3884_v43  ;;  %v1810_v62 = vadd.f32 %v8575_v29, %v1675_v51  ;;  %v3137_v63 = vmul.f32 %v8592_v46, %v7356_v56  ;;  %v3887_v0 = vsel %vm866_vm1, %v3653_v52, 0.0  ;;  %v2799_v1 = vpop.f32.mrb[63].mxu1 }
 0x167   : > { %v3269_v2 = vadd.f32 %v8609_v3, %v3134_v55  ;;  %v1813_v4 = vadd.f32 %v8575_v29, %v1678_v58  ;;  %v1676_v5 = vmul.f32 %v8584_v36, %v1340_v59  ;;  %v3135_v6 = vmul.f32 %v8592_v46, %v2799_v1 }
 0x168   : > { %v3399_v7 = vadd.f32 %v3271_v61, %v1812_v54  ;;  %v3272_v8 = vadd.f32 %v8609_v3, %v3137_v63  ;;  %v3902_v9 = vsel %vm866_vm1, %v3658_v60, 0.0  ;;  %v3524_v10 = vmax.f32 %v3396_v32, 0.0 }
 0x169   : > { %v3397_v11 = vadd.f32 %v3269_v2, %v1810_v62  ;;  %3888 = vadd.xlane.f32.xlu1 %v3887_v0  ;;  %v1811_v12 = vadd.f32 %v8575_v29, %v1676_v5  ;;  %v3270_v13 = vadd.f32 %v8609_v3, %v3135_v6  ;;  %v3656_v14 = vmul.f32 %v8603_v57, %v3521_v47 }
 0x16a   : > { %v3400_v15 = vadd.f32 %v3272_v8, %v1813_v4  ;;  %3903 = vadd.xlane.f32.xlu0 %v3902_v9  ;;  %v3659_v16 = vmul.f32 %v8603_v57, %v3524_v10  ;;  %v7229_v17 = vpop.f32.mrb[64].mxu0  ;;  %v3522_v18 = vmax.f32 %v3394_v40, 0.0  ;;  %v3527_v19 = vmax.f32 %v3399_v7, 0.0 }
 0x16b   : > { %v3398_v20 = vadd.f32 %v3270_v13, %v1811_v12  ;;  %v1681_v21 = vmul.f32 %v8584_v36, %v7229_v17  ;;  %v7359_v22 = vpop.f32.mrb[64].mxu1  ;;  %v3896_v23 = vsel %vm866_vm1, %v3656_v14, 0.0  ;;  %v1353_v24 = vpop.f32.mrb[65].mxu0  ;;  %v3525_v25 = vmax.f32 %v3397_v11, 0.0 }
 0x16c   : > { %v3905_v26 = vsel %vm866_vm1, %v3659_v16, 0.0  ;;  %v3140_v27 = vmul.f32 %v8592_v46, %v7359_v22  ;;  %v2812_v28 = vpop.f32.mrb[65].mxu1  ;;  %v1679_v30 = vmul.f32 %v8584_v36, %v1353_v24  ;;  %v3657_v41 = vmul.f32 %v8603_v57, %v3522_v18  ;;  %v7230_v38 = vpop.f32.mrb[66].mxu0 }
 0x16d   : > { %3906 = vadd.xlane.f32.xlu1 %v3905_v26  ;;  %v1816_v39 = vadd.f32 %v8575_v29, %v1681_v21  ;;  %v3138_v31 = vmul.f32 %v8592_v46, %v2812_v28  ;;  %v7360_v32 = vpop.f32.mrb[66].mxu1  ;;  %v1682_v33 = vmul.f32 %v8584_v36, %v7230_v38  ;;  %v1356_v34 = vpop.f32.mrb[67].mxu0  ;;  %v3662_v35 = vmul.f32 %v8603_v57, %v3527_v19 }
 0x16e   : > { %v3275_v37 = vadd.f32 %v8609_v3, %v3140_v27  ;;  %3897 = vadd.xlane.f32.xlu0 %v3896_v23  ;;  %v1814_v40 = vadd.f32 %v8575_v29, %v1679_v30  ;;  %v3141_v44 = vmul.f32 %v8592_v46, %v7360_v32  ;;  %v3899_v42 = vsel %vm866_vm1, %v3657_v41, 0.0  ;;  %v2815_v43 = vpop.f32.mrb[67].mxu1 }
 0x16f   : > { %v3273_v45 = vadd.f32 %v8609_v3, %v3138_v31  ;;  %v1817_v47 = vadd.f32 %v8575_v29, %v1682_v33  ;;  %v1680_v48 = vmul.f32 %v8584_v36, %v1356_v34  ;;  %v3139_v49 = vmul.f32 %v8592_v46, %v2815_v43 }
 0x170   : > { %v3403_v50 = vadd.f32 %v3275_v37, %v1816_v39  ;;  %v3276_v51 = vadd.f32 %v8609_v3, %v3141_v44  ;;  %v3914_v52 = vsel %vm866_vm1, %v3662_v35, 0.0  ;;  %v3528_v53 = vmax.f32 %v3400_v15, 0.0 }
 0x171   : > { %v3401_v54 = vadd.f32 %v3273_v45, %v1814_v40  ;;  %3900 = vadd.xlane.f32.xlu1 %v3899_v42  ;;  %v1815_v55 = vadd.f32 %v8575_v29, %v1680_v48  ;;  %v3274_v56 = vadd.f32 %v8609_v3, %v3139_v49  ;;  %v3660_v58 = vmul.f32 %v8603_v57, %v3525_v25  ;;  %v7538_v42 = vld [vmem:[%s8063_s29 + $0x1a0] sm:$0xff]  }
 0x172   : > { %v3404_v59 = vadd.f32 %v3276_v51, %v1817_v47  ;;  %3915 = vadd.xlane.f32.xlu0 %v3914_v52  ;;  %v3663_v60 = vmul.f32 %v8603_v57, %v3528_v53  ;;  %v7233_v61 = vpop.f32.mrb[68].mxu0  ;;  %v3526_v62 = vmax.f32 %v3398_v20, 0.0  ;;  %v3531_v63 = vmax.f32 %v3403_v50, 0.0  ;;  %v7540_v51 = vld [vmem:[%s8063_s29 + $0x1a8] sm:$0xff]   ;;  %7267 = vmatprep.mubr.msk.bf16.mxu0 %vm866_vm1, %v7538_v42 }
 0x173   : > { %v3402_v0 = vadd.f32 %v3274_v56, %v1815_v55  ;;  %v1685_v1 = vmul.f32 %v8584_v36, %v7233_v61  ;;  %v7363_v2 = vpop.f32.mrb[68].mxu1  ;;  %v3908_v4 = vsel %vm866_vm1, %v3660_v58, 0.0  ;;  %v1369_v5 = vpop.f32.mrb[69].mxu0  ;;  %v3529_v6 = vmax.f32 %v3401_v54, 0.0  ;;  %7268 = vmatmul.mubr.msk.bf16.gmra.mrb[104].mxu0 %vm866_vm1, %v7540_v51 }
 0x174   : > { %v3917_v7 = vsel %vm866_vm1, %v3663_v60, 0.0  ;;  %v3144_v8 = vmul.f32 %v8592_v46, %v7363_v2  ;;  %v2828_v9 = vpop.f32.mrb[69].mxu1  ;;  %v1683_v10 = vmul.f32 %v8584_v36, %v1369_v5  ;;  %v3661_v11 = vmul.f32 %v8603_v57, %v3526_v62  ;;  %v7234_v12 = vpop.f32.mrb[70].mxu0 }
 0x175   : > { %3918 = vadd.xlane.f32.xlu1 %v3917_v7  ;;  %v1820_v13 = vadd.f32 %v8575_v29, %v1685_v1  ;;  %v3142_v14 = vmul.f32 %v8592_v46, %v2828_v9  ;;  %v7364_v15 = vpop.f32.mrb[70].mxu1  ;;  %v1686_v16 = vmul.f32 %v8584_v36, %v7234_v12  ;;  %v1372_v17 = vpop.f32.mrb[71].mxu0  ;;  %v3666_v18 = vmul.f32 %v8603_v57, %v3531_v63 }
 0x176   : > { %v3279_v19 = vadd.f32 %v8609_v3, %v3144_v8  ;;  %3909 = vadd.xlane.f32.xlu0 %v3908_v4  ;;  %v1818_v20 = vadd.f32 %v8575_v29, %v1683_v10  ;;  %v3145_v21 = vmul.f32 %v8592_v46, %v7364_v15  ;;  %v3911_v22 = vsel %vm866_vm1, %v3661_v11, 0.0  ;;  %v2831_v23 = vpop.f32.mrb[71].mxu1 }
 0x177   : > { %v3277_v24 = vadd.f32 %v8609_v3, %v3142_v14  ;;  %v1821_v25 = vadd.f32 %v8575_v29, %v1686_v16  ;;  %v1684_v26 = vmul.f32 %v8584_v36, %v1372_v17  ;;  %v3143_v27 = vmul.f32 %v8592_v46, %v2831_v23 }
 0x178   : > { %v3407_v28 = vadd.f32 %v3279_v19, %v1820_v13  ;;  %v3280_v30 = vadd.f32 %v8609_v3, %v3145_v21  ;;  %v3926_v41 = vsel %vm866_vm1, %v3666_v18, 0.0  ;;  %v3532_v38 = vmax.f32 %v3404_v59, 0.0 }
 0x179   : > { %v3405_v39 = vadd.f32 %v3277_v24, %v1818_v20  ;;  %3912 = vadd.xlane.f32.xlu1 %v3911_v22  ;;  %v1819_v31 = vadd.f32 %v8575_v29, %v1684_v26  ;;  %v3278_v32 = vadd.f32 %v8609_v3, %v3143_v27  ;;  %v3664_v33 = vmul.f32 %v8603_v57, %v3529_v6 }
 0x17a   : > { %v3408_v34 = vadd.f32 %v3280_v30, %v1821_v25  ;;  %3927 = vadd.xlane.f32.xlu0 %v3926_v41  ;;  %v3667_v35 = vmul.f32 %v8603_v57, %v3532_v38  ;;  %v7237_v37 = vpop.f32.mrb[72].mxu0  ;;  %v3530_v40 = vmax.f32 %v3402_v0, 0.0  ;;  %v3535_v44 = vmax.f32 %v3407_v28, 0.0 }
 0x17b   : > { %v3406_v43 = vadd.f32 %v3278_v32, %v1819_v31  ;;  %v1689_v45 = vmul.f32 %v8584_v36, %v7237_v37  ;;  %v7367_v47 = vpop.f32.mrb[72].mxu1  ;;  %v3920_v48 = vsel %vm866_vm1, %v3664_v33, 0.0  ;;  %v1385_v49 = vpop.f32.mrb[73].mxu0  ;;  %v3533_v50 = vmax.f32 %v3405_v39, 0.0 }
 0x17c   : > { %v3929_v52 = vsel %vm866_vm1, %v3667_v35, 0.0  ;;  %v3148_v53 = vmul.f32 %v8592_v46, %v7367_v47  ;;  %v2844_v54 = vpop.f32.mrb[73].mxu1  ;;  %v1687_v55 = vmul.f32 %v8584_v36, %v1385_v49  ;;  %v3665_v56 = vmul.f32 %v8603_v57, %v3530_v40  ;;  %v7238_v58 = vpop.f32.mrb[74].mxu0 }
 0x17d   : > { %3930 = vadd.xlane.f32.xlu1 %v3929_v52  ;;  %v1824_v59 = vadd.f32 %v8575_v29, %v1689_v45  ;;  %v3146_v60 = vmul.f32 %v8592_v46, %v2844_v54  ;;  %v7368_v61 = vpop.f32.mrb[74].mxu1  ;;  %v1690_v62 = vmul.f32 %v8584_v36, %v7238_v58  ;;  %v1388_v63 = vpop.f32.mrb[75].mxu0  ;;  %v3670_v0 = vmul.f32 %v8603_v57, %v3535_v44 }
 0x17e   : > { %v3283_v1 = vadd.f32 %v8609_v3, %v3148_v53  ;;  %3921 = vadd.xlane.f32.xlu0 %v3920_v48  ;;  %v1822_v2 = vadd.f32 %v8575_v29, %v1687_v55  ;;  %v3149_v4 = vmul.f32 %v8592_v46, %v7368_v61  ;;  %v3923_v5 = vsel %vm866_vm1, %v3665_v56, 0.0  ;;  %v2847_v6 = vpop.f32.mrb[75].mxu1 }
 0x17f   : > { %v3281_v7 = vadd.f32 %v8609_v3, %v3146_v60  ;;  %v1825_v8 = vadd.f32 %v8575_v29, %v1690_v62  ;;  %v1688_v9 = vmul.f32 %v8584_v36, %v1388_v63  ;;  %v3147_v10 = vmul.f32 %v8592_v46, %v2847_v6 }
 0x180   : > { %v3411_v11 = vadd.f32 %v3283_v1, %v1824_v59  ;;  %v3284_v12 = vadd.f32 %v8609_v3, %v3149_v4  ;;  %v3938_v13 = vsel %vm866_vm1, %v3670_v0, 0.0  ;;  %v3536_v14 = vmax.f32 %v3408_v34, 0.0 }
 0x181   : > { %v8769_v15 = vadd.f32 %v3281_v7, %v1822_v2  ;;  %3924 = vadd.xlane.f32.xlu1 %v3923_v5  ;;  %v1823_v16 = vadd.f32 %v8575_v29, %v1688_v9  ;;  %v3282_v17 = vadd.f32 %v8609_v3, %v3147_v10  ;;  %v3668_v18 = vmul.f32 %v8603_v57, %v3533_v50 }
 0x182   : > { %v3412_v19 = vadd.f32 %v3284_v12, %v1825_v8  ;;  %3939 = vadd.xlane.f32.xlu0 %v3938_v13  ;;  %v3671_v20 = vmul.f32 %v8603_v57, %v3536_v14  ;;  %v7241_v21 = vpop.f32.mrb[76].mxu0  ;;  %v3534_v22 = vmax.f32 %v3406_v43, 0.0  ;;  %v3539_v23 = vmax.f32 %v3411_v11, 0.0 }
 0x183   : > { %v8775_v24 = vadd.f32 %v3282_v17, %v1823_v16  ;;  %v1693_v25 = vmul.f32 %v8584_v36, %v7241_v21  ;;  %v7371_v26 = vpop.f32.mrb[76].mxu1  ;;  %v3932_v27 = vsel %vm866_vm1, %v3668_v18, 0.0  ;;  %v1401_v28 = vpop.f32.mrb[77].mxu0  ;;  %v3537_v6 = vmax.f32 %v8769_v15, 0.0 }
 0x184   : > { %v3941_v30 = vsel %vm866_vm1, %v3671_v20, 0.0  ;;  %v3152_v41 = vmul.f32 %v8592_v46, %v7371_v26  ;;  %v2860_v38 = vpop.f32.mrb[77].mxu1  ;;  %v1691_v39 = vmul.f32 %v8584_v36, %v1401_v28  ;;  %v3669_v31 = vmul.f32 %v8603_v57, %v3534_v22  ;;  %v7242_v32 = vpop.f32.mrb[78].mxu0 }
 0x185   : > { %3942 = vadd.xlane.f32.xlu1 %v3941_v30  ;;  %v1828_v33 = vadd.f32 %v8575_v29, %v1693_v25  ;;  %v3150_v34 = vmul.f32 %v8592_v46, %v2860_v38  ;;  %v8785_v35 = vpop.xlane.xlu1 %3735  ;;  %v7372_v37 = vpop.f32.mrb[78].mxu1  ;;  %v1694_v40 = vmul.f32 %v8584_v36, %v7242_v32  ;;  %v3674_v44 = vmul.f32 %v8603_v57, %v3539_v23 }
 0x186   : > { %v3287_v42 = vadd.f32 %v8609_v3, %v3152_v41  ;;  %3933 = vadd.xlane.f32.xlu0 %v3932_v27  ;;  %v1826_v43 = vadd.f32 %v8575_v29, %v1691_v39  ;;  %v3153_v45 = vmul.f32 %v8592_v46, %v7372_v37  ;;  %v8792_v47 = vpop.xlane.xlu0 %3729  ;;  %v1404_v48 = vpop.f32.mrb[79].mxu0  ;;  %v3935_v54 = vsel %vm866_vm1, %v3669_v31, 0.0 }
 0x187   : > { %v3285_v49 = vadd.f32 %v8609_v3, %v3150_v34  ;;  %v1829_v50 = vadd.f32 %v8575_v29, %v1694_v40  ;;  %v2863_v51 = vpop.f32.mrb[79].mxu1  ;;  %v1692_v55 = vmul.f32 %v8584_v36, %v1404_v48  ;;  %v3950_v59 = vsel %vm866_vm1, %v3674_v44, 0.0 }
 0x188   : > { %v8796_v52 = vadd.f32 %v3287_v42, %v1828_v33  ;;  %v3288_v53 = vadd.f32 %v8609_v3, %v3153_v45  ;;  %v3151_v58 = vmul.f32 %v8592_v46, %v2863_v51  ;;  %v3540_v2 = vmax.f32 %v3412_v19, 0.0 }
 0x189   : > { %v8801_v56 = vadd.f32 %v3285_v49, %v1826_v43  ;;  %3936 = vadd.xlane.f32.xlu1 %v3935_v54  ;;  %v1827_v61 = vadd.f32 %v8575_v29, %v1692_v55  ;;  %v8808_v62 = vpop.xlane.xlu1 %3738  ;;  %v3672_v20 = vmul.f32 %v8603_v57, %v3537_v6  ;;  %v3538_v38 = vmax.f32 %v8775_v24, 0.0  ;;  %v8854_v49 = vld [vmem:[#allocation2] ss:$0 sm:$0xff] }
 0x18a   : > { %v8805_v60 = vadd.f32 %v3288_v53, %v1829_v50  ;;  %3951 = vadd.xlane.f32.xlu0 %v3950_v59  ;;  %v7245_v63 = vpop.f32.mrb[80].mxu0  ;;  %v3286_v0 = vadd.f32 %v8609_v3, %v3151_v58  ;;  %v3675_v11 = vmul.f32 %v8603_v57, %v3540_v2  ;;  %v3543_v43 = vmax.f32 %v8796_v52, 0.0 }
 0x18b   : > { %v8811_v1 = vpop.xlane.xlu0 %3732  ;;  %v1697_v4 = vmul.f32 %v8584_v36, %v7245_v63  ;;  %v7375_v5 = vpop.f32.mrb[80].mxu1  ;;  %v3944_v28 = vsel %vm866_vm1, %v3672_v20, 0.0  ;;  %v3673_v44 = vmul.f32 %v8603_v57, %v3538_v38 }
 0x18c   : > { %v3156_v7 = vmul.f32 %v8592_v46, %v7375_v5  ;;  %v2876_v8 = vpop.f32.mrb[81].mxu1  ;;  %v1417_v9 = vpop.f32.mrb[81].mxu0  ;;  %v8816_v10 = vadd.f32 %v3286_v0, %v1827_v61  ;;  %v3953_v15 = vsel %vm866_vm1, %v3675_v11, 0.0  ;;  %v3678_v58 = vmul.f32 %v8603_v57, %v3543_v43  ;;  %v1978_v43 = vld [vmem:[%s8069_s13 + $0x190] sm:$0xff]  }
 0x18d   : > { %v1832_v12 = vadd.f32 %v8575_v29, %v1697_v4  ;;  %v7376_v13 = vpop.f32.mrb[82].mxu1  ;;  %v7246_v14 = vpop.f32.mrb[82].mxu0  ;;  %v3154_v17 = vmul.f32 %v8592_v46, %v2876_v8  ;;  %v1695_v21 = vmul.f32 %v8584_v36, %v1417_v9  ;;  %3954 = vadd.xlane.f32.xlu1 %v3953_v15  ;;  %v3947_v54 = vsel %vm866_vm1, %v3673_v44, 0.0  ;;  %v8879_v8 = vld [vmem:[#allocation3] ss:$0 sm:$0xff]  ;;  %7393 = vmatprep.mubr.msk.bf16.mxu1 %vm866_vm1, %v1978_v43 }
 0x18e   : > { %v3291_v16 = vadd.f32 %v8609_v3, %v3156_v7  ;;  %v2879_v18 = vpop.f32.mrb[83].mxu1  ;;  %v1420_v19 = vpop.f32.mrb[83].mxu0  ;;  %v3157_v22 = vmul.f32 %v8592_v46, %v7376_v13  ;;  %3945 = vadd.xlane.f32.xlu0 %v3944_v28  ;;  %v1698_v39 = vmul.f32 %v8584_v36, %v7246_v14  ;;  %v3544_v59 = vmax.f32 %v8805_v60, 0.0 }
 0x18f   : > { %v8826_v23 = vpop.xlane.xlu0 %3747  ;;  %v3289_v26 = vadd.f32 %v8609_v3, %v3154_v17  ;;  %v1830_v30 = vadd.f32 %v8575_v29, %v1695_v21  ;;  %v3155_v31 = vmul.f32 %v8592_v46, %v2879_v18  ;;  %v1696_v34 = vmul.f32 %v8584_v36, %v1420_v19 }
 0x190   : > { %v3419_v25 = vadd.f32 %v3291_v16, %v1832_v12  ;;  %v8829_v27 = vpop.xlane.xlu1 %3750  ;;  %v3292_v41 = vadd.f32 %v8609_v3, %v3157_v22  ;;  %v1833_v42 = vadd.f32 %v8575_v29, %v1698_v39  ;;  %v4121_v4 = vmul.f32 %v8854_v49, %v8785_v35 }
 0x191   : > { %v8839_v33 = vadd.f32 %v3289_v26, %v1830_v30  ;;  %v3290_v24 = vadd.f32 %v8609_v3, %v3155_v31  ;;  %v1831_v50 = vadd.f32 %v8575_v29, %v1696_v34  ;;  %3948 = vadd.xlane.f32.xlu1 %v3947_v54  ;;  %v3962_v5 = vsel %vm866_vm1, %v3678_v58, 0.0 }
 0x192   : > { %v8837_v32 = vpop.f32.mrb[84].mxu0  ;;  %v3420_v55 = vadd.f32 %v3292_v41, %v1833_v42  ;;  %v3679_v6 = vmul.f32 %v8603_v57, %v3544_v59  ;;  %v3541_v7 = vmax.f32 %v8801_v56, 0.0  ;;  %3963 = vadd.xlane.f32.xlu0 %v3962_v5  ;;  %v3542_v9 = vmax.f32 %v8816_v10, 0.0  ;;  %v1980_v59 = vld [vmem:[%s8069_s13 + $0x198] sm:$0xff]  }
 0x193   : > { %v8842_v37 = vpop.xlane.xlu0 %3741  ;;  %v8844_v40 = vpop.f32.mrb[84].mxu1  ;;  %v3418_v63 = vadd.f32 %v3290_v24, %v1831_v50  ;;  %v3547_v14 = vmax.f32 %v3419_v25, 0.0  ;;  %v4256_v17 = vadd.f32 %v8879_v8, %v4121_v4  ;;  %v4119_v18 = vmul.f32 %v8854_v49, %v8792_v47  ;;  %7394 = vmatmul.mubr.msk.bf16.gmra.mrb[100].mxu1 %vm866_vm1, %v1980_v59 }
 0x194   : > { %v8850_v45 = vpop.xlane.xlu1 %3744  ;;  %v8852_v48 = vpop.f32.mrb[85].mxu1  ;;  %v3965_v11 = vsel %vm866_vm1, %v3679_v6, 0.0  ;;  %v3676_v12 = vmul.f32 %v8603_v57, %v3541_v7  ;;  %v3677_v35 = vmul.f32 %v8603_v57, %v3542_v9  ;;  %v4122_v10 = vmul.f32 %v8854_v49, %v8808_v62 }
 0x195   : > { %v8857_v51 = vpop.f32.mrb[85].mxu0  ;;  %v8859_v53 = vpop.f32.mrb[86].mxu1  ;;  %3966 = vadd.xlane.f32.xlu1 %v3965_v11  ;;  %v3682_v21 = vmul.f32 %v8603_v57, %v3547_v14  ;;  %v3548_v22 = vmax.f32 %v3420_v55, 0.0  ;;  %v3545_v38 = vmax.f32 %v8839_v33, 0.0  ;;  %v4384_v34 = vmul.f32 0.5, %v4256_v17 }
 0x196   : > { %v8864_v52 = vpop.f32.mrb[86].mxu0  ;;  %v8866_v61 = vpop.f32.mrb[87].mxu1  ;;  %v3956_v19 = vsel %vm866_vm1, %v3676_v12, 0.0  ;;  %v3959_v47 = vsel %vm866_vm1, %v3677_v35, 0.0  ;;  %v4254_v44 = vadd.f32 %v8879_v8, %v4119_v18  ;;  %v4257_v42 = vadd.f32 %v8879_v8, %v4122_v10 }
 0x197   : > { %v8868_v0 = vpop.xlane.xlu0 %3759  ;;  %v8870_v2 = vpop.f32.mrb[87].mxu0  ;;  %3957 = vadd.xlane.f32.xlu0 %v3956_v19  ;;  %v3974_v30 = vsel %vm866_vm1, %v3682_v21, 0.0  ;;  %v3683_v41 = vmul.f32 %v8603_v57, %v3548_v22  ;;  %v4120_v24 = vmul.f32 %v8854_v49, %v8811_v1  ;;  %v3680_v54 = vmul.f32 %v8603_v57, %v3545_v38 }
 0x198   : > { %v8877_v60 = vpop.xlane.xlu1 %3762  ;;  %v3546_v33 = vmax.f32 %v3418_v63, 0.0  ;;  %v7976_v58 = vmov 0   ;;  %v4382_v7 = vmul.f32 0.5, %v4254_v44  ;;  %7626 = vtanh.f32 %v4384_v34 }
 0x199   : > { %3960 = vadd.xlane.f32.xlu1 %v3959_v47  ;;  %v3977_v50 = vsel %vm866_vm1, %v3683_v41, 0.0  ;;  %7433 = vset.pattern.permute.xlu0 %v7976_v58  ;;  %v3968_v9 = vsel %vm866_vm1, %v3680_v54, 0.0  ;;  %v4385_v12 = vmul.f32 0.5, %v4257_v42  ;;  %v4255_v35 = vadd.f32 %v8879_v8, %v4120_v24 }
 0x19a   : > { %v8884_v13 = vpop.f32.mrb[88].mxu0  ;;  %7432 = vset.pattern.permute.xlu1 %v7976_v58  ;;  %v3681_v5 = vmul.f32 %v8603_v57, %v3546_v33  ;;  %v3160_v18 = vmul.f32 %v8592_v46, %v8844_v40  ;;  %7628 = vtanh.f32 %v4382_v7  ;;  %v1701_v47 = vmul.f32 %v8584_v36, %v8837_v32 }
 0x19b   : > { %v8887_v16 = vpop.xlane.xlu0 %3753  ;;  %v8889_v56 = vpop.f32.mrb[88].mxu1  ;;  %3975 = vadd.xlane.f32.xlu0 %v3974_v30  ;;  %7630 = vtanh.f32 %v4385_v12  ;;  %v4383_v10 = vmul.f32 0.5, %v4255_v35  ;;  %v3158_v30 = vmul.f32 %v8592_v46, %v8852_v48  ;;  %v1699_v41 = vmul.f32 %v8584_v36, %v8857_v51 }
 0x19c   : > { %v8897_v15 = vpop.xlane.xlu1 %3756  ;;  %v8899_v20 = vpop.f32.mrb[89].mxu1  ;;  %v3971_v57 = vsel %vm866_vm1, %v3681_v5, 0.0  ;;  %v3295_v22 = vadd.f32 %v8609_v3, %v3160_v18  ;;  %v1702_v40 = vmul.f32 %v8584_v36, %v8864_v52  ;;  %v1836_v38 = vadd.f32 %v8575_v29, %v1701_v47 }
 0x19d   : > { %v8902_v25 = vpop.f32.mrb[89].mxu0  ;;  %v8904_v26 = vpop.f32.mrb[90].mxu1  ;;  %3978 = vadd.xlane.f32.xlu1 %v3977_v50  ;;  %7632 = vtanh.f32 %v4383_v10  ;;  %v3293_v44 = vadd.f32 %v8609_v3, %v3158_v30  ;;  %v1834_v42 = vadd.f32 %v8575_v29, %v1699_v41  ;;  %v3161_v52 = vmul.f32 %v8592_v46, %v8859_v53  ;;  %v9014_v41 = vld [vmem:[%s10662_s6] ss:$0 sm:$0xff] }
 0x19e   : > { %v8907_v28 = vpop.f32.mrb[90].mxu0  ;;  %v8909_v62 = vpop.f32.mrb[91].mxu1  ;;  %v8970_v43 = vadd.f32 %v3295_v22, %v1836_v38  ;;  %v1837_v51 = vadd.f32 %v8575_v29, %v1702_v40  ;;  %v1700_v50 = vmul.f32 %v8584_v36, %v8870_v2  ;;  %v3159_v5 = vmul.f32 %v8592_v46, %v8866_v61  ;;  %v8989_v29 = vld [vmem:[%s10660_s4] ss:$0 sm:$0xff] }
 0x19f   : > { %v8914_v39 = vpop.xlane.xlu0 %3771  ;;  %v8916_v31 = vpop.f32.mrb[91].mxu0  ;;  %3969 = vadd.xlane.f32.xlu0 %v3968_v9  ;;  %v8972_v48 = vadd.f32 %v3293_v44, %v1834_v42  ;;  %v3296_v59 = vadd.f32 %v8609_v3, %v3161_v52  ;;  %v3164_v36 = vmul.f32 %v8592_v46, %v8889_v56  ;;  %v9003_v22 = vld [vmem:[%s10659_s3] ss:$0 sm:$0xff] }
 0x1a0   : > { %v1835_v53 = vadd.f32 %v8989_v29, %v1700_v50  ;;  %v3294_v35 = vadd.f32 %v8609_v3, %v3159_v5  ;;  %v1705_v47 = vmul.f32 %v9003_v22, %v8884_v13  ;;  %v1703_v50 = vmul.f32 %v9003_v22, %v8902_v25  ;;  %v1984_v25 = vld [vmem:[%s8069_s13 + $0x1a8] sm:$0xff]  }
 0x1a1   : > { %3972 = vadd.xlane.f32.xlu1 %v3971_v57  ;;  %v8994_v2 = vadd.f32 %v3296_v59, %v1837_v51  ;;  %v3299_v10 = vadd.f32 %v8609_v3, %v3164_v36  ;;  %v3162_v3 = vmul.f32 %v9014_v41, %v8899_v20  ;;  %v9028_v20 = vld [vmem:[%s10663_s7] ss:$0 sm:$0xff] }
 0x1a2   : > { %v8925_v55 = vpop.xlane.xlu1 %3774  ;;  %v8928_v4 = vpop.f32.mrb[92].mxu0  ;;  %v9009_v30 = vadd.f32 %v3294_v35, %v1835_v53  ;;  %v1840_v40 = vadd.f32 %v8989_v29, %v1705_v47  ;;  %v7542_v35 = vld [vmem:[%s8063_s29 + $0x1b0] sm:$0xff]  }
 0x1a3   : > { %v8931_v6 = vpop.xlane.xlu0 %3765  ;;  %v8933_v1 = vpop.f32.mrb[92].mxu1  ;;  %v3297_v52 = vadd.f32 %v9028_v20, %v3162_v3  ;;  %7271 = vmatprep.mubr.msk.bf16.mxu0 %vm866_vm1, %v7542_v35  ;;  %v1706_v35 = vmul.f32 %v9003_v22, %v8907_v28  ;;  %v9096_v28 = vld [vmem:[%s10664_s8] ss:$0 sm:$0xff] }
 0x1a4   : > { %v8936_v11 = vpop.f32.mrb[93].mxu1  ;;  %v8938_v63 = vpop.f32.mrb[93].mxu0 }
 0x1a5   : > { %v7627_v24 = vpop.eup %7626 }
 0x1a6   : > { %v8943_v14 = vpop.xlane.xlu1 %3768  ;;  %v7629_v54 = vpop.eup %7628  ;;  %v4640_v58 = vadd.f32 1.0, %v7627_v24  ;;  %v9021_v24 = vadd.f32 %v3299_v10, %v1840_v40 }
 0x1a7   : > { %v8945_v17 = vpop.xlane.xlu0 %3783  ;;  %v7631_v7 = vpop.eup %7630  ;;  %v4638_v12 = vadd.f32 1.0, %v7629_v54  ;;  %v1838_v54 = vadd.f32 %v8989_v29, %v1703_v50 }
 0x1a8   : > { %v4768_v57 = vmul.f32 0.5, %v4640_v58  ;;  %v4641_v18 = vadd.f32 1.0, %v7631_v7  ;;  %v7633_v46 = vpop.eup %7632  ;;  %v9051_v10 = vpop.f32.mrb[94].mxu0 }
 0x1a9   : > { %v4766_v38 = vmul.f32 0.5, %v4638_v12  ;;  %v4639_v13 = vadd.f32 1.0, %v7633_v46  ;;  %v9038_v7 = vadd.f32 %v3297_v52, %v1838_v54  ;;  %v1982_v12 = vld [vmem:[%s8069_s13 + $0x1a0] sm:$0xff]   ;;  %v9055_v46 = vpop.f32.mrb[94].mxu1  ;;  %v9058_v3 = vpop.f32.mrb[95].mxu0 }
 0x1aa   : > { %v8950_v19 = vpop.xlane.xlu1 %3786  ;;  %v4769_v44 = vmul.f32 0.5, %v4641_v18  ;;  %v7544_v18 = vld [vmem:[%s8063_s29 + $0x1b8] sm:$0xff]   ;;  %v9060_v40 = vpop.f32.mrb[95].mxu1  ;;  %7397 = vmatprep.mubr.msk.bf16.mxu1 %vm866_vm1, %v1982_v12 }
 0x1ab   : > { %v8952_v21 = vpop.xlane.xlu0 %3777  ;;  %v4767_v58 = vmul.f32 0.5, %v4639_v13  ;;  %7272 = vmatmul.mubr.msk.bf16.gmra.mrb[108].mxu0 %vm866_vm1, %v7544_v18  ;;  %7398 = vmatmul.mubr.msk.bf16.gmra.mrb[104].mxu1 %vm866_vm1, %v1984_v25  ;;  %v9079_v12 = vpop.f32.mrb[96].mxu1  ;;  %v3549_v25 = vmax.f32 %v8972_v48, 0.0  ;;  %v1704_v48 = vmul.f32 %v9003_v22, %v8916_v31  ;;  %v3555_v31 = vmax.f32 %v9021_v24, 0.0 }
 0x1ac   : > { %v9081_v18 = vpop.f32.mrb[97].mxu1  ;;  %v3166_v24 = vmul.f32 %v9014_v41, %v8936_v11 }
 0x1ae   : > { %v8964_v34 = vpop.xlane.xlu1 %3780 }
 0x1af   : > { %v8968_v32 = vpop.xlane.xlu0 %3795 }
 0x1b2   : > { %v8979_v33 = vpop.xlane.xlu1 %3798  ;;  %5034 = vperm.xlu1 %7432, %v4768_v57  }
 0x1b3   : > { %v8984_v9 = vpop.xlane.xlu0 %3789 }
 0x1b5   : > { %5024 = vperm.xlu0 %7433, %v4766_v38  }
 0x1b6   : > { %v8997_v61 = vpop.xlane.xlu1 %3792  ;;  %5039 = vperm.xlu1 %7432, %v4769_v44  }
 0x1b7   : > { %v9007_v56 = vpop.xlane.xlu0 %3807 }
 0x1ba   : > { %v9019_v42 = vpop.xlane.xlu1 %3810  ;;  %5029 = vperm.xlu1 %7432, %v4767_v58   ;;  %v3551_v58 = vmax.f32 %v8970_v43, 0.0 }
 0x1bb   : > { %v9023_v51 = vpop.xlane.xlu0 %3801 }
 0x1bc   : > { %10668 = vst [vmem:[#allocation4_spill] sm:$0xff] %v9023_v51 }
 0x1be   : > { %v9034_v59 = vpop.xlane.xlu1 %3804 }
 0x1bf   : > { %v9036_v5 = vpop.xlane.xlu0 %3819 }
 0x1c0   : > { %10669 = vst [vmem:[#allocation5_spill] sm:$0xff] %v9036_v5  ;;  %v9068_v13 = vpop.f32.mrb[96].mxu0  ;;  %v3686_v5 = vmul.f32 %v9096_v28, %v3551_v58 }
 0x1c1   : > { %v9072_v50 = vpop.f32.mrb[97].mxu0 }
 0x1c2   : > { %v9040_v53 = vpop.xlane.xlu1 %3822  ;;  %v3986_v58 = vsel %vm866_vm1, %v3686_v5, 0.0 }
 0x1c3   : > { %v9042_v36 = vpop.xlane.xlu0 %3813 }
 0x1c4   : > { %10670 = vst [vmem:[#allocation6_spill] sm:$0xff] %v9042_v36  ;;  %v3165_v36 = vmul.f32 %v9014_v41, %v8904_v26  ;;  %v3168_v26 = vmul.f32 %v9014_v41, %v8933_v1 }
 0x1c6   : > { %v9046_v57 = vpop.xlane.xlu1 %3816  ;;  %v3303_v1 = vadd.f32 %v9028_v20, %v3168_v26 }
 0x1c7   : > { %v9053_v47 = vpop.xlane.xlu0 %3831 }
 0x1c8   : > { %10671 = vst [vmem:[#allocation7_spill] sm:$0xff] %v9053_v47  ;;  %v1841_v47 = vadd.f32 %v8989_v29, %v1706_v35  ;;  %v3300_v35 = vadd.f32 %v9028_v20, %v3165_v36  ;;  %v1709_v36 = vmul.f32 %v9003_v22, %v8928_v4  ;;  %v3690_v4 = vmul.f32 %v9096_v28, %v3555_v31 }
 0x1ca   : > { %v9063_v38 = vpop.xlane.xlu1 %3834  ;;  %v1844_v5 = vadd.f32 %v8989_v29, %v1709_v36  ;;  %v4123_v36 = vmul.f32 %v8854_v49, %v8842_v37  ;;  %v4126_v37 = vmul.f32 %v8854_v49, %v8829_v27  ;;  %v1988_v27 = vld [vmem:[%s8069_s13 + $0x1b8] sm:$0xff]  }
 0x1cb   : > { %10672 = vst [vmem:[#allocation8_spill] sm:$0xff] %v9063_v38  ;;  %v9065_v44 = vpop.xlane.xlu0 %3825  ;;  %v1839_v38 = vadd.f32 %v8989_v29, %v1704_v48 }
 0x1cc   : > { %10673 = vst [vmem:[#allocation9_spill] sm:$0xff] %v9065_v44  ;;  %v9135_v26 = vadd.f32 %v3303_v1, %v1844_v5 }
 0x1ce   : > { %v9070_v52 = vpop.xlane.xlu1 %3828 }
 0x1cf   : > { %10674 = vst [vmem:[#allocation10_spill] sm:$0xff] %v9070_v52  ;;  %v9074_v54 = vpop.xlane.xlu0 %3843  ;;  %v9108_v52 = vadd.f32 %v3300_v35, %v1841_v47 }
 0x1d0   : > { %10675 = vst [vmem:[#allocation11_spill] sm:$0xff] %v9074_v54  ;;  %v3163_v54 = vmul.f32 %v9014_v41, %v8909_v62 }
 0x1d2   : > { %v9083_v44 = vpop.xlane.xlu1 %3846 }
 0x1d3   : > { %10676 = vst [vmem:[#allocation12_spill] sm:$0xff] %v9083_v44  ;;  %v9091_v43 = vpop.xlane.xlu0 %3837  ;;  %v3298_v44 = vadd.f32 %v9028_v20, %v3163_v54 }
 0x1d4   : > { %10677 = vst [vmem:[#allocation13_spill] sm:$0xff] %v9091_v43  ;;  %v3684_v43 = vmul.f32 %v9096_v28, %v3549_v25  ;;  %v4125_v25 = vmul.f32 %v8854_v49, %v8826_v23  ;;  %3987 = vadd.xlane.f32.xlu0 %v3986_v58  ;;  %v1707_v23 = vmul.f32 %v9003_v22, %v8938_v63  ;;  %v3998_v63 = vsel %vm866_vm1, %v3690_v4, 0.0 }
 0x1d5   : > { %v9118_v54 = vadd.f32 %v3298_v44, %v1839_v38  ;;  %v3552_v38 = vmax.f32 %v8994_v2, 0.0  ;;  %v3553_v44 = vmax.f32 %v9038_v7, 0.0  ;;  %v3301_v58 = vadd.f32 %v9028_v20, %v3166_v24 }
 0x1d6   : > { %v9105_v62 = vpop.xlane.xlu1 %3840  ;;  %v3980_v47 = vsel %vm866_vm1, %v3684_v43, 0.0  ;;  %v4130_v43 = vmul.f32 %v8854_v49, %v8877_v60  ;;  %v4260_v11 = vadd.f32 %v8879_v8, %v4125_v25  ;;  %v1842_v7 = vadd.f32 %v8989_v29, %v1707_v23 }
 0x1d7   : > { %v9112_v51 = vpop.xlane.xlu0 %3855  ;;  %v3687_v31 = vmul.f32 %v9096_v28, %v3552_v38  ;;  %v3688_v60 = vmul.f32 %v9096_v28, %v3553_v44  ;;  %v3550_v25 = vmax.f32 %v9009_v30, 0.0  ;;  %v4128_v24 = vmul.f32 %v8854_v49, %v8897_v15 }
 0x1d8   : > { %3981 = vadd.xlane.f32.xlu0 %v3980_v47  ;;  %v9152_v5 = vadd.f32 %v3301_v58, %v1842_v7  ;;  %v4265_v47 = vadd.f32 %v8879_v8, %v4130_v43  ;;  %v4388_v4 = vmul.f32 0.5, %v4260_v11  ;;  %v4258_v38 = vadd.f32 %v8879_v8, %v4123_v36 }
 0x1d9   : > { %v3989_v44 = vsel %vm866_vm1, %v3687_v31, 0.0  ;;  %v3992_v30 = vsel %vm866_vm1, %v3688_v60, 0.0  ;;  %v3685_v58 = vmul.f32 %v9096_v28, %v3550_v25  ;;  %v4261_v43 = vadd.f32 %v8879_v8, %v4126_v37 }
 0x1da   : > { %v9123_v48 = vpop.xlane.xlu1 %3858  ;;  %v4393_v15 = vmul.f32 0.5, %v4265_v47  ;;  %v4263_v11 = vadd.f32 %v8879_v8, %v4128_v24  ;;  %7634 = vtanh.f32 %v4388_v4  ;;  %v4386_v36 = vmul.f32 0.5, %v4258_v38 }
 0x1db   : > { %v9128_v35 = vpop.xlane.xlu0 %3849  ;;  %v3983_v60 = vsel %vm866_vm1, %v3685_v58, 0.0  ;;  %v4389_v47 = vmul.f32 0.5, %v4261_v43  ;;  %v1710_v38 = vmul.f32 %v9003_v22, %v9051_v10  ;;  %v1708_v43 = vmul.f32 %v9003_v22, %v9058_v3 }
 0x1dc   : > { %3999 = vadd.xlane.f32.xlu0 %v3998_v63  ;;  %v4124_v63 = vmul.f32 %v8854_v49, %v8850_v45  ;;  %7636 = vtanh.f32 %v4393_v15  ;;  %v4391_v37 = vmul.f32 0.5, %v4263_v11  ;;  %v3167_v10 = vmul.f32 %v9014_v41, %v9060_v40 }
 0x1dd   : > { %7638 = vtanh.f32 %v4386_v36  ;;  %v3172_v40 = vmul.f32 %v9014_v41, %v9079_v12  ;;  %v3170_v12 = vmul.f32 %v9014_v41, %v9081_v18  ;;  %v7546_v18 = vld [vmem:[%s8063_s29 + $0x1c0] sm:$0xff]  }
 0x1de   : > { %v9143_v2 = vpop.xlane.xlu1 %3852  ;;  %3990 = vadd.xlane.f32.xlu1 %v3989_v44  ;;  %v4259_v24 = vadd.f32 %v8879_v8, %v4124_v63  ;;  %v3169_v44 = vmul.f32 %v9014_v41, %v9055_v46  ;;  %7640 = vtanh.f32 %v4391_v37  ;;  %v1713_v46 = vmul.f32 %v9003_v22, %v9068_v13  ;;  %7275 = vmatprep.mubr.msk.bf16.mxu0 %vm866_vm1, %v7546_v18  ;;  %v7392_v18 = vpop.f32.mrb[98].mxu1 }
 0x1df   : > { %v9148_v1 = vpop.xlane.xlu0 %3867  ;;  %7642 = vtanh.f32 %v4389_v47  ;;  %v1843_v63 = vadd.f32 %v8989_v29, %v1708_v43  ;;  %v3302_v37 = vadd.f32 %v9028_v20, %v3167_v10  ;;  %v1711_v43 = vmul.f32 %v9003_v22, %v9072_v50 }
 0x1e0   : > { %10678 = vst [vmem:[#allocation14_spill] sm:$0xff] %v9148_v1  ;;  %v1986_v1 = vld [vmem:[%s8069_s13 + $0x1b0] sm:$0xff]   ;;  %3993 = vadd.xlane.f32.xlu0 %v3992_v30  ;;  %v4387_v30 = vmul.f32 0.5, %v4259_v24 }
 0x1e1   : > { %7401 = vmatprep.mubr.msk.bf16.mxu1 %vm866_vm1, %v1986_v1  ;;  %v1845_v1 = vadd.f32 %v8989_v29, %v1710_v38  ;;  %v1848_v38 = vadd.f32 %v8989_v29, %v1713_v46 }
 0x1e2   : > { %v9160_v23 = vpop.xlane.xlu1 %3870  ;;  %3984 = vadd.xlane.f32.xlu1 %v3983_v60  ;;  %7402 = vmatmul.mubr.msk.bf16.gmra.mrb[108].mxu1 %vm866_vm1, %v1988_v27  ;;  %v3304_v27 = vadd.f32 %v9028_v20, %v3169_v44  ;;  %7644 = vtanh.f32 %v4387_v30  ;;  %v9212_v44 = vadd.f32 %v3302_v37, %v1843_v63  ;;  %v1846_v37 = vadd.f32 %v8989_v29, %v1711_v43  ;;  %v1990_v43 = vld [vmem:[%s8069_s13 + $0x1c0] sm:$0xff]  }
 0x1e3   : > { %v9166_v7 = vpop.xlane.xlu0 %3861  ;;  %7405 = vmatprep.mubr.msk.bf16.mxu1 %vm866_vm1, %v1990_v43  ;;  %v3173_v43 = vmul.f32 %v9014_v41, %v7392_v18 }
 0x1e4   : > { %10679 = vst [vmem:[#allocation15_spill] sm:$0xff] %v9166_v7  ;;  %v7635_v11 = vpop.eup %7634  ;;  %v9201_v36 = vadd.f32 %v3304_v27, %v1845_v1  ;;  %v3307_v1 = vadd.f32 %v9028_v20, %v3172_v40 }
 0x1e5   : > { %v4644_v3 = vadd.f32 1.0, %v7635_v11 }
 0x1e6   : > { %v9173_v31 = vpop.xlane.xlu1 %3864  ;;  %v7637_v47 = vpop.eup %7636  ;;  %v9221_v46 = vadd.f32 %v3307_v1, %v1848_v38 }
 0x1e7   : > { %v9176_v25 = vpop.xlane.xlu0 %3879  ;;  %v7639_v13 = vpop.eup %7638  ;;  %v4649_v30 = vadd.f32 1.0, %v7637_v47  ;;  %v4772_v11 = vmul.f32 0.5, %v4644_v3  ;;  %v3305_v3 = vadd.f32 %v9028_v20, %v3170_v12 }
 0x1e8   : > { %10680 = vst [vmem:[#allocation16_spill] sm:$0xff] %v9176_v25  ;;  %v7641_v10 = vpop.eup %7640 }
 0x1e9   : > { %v7643_v63 = vpop.eup %7642  ;;  %v4777_v47 = vmul.f32 0.5, %v4649_v30  ;;  %v4647_v50 = vadd.f32 1.0, %v7641_v10  ;;  %v9231_v1 = vadd.f32 %v3305_v3, %v1846_v37  ;;  %v1992_v37 = vld [vmem:[%s8069_s13 + $0x1c8] sm:$0xff]  }
 0x1ea   : > { %v9181_v4 = vpop.xlane.xlu1 %3882  ;;  %7406 = vmatmul.mubr.msk.bf16.gmra.mrb[112].mxu1 %vm866_vm1, %v1992_v37  ;;  %v3308_v37 = vadd.f32 %v9028_v20, %v3173_v43  ;;  %v3559_v43 = vmax.f32 %v9135_v26, 0.0 }
 0x1eb   : > { %v9183_v45 = vpop.xlane.xlu0 %3873 }
 0x1ec   : > { %10681 = vst [vmem:[#allocation17_spill] sm:$0xff] %v9183_v45  ;;  %v7645_v38 = vpop.eup %7644 }
 0x1ed   : > { %v4643_v25 = vadd.f32 1.0, %v7645_v38 }
 0x1ee   : > { %v9190_v58 = vpop.xlane.xlu1 %3876 }
 0x1ef   : > { %v9195_v15 = vpop.xlane.xlu0 %3891  ;;  %v4771_v12 = vmul.f32 0.5, %v4643_v25 }
 0x1f0   : > { %10682 = vst [vmem:[#allocation18_spill] sm:$0xff] %v9195_v15  ;;  %v4642_v15 = vadd.f32 1.0, %v7639_v13  ;;  %v4645_v13 = vadd.f32 1.0, %v7643_v63  ;;  %v7548_v63 = vld [vmem:[%s8063_s29 + $0x1c8] sm:$0xff]  }
 0x1f1   : > { %7276 = vmatmul.mubr.msk.bf16.gmra.mrb[112].mxu0 %vm866_vm1, %v7548_v63 }
 0x1f2   : > { %v9204_v60 = vpop.xlane.xlu1 %3894  ;;  %v4770_v45 = vmul.f32 0.5, %v4642_v15  ;;  %v4773_v10 = vmul.f32 0.5, %v4645_v13  ;;  %v7262_v13 = vpop.f32.mrb[98].mxu0 }
 0x1f3   : > { %v9207_v24 = vpop.xlane.xlu0 %3885  ;;  %5054 = vperm.xlu1 %7432, %v4772_v11   ;;  %v4775_v11 = vmul.f32 0.5, %v4647_v50  ;;  %v1714_v25 = vmul.f32 %v9003_v22, %v7262_v13 }
 0x1f4   : > { %10683 = vst [vmem:[#allocation19_spill] sm:$0xff] %v9207_v24 }
 0x1f6   : > { %v9215_v27 = vpop.xlane.xlu1 %3888  ;;  %5079 = vperm.xlu0 %7433, %v4777_v47  }
 0x1f7   : > { %v9219_v24 = vpop.xlane.xlu0 %3903  ;;  %5044 = vperm.xlu1 %7432, %v4770_v45  }
 0x1f8   : > { %10684 = vst [vmem:[#allocation20_spill] sm:$0xff] %v9219_v24 }
 0x1fa   : > { %v9226_v40 = vpop.xlane.xlu1 %3906  ;;  %5069 = vperm.xlu0 %7433, %v4775_v11   ;;  %v1484_v11 = vpop.f32.mrb[99].mxu0 }
 0x1fb   : > { %v9229_v24 = vpop.xlane.xlu0 %3897  ;;  %5059 = vperm.xlu1 %7432, %v4773_v10   ;;  %v2943_v10 = vpop.f32.mrb[99].mxu1 }
 0x1fc   : > { %10685 = vst [vmem:[#allocation21_spill] sm:$0xff] %v9229_v24 }
 0x1fe   : > { %v9235_v30 = vpop.xlane.xlu1 %3900 }
 0x1ff   : > { %v9237_v7 = vpop.xlane.xlu0 %3915  ;;  %5049 = vperm.xlu1 %7432, %v4771_v12   ;;  %v1849_v12 = vadd.f32 %v8989_v29, %v1714_v25 }
 0x200   : > { %10686 = vst [vmem:[#allocation22_spill] sm:$0xff] %v9237_v7  ;;  %v3171_v7 = vmul.f32 %v9014_v41, %v2943_v10  ;;  %v3557_v10 = vmax.f32 %v9152_v5, 0.0  ;;  %v4129_v5 = vmul.f32 %v8854_v49, %v8868_v0  ;;  %v3554_v0 = vmax.f32 %v9118_v54, 0.0 }
 0x202   : > { %v9241_v15 = vpop.xlane.xlu1 %3918  ;;  %v3306_v18 = vadd.f32 %v9028_v20, %v3171_v7  ;;  %v3689_v54 = vmul.f32 %v9096_v28, %v3554_v0 }
 0x203   : > { %v9243_v45 = vpop.xlane.xlu0 %3909 }
 0x204   : > { %10687 = vst [vmem:[#allocation23_spill] sm:$0xff] %v9243_v45 }
 0x206   : > { %v9248_v47 = vpop.xlane.xlu1 %3912 }
 0x207   : > { %10688 = vst [vmem:[#allocation24_spill] sm:$0xff] %v9248_v47  ;;  %v9251_v50 = vpop.xlane.xlu0 %3927 }
 0x208   : > { %10689 = vst [vmem:[#allocation25_spill] sm:$0xff] %v9251_v50  ;;  %v1712_v50 = vmul.f32 %v9003_v22, %v1484_v11 }
 0x20a   : > { %v9253_v3 = vpop.xlane.xlu1 %3930  ;;  %v1847_v13 = vadd.f32 %v8989_v29, %v1712_v50  ;;  %v3694_v50 = vmul.f32 %v9096_v28, %v3559_v43  ;;  %v3556_v43 = vmax.f32 %v9108_v52, 0.0 }
 0x20b   : > { %10690 = vst [vmem:[#allocation26_spill] sm:$0xff] %v9253_v3  ;;  %v9255_v38 = vpop.xlane.xlu0 %3921  ;;  %v9273_v3 = vpop.f32.mrb[100].mxu0 }
 0x20c   : > { %10691 = vst [vmem:[#allocation27_spill] sm:$0xff] %v9255_v38  ;;  %v9267_v38 = vadd.f32 %v3308_v37, %v1849_v12  ;;  %v9275_v25 = vpop.f32.mrb[101].mxu0  ;;  %v9280_v11 = vadd.f32 %v3306_v18, %v1847_v13  ;;  %v4134_v37 = vmul.f32 %v8854_v49, %v8925_v55  ;;  %v4132_v13 = vmul.f32 %v8854_v49, %v8943_v14 }
 0x20d   : > { %v4264_v14 = vadd.f32 %v8879_v8, %v4129_v5  ;;  %v1994_v5 = vld [vmem:[%s8069_s13 + $0x1d0] sm:$0xff]  }
 0x20e   : > { %v9260_v63 = vpop.xlane.xlu1 %3924  ;;  %v4269_v26 = vadd.f32 %v8879_v8, %v4134_v37  ;;  %v4267_v37 = vadd.f32 %v8879_v8, %v4132_v13  ;;  %7409 = vmatprep.mubr.msk.bf16.mxu1 %vm866_vm1, %v1994_v5 }
 0x20f   : > { %10692 = vst [vmem:[#allocation28_spill] sm:$0xff] %v9260_v63  ;;  %v9264_v45 = vpop.xlane.xlu0 %3939 }
 0x210   : > { %10693 = vst [vmem:[#allocation29_spill] sm:$0xff] %v9264_v45  ;;  %v4010_v45 = vsel %vm866_vm1, %v3694_v50, 0.0 }
 0x212   : > { %v9270_v24 = vpop.xlane.xlu1 %3942 }
 0x213   : > { %10694 = vst [vmem:[#allocation30_spill] sm:$0xff] %v9270_v24  ;;  %v9278_v63 = vpop.xlane.xlu0 %3933  ;;  %v3692_v24 = vmul.f32 %v9096_v28, %v3557_v10  ;;  %v4397_v10 = vmul.f32 0.5, %v4269_v26  ;;  %v4392_v26 = vmul.f32 0.5, %v4264_v14 }
 0x214   : > { %10695 = vst [vmem:[#allocation31_spill] sm:$0xff] %v9278_v63  ;;  %v7550_v63 = vld [vmem:[%s8063_s29 + $0x1d0] sm:$0xff]  }
 0x215   : > { %v4004_v50 = vsel %vm866_vm1, %v3692_v24, 0.0  ;;  %7646 = vtanh.f32 %v4397_v10  ;;  %7279 = vmatprep.mubr.msk.bf16.mxu0 %vm866_vm1, %v7550_v63 }
 0x216   : > { %v9283_v12 = vpop.xlane.xlu1 %3936 }
 0x217   : > { %10696 = vst [vmem:[#allocation32_spill] sm:$0xff] %v9283_v12  ;;  %v9288_v7 = vpop.xlane.xlu0 %3951 }
 0x218   : > { %10697 = vst [vmem:[#allocation33_spill] sm:$0xff] %v9288_v7  ;;  %v4127_v7 = vmul.f32 %v8854_v49, %v8887_v16 }
 0x219   : > { %4011 = vadd.xlane.f32.xlu0 %v4010_v45  ;;  %v3691_v45 = vmul.f32 %v9096_v28, %v3556_v43 }
 0x21a   : > { %v9295_v18 = vpop.xlane.xlu1 %3954  ;;  %v4262_v13 = vadd.f32 %v8879_v8, %v4127_v7 }
 0x21b   : > { %10698 = vst [vmem:[#allocation34_spill] sm:$0xff] %v9295_v18  ;;  %v9300_v55 = vpop.xlane.xlu0 %3945  ;;  %v7552_v18 = vld [vmem:[%s8063_s29 + $0x1d8] sm:$0xff]   ;;  %v4001_v16 = vsel %vm866_vm1, %v3691_v45, 0.0 }
 0x21c   : > { %10699 = vst [vmem:[#allocation35_spill] sm:$0xff] %v9300_v55  ;;  %v4395_v55 = vmul.f32 0.5, %v4267_v37  ;;  %7280 = vmatmul.mubr.msk.bf16.gmra.mrb[116].mxu0 %vm866_vm1, %v7552_v18  ;;  %v4390_v7 = vmul.f32 0.5, %v4262_v13  ;;  %v3995_v37 = vsel %vm866_vm1, %v3689_v54, 0.0  ;;  %v7892_v13 = vld [vmem:[%s8069_s13 + $0x8] sm:$0xff]   ;;  %v7893_v54 = vld [vmem:[%s8069_s13] sm:$0xff]  }
 0x21d   : > { %4005 = vadd.xlane.f32.xlu0 %v4004_v50  ;;  %v1996_v50 = vld [vmem:[%s8069_s13 + $0x1d8] sm:$0xff]   ;;  %v4896_v5 = vunpack.c.l.bf16 %v7892_v13 }
 0x21e   : > { %v9308_v52 = vpop.xlane.xlu1 %3948  ;;  %7648 = vtanh.f32 %v4395_v55  ;;  %7410 = vmatmul.mubr.msk.bf16.gmra.mrb[116].mxu1 %vm866_vm1, %v1996_v50 }
 0x21f   : > { %10700 = vst [vmem:[#allocation36_spill] sm:$0xff] %v9308_v52  ;;  %v9311_v24 = vpop.xlane.xlu0 %3963  ;;  %7650 = vtanh.f32 %v4392_v26  ;;  %v7647_v63 = vpop.eup %7646 }
 0x220   : > { %10701 = vst [vmem:[#allocation37_spill] sm:$0xff] %v9311_v24  ;;  %7652 = vtanh.f32 %v4390_v7  ;;  %v4653_v0 = vadd.f32 1.0, %v7647_v63 }
 0x222   : > { %v9317_v12 = vpop.xlane.xlu1 %3966 }
 0x223   : > { %10702 = vst [vmem:[#allocation38_spill] sm:$0xff] %v9317_v12  ;;  %4002 = vadd.xlane.f32.xlu1 %v4001_v16 }
 0x224   : > { %v9323_v43 = vpop.xlane.xlu0 %3957 }
 0x225   : > { %10703 = vst [vmem:[#allocation39_spill] sm:$0xff] %v9323_v43  ;;  %v4894_v43 = vunpack.c.l.bf16 %v7893_v54 }
 0x226   : > { %v9327_v10 = vpop.xlane.xlu1 %3960 }
 0x227   : > { %10704 = vst [vmem:[#allocation40_spill] sm:$0xff] %v9327_v10  ;;  %3996 = vadd.xlane.f32.xlu1 %v3995_v37  ;;  %v4781_v37 = vmul.f32 0.5, %v4653_v0 }
 0x228   : > { %v9331_v55 = vpop.xlane.xlu0 %3975  ;;  %v7649_v45 = vpop.eup %7648 }
 0x229   : > { %10705 = vst [vmem:[#allocation41_spill] sm:$0xff] %v9331_v55  ;;  %v7651_v26 = vpop.eup %7650  ;;  %v4651_v50 = vadd.f32 1.0, %v7649_v45 }
 0x22a   : > { %v9333_v14 = vpop.xlane.xlu1 %3978  ;;  %v4648_v7 = vadd.f32 1.0, %v7651_v26  ;;  %v7653_v10 = vpop.eup %7652 }
 0x22b   : > { %10706 = vst [vmem:[#allocation42_spill] sm:$0xff] %v9333_v14  ;;  %v4897_v14 = vunpack.c.h.bf16 %v7892_v13  ;;  %v4779_v45 = vmul.f32 0.5, %v4651_v50  ;;  %v4646_v0 = vadd.f32 1.0, %v7653_v10 }
 0x22c   : > { %v9338_v16 = vpop.xlane.xlu0 %3969  ;;  %v4776_v12 = vmul.f32 0.5, %v4648_v7 }
 0x22d   : > { %10708 = vst [vmem:[#allocation44_spill] sm:$0xff] %v9338_v16  ;;  %v4774_v47 = vmul.f32 0.5, %v4646_v0 }
 0x22e   : > { %v9335_v18 = vpop.xlane.xlu1 %3972 }
 0x22f   : > { %10707 = vst [vmem:[#allocation43_spill] sm:$0xff] %v9335_v18 }
 0x232   : > { %v5035_v24 = vpop.permute.xlu1 %5034 }
 0x233   : > { %v5664_v55 = vmul.f32 %v5035_v24, %v4896_v5  ;;  %5099 = vperm.xlu0 %7433, %v4781_v37   ;;  %v4895_v24 = vunpack.c.h.bf16 %v7893_v54 }
 0x234   : > { %v5025_v63 = vpop.permute.xlu0 %5024 }
 0x235   : > { %v6905_v16 = vpack.c.bf16 %v5664_v55, %v5664_v55  ;;  %v5662_v18 = vmul.f32 %v5025_v63, %v4894_v43  ;;  %v9355_v55 = vpop.f32.mrb[102].mxu0 }
 0x236   : > { %v5040_v26 = vpop.permute.xlu1 %5039  ;;  %v9357_v54 = vpop.f32.mrb[103].mxu0 }
 0x237   : > { %6305 = vst.msk [vmem:[%s9345_s30 + $0x8] sm:$0xf] %vm6302_vm2, %v6905_v16  ;;  %v6903_v13 = vpack.c.bf16 %v5662_v18, %v5662_v18  ;;  %v5665_v5 = vmul.f32 %v5040_v26, %v4897_v14  ;;  %5089 = vperm.xlu0 %7433, %v4779_v45   ;;  %v3563_v14 = vmax.f32 %v9221_v46, 0.0  ;;  %v3561_v16 = vmax.f32 %v9231_v1, 0.0 }
 0x238   : > { %5074 = vperm.xlu1 %7432, %v4776_v12   ;;  %v4136_v46 = vmul.f32 %v8854_v49, %v8964_v34  ;;  %v4133_v45 = vmul.f32 %v8854_v49, %v8914_v39  ;;  %v4131_v1 = vmul.f32 %v8854_v49, %v8931_v6  ;;  %v3558_v39 = vmax.f32 %v9212_v44, 0.0  ;;  %v7554_v6 = vld [vmem:[%s8063_s29 + $0x1e0] sm:$0xff]  }
 0x239   : > { %6303 = vst.msk [vmem:[%s9345_s30] sm:$0xf] %vm6302_vm2, %v6903_v13  ;;  %v6906_v37 = vpack.c.bf16 %v5665_v5, %v5665_v5  ;;  %v3698_v50 = vmul.f32 %v9096_v28, %v3563_v14  ;;  %v3696_v7 = vmul.f32 %v9096_v28, %v3561_v16  ;;  %7283 = vmatprep.mubr.msk.bf16.mxu0 %vm866_vm1, %v7554_v6 }
 0x23a   : > { %v5030_v52 = vpop.permute.xlu1 %5029  ;;  %v4268_v34 = vadd.f32 %v8879_v8, %v4133_v45  ;;  %v4266_v13 = vadd.f32 %v8879_v8, %v4131_v1  ;;  %v3693_v16 = vmul.f32 %v9096_v28, %v3558_v39 }
 0x23b   : > { %6306 = vst.msk [vmem:[%s9345_s30 + $0xc] sm:$0xf] %vm6302_vm2, %v6906_v37  ;;  %v5663_v43 = vmul.f32 %v5030_v52, %v4895_v24  ;;  %v4022_v52 = vsel %vm866_vm1, %v3698_v50, 0.0  ;;  %v4016_v0 = vsel %vm866_vm1, %v3696_v7, 0.0  ;;  %v4271_v24 = vadd.f32 %v8879_v8, %v4136_v46  ;;  %v2000_v50 = vld [vmem:[%s8069_s13 + $0x1e8] sm:$0xff]  }
 0x23c   : > { %5064 = vperm.xlu1 %7432, %v4774_v47   ;;  %v4138_v47 = vmul.f32 %v8854_v49, %v8950_v19  ;;  %v3560_v19 = vmax.f32 %v9201_v36, 0.0  ;;  %v4396_v49 = vmul.f32 0.5, %v4268_v34  ;;  %v1998_v36 = vld [vmem:[%s8069_s13 + $0x1e0] sm:$0xff]   ;;  %v4007_v44 = vsel %vm866_vm1, %v3693_v16, 0.0 }
 0x23d   : > { %v6904_v10 = vpack.c.bf16 %v5663_v43, %v5663_v43  ;;  %v4399_v37 = vmul.f32 0.5, %v4271_v24  ;;  %v7556_v43 = vld [vmem:[%s8063_s29 + $0x1e8] sm:$0xff]   ;;  %7413 = vmatprep.mubr.msk.bf16.mxu1 %vm866_vm1, %v1998_v36 }
 0x23e   : > { %v4273_v63 = vadd.f32 %v8879_v8, %v4138_v47  ;;  %v3695_v5 = vmul.f32 %v9096_v28, %v3560_v19  ;;  %7284 = vmatmul.mubr.msk.bf16.gmra.mrb[120].mxu0 %vm866_vm1, %v7556_v43  ;;  %7414 = vmatmul.mubr.msk.bf16.gmra.mrb[120].mxu1 %vm866_vm1, %v2000_v50  ;;  %v9411_v36 = vld [vmem:[%s8069_s13 + $0x28] sm:$0xff]   ;;  %v1718_v50 = vmul.f32 %v9003_v22, %v9355_v55 }
 0x23f   : > { %6304 = vst.msk [vmem:[%s9345_s30 + $0x4] sm:$0xf] %vm6302_vm2, %v6904_v10  ;;  %v4394_v10 = vmul.f32 0.5, %v4266_v13  ;;  %v4905_v43 = vunpack.c.h.bf16 %v9411_v36 }
 0x240   : > { %v4401_v26 = vmul.f32 0.5, %v4273_v63  ;;  %v4013_v14 = vsel %vm866_vm1, %v3695_v5, 0.0  ;;  %v7894_v5 = vld [vmem:[%s8069_s13 + $0x18] sm:$0xff]  }
 0x242   : > { %7654 = vtanh.f32 %v4401_v26 }
 0x243   : > { %7656 = vtanh.f32 %v4399_v37  ;;  %v4900_v37 = vunpack.c.l.bf16 %v7894_v5 }
 0x244   : > { %7658 = vtanh.f32 %v4396_v49  ;;  %v1717_v49 = vmul.f32 %v9003_v22, %v9273_v3  ;;  %v7896_v3 = vld [vmem:[%s8069_s13 + $0x10] sm:$0xff]  }
 0x245   : > { %7660 = vtanh.f32 %v4394_v10  ;;  %v1715_v10 = vmul.f32 %v9003_v22, %v9275_v25 }
 0x246   : > { %v9360_v18 = vpop.f32.mrb[104].mxu0 }
 0x247   : > { %v9362_v12 = vpop.f32.mrb[105].mxu0 }
 0x256   : > { %4023 = vadd.xlane.f32.xlu0 %v4022_v52  ;;  %v7655_v52 = vpop.eup %7654 }
 0x257   : > { %v4657_v63 = vadd.f32 1.0, %v7655_v52  ;;  %v7657_v46 = vpop.eup %7656 }
 0x258   : > { %v7659_v1 = vpop.eup %7658 }
 0x259   : > { %v7661_v19 = vpop.eup %7660  ;;  %v4785_v26 = vmul.f32 0.5, %v4657_v63  ;;  %v4652_v24 = vadd.f32 1.0, %v7659_v1  ;;  %v4898_v63 = vunpack.c.l.bf16 %v7896_v3 }
 0x25a   : > { %4017 = vadd.xlane.f32.xlu0 %v4016_v0  ;;  %v4655_v0 = vadd.f32 1.0, %v7657_v46  ;;  %v4650_v39 = vadd.f32 1.0, %v7661_v19 }
 0x25b   : > { %v4780_v16 = vmul.f32 0.5, %v4652_v24  ;;  %v1852_v24 = vadd.f32 %v8989_v29, %v1717_v49 }
 0x25c   : > { %v4783_v6 = vmul.f32 0.5, %v4655_v0  ;;  %v4778_v46 = vmul.f32 0.5, %v4650_v39  ;;  %v9422_v0 = vld [vmem:[%s8069_s13 + $0x20] sm:$0xff]  }
 0x25d   : > { %v4903_v25 = vunpack.c.h.bf16 %v9422_v0 }
 0x260   : > { %4014 = vadd.xlane.f32.xlu1 %v4013_v14 }
 0x261   : > { %v9391_v8 = vpop.xlane.xlu0 %3987 }
 0x262   : > { %10709 = vst [vmem:[#allocation45_spill] sm:$0xff] %v9391_v8 }
 0x264   : > { %4008 = vadd.xlane.f32.xlu1 %v4007_v44  ;;  %v1716_v44 = vmul.f32 %v9003_v22, %v9357_v54 }
 0x265   : > { %v9397_v47 = vpop.xlane.xlu0 %3981 }
 0x266   : > { %10710 = vst [vmem:[#allocation46_spill] sm:$0xff] %v9397_v47  ;;  %v7395_v1 = vpop.f32.mrb[100].mxu1  ;;  %v1853_v47 = vadd.f32 %v8989_v29, %v1718_v50  ;;  %v1851_v49 = vadd.f32 %v8989_v29, %v1716_v44 }
 0x267   : > { %v3176_v55 = vmul.f32 %v9014_v41, %v7395_v1 }
 0x269   : > { %v9399_v7 = vpop.xlane.xlu0 %3999 }
 0x26a   : > { %10711 = vst [vmem:[#allocation47_spill] sm:$0xff] %v9399_v7  ;;  %v3311_v7 = vadd.f32 %v9028_v20, %v3176_v55 }
 0x26b   : > { %v9401_v45 = vpop.xlane.xlu1 %3990 }
 0x26d   : > { %v9405_v13 = vpop.xlane.xlu0 %3993 }
 0x26e   : > { %10712 = vst [vmem:[#allocation48_spill] sm:$0xff] %v9405_v13  ;;  %v2956_v13 = vpop.f32.mrb[101].mxu1 }
 0x26f   : > { %v9403_v34 = vpop.xlane.xlu1 %3984  ;;  %v3174_v39 = vmul.f32 %v9014_v41, %v2956_v13 }
 0x270   : > { %5119 = vperm.xlu0 %7433, %v4785_v26   ;;  %v4901_v26 = vunpack.c.h.bf16 %v7894_v5 }
 0x273   : > { %v5055_v14 = vpop.permute.xlu1 %5054 }
 0x274   : > { %v5668_v52 = vmul.f32 %v5055_v14, %v4900_v37  ;;  %5109 = vperm.xlu0 %7433, %v4783_v6   ;;  %v1850_v6 = vadd.f32 %v8989_v29, %v1715_v10  ;;  %v7396_v14 = vpop.f32.mrb[102].mxu1  ;;  %v3309_v10 = vadd.f32 %v9028_v20, %v3174_v39  ;;  %v4899_v39 = vunpack.c.h.bf16 %v7896_v3 }
 0x275   : > { %5094 = vperm.xlu1 %7432, %v4780_v16   ;;  %v5080_v19 = vpop.permute.xlu0 %5079  ;;  %v3177_v5 = vmul.f32 %v9014_v41, %v7396_v14  ;;  %v2959_v8 = vpop.f32.mrb[103].mxu1 }
 0x276   : > { %v6909_v54 = vpack.c.bf16 %v5668_v52, %v5668_v52  ;;  %v5673_v37 = vmul.f32 %v5080_v19, %v4905_v43  ;;  %v3175_v13 = vmul.f32 %v9014_v41, %v2959_v8  ;;  %v3439_v19 = vadd.f32 %v3311_v7, %v1852_v24 }
 0x277   : > { %v5045_v16 = vpop.permute.xlu1 %5044  ;;  %v3312_v50 = vadd.f32 %v9028_v20, %v3177_v5  ;;  %v3437_v14 = vadd.f32 %v3309_v10, %v1850_v6  ;;  %v7270_v5 = vpop.f32.mrb[106].mxu0 }
 0x278   : > { %6309 = vst.msk [vmem:[%s9345_s30 + $0x18] sm:$0xf] %vm6302_vm2, %v6909_v54  ;;  %v6914_v43 = vpack.c.bf16 %v5673_v37, %v5673_v37  ;;  %v5666_v52 = vmul.f32 %v5045_v16, %v4898_v63  ;;  %v3310_v54 = vadd.f32 %v9028_v20, %v3175_v13 }
 0x279   : > { %5084 = vperm.xlu1 %7432, %v4778_v46   ;;  %v5070_v1 = vpop.permute.xlu0 %5069  ;;  %v9441_v37 = vadd.f32 %v3312_v50, %v1853_v47  ;;  %v1516_v47 = vpop.f32.mrb[107].mxu0  ;;  %v9462_v50 = vld [vmem:[#allocation3] ss:$0 sm:$0xff] }
 0x27a   : > { %6314 = vst.msk [vmem:[%s9345_s30 + $0x2c] sm:$0xf] %vm6302_vm2, %v6914_v43  ;;  %v6907_v44 = vpack.c.bf16 %v5666_v52, %v5666_v52  ;;  %v5671_v55 = vmul.f32 %v5070_v1, %v4903_v25  ;;  %v9445_v7 = vadd.f32 %v3310_v54, %v1851_v49  ;;  %v3567_v43 = vmax.f32 %v3439_v19, 0.0 }
 0x27b   : > { %v5060_v63 = vpop.permute.xlu1 %5059  ;;  %v3565_v52 = vmax.f32 %v3437_v14, 0.0 }
 0x27c   : > { %6307 = vst.msk [vmem:[%s9345_s30 + $0x10] sm:$0xf] %vm6302_vm2, %v6907_v44  ;;  %v6912_v8 = vpack.c.bf16 %v5671_v55, %v5671_v55  ;;  %v5669_v46 = vmul.f32 %v5060_v63, %v4901_v26  ;;  %v3702_v10 = vmul.f32 %v9096_v28, %v3567_v43  ;;  %v9454_v26 = vld [vmem:[#allocation2] ss:$0 sm:$0xff]  ;;  %v3564_v55 = vmax.f32 %v9267_v38, 0.0 }
 0x27d   : > { %v4142_v3 = vmul.f32 %v9454_v26, %v8979_v33  ;;  %v4137_v49 = vmul.f32 %v9454_v26, %v8945_v17  ;;  %v3700_v1 = vmul.f32 %v9096_v28, %v3565_v52  ;;  %v4140_v19 = vmul.f32 %v9454_v26, %v8997_v61 }
 0x27e   : > { %6312 = vst.msk [vmem:[%s9345_s30 + $0x24] sm:$0xf] %vm6302_vm2, %v6912_v8  ;;  %v6910_v24 = vpack.c.bf16 %v5669_v46, %v5669_v46  ;;  %v4034_v13 = vsel %vm866_vm1, %v3702_v10, 0.0  ;;  %v4135_v17 = vmul.f32 %v9454_v26, %v8952_v21  ;;  %v1721_v63 = vmul.f32 %v9003_v22, %v9360_v18  ;;  %v9474_v8 = vpop.f32.mrb[108].mxu0 }
 0x27f   : > { %v5050_v16 = vpop.permute.xlu1 %5049  ;;  %v4277_v44 = vadd.f32 %v9462_v50, %v4142_v3  ;;  %v4272_v14 = vadd.f32 %v9462_v50, %v4137_v49  ;;  %v4028_v33 = vsel %vm866_vm1, %v3700_v1, 0.0  ;;  %v4275_v46 = vadd.f32 %v9462_v50, %v4140_v19  ;;  %v7558_v19 = vld [vmem:[%s8063_s29 + $0x1f0] sm:$0xff]  }
 0x280   : > { %6310 = vst.msk [vmem:[%s9345_s30 + $0x1c] sm:$0xf] %vm6302_vm2, %v6910_v24  ;;  %v5667_v25 = vmul.f32 %v5050_v16, %v4899_v39  ;;  %v3699_v61 = vmul.f32 %v9096_v28, %v3564_v55  ;;  %v1719_v38 = vmul.f32 %v9003_v22, %v9362_v12  ;;  %v9480_v39 = vpop.f32.mrb[109].mxu0  ;;  %v3562_v24 = vmax.f32 %v9280_v11, 0.0  ;;  %v2002_v55 = vld [vmem:[%s8069_s13 + $0x1f0] sm:$0xff]   ;;  %7287 = vmatprep.mubr.msk.bf16.mxu0 %vm866_vm1, %v7558_v19 }
 0x281   : > { %v4405_v54 = vmul.f32 0.5, %v4277_v44  ;;  %v1722_v21 = vmul.f32 %v9003_v22, %v7270_v5  ;;  %v4400_v16 = vmul.f32 0.5, %v4272_v14  ;;  %v1720_v18 = vmul.f32 %v9003_v22, %v1516_v47  ;;  %v7560_v14 = vld [vmem:[%s8063_s29 + $0x1f8] sm:$0xff]   ;;  %7417 = vmatprep.mubr.msk.bf16.mxu1 %vm866_vm1, %v2002_v55 }
 0x282   : > { %v6908_v6 = vpack.c.bf16 %v5667_v25, %v5667_v25  ;;  %v7399_v25 = vpop.f32.mrb[104].mxu1  ;;  %v1856_v43 = vadd.f32 %v8989_v29, %v1721_v63  ;;  %v4403_v10 = vmul.f32 0.5, %v4275_v46  ;;  %v4025_v11 = vsel %vm866_vm1, %v3699_v61, 0.0  ;;  %v2004_v63 = vld [vmem:[%s8069_s13 + $0x1f8] sm:$0xff]   ;;  %7288 = vmatmul.mubr.msk.bf16.gmra.mrb[124].mxu0 %vm866_vm1, %v7560_v14  ;;  %v9535_v14 = vld [vmem:[%s8069_s13 + $0x30] sm:$0xff]  }
 0x283   : > { %7662 = vtanh.f32 %v4405_v54  ;;  %v3180_v12 = vmul.f32 %v9014_v41, %v7399_v25  ;;  %v2972_v52 = vpop.f32.mrb[105].mxu1  ;;  %v1854_v5 = vadd.f32 %v8989_v29, %v1719_v38  ;;  %v3697_v47 = vmul.f32 %v9096_v28, %v3562_v24  ;;  %7418 = vmatmul.mubr.msk.bf16.gmra.mrb[124].mxu1 %vm866_vm1, %v2004_v63 }
 0x284   : > { %6308 = vst.msk [vmem:[%s9345_s30 + $0x14] sm:$0xf] %vm6302_vm2, %v6908_v6  ;;  %v4270_v6 = vadd.f32 %v9462_v50, %v4135_v17  ;;  %v3178_v3 = vmul.f32 %v9014_v41, %v2972_v52  ;;  %v7400_v22 = vpop.f32.mrb[106].mxu1  ;;  %v1855_v17 = vadd.f32 %v8989_v29, %v1720_v18  ;;  %7664 = vtanh.f32 %v4403_v10 }
 0x285   : > { %v3315_v49 = vadd.f32 %v9028_v20, %v3180_v12  ;;  %v3181_v1 = vmul.f32 %v9014_v41, %v7400_v22  ;;  %v2975_v44 = vpop.f32.mrb[107].mxu1  ;;  %7666 = vtanh.f32 %v4400_v16  ;;  %v4019_v24 = vsel %vm866_vm1, %v3697_v47, 0.0 }
 0x286   : > { %v3179_v54 = vmul.f32 %v9014_v41, %v2975_v44  ;;  %v9530_v44 = vld [vmem:[%s10659_s3] ss:$0 sm:$0xff] }
 0x287   : > { %v9502_v46 = vadd.f32 %v3315_v49, %v1856_v43  ;;  %v3316_v28 = vadd.f32 %v9028_v20, %v3181_v1  ;;  %v1725_v19 = vmul.f32 %v9530_v44, %v9474_v8  ;;  %v9546_v8 = vld [vmem:[%s10660_s4] ss:$0 sm:$0xff] }
 0x288   : > { %v3314_v38 = vadd.f32 %v9028_v20, %v3179_v54 }
 0x28d   : > { %v7663_v25 = vpop.eup %7662 }
 0x28e   : > { %v7665_v43 = vpop.eup %7664 }
 0x28f   : > { %v7667_v12 = vpop.eup %7666  ;;  %v4659_v52 = vadd.f32 1.0, %v7665_v43 }
 0x293   : > { %4035 = vadd.xlane.f32.xlu0 %v4034_v13  ;;  %v1857_v13 = vadd.f32 %v8989_v29, %v1722_v21  ;;  %v4398_v29 = vmul.f32 0.5, %v4270_v6  ;;  %v9515_v21 = vadd.f32 %v3314_v38, %v1855_v17  ;;  %v4656_v6 = vadd.f32 1.0, %v7667_v12 }
 0x294   : > { %v1723_v17 = vmul.f32 %v9530_v44, %v9480_v39  ;;  %v4904_v38 = vunpack.c.l.bf16 %v9411_v36  ;;  %v9552_v39 = vld [vmem:[%s10662_s6] ss:$0 sm:$0xff] }
 0x295   : > { %v9511_v41 = vadd.f32 %v3316_v28, %v1857_v13  ;;  %7668 = vtanh.f32 %v4398_v29  ;;  %v4784_v13 = vmul.f32 0.5, %v4656_v6  ;;  %v9562_v6 = vld [vmem:[%s10663_s7] ss:$0 sm:$0xff] }
 0x296   : > { %v1858_v12 = vadd.f32 %v9546_v8, %v1723_v17 }
 0x297   : > { %4029 = vadd.xlane.f32.xlu0 %v4028_v33  ;;  %v3313_v33 = vadd.f32 %v9028_v20, %v3178_v3  ;;  %v4661_v20 = vadd.f32 1.0, %v7663_v25  ;;  %v9522_v3 = vld [vmem:[%s8069_s13 + $0x38] sm:$0xff]   ;;  %v1860_v25 = vadd.f32 %v9546_v8, %v1725_v19 }
 0x298   : > { %v4909_v22 = vunpack.c.h.bf16 %v9522_v3 }
 0x299   : > { %v9506_v61 = vadd.f32 %v3313_v33, %v1854_v5  ;;  %v4789_v16 = vmul.f32 0.5, %v4661_v20  ;;  %v4787_v5 = vmul.f32 0.5, %v4659_v52  ;;  %v4907_v33 = vunpack.c.h.bf16 %v9535_v14 }
 0x29d   : > { %4026 = vadd.xlane.f32.xlu1 %v4025_v11 }
 0x29f   : > { %v7669_v11 = vpop.eup %7668 }
 0x2a0   : > { %v4654_v47 = vadd.f32 1.0, %v7669_v11 }
 0x2a1   : > { %4020 = vadd.xlane.f32.xlu1 %v4019_v24 }
 0x2a2   : > { %v4782_v63 = vmul.f32 0.5, %v4654_v47  ;;  %v4902_v47 = vunpack.c.l.bf16 %v9422_v0 }
 0x2a6   : > { %v9517_v18 = vpop.xlane.xlu0 %4011 }
 0x2aa   : > { %v9519_v10 = vpop.xlane.xlu0 %4005 }
 0x2ad   : > { %5139 = vperm.xlu0 %7433, %v4789_v16  }
 0x2b0   : > { %v9525_v49 = vpop.xlane.xlu1 %4002 }
 0x2b1   : > { %5129 = vperm.xlu0 %7433, %v4787_v5  }
 0x2b2   : > { %5114 = vperm.xlu1 %7432, %v4784_v13   ;;  %v5100_v1 = vpop.permute.xlu0 %5099 }
 0x2b3   : > { %v5677_v55 = vmul.f32 %v5100_v1, %v4909_v22 }
 0x2b4   : > { %v9540_v54 = vpop.xlane.xlu1 %3996 }
 0x2b5   : > { %v6918_v28 = vpack.c.bf16 %v5677_v55, %v5677_v55  ;;  %v7403_v29 = vpop.f32.mrb[108].mxu1 }
 0x2b6   : > { %5104 = vperm.xlu1 %7432, %v4782_v63   ;;  %v5090_v24 = vpop.permute.xlu0 %5089  ;;  %v3184_v20 = vmul.f32 %v9552_v39, %v7403_v29  ;;  %v2988_v43 = vpop.f32.mrb[109].mxu1 }
 0x2b7   : > { %6318 = vst.msk [vmem:[%s9345_s30 + $0x3c] sm:$0xf] %vm6302_vm2, %v6918_v28  ;;  %v5675_v36 = vmul.f32 %v5090_v24, %v4907_v33  ;;  %v3182_v52 = vmul.f32 %v9552_v39, %v2988_v43  ;;  %v7274_v28 = vpop.f32.mrb[110].mxu0  ;;  %v7404_v29 = vpop.f32.mrb[110].mxu1 }
 0x2b8   : > { %v5075_v16 = vpop.permute.xlu1 %5074  ;;  %v3319_v11 = vadd.f32 %v9562_v6, %v3184_v20  ;;  %v1726_v0 = vmul.f32 %v9530_v44, %v7274_v28  ;;  %v1532_v24 = vpop.f32.mrb[111].mxu0  ;;  %v4144_v28 = vmul.f32 %v9454_v26, %v9034_v59  ;;  %v4139_v59 = vmul.f32 %v9454_v26, %v8984_v9 }
 0x2b9   : > { %v6916_v5 = vpack.c.bf16 %v5675_v36, %v5675_v36  ;;  %v5672_v22 = vmul.f32 %v5075_v16, %v4904_v38  ;;  %v3317_v13 = vadd.f32 %v9562_v6, %v3182_v52  ;;  %v3185_v38 = vmul.f32 %v9552_v39, %v7404_v29 }
 0x2ba   : > { %v9567_v1 = vadd.f32 %v3319_v11, %v1860_v25  ;;  %v2991_v25 = vpop.f32.mrb[111].mxu1  ;;  %v1724_v20 = vmul.f32 %v9530_v44, %v1532_v24  ;;  %v1861_v36 = vadd.f32 %v9546_v8, %v1726_v0  ;;  %v3571_v11 = vmax.f32 %v9502_v46, 0.0 }
 0x2bb   : > { %6316 = vst.msk [vmem:[%s9345_s30 + $0x34] sm:$0xf] %vm6302_vm2, %v6916_v5  ;;  %v6913_v19 = vpack.c.bf16 %v5672_v22, %v5672_v22  ;;  %v9571_v55 = vadd.f32 %v3317_v13, %v1858_v12  ;;  %v3183_v43 = vmul.f32 %v9552_v39, %v2991_v25  ;;  %v3320_v12 = vadd.f32 %v9562_v6, %v3185_v38  ;;  %v9594_v13 = vld [vmem:[%s10664_s8] ss:$0 sm:$0xff] }
 0x2bc   : > { %v5065_v33 = vpop.permute.xlu1 %5064  ;;  %v1859_v52 = vadd.f32 %v9546_v8, %v1724_v20  ;;  %v3568_v29 = vmax.f32 %v9441_v37, 0.0 }
 0x2bd   : > { %6313 = vst.msk [vmem:[%s9345_s30 + $0x28] sm:$0xf] %vm6302_vm2, %v6913_v19  ;;  %v5670_v17 = vmul.f32 %v5065_v33, %v4902_v47  ;;  %v3318_v16 = vadd.f32 %v9562_v6, %v3183_v43  ;;  %v9586_v5 = vadd.f32 %v3320_v12, %v1861_v36  ;;  %v3569_v47 = vmax.f32 %v9506_v61, 0.0  ;;  %v7407_v20 = vpop.f32.mrb[112].mxu1 }
 0x2be   : > { %v3706_v19 = vmul.f32 %v9594_v13, %v3571_v11  ;;  %v4146_v33 = vmul.f32 %v9454_v26, %v9019_v42  ;;  %v4141_v61 = vmul.f32 %v9454_v26, %v8968_v32  ;;  %v4279_v42 = vadd.f32 %v9462_v50, %v4144_v28  ;;  %v3004_v12 = vpop.f32.mrb[113].mxu1 }
 0x2bf   : > { %v6911_v63 = vpack.c.bf16 %v5670_v17, %v5670_v17  ;;  %v9588_v22 = vadd.f32 %v3318_v16, %v1859_v52  ;;  %v3704_v46 = vmul.f32 %v9594_v13, %v3569_v47  ;;  %v3188_v32 = vmul.f32 %v9552_v39, %v7407_v20 }
 0x2c0   : > { %v4046_v17 = vsel %vm866_vm1, %v3706_v19, 0.0  ;;  %v4276_v36 = vadd.f32 %v9462_v50, %v4141_v61  ;;  %v3566_v52 = vmax.f32 %v9445_v7, 0.0  ;;  %v3703_v16 = vmul.f32 %v9594_v13, %v3568_v29 }
 0x2c1   : > { %6311 = vst.msk [vmem:[%s9345_s30 + $0x20] sm:$0xf] %vm6302_vm2, %v6911_v63  ;;  %v4281_v63 = vadd.f32 %v9462_v50, %v4146_v33  ;;  %v4040_v0 = vsel %vm866_vm1, %v3704_v46, 0.0  ;;  %v3186_v47 = vmul.f32 %v9552_v39, %v3004_v12  ;;  %v3323_v19 = vadd.f32 %v9562_v6, %v3188_v32 }
 0x2c2   : > { %v4407_v9 = vmul.f32 0.5, %v4279_v42  ;;  %v4404_v46 = vmul.f32 0.5, %v4276_v36  ;;  %v4037_v7 = vsel %vm866_vm1, %v3703_v16, 0.0  ;;  %v3701_v61 = vmul.f32 %v9594_v13, %v3566_v52  ;;  %v9635_v16 = vld [vmem:[%s8069_s13 + $0x48] sm:$0xff]  }
 0x2c3   : > { %v4409_v24 = vmul.f32 0.5, %v4281_v63  ;;  %v4274_v63 = vadd.f32 %v9462_v50, %v4139_v59 }
 0x2c4   : > { %v7277_v38 = vpop.f32.mrb[112].mxu0 }
 0x2c5   : > { %v1729_v25 = vmul.f32 %v9530_v44, %v7277_v38  ;;  %v1545_v43 = vpop.f32.mrb[113].mxu0  ;;  %7670 = vtanh.f32 %v4409_v24  ;;  %v4031_v38 = vsel %vm866_vm1, %v3701_v61, 0.0 }
 0x2c6   : > { %v1727_v37 = vmul.f32 %v9530_v44, %v1545_v43  ;;  %7672 = vtanh.f32 %v4407_v9 }
 0x2c7   : > { %v1864_v11 = vadd.f32 %v9546_v8, %v1729_v25  ;;  %7674 = vtanh.f32 %v4404_v46  ;;  %v9641_v46 = vld [vmem:[%s8069_s13 + $0x40] sm:$0xff]  }
 0x2c8   : > { %v1862_v33 = vadd.f32 %v9546_v8, %v1727_v37 }
 0x2c9   : > { %v9623_v28 = vadd.f32 %v3323_v19, %v1864_v11  ;;  %v4913_v11 = vunpack.c.h.bf16 %v9635_v16 }
 0x2cf   : > { %v7671_v24 = vpop.eup %7670 }
 0x2d0   : > { %4047 = vadd.xlane.f32.xlu0 %v4046_v17  ;;  %v3321_v17 = vadd.f32 %v9562_v6, %v3186_v47  ;;  %v4665_v25 = vadd.f32 1.0, %v7671_v24  ;;  %v7673_v20 = vpop.eup %7672 }
 0x2d1   : > { %v7675_v43 = vpop.eup %7674  ;;  %v4663_v36 = vadd.f32 1.0, %v7673_v20 }
 0x2d2   : > { %v9627_v29 = vadd.f32 %v3321_v17, %v1862_v33  ;;  %v4793_v59 = vmul.f32 0.5, %v4665_v25  ;;  %v4660_v32 = vadd.f32 1.0, %v7675_v43 }
 0x2d3   : > { %v4791_v52 = vmul.f32 0.5, %v4663_v36 }
 0x2d4   : > { %4041 = vadd.xlane.f32.xlu0 %v4040_v0  ;;  %v4402_v0 = vmul.f32 0.5, %v4274_v63  ;;  %v4788_v33 = vmul.f32 0.5, %v4660_v32  ;;  %v4911_v63 = vunpack.c.h.bf16 %v9641_v46 }
 0x2d6   : > { %7676 = vtanh.f32 %v4402_v0 }
 0x2da   : > { %4038 = vadd.xlane.f32.xlu1 %v4037_v7 }
 0x2de   : > { %4032 = vadd.xlane.f32.xlu1 %v4031_v38  ;;  %v4908_v38 = vunpack.c.l.bf16 %v9522_v3  ;;  %v7278_v3 = vpop.f32.mrb[114].mxu0 }
 0x2e0   : > { %v7677_v12 = vpop.eup %7676 }
 0x2e1   : > { %v4658_v47 = vadd.f32 1.0, %v7677_v12 }
 0x2e3   : > { %v9630_v42 = vpop.xlane.xlu0 %4023  ;;  %v4786_v61 = vmul.f32 0.5, %v4658_v47  ;;  %v7408_v47 = vpop.f32.mrb[114].mxu1 }
 0x2e7   : > { %v9632_v37 = vpop.xlane.xlu0 %4017 }
 0x2ea   : > { %5159 = vperm.xlu0 %7433, %v4793_v59   ;;  %v4906_v59 = vunpack.c.l.bf16 %v9535_v14 }
 0x2ed   : > { %v9638_v19 = vpop.xlane.xlu1 %4014 }
 0x2ee   : > { %5149 = vperm.xlu0 %7433, %v4791_v52  }
 0x2ef   : > { %5134 = vperm.xlu1 %7432, %v4788_v33   ;;  %v5120_v9 = vpop.permute.xlu0 %5119  ;;  %v1730_v33 = vmul.f32 %v9530_v44, %v7278_v3  ;;  %v3575_v3 = vmax.f32 %v9567_v1, 0.0 }
 0x2f0   : > { %v5681_v17 = vmul.f32 %v5120_v9, %v4913_v11  ;;  %v3189_v9 = vmul.f32 %v9552_v39, %v7408_v47 }
 0x2f1   : > { %v9644_v7 = vpop.xlane.xlu1 %4008  ;;  %v3710_v1 = vmul.f32 %v9594_v13, %v3575_v3 }
 0x2f2   : > { %v6922_v0 = vpack.c.bf16 %v5681_v17, %v5681_v17  ;;  %v1548_v17 = vpop.f32.mrb[115].mxu0 }
 0x2f3   : > { %5124 = vperm.xlu1 %7432, %v4786_v61   ;;  %v5110_v24 = vpop.permute.xlu0 %5109  ;;  %v1728_v14 = vmul.f32 %v9530_v44, %v1548_v17 }
 0x2f4   : > { %6322 = vst.msk [vmem:[%s9345_s30 + $0x4c] sm:$0xf] %vm6302_vm2, %v6922_v0  ;;  %v5679_v25 = vmul.f32 %v5110_v24, %v4911_v63  ;;  %v3007_v63 = vpop.f32.mrb[115].mxu1  ;;  %v7281_v0 = vpop.f32.mrb[116].mxu0  ;;  %v1865_v24 = vadd.f32 %v9546_v8, %v1730_v33 }
 0x2f5   : > { %v5095_v20 = vpop.permute.xlu1 %5094  ;;  %v3187_v61 = vmul.f32 %v9552_v39, %v3007_v63 }
 0x2f6   : > { %v6920_v43 = vpack.c.bf16 %v5679_v25, %v5679_v25  ;;  %v5676_v36 = vmul.f32 %v5095_v20, %v4908_v38  ;;  %v7411_v38 = vpop.f32.mrb[116].mxu1  ;;  %v3324_v25 = vadd.f32 %v9562_v6, %v3189_v9  ;;  %v1733_v20 = vmul.f32 %v9530_v44, %v7281_v0 }
 0x2f8   : > { %6320 = vst.msk [vmem:[%s9345_s30 + $0x44] sm:$0xf] %vm6302_vm2, %v6920_v43  ;;  %v6917_v32 = vpack.c.bf16 %v5676_v36, %v5676_v36  ;;  %v3192_v43 = vmul.f32 %v9552_v39, %v7411_v38  ;;  %v1561_v36 = vpop.f32.mrb[117].mxu0  ;;  %v9669_v47 = vadd.f32 %v3324_v25, %v1865_v24  ;;  %v1868_v33 = vadd.f32 %v9546_v8, %v1733_v20 }
 0x2f9   : > { %v5085_v12 = vpop.permute.xlu1 %5084  ;;  %v3573_v38 = vmax.f32 %v9571_v55, 0.0  ;;  %v4150_v24 = vmul.f32 %v9454_v26, %v9040_v53  ;;  %v4058_v25 = vsel %vm866_vm1, %v3710_v1, 0.0  ;;  %v3572_v55 = vmax.f32 %v9511_v41, 0.0 }
 0x2fa   : > { %6317 = vst.msk [vmem:[%s9345_s30 + $0x38] sm:$0xf] %vm6302_vm2, %v6917_v32  ;;  %v5674_v52 = vmul.f32 %v5085_v12, %v4906_v59  ;;  %v3020_v59 = vpop.f32.mrb[117].mxu1  ;;  %v1863_v32 = vadd.f32 %v9546_v8, %v1728_v14  ;;  %v3322_v12 = vadd.f32 %v9562_v6, %v3187_v61  ;;  %v3327_v9 = vadd.f32 %v9562_v6, %v3192_v43 }
 0x2fb   : > { %v3708_v20 = vmul.f32 %v9594_v13, %v3573_v38  ;;  %v4285_v43 = vadd.f32 %v9462_v50, %v4150_v24 }
 0x2fc   : > { %v6915_v11 = vpack.c.bf16 %v5674_v52, %v5674_v52  ;;  %v1731_v52 = vmul.f32 %v9530_v44, %v1561_v36  ;;  %v9673_v17 = vadd.f32 %v3322_v12, %v1863_v32  ;;  %v9677_v0 = vadd.f32 %v3327_v9, %v1868_v33 }
 0x2fd   : > { %v4148_v36 = vmul.f32 %v9454_v26, %v9046_v57  ;;  %v4052_v32 = vsel %vm866_vm1, %v3708_v20, 0.0  ;;  %v4413_v12 = vmul.f32 0.5, %v4285_v43  ;;  %v3570_v33 = vmax.f32 %v9515_v21, 0.0 }
 0x2fe   : > { %6315 = vst.msk [vmem:[%s9345_s30 + $0x30] sm:$0xf] %vm6302_vm2, %v6915_v11  ;;  %v3190_v11 = vmul.f32 %v9552_v39, %v3020_v59  ;;  %v1866_v63 = vadd.f32 %v9546_v8, %v1731_v52  ;;  %v4145_v59 = vmul.f32 %v9454_v26, %v9007_v56  ;;  %v3707_v57 = vmul.f32 %v9594_v13, %v3572_v55 }
 0x2ff   : > { %v4283_v53 = vadd.f32 %v9462_v50, %v4148_v36  ;;  %7678 = vtanh.f32 %v4413_v12 }
 0x300   : > { %v3325_v14 = vadd.f32 %v9562_v6, %v3190_v11  ;;  %v4280_v52 = vadd.f32 %v9462_v50, %v4145_v59  ;;  %v10713_v11 = vld [vmem:[#allocation4_spill] sm:$0xff] }
 0x301   : > { %v4143_v3 = vmul.f32 %v9454_v26, %v10713_v11  ;;  %v4411_v56 = vmul.f32 0.5, %v4283_v53 }
 0x302   : > { %v9679_v61 = vadd.f32 %v3325_v14, %v1866_v63  ;;  %v4408_v9 = vmul.f32 0.5, %v4280_v52  ;;  %v4049_v63 = vsel %vm866_vm1, %v3707_v57, 0.0  ;;  %v3705_v14 = vmul.f32 %v9594_v13, %v3570_v33  ;;  %v9709_v52 = vld [vmem:[%s8069_s13 + $0x58] sm:$0xff]  }
 0x303   : > { %v4278_v41 = vadd.f32 %v9462_v50, %v4143_v3  ;;  %7680 = vtanh.f32 %v4411_v56  ;;  %v4917_v11 = vunpack.c.h.bf16 %v9709_v52 }
 0x304   : > { %7682 = vtanh.f32 %v4408_v9  ;;  %v4043_v1 = vsel %vm866_vm1, %v3705_v14, 0.0 }
 0x305   : > { %v4406_v38 = vmul.f32 0.5, %v4278_v41  ;;  %v9715_v41 = vld [vmem:[%s8069_s13 + $0x50] sm:$0xff]  }
 0x307   : > { %7684 = vtanh.f32 %v4406_v38 }
 0x309   : > { %v7679_v21 = vpop.eup %7678 }
 0x30d   : > { %4059 = vadd.xlane.f32.xlu0 %v4058_v25  ;;  %v4669_v25 = vadd.f32 1.0, %v7679_v21  ;;  %v7681_v20 = vpop.eup %7680  ;;  %v4912_v21 = vunpack.c.l.bf16 %v9635_v16  ;;  %v7282_v16 = vpop.f32.mrb[118].mxu0 }
 0x30e   : > { %v7683_v43 = vpop.eup %7682  ;;  %v4667_v36 = vadd.f32 1.0, %v7681_v20 }
 0x30f   : > { %v4797_v59 = vmul.f32 0.5, %v4669_v25  ;;  %v4664_v55 = vadd.f32 1.0, %v7683_v43 }
 0x310   : > { %v4795_v53 = vmul.f32 0.5, %v4667_v36 }
 0x311   : > { %4053 = vadd.xlane.f32.xlu0 %v4052_v32  ;;  %v7685_v12 = vpop.eup %7684  ;;  %v4792_v57 = vmul.f32 0.5, %v4664_v55  ;;  %v4910_v55 = vunpack.c.l.bf16 %v9641_v46 }
 0x312   : > { %v4662_v3 = vadd.f32 1.0, %v7685_v12 }
 0x314   : > { %v4790_v38 = vmul.f32 0.5, %v4662_v3 }
 0x317   : > { %4050 = vadd.xlane.f32.xlu1 %v4049_v63  ;;  %v4915_v63 = vunpack.c.h.bf16 %v9715_v41 }
 0x31b   : > { %4044 = vadd.xlane.f32.xlu1 %v4043_v1 }
 0x320   : > { %v9704_v24 = vpop.xlane.xlu0 %4035 }
 0x321   : > { %10714 = vst [vmem:[#allocation4_spill] sm:$0xff] %v9704_v24 }
 0x324   : > { %v9706_v32 = vpop.xlane.xlu0 %4029 }
 0x325   : > { %10715 = vst [vmem:[#allocation49_spill] sm:$0xff] %v9706_v32 }
 0x327   : > { %5179 = vperm.xlu0 %7433, %v4797_v59  }
 0x32a   : > { %v9712_v33 = vpop.xlane.xlu1 %4026 }
 0x32b   : > { %5169 = vperm.xlu0 %7433, %v4795_v53  }
 0x32c   : > { %5154 = vperm.xlu1 %7432, %v4792_v57   ;;  %v5140_v56 = vpop.permute.xlu0 %5139  ;;  %v7412_v57 = vpop.f32.mrb[118].mxu1 }
 0x32d   : > { %v5685_v9 = vmul.f32 %v5140_v56, %v4917_v11  ;;  %v1734_v56 = vmul.f32 %v9530_v44, %v7282_v16 }
 0x32e   : > { %v9718_v14 = vpop.xlane.xlu1 %4020 }
 0x32f   : > { %v6926_v1 = vpack.c.bf16 %v5685_v9, %v5685_v9  ;;  %v3193_v9 = vmul.f32 %v9552_v39, %v7412_v57  ;;  %v3579_v57 = vmax.f32 %v9623_v28, 0.0 }
 0x330   : > { %5144 = vperm.xlu1 %7432, %v4790_v38   ;;  %v5130_v25 = vpop.permute.xlu0 %5129  ;;  %v3023_v38 = vpop.f32.mrb[119].mxu1 }
 0x331   : > { %6326 = vst.msk [vmem:[%s9345_s30 + $0x5c] sm:$0xf] %vm6302_vm2, %v6926_v1  ;;  %v5683_v20 = vmul.f32 %v5130_v25, %v4915_v63  ;;  %v1564_v63 = vpop.f32.mrb[119].mxu0  ;;  %v3191_v1 = vmul.f32 %v9552_v39, %v3023_v38  ;;  %v7415_v25 = vpop.f32.mrb[120].mxu1  ;;  %v3714_v28 = vmul.f32 %v9594_v13, %v3579_v57 }
 0x332   : > { %v5115_v43 = vpop.permute.xlu1 %5114  ;;  %v1732_v46 = vmul.f32 %v9530_v44, %v1564_v63 }
 0x333   : > { %v6924_v36 = vpack.c.bf16 %v5683_v20, %v5683_v20  ;;  %v5680_v59 = vmul.f32 %v5115_v43, %v4912_v21  ;;  %v7285_v21 = vpop.f32.mrb[120].mxu0  ;;  %v1869_v20 = vadd.f32 %v9546_v8, %v1734_v56  ;;  %v3328_v43 = vadd.f32 %v9562_v6, %v3193_v9 }
 0x335   : > { %6324 = vst.msk [vmem:[%s9345_s30 + $0x54] sm:$0xf] %vm6302_vm2, %v6924_v36  ;;  %v6921_v12 = vpack.c.bf16 %v5680_v59, %v5680_v59  ;;  %v1737_v36 = vmul.f32 %v9530_v44, %v7285_v21  ;;  %v3196_v59 = vmul.f32 %v9552_v39, %v7415_v25  ;;  %v9743_v63 = vadd.f32 %v3328_v43, %v1869_v20  ;;  %v10716_v20 = vld [vmem:[#allocation8_spill] sm:$0xff] }
 0x336   : > { %v5105_v53 = vpop.permute.xlu1 %5104  ;;  %v4154_v43 = vmul.f32 %v9454_v26, %v10716_v20 }
 0x337   : > { %6321 = vst.msk [vmem:[%s9345_s30 + $0x48] sm:$0xf] %vm6302_vm2, %v6921_v12  ;;  %v5678_v11 = vmul.f32 %v5105_v53, %v4910_v55  ;;  %v1577_v55 = vpop.f32.mrb[121].mxu0  ;;  %v3036_v12 = vpop.f32.mrb[121].mxu1  ;;  %v1867_v53 = vadd.f32 %v9546_v8, %v1732_v46  ;;  %v1872_v56 = vadd.f32 %v9546_v8, %v1737_v36  ;;  %v3331_v9 = vadd.f32 %v9562_v6, %v3196_v59 }
 0x338   : > { %v3194_v16 = vmul.f32 %v9552_v39, %v3036_v12  ;;  %v4070_v36 = vsel %vm866_vm1, %v3714_v28, 0.0  ;;  %v4289_v12 = vadd.f32 %v9462_v50, %v4154_v43  ;;  %v3574_v28 = vmax.f32 %v9588_v22, 0.0 }
 0x339   : > { %v6919_v3 = vpack.c.bf16 %v5678_v11, %v5678_v11  ;;  %v3326_v11 = vadd.f32 %v9562_v6, %v3191_v1  ;;  %v9751_v25 = vadd.f32 %v3331_v9, %v1872_v56 }
 0x33a   : > { %v3329_v46 = vadd.f32 %v9562_v6, %v3194_v16  ;;  %v4417_v56 = vmul.f32 0.5, %v4289_v12  ;;  %v3709_v12 = vmul.f32 %v9594_v13, %v3574_v28 }
 0x33b   : > { %6319 = vst.msk [vmem:[%s9345_s30 + $0x40] sm:$0xf] %vm6302_vm2, %v6919_v3  ;;  %v1735_v3 = vmul.f32 %v9530_v44, %v1577_v55  ;;  %v9747_v38 = vadd.f32 %v3326_v11, %v1867_v53  ;;  %v3577_v55 = vmax.f32 %v9627_v29, 0.0  ;;  %v10717_v53 = vld [vmem:[#allocation10_spill] sm:$0xff]  ;;  %v3576_v29 = vmax.f32 %v9586_v5, 0.0 }
 0x33c   : > { %v4152_v11 = vmul.f32 %v9454_v26, %v10717_v53  ;;  %7686 = vtanh.f32 %v4417_v56 }
 0x33d   : > { %v1870_v21 = vadd.f32 %v9546_v8, %v1735_v3  ;;  %v3712_v59 = vmul.f32 %v9594_v13, %v3577_v55  ;;  %v10718_v3 = vld [vmem:[#allocation5_spill] sm:$0xff]  ;;  %v3711_v20 = vmul.f32 %v9594_v13, %v3576_v29 }
 0x33e   : > { %v4149_v16 = vmul.f32 %v9454_v26, %v10718_v3  ;;  %v4287_v9 = vadd.f32 %v9462_v50, %v4152_v11  ;;  %v4055_v11 = vsel %vm866_vm1, %v3709_v12, 0.0 }
 0x33f   : > { %v9753_v1 = vadd.f32 %v3329_v46, %v1870_v21  ;;  %v4064_v57 = vsel %vm866_vm1, %v3712_v59, 0.0  ;;  %v10719_v46 = vld [vmem:[#allocation6_spill] sm:$0xff]  ;;  %v4061_v59 = vsel %vm866_vm1, %v3711_v20, 0.0  ;;  %v9783_v20 = vld [vmem:[%s8069_s13 + $0x68] sm:$0xff]  }
 0x340   : > { %v4284_v21 = vadd.f32 %v9462_v50, %v4149_v16  ;;  %v4147_v55 = vmul.f32 %v9454_v26, %v10719_v46  ;;  %v4415_v43 = vmul.f32 0.5, %v4287_v9 }
 0x342   : > { %v4282_v5 = vadd.f32 %v9462_v50, %v4147_v55  ;;  %7688 = vtanh.f32 %v4415_v43  ;;  %v4921_v43 = vunpack.c.h.bf16 %v9783_v20 }
 0x344   : > { %v4410_v53 = vmul.f32 0.5, %v4282_v5 }
 0x346   : > { %v7687_v22 = vpop.eup %7686 }
 0x347   : > { %v4673_v16 = vadd.f32 1.0, %v7687_v22 }
 0x349   : > { %v4801_v9 = vmul.f32 0.5, %v4673_v16 }
 0x34a   : > { %4071 = vadd.xlane.f32.xlu0 %v4070_v36  ;;  %v4412_v36 = vmul.f32 0.5, %v4284_v21 }
 0x34c   : > { %7690 = vtanh.f32 %v4412_v36  ;;  %v7689_v29 = vpop.eup %7688 }
 0x34d   : > { %7692 = vtanh.f32 %v4410_v53  ;;  %v4671_v56 = vadd.f32 1.0, %v7689_v29 }
 0x34e   : > { %4065 = vadd.xlane.f32.xlu0 %v4064_v57 }
 0x34f   : > { %v4799_v28 = vmul.f32 0.5, %v4671_v56  ;;  %v4916_v56 = vunpack.c.l.bf16 %v9709_v52  ;;  %v7286_v52 = vpop.f32.mrb[122].mxu0 }
 0x354   : > { %4062 = vadd.xlane.f32.xlu1 %v4061_v59 }
 0x356   : > { %v7691_v57 = vpop.eup %7690 }
 0x357   : > { %v4668_v21 = vadd.f32 1.0, %v7691_v57  ;;  %v7693_v55 = vpop.eup %7692 }
 0x358   : > { %4056 = vadd.xlane.f32.xlu1 %v4055_v11  ;;  %v4666_v36 = vadd.f32 1.0, %v7693_v55  ;;  %v9789_v11 = vld [vmem:[%s8069_s13 + $0x60] sm:$0xff]  }
 0x359   : > { %v4796_v59 = vmul.f32 0.5, %v4668_v21  ;;  %v4919_v22 = vunpack.c.h.bf16 %v9789_v11 }
 0x35a   : > { %v4794_v29 = vmul.f32 0.5, %v4666_v36 }
 0x35d   : > { %v9778_v3 = vpop.xlane.xlu0 %4047 }
 0x35e   : > { %10720 = vst [vmem:[#allocation8_spill] sm:$0xff] %v9778_v3  ;;  %v3583_v3 = vmax.f32 %v9677_v0, 0.0 }
 0x360   : > { %v3718_v0 = vmul.f32 %v9594_v13, %v3583_v3 }
 0x361   : > { %v9780_v46 = vpop.xlane.xlu0 %4041 }
 0x362   : > { %10721 = vst [vmem:[#allocation10_spill] sm:$0xff] %v9780_v46 }
 0x364   : > { %5199 = vperm.xlu0 %7433, %v4801_v9  }
 0x367   : > { %v9786_v5 = vpop.xlane.xlu1 %4038 }
 0x368   : > { %5189 = vperm.xlu0 %7433, %v4799_v28  }
 0x369   : > { %5174 = vperm.xlu1 %7432, %v4796_v59   ;;  %v5160_v12 = vpop.permute.xlu0 %5159  ;;  %v4914_v59 = vunpack.c.l.bf16 %v9715_v41 }
 0x36a   : > { %v5689_v53 = vmul.f32 %v5160_v12, %v4921_v43 }
 0x36b   : > { %v9792_v16 = vpop.xlane.xlu1 %4032 }
 0x36c   : > { %v6930_v57 = vpack.c.bf16 %v5689_v53, %v5689_v53 }
 0x36d   : > { %5164 = vperm.xlu1 %7432, %v4794_v29   ;;  %v5150_v9 = vpop.permute.xlu0 %5149  ;;  %v7416_v29 = vpop.f32.mrb[122].mxu1 }
 0x36e   : > { %6330 = vst.msk [vmem:[%s9345_s30 + $0x6c] sm:$0xf] %vm6302_vm2, %v6930_v57  ;;  %v5687_v21 = vmul.f32 %v5150_v9, %v4919_v22  ;;  %v1738_v57 = vmul.f32 %v9530_v44, %v7286_v52  ;;  %v3197_v22 = vmul.f32 %v9552_v39, %v7416_v29  ;;  %v1580_v9 = vpop.f32.mrb[123].mxu0 }
 0x36f   : > { %v5135_v55 = vpop.permute.xlu1 %5134  ;;  %v1736_v41 = vmul.f32 %v9530_v44, %v1580_v9 }
 0x370   : > { %v6928_v28 = vpack.c.bf16 %v5687_v21, %v5687_v21  ;;  %v5684_v43 = vmul.f32 %v5135_v55, %v4916_v56  ;;  %v3039_v56 = vpop.f32.mrb[123].mxu1  ;;  %v7289_v55 = vpop.f32.mrb[124].mxu0 }
 0x371   : > { %v3195_v21 = vmul.f32 %v9552_v39, %v3039_v56  ;;  %v1871_v52 = vadd.f32 %v9546_v8, %v1736_v41 }
 0x372   : > { %6328 = vst.msk [vmem:[%s9345_s30 + $0x64] sm:$0xf] %vm6302_vm2, %v6928_v28  ;;  %v6925_v12 = vpack.c.bf16 %v5684_v43, %v5684_v43  ;;  %v7419_v28 = vpop.f32.mrb[124].mxu1  ;;  %v1873_v43 = vadd.f32 %v9546_v8, %v1738_v57 }
 0x373   : > { %v5125_v46 = vpop.permute.xlu1 %5124  ;;  %v3330_v29 = vadd.f32 %v9562_v6, %v3195_v21 }
 0x374   : > { %6325 = vst.msk [vmem:[%s9345_s30 + $0x58] sm:$0xf] %vm6302_vm2, %v6925_v12  ;;  %v5682_v36 = vmul.f32 %v5125_v46, %v4914_v59  ;;  %v3332_v46 = vadd.f32 %v9562_v6, %v3197_v22  ;;  %v1741_v59 = vmul.f32 %v9530_v44, %v7289_v55  ;;  %v3200_v12 = vmul.f32 %v9552_v39, %v7419_v28 }
 0x375   : > { %v9821_v55 = vadd.f32 %v3330_v29, %v1871_v52  ;;  %v4156_v52 = vmul.f32 %v9454_v26, %v9105_v62  ;;  %v10723_v29 = vld [vmem:[#allocation7_spill] sm:$0xff] }
 0x376   : > { %v6923_v53 = vpack.c.bf16 %v5682_v36, %v5682_v36  ;;  %v1593_v36 = vpop.f32.mrb[125].mxu0  ;;  %v9817_v32 = vadd.f32 %v3332_v46, %v1873_v43  ;;  %v1876_v57 = vadd.f32 %v9546_v8, %v1741_v59  ;;  %v3335_v22 = vadd.f32 %v9562_v6, %v3200_v12  ;;  %v10722_v43 = vld [vmem:[#allocation12_spill] sm:$0xff] }
 0x377   : > { %v1739_v9 = vmul.f32 %v9530_v44, %v1593_v36  ;;  %v3581_v36 = vmax.f32 %v9679_v61, 0.0  ;;  %v4158_v46 = vmul.f32 %v9454_v26, %v10722_v43  ;;  %v4082_v59 = vsel %vm866_vm1, %v3718_v0, 0.0 }
 0x378   : > { %6323 = vst.msk [vmem:[%s9345_s30 + $0x50] sm:$0xf] %vm6302_vm2, %v6923_v53  ;;  %v3052_v53 = vpop.f32.mrb[125].mxu1  ;;  %v9825_v24 = vadd.f32 %v3335_v22, %v1876_v57  ;;  %v3580_v61 = vmax.f32 %v9669_v47, 0.0  ;;  %v4291_v57 = vadd.f32 %v9462_v50, %v4156_v52 }
 0x379   : > { %v3198_v56 = vmul.f32 %v9552_v39, %v3052_v53  ;;  %v1874_v28 = vadd.f32 %v9546_v8, %v1739_v9  ;;  %v3716_v12 = vmul.f32 %v9594_v13, %v3581_v36  ;;  %v4293_v53 = vadd.f32 %v9462_v50, %v4158_v46 }
 0x37a   : > { %v4153_v9 = vmul.f32 %v9454_v26, %v10723_v29  ;;  %v3578_v36 = vmax.f32 %v9673_v17, 0.0  ;;  %v3715_v62 = vmul.f32 %v9594_v13, %v3580_v61  ;;  %v4419_v0 = vmul.f32 0.5, %v4291_v57 }
 0x37b   : > { %v3333_v41 = vadd.f32 %v9562_v6, %v3198_v56  ;;  %v4076_v3 = vsel %vm866_vm1, %v3716_v12, 0.0  ;;  %v4421_v56 = vmul.f32 0.5, %v4293_v53 }
 0x37c   : > { %v4288_v22 = vadd.f32 %v9462_v50, %v4153_v9  ;;  %v4073_v46 = vsel %vm866_vm1, %v3715_v62, 0.0 }
 0x37d   : > { %v9827_v21 = vadd.f32 %v3333_v41, %v1874_v28  ;;  %v10724_v28 = vld [vmem:[#allocation9_spill] sm:$0xff]  ;;  %7694 = vtanh.f32 %v4421_v56 }
 0x37e   : > { %v4151_v41 = vmul.f32 %v9454_v26, %v10724_v28  ;;  %v4416_v43 = vmul.f32 0.5, %v4288_v22  ;;  %7696 = vtanh.f32 %v4419_v0  ;;  %v9857_v28 = vld [vmem:[%s8069_s13 + $0x78] sm:$0xff]  }
 0x380   : > { %v4286_v47 = vadd.f32 %v9462_v50, %v4151_v41  ;;  %7698 = vtanh.f32 %v4416_v43  ;;  %v4925_v41 = vunpack.c.h.bf16 %v9857_v28 }
 0x382   : > { %v4414_v12 = vmul.f32 0.5, %v4286_v47 }
 0x384   : > { %7700 = vtanh.f32 %v4414_v12 }
 0x387   : > { %4083 = vadd.xlane.f32.xlu0 %v4082_v59  ;;  %v3713_v59 = vmul.f32 %v9594_v13, %v3578_v36  ;;  %v7695_v17 = vpop.eup %7694 }
 0x388   : > { %v4677_v52 = vadd.f32 1.0, %v7695_v17  ;;  %v7697_v29 = vpop.eup %7696 }
 0x389   : > { %v4067_v26 = vsel %vm866_vm1, %v3713_v59, 0.0  ;;  %v4675_v50 = vadd.f32 1.0, %v7697_v29 }
 0x38a   : > { %v7699_v9 = vpop.eup %7698  ;;  %v4805_v61 = vmul.f32 0.5, %v4677_v52  ;;  %v4920_v52 = vunpack.c.l.bf16 %v9783_v20  ;;  %v7290_v20 = vpop.f32.mrb[126].mxu0 }
 0x38b   : > { %4077 = vadd.xlane.f32.xlu0 %v4076_v3  ;;  %v4672_v3 = vadd.f32 1.0, %v7699_v9  ;;  %v4803_v22 = vmul.f32 0.5, %v4675_v50 }
 0x38d   : > { %v4800_v0 = vmul.f32 0.5, %v4672_v3 }
 0x38e   : > { %v7701_v57 = vpop.eup %7700 }
 0x38f   : > { %v4670_v36 = vadd.f32 1.0, %v7701_v57  ;;  %v4918_v57 = vunpack.c.l.bf16 %v9789_v11 }
 0x391   : > { %4074 = vadd.xlane.f32.xlu1 %v4073_v46  ;;  %v9863_v46 = vld [vmem:[%s8069_s13 + $0x70] sm:$0xff]  }
 0x392   : > { %v4923_v59 = vunpack.c.h.bf16 %v9863_v46 }
 0x395   : > { %4068 = vadd.xlane.f32.xlu1 %v4067_v26  ;;  %v4798_v26 = vmul.f32 0.5, %v4670_v36 }
 0x39a   : > { %v9852_v53 = vpop.xlane.xlu0 %4059 }
 0x39e   : > { %v9854_v56 = vpop.xlane.xlu0 %4053 }
 0x3a1   : > { %5219 = vperm.xlu0 %7433, %v4805_v61  }
 0x3a4   : > { %v9860_v62 = vpop.xlane.xlu1 %4050 }
 0x3a5   : > { %5209 = vperm.xlu0 %7433, %v4803_v22  }
 0x3a6   : > { %5194 = vperm.xlu1 %7432, %v4800_v0   ;;  %v5180_v43 = vpop.permute.xlu0 %5179 }
 0x3a7   : > { %v5693_v47 = vmul.f32 %v5180_v43, %v4925_v41  ;;  %v7420_v43 = vpop.f32.mrb[126].mxu1 }
 0x3a8   : > { %v9866_v12 = vpop.xlane.xlu1 %4044 }
 0x3a9   : > { %v6934_v17 = vpack.c.bf16 %v5693_v47, %v5693_v47  ;;  %v1742_v47 = vmul.f32 %v9530_v44, %v7290_v20 }
 0x3aa   : > { %5184 = vperm.xlu1 %7432, %v4798_v26   ;;  %v5170_v29 = vpop.permute.xlu0 %5169  ;;  %v3055_v26 = vpop.f32.mrb[127].mxu1 }
 0x3ab   : > { %6334 = vst.msk [vmem:[%s9345_s30 + $0x7c] sm:$0xf] %vm6302_vm2, %v6934_v17  ;;  %v5691_v9 = vmul.f32 %v5170_v29, %v4923_v59  ;;  %v3201_v59 = vmul.f32 %v9552_v39, %v7420_v43  ;;  %v3199_v17 = vmul.f32 %v9552_v39, %v3055_v26  ;;  %v1877_v11 = vadd.f32 %v9546_v8, %v1742_v47  ;;  %v1596_v29 = vpop.f32.mrb[127].mxu0  ;;  %v10725_v43 = vld [vmem:[#allocation11_spill] sm:$0xff] }
 0x3ac   : > { %v5155_v50 = vpop.permute.xlu1 %5154  ;;  %v3584_v47 = vmax.f32 %v9743_v63, 0.0 }
 0x3ad   : > { %v6932_v61 = vpack.c.bf16 %v5691_v9, %v5691_v9  ;;  %v5688_v3 = vmul.f32 %v5155_v50, %v4920_v52  ;;  %v3336_v52 = vadd.f32 %v9562_v6, %v3201_v59  ;;  %v3334_v9 = vadd.f32 %v9562_v6, %v3199_v17 }
 0x3ae   : > { %v1740_v50 = vmul.f32 %v9530_v44, %v1596_v29  ;;  %v3582_v29 = vmax.f32 %v9747_v38, 0.0 }
 0x3af   : > { %6332 = vst.msk [vmem:[%s9345_s30 + $0x74] sm:$0xf] %vm6302_vm2, %v6932_v61  ;;  %v6929_v22 = vpack.c.bf16 %v5688_v3, %v5688_v3  ;;  %v3587_v61 = vmax.f32 %v9751_v25, 0.0  ;;  %v9886_v3 = vadd.f32 %v3336_v52, %v1877_v11  ;;  %v9899_v25 = vld [vmem:[#allocation3] ss:$0 sm:$0xff]  ;;  %v10726_v11 = vld [vmem:[#allocation13_spill] sm:$0xff] }
 0x3b0   : > { %v5145_v41 = vpop.permute.xlu1 %5144 }
 0x3b1   : > { %6329 = vst.msk [vmem:[%s9345_s30 + $0x68] sm:$0xf] %vm6302_vm2, %v6929_v22  ;;  %v5686_v36 = vmul.f32 %v5145_v41, %v4918_v57  ;;  %v1875_v57 = vadd.f32 %v9546_v8, %v1740_v50  ;;  %v3585_v41 = vmax.f32 %v9753_v1, 0.0  ;;  %v3722_v39 = vmul.f32 %v9594_v13, %v3587_v61 }
 0x3b3   : > { %v6927_v0 = vpack.c.bf16 %v5686_v36, %v5686_v36  ;;  %v9889_v22 = vadd.f32 %v3334_v9, %v1875_v57  ;;  %v9893_v36 = vld [vmem:[#allocation2] ss:$0 sm:$0xff]  ;;  %v4094_v6 = vsel %vm866_vm1, %v3722_v39, 0.0  ;;  %v3720_v44 = vmul.f32 %v9594_v13, %v3585_v41 }
 0x3b4   : > { %v4160_v8 = vmul.f32 %v9893_v36, %v9143_v2  ;;  %v4157_v1 = vmul.f32 %v9893_v36, %v10725_v43  ;;  %v4155_v52 = vmul.f32 %v9893_v36, %v10726_v11  ;;  %v3719_v2 = vmul.f32 %v9594_v13, %v3584_v47 }
 0x3b5   : > { %6327 = vst.msk [vmem:[%s9345_s30 + $0x60] sm:$0xf] %vm6302_vm2, %v6927_v0  ;;  %v4162_v0 = vmul.f32 %v9893_v36, %v9123_v48  ;;  %v4088_v59 = vsel %vm866_vm1, %v3720_v44, 0.0  ;;  %v3717_v57 = vmul.f32 %v9594_v13, %v3582_v29 }
 0x3b6   : > { %v4295_v26 = vadd.f32 %v9899_v25, %v4160_v8  ;;  %v4292_v17 = vadd.f32 %v9899_v25, %v4157_v1  ;;  %v4290_v63 = vadd.f32 %v9899_v25, %v4155_v52  ;;  %v4085_v61 = vsel %vm866_vm1, %v3719_v2, 0.0 }
 0x3b7   : > { %v4297_v20 = vadd.f32 %v9899_v25, %v4162_v0  ;;  %v4079_v39 = vsel %vm866_vm1, %v3717_v57, 0.0 }
 0x3b8   : > { %v4423_v9 = vmul.f32 0.5, %v4295_v26  ;;  %v4420_v50 = vmul.f32 0.5, %v4292_v17  ;;  %v4418_v41 = vmul.f32 0.5, %v4290_v63  ;;  %v9923_v26 = vld [vmem:[%s8069_s13 + $0x88] sm:$0xff]  }
 0x3b9   : > { %v4425_v48 = vmul.f32 0.5, %v4297_v20  ;;  %v4929_v17 = vunpack.c.h.bf16 %v9923_v26 }
 0x3bb   : > { %7702 = vtanh.f32 %v4425_v48 }
 0x3bc   : > { %7704 = vtanh.f32 %v4423_v9 }
 0x3bd   : > { %7706 = vtanh.f32 %v4420_v50  ;;  %v9929_v50 = vld [vmem:[%s8069_s13 + $0x80] sm:$0xff]  }
 0x3be   : > { %7708 = vtanh.f32 %v4418_v41  ;;  %v4927_v63 = vunpack.c.h.bf16 %v9929_v50 }
 0x3c4   : > { %4095 = vadd.xlane.f32.xlu0 %v4094_v6 }
 0x3c5   : > { %v7703_v38 = vpop.eup %7702 }
 0x3c6   : > { %v4681_v6 = vadd.f32 1.0, %v7703_v38  ;;  %v7705_v44 = vpop.eup %7704 }
 0x3c7   : > { %v7707_v20 = vpop.eup %7706  ;;  %v4679_v8 = vadd.f32 1.0, %v7705_v44 }
 0x3c8   : > { %4089 = vadd.xlane.f32.xlu0 %v4088_v59  ;;  %v4809_v43 = vmul.f32 0.5, %v4681_v6  ;;  %v4676_v1 = vadd.f32 1.0, %v7707_v20  ;;  %v7709_v59 = vpop.eup %7708 }
 0x3c9   : > { %v4807_v48 = vmul.f32 0.5, %v4679_v8  ;;  %v4674_v11 = vadd.f32 1.0, %v7709_v59 }
 0x3ca   : > { %v4804_v29 = vmul.f32 0.5, %v4676_v1 }
 0x3cb   : > { %v4802_v57 = vmul.f32 0.5, %v4674_v11  ;;  %v3589_v11 = vmax.f32 %v9827_v21, 0.0 }
 0x3ce   : > { %4086 = vadd.xlane.f32.xlu1 %v4085_v61 }
 0x3d2   : > { %4080 = vadd.xlane.f32.xlu1 %v4079_v39  ;;  %v4924_v39 = vunpack.c.l.bf16 %v9857_v28  ;;  %v3591_v28 = vmax.f32 %v9825_v24, 0.0  ;;  %v3588_v24 = vmax.f32 %v9817_v32, 0.0 }
 0x3d7   : > { %v9918_v0 = vpop.xlane.xlu0 %4071 }
 0x3db   : > { %v9920_v47 = vpop.xlane.xlu0 %4065 }
 0x3de   : > { %5239 = vperm.xlu0 %7433, %v4809_v43   ;;  %v4922_v43 = vunpack.c.l.bf16 %v9863_v46 }
 0x3e1   : > { %v9926_v52 = vpop.xlane.xlu1 %4062 }
 0x3e2   : > { %5229 = vperm.xlu0 %7433, %v4807_v48  }
 0x3e3   : > { %5214 = vperm.xlu1 %7432, %v4804_v29   ;;  %v5200_v2 = vpop.permute.xlu0 %5199  ;;  %v3726_v29 = vmul.f32 %v9594_v13, %v3591_v28 }
 0x3e4   : > { %v5697_v9 = vmul.f32 %v5200_v2, %v4929_v17  ;;  %v4166_v2 = vmul.f32 %v9893_v36, %v9160_v23 }
 0x3e5   : > { %v9932_v61 = vpop.xlane.xlu1 %4056  ;;  %v4106_v46 = vsel %vm866_vm1, %v3726_v29, 0.0 }
 0x3e6   : > { %v6938_v41 = vpack.c.bf16 %v5697_v9, %v5697_v9  ;;  %v3724_v9 = vmul.f32 %v9594_v13, %v3589_v11 }
 0x3e7   : > { %5204 = vperm.xlu1 %7432, %v4802_v57   ;;  %v5190_v38 = vpop.permute.xlu0 %5189  ;;  %v4164_v57 = vmul.f32 %v9893_v36, %v9173_v31  ;;  %v3586_v31 = vmax.f32 %v9821_v55, 0.0 }
 0x3e8   : > { %6338 = vst.msk [vmem:[%s9345_s30 + $0x8c] sm:$0xf] %vm6302_vm2, %v6938_v41  ;;  %v5695_v6 = vmul.f32 %v5190_v38, %v4927_v63  ;;  %v4301_v63 = vadd.f32 %v9899_v25, %v4166_v2  ;;  %v4161_v41 = vmul.f32 %v9893_v36, %v9112_v51  ;;  %v4100_v21 = vsel %vm866_vm1, %v3724_v9, 0.0 }
 0x3e9   : > { %v5175_v44 = vpop.permute.xlu1 %5174  ;;  %v4299_v23 = vadd.f32 %v9899_v25, %v4164_v57  ;;  %v4170_v38 = vmul.f32 %v9893_v36, %v9181_v4  ;;  %v3723_v51 = vmul.f32 %v9594_v13, %v3588_v24 }
 0x3ea   : > { %v6936_v20 = vpack.c.bf16 %v5695_v6, %v5695_v6  ;;  %v5692_v8 = vmul.f32 %v5175_v44, %v4924_v39  ;;  %v4429_v39 = vmul.f32 0.5, %v4301_v63  ;;  %v4296_v6 = vadd.f32 %v9899_v25, %v4161_v41 }
 0x3eb   : > { %v4159_v44 = vmul.f32 %v9893_v36, %v9128_v35  ;;  %v4427_v32 = vmul.f32 0.5, %v4299_v23 }
 0x3ec   : > { %6336 = vst.msk [vmem:[%s9345_s30 + $0x84] sm:$0xf] %vm6302_vm2, %v6936_v20  ;;  %v6933_v1 = vpack.c.bf16 %v5692_v8, %v5692_v8  ;;  %7710 = vtanh.f32 %v4429_v39  ;;  %v4305_v20 = vadd.f32 %v9899_v25, %v4170_v38  ;;  %v4168_v8 = vmul.f32 %v9893_v36, %v9190_v58 }
 0x3ed   : > { %v5165_v59 = vpop.permute.xlu1 %5164  ;;  %v4294_v4 = vadd.f32 %v9899_v25, %v4159_v44  ;;  %7712 = vtanh.f32 %v4427_v32  ;;  %v4182_v32 = vmul.f32 %v9893_v36, %v9241_v15 }
 0x3ee   : > { %6333 = vst.msk [vmem:[%s9345_s30 + $0x78] sm:$0xf] %vm6302_vm2, %v6933_v1  ;;  %v5690_v48 = vmul.f32 %v5165_v59, %v4922_v43  ;;  %v4424_v43 = vmul.f32 0.5, %v4296_v6  ;;  %v4097_v1 = vsel %vm866_vm1, %v3723_v51, 0.0  ;;  %v3721_v59 = vmul.f32 %v9594_v13, %v3586_v31 }
 0x3ef   : > { %v4433_v35 = vmul.f32 0.5, %v4305_v20  ;;  %v4303_v55 = vadd.f32 %v9899_v25, %v4168_v8  ;;  %v4172_v13 = vmul.f32 %v9893_v36, %v9215_v27  ;;  %v4176_v27 = vmul.f32 %v9893_v36, %v9235_v30 }
 0x3f0   : > { %v6931_v17 = vpack.c.bf16 %v5690_v48, %v5690_v48  ;;  %v4174_v48 = vmul.f32 %v9893_v36, %v9204_v60  ;;  %7714 = vtanh.f32 %v4424_v43  ;;  %v4091_v28 = vsel %vm866_vm1, %v3721_v59, 0.0  ;;  %v9993_v43 = vld [vmem:[%s8069_s13 + $0x98] sm:$0xff]  }
 0x3f1   : > { %7716 = vtanh.f32 %v4433_v35  ;;  %v4431_v58 = vmul.f32 0.5, %v4303_v55  ;;  %v4178_v60 = vmul.f32 %v9893_v36, %v9226_v40  ;;  %v4311_v51 = vadd.f32 %v9899_v25, %v4176_v27  ;;  %v10728_v27 = vld [vmem:[#allocation26_spill] sm:$0xff] }
 0x3f2   : > { %6331 = vst.msk [vmem:[%s9345_s30 + $0x70] sm:$0xf] %vm6302_vm2, %v6931_v17  ;;  %v4422_v17 = vmul.f32 0.5, %v4294_v4  ;;  %v4309_v11 = vadd.f32 %v9899_v25, %v4174_v48  ;;  %v4933_v30 = vunpack.c.h.bf16 %v9993_v43  ;;  %v4317_v48 = vadd.f32 %v9899_v25, %v4182_v32 }
 0x3f3   : > { %v4439_v55 = vmul.f32 0.5, %v4311_v51 }
 0x3f4   : > { %7718 = vtanh.f32 %v4422_v17  ;;  %v4437_v2 = vmul.f32 0.5, %v4309_v11  ;;  %v10727_v17 = vld [vmem:[#allocation24_spill] sm:$0xff] }
 0x3f5   : > { %7720 = vtanh.f32 %v4431_v58  ;;  %v4180_v15 = vmul.f32 %v9893_v36, %v10727_v17 }
 0x3f6   : > { %v7711_v29 = vpop.eup %7710  ;;  %7722 = vtanh.f32 %v4437_v2 }
 0x3f7   : > { %v4685_v63 = vadd.f32 1.0, %v7711_v29  ;;  %v7713_v57 = vpop.eup %7712  ;;  %v10002_v29 = vld [vmem:[%s8069_s13 + $0x90] sm:$0xff]  }
 0x3f8   : > { %v4683_v39 = vadd.f32 1.0, %v7713_v57  ;;  %v4931_v2 = vunpack.c.h.bf16 %v10002_v29 }
 0x3f9   : > { %v4813_v23 = vmul.f32 0.5, %v4685_v63 }
 0x3fa   : > { %v7715_v41 = vpop.eup %7714  ;;  %v4811_v8 = vmul.f32 0.5, %v4683_v39  ;;  %v4186_v39 = vmul.f32 %v9893_v36, %v10728_v27 }
 0x3fb   : > { %v7717_v38 = vpop.eup %7716  ;;  %v4680_v6 = vadd.f32 1.0, %v7715_v41  ;;  %v4928_v41 = vunpack.c.l.bf16 %v9923_v26 }
 0x3fc   : > { %v4689_v20 = vadd.f32 1.0, %v7717_v38 }
 0x3fd   : > { %v4808_v35 = vmul.f32 0.5, %v4680_v6 }
 0x3fe   : > { %v7719_v40 = vpop.eup %7718 }
 0x3ff   : > { %v7721_v4 = vpop.eup %7720 }
 0x400   : > { %v4687_v58 = vadd.f32 1.0, %v7721_v4  ;;  %v10729_v4 = vld [vmem:[#allocation28_spill] sm:$0xff] }
 0x401   : > { %4107 = vadd.xlane.f32.xlu0 %v4106_v46  ;;  %v4307_v46 = vadd.f32 %v9899_v25, %v4172_v13  ;;  %v4817_v13 = vmul.f32 0.5, %v4689_v20  ;;  %v4926_v20 = vunpack.c.l.bf16 %v9929_v50 }
 0x403   : > { %v4435_v24 = vmul.f32 0.5, %v4307_v46  ;;  %v7723_v46 = vpop.eup %7722 }
 0x404   : > { %v4693_v38 = vadd.f32 1.0, %v7723_v46 }
 0x405   : > { %4101 = vadd.xlane.f32.xlu0 %v4100_v21  ;;  %v4313_v21 = vadd.f32 %v9899_v25, %v4178_v60  ;;  %7724 = vtanh.f32 %v4435_v24  ;;  %v4445_v24 = vmul.f32 0.5, %v4317_v48 }
 0x406   : > { %v4821_v48 = vmul.f32 0.5, %v4693_v38 }
 0x407   : > { %v4441_v31 = vmul.f32 0.5, %v4313_v21  ;;  %v4315_v21 = vadd.f32 %v9899_v25, %v4180_v15 }
 0x409   : > { %7726 = vtanh.f32 %v4441_v31 }
 0x40a   : > { %7728 = vtanh.f32 %v4439_v55 }
 0x40b   : > { %4098 = vadd.xlane.f32.xlu1 %v4097_v1  ;;  %v4678_v1 = vadd.f32 1.0, %v7719_v40  ;;  %v4815_v40 = vmul.f32 0.5, %v4687_v58  ;;  %7730 = vtanh.f32 %v4445_v24 }
 0x40d   : > { %v4806_v63 = vmul.f32 0.5, %v4678_v1  ;;  %v4184_v1 = vmul.f32 %v9893_v36, %v10729_v4  ;;  %v10733_v4 = vld [vmem:[#allocation36_spill] sm:$0xff] }
 0x40f   : > { %4092 = vadd.xlane.f32.xlu1 %v4091_v28  ;;  %v7725_v31 = vpop.eup %7724  ;;  %v4319_v58 = vadd.f32 %v9899_v25, %v4184_v1  ;;  %v4192_v1 = vmul.f32 %v9893_v36, %v10733_v4 }
 0x413   : > { %v7727_v17 = vpop.eup %7726 }
 0x414   : > { %v9982_v9 = vpop.xlane.xlu0 %4083 }
 0x418   : > { %v9987_v44 = vpop.xlane.xlu0 %4077 }
 0x41b   : > { %5259 = vperm.xlu0 %7433, %v4813_v23  }
 0x41e   : > { %v9996_v59 = vpop.xlane.xlu1 %4074 }
 0x41f   : > { %5249 = vperm.xlu0 %7433, %v4811_v8   ;;  %v4443_v8 = vmul.f32 0.5, %v4315_v21  ;;  %v10731_v21 = vld [vmem:[#allocation32_spill] sm:$0xff] }
 0x420   : > { %5234 = vperm.xlu1 %7432, %v4808_v35   ;;  %v5220_v28 = vpop.permute.xlu0 %5219  ;;  %v4691_v35 = vadd.f32 1.0, %v7725_v31  ;;  %v4188_v27 = vmul.f32 %v9893_v36, %v10731_v21  ;;  %v10732_v31 = vld [vmem:[#allocation34_spill] sm:$0xff] }
 0x421   : > { %v5701_v11 = vmul.f32 %v5220_v28, %v4933_v30  ;;  %v4321_v30 = vadd.f32 %v9899_v25, %v4186_v39  ;;  %7732 = vtanh.f32 %v4443_v8 }
 0x422   : > { %v10005_v60 = vpop.xlane.xlu1 %4068 }
 0x423   : > { %v6942_v57 = vpack.c.bf16 %v5701_v11, %v5701_v11  ;;  %5279 = vperm.xlu0 %7433, %v4817_v13   ;;  %v4449_v50 = vmul.f32 0.5, %v4321_v30  ;;  %v10730_v11 = vld [vmem:[#allocation30_spill] sm:$0xff] }
 0x424   : > { %5224 = vperm.xlu1 %7432, %v4806_v63   ;;  %v5210_v23 = vpop.permute.xlu0 %5209  ;;  %v4190_v13 = vmul.f32 %v9893_v36, %v10730_v11  ;;  %v4819_v63 = vmul.f32 0.5, %v4691_v35 }
 0x425   : > { %6342 = vst.msk [vmem:[%s9345_s30 + $0x9c] sm:$0xf] %vm6302_vm2, %v6942_v57  ;;  %v5699_v6 = vmul.f32 %v5210_v23, %v4931_v2  ;;  %v4697_v2 = vadd.f32 1.0, %v7727_v17  ;;  %v7729_v57 = vpop.eup %7728  ;;  %7734 = vtanh.f32 %v4449_v50 }
 0x426   : > { %v5195_v51 = vpop.permute.xlu1 %5194  ;;  %v4325_v24 = vadd.f32 %v9899_v25, %v4190_v13  ;;  %v4695_v39 = vadd.f32 1.0, %v7729_v57  ;;  %v7731_v38 = vpop.eup %7730 }
 0x427   : > { %v6940_v32 = vpack.c.bf16 %v5699_v6, %v5699_v6  ;;  %v5696_v26 = vmul.f32 %v5195_v51, %v4928_v41  ;;  %5269 = vperm.xlu0 %7433, %v4815_v40   ;;  %v4447_v41 = vmul.f32 0.5, %v4319_v58  ;;  %v4825_v23 = vmul.f32 0.5, %v4697_v2  ;;  %v10735_v2 = vld [vmem:[#allocation14_spill] sm:$0xff] }
 0x428   : > { %v4453_v6 = vmul.f32 0.5, %v4325_v24  ;;  %v4323_v40 = vadd.f32 %v9899_v25, %v4188_v27  ;;  %v4194_v51 = vmul.f32 %v9893_v36, %v10732_v31  ;;  %v10736_v24 = vld [vmem:[#allocation40_spill] sm:$0xff] }
 0x429   : > { %6340 = vst.msk [vmem:[%s9345_s30 + $0x94] sm:$0xf] %vm6302_vm2, %v6940_v32  ;;  %v6937_v55 = vpack.c.bf16 %v5696_v26, %v5696_v26  ;;  %7736 = vtanh.f32 %v4447_v41  ;;  %v4701_v32 = vadd.f32 1.0, %v7731_v38  ;;  %v4823_v26 = vmul.f32 0.5, %v4695_v39  ;;  %v10738_v31 = vld [vmem:[#allocation16_spill] sm:$0xff] }
 0x42a   : > { %v5185_v15 = vpop.permute.xlu1 %5184  ;;  %7738 = vtanh.f32 %v4453_v6  ;;  %v4451_v8 = vmul.f32 0.5, %v4323_v40  ;;  %v4329_v30 = vadd.f32 %v9899_v25, %v4194_v51  ;;  %v4196_v21 = vmul.f32 %v9893_v36, %v10736_v24  ;;  %v10737_v6 = vld [vmem:[#allocation15_spill] sm:$0xff] }
 0x42b   : > { %6337 = vst.msk [vmem:[%s9345_s30 + $0x88] sm:$0xf] %vm6302_vm2, %v6937_v55  ;;  %v5694_v28 = vmul.f32 %v5185_v15, %v4926_v20  ;;  %5299 = vperm.xlu0 %7433, %v4821_v48   ;;  %v7733_v20 = vpop.eup %7732  ;;  %v4829_v55 = vmul.f32 0.5, %v4701_v32  ;;  %v4327_v15 = vadd.f32 %v9899_v25, %v4192_v1  ;;  %v4163_v40 = vmul.f32 %v9893_v36, %v10737_v6  ;;  %v7921_v32 = vld [vmem:[%s10664_s8] ss:$0 sm:$0xff] }
 0x42c   : > { %v4699_v35 = vadd.f32 1.0, %v7733_v20  ;;  %7740 = vtanh.f32 %v4451_v8  ;;  %v4457_v17 = vmul.f32 0.5, %v4329_v30  ;;  %v4169_v51 = vmul.f32 %v9893_v36, %v10738_v31  ;;  %v10739_v30 = vld [vmem:[#allocation42_spill] sm:$0xff] }
 0x42d   : > { %v6935_v46 = vpack.c.bf16 %v5694_v28, %v5694_v28  ;;  %v10734_v28 = vld [vmem:[#allocation38_spill] sm:$0xff]  ;;  %v4455_v57 = vmul.f32 0.5, %v4327_v15  ;;  %v4331_v8 = vadd.f32 %v9899_v25, %v4196_v21  ;;  %v4202_v4 = vmul.f32 %v9893_v36, %v10739_v30  ;;  %v10740_v15 = vld [vmem:[#allocation17_spill] sm:$0xff] }
 0x42e   : > { %v4198_v50 = vmul.f32 %v9893_v36, %v10734_v28  ;;  %v4827_v11 = vmul.f32 0.5, %v4699_v35  ;;  %7742 = vtanh.f32 %v4457_v17  ;;  %v4298_v17 = vadd.f32 %v9899_v25, %v4163_v40 }
 0x42f   : > { %6335 = vst.msk [vmem:[%s9345_s30 + $0x80] sm:$0xf] %vm6302_vm2, %v6935_v46  ;;  %5289 = vperm.xlu0 %7433, %v4819_v63   ;;  %v7735_v48 = vpop.eup %7734  ;;  %v4165_v46 = vmul.f32 %v9893_v36, %v10735_v2  ;;  %v3592_v63 = vmax.f32 %v9886_v3, 0.0  ;;  %v3590_v3 = vmax.f32 %v9889_v22, 0.0  ;;  %7744 = vtanh.f32 %v4455_v57  ;;  %v10741_v2 = vld [vmem:[#allocation43_spill] sm:$0xff] }
 0x430   : > { %v4705_v58 = vadd.f32 1.0, %v7735_v48  ;;  %v4333_v41 = vadd.f32 %v9899_v25, %v4198_v50  ;;  %v4304_v22 = vadd.f32 %v9899_v25, %v4169_v51  ;;  %v4167_v28 = vmul.f32 %v9893_v36, %v10740_v15 }
 0x431   : > { %v4300_v38 = vadd.f32 %v9899_v25, %v4165_v46  ;;  %v4200_v46 = vmul.f32 %v9893_v36, %v10741_v2  ;;  %v4426_v24 = vmul.f32 0.5, %v4298_v17  ;;  %v4206_v6 = vmul.f32 %v9893_v36, %v9401_v45 }
 0x432   : > { %v4833_v39 = vmul.f32 0.5, %v4705_v58  ;;  %v4461_v20 = vmul.f32 0.5, %v4333_v41  ;;  %v3725_v58 = vmul.f32 %v7921_v32, %v3590_v3  ;;  %v4432_v21 = vmul.f32 0.5, %v4304_v22  ;;  %v10742_v3 = vld [vmem:[#allocation18_spill] sm:$0xff] }
 0x433   : > { %5319 = vperm.xlu0 %7433, %v4825_v23   ;;  %v7737_v13 = vpop.eup %7736  ;;  %v4428_v48 = vmul.f32 0.5, %v4300_v38  ;;  %v4335_v38 = vadd.f32 %v9899_v25, %v4200_v46  ;;  %v4204_v30 = vmul.f32 %v9893_v36, %v9403_v34  ;;  %v4210_v34 = vmul.f32 %v9893_v36, %v9525_v49  ;;  %v10744_v46 = vld [vmem:[#allocation20_spill] sm:$0xff] }
 0x434   : > { %v4703_v27 = vadd.f32 1.0, %v7737_v13  ;;  %v7739_v23 = vpop.eup %7738  ;;  %7746 = vtanh.f32 %v4461_v20  ;;  %v4337_v13 = vadd.f32 %v9899_v25, %v4202_v4  ;;  %v10743_v4 = vld [vmem:[#allocation19_spill] sm:$0xff] }
 0x435   : > { %v4709_v1 = vadd.f32 1.0, %v7739_v23  ;;  %7748 = vtanh.f32 %v4428_v48  ;;  %v4463_v20 = vmul.f32 0.5, %v4335_v38  ;;  %v4171_v45 = vmul.f32 %v9893_v36, %v10743_v4 }
 0x436   : > { %v4831_v35 = vmul.f32 0.5, %v4703_v27  ;;  %v4302_v27 = vadd.f32 %v9899_v25, %v4167_v28  ;;  %v4465_v23 = vmul.f32 0.5, %v4337_v13  ;;  %v4339_v28 = vadd.f32 %v9899_v25, %v4204_v30 }
 0x437   : > { %5309 = vperm.xlu0 %7433, %v4823_v26   ;;  %v3727_v26 = vmul.f32 %v7921_v32, %v3592_v63  ;;  %v4837_v57 = vmul.f32 0.5, %v4709_v1  ;;  %v4173_v32 = vmul.f32 %v9893_v36, %v10742_v3 }
 0x438   : > { %v4467_v49 = vmul.f32 0.5, %v4339_v28 }
 0x439   : > { %v4109_v50 = vsel %vm866_vm1, %v3727_v26, 0.0  ;;  %v4430_v26 = vmul.f32 0.5, %v4302_v27  ;;  %v4308_v17 = vadd.f32 %v9899_v25, %v4173_v32  ;;  %v4345_v27 = vadd.f32 %v9899_v25, %v4210_v34 }
 0x43b   : > { %5339 = vperm.xlu0 %7433, %v4829_v55   ;;  %v7741_v55 = vpop.eup %7740  ;;  %v4436_v2 = vmul.f32 0.5, %v4308_v17 }
 0x43c   : > { %v4707_v63 = vadd.f32 1.0, %v7741_v55  ;;  %v7743_v41 = vpop.eup %7742 }
 0x43d   : > { %v4713_v40 = vadd.f32 1.0, %v7743_v41  ;;  %v7745_v51 = vpop.eup %7744  ;;  %v4208_v41 = vmul.f32 %v9893_v36, %v9540_v54  ;;  %v10094_v54 = vld [vmem:[%s8069_s13 + $0xa8] sm:$0xff]  }
 0x43e   : > { %v4835_v31 = vmul.f32 0.5, %v4707_v63  ;;  %v4711_v1 = vadd.f32 1.0, %v7745_v51  ;;  %v7747_v48 = vpop.eup %7746  ;;  %v4177_v63 = vmul.f32 %v9893_v36, %v10744_v46  ;;  %v10745_v51 = vld [vmem:[#allocation21_spill] sm:$0xff]  ;;  %v4937_v32 = vunpack.c.h.bf16 %v10094_v54 }
 0x43f   : > { %5329 = vperm.xlu0 %7433, %v4827_v11   ;;  %v4459_v11 = vmul.f32 0.5, %v4331_v8  ;;  %v4341_v8 = vadd.f32 %v9899_v25, %v4206_v6  ;;  %v7749_v22 = vpop.eup %7748  ;;  %v4175_v3 = vmul.f32 %v9893_v36, %v10745_v51 }
 0x441   : > { %7750 = vtanh.f32 %v4459_v11  ;;  %v4469_v15 = vmul.f32 0.5, %v4341_v8  ;;  %v4839_v11 = vmul.f32 0.5, %v4711_v1  ;;  %v4214_v8 = vmul.f32 %v9893_v36, %v9638_v19 }
 0x442   : > { %7752 = vtanh.f32 %v4426_v24  ;;  %v4473_v1 = vmul.f32 0.5, %v4345_v27  ;;  %v4310_v19 = vadd.f32 %v9899_v25, %v4175_v3 }
 0x443   : > { %5359 = vperm.xlu0 %7433, %v4833_v39   ;;  %v4103_v39 = vsel %vm866_vm1, %v3725_v58, 0.0  ;;  %7754 = vtanh.f32 %v4432_v21  ;;  %v4717_v58 = vadd.f32 1.0, %v7747_v48  ;;  %v10746_v48 = vld [vmem:[#allocation22_spill] sm:$0xff]  ;;  %v4349_v46 = vadd.f32 %v9899_v25, %v4214_v8 }
 0x444   : > { %7756 = vtanh.f32 %v4465_v23  ;;  %v4181_v17 = vmul.f32 %v9893_v36, %v10746_v48  ;;  %v4930_v48 = vunpack.c.l.bf16 %v10002_v29 }
 0x445   : > { %7758 = vtanh.f32 %v4430_v26  ;;  %v4845_v6 = vmul.f32 0.5, %v4717_v58 }
 0x446   : > { %7760 = vtanh.f32 %v4463_v20  ;;  %v4343_v20 = vadd.f32 %v9899_v25, %v4208_v41 }
 0x447   : > { %5349 = vperm.xlu0 %7433, %v4831_v35   ;;  %v4841_v35 = vmul.f32 0.5, %v4713_v40  ;;  %7762 = vtanh.f32 %v4469_v15 }
 0x448   : > { %4110 = vadd.xlane.f32.xlu1 %v4109_v50  ;;  %v4306_v50 = vadd.f32 %v9899_v25, %v4171_v45  ;;  %7764 = vtanh.f32 %v4436_v2  ;;  %v4471_v2 = vmul.f32 0.5, %v4343_v20 }
 0x449   : > { %7766 = vtanh.f32 %v4467_v49  ;;  %v4932_v49 = vunpack.c.l.bf16 %v9993_v43 }
 0x44a   : > { %v4434_v23 = vmul.f32 0.5, %v4306_v50 }
 0x44b   : > { %5379 = vperm.xlu0 %7433, %v4837_v57   ;;  %v7751_v13 = vpop.eup %7750  ;;  %v4684_v57 = vadd.f32 1.0, %v7749_v22 }
 0x44c   : > { %4104 = vadd.xlane.f32.xlu1 %v4103_v39  ;;  %v7753_v21 = vpop.eup %7752  ;;  %v4715_v38 = vadd.f32 1.0, %v7751_v13  ;;  %7768 = vtanh.f32 %v4434_v23 }
 0x44d   : > { %v7755_v39 = vpop.eup %7754  ;;  %v4682_v26 = vadd.f32 1.0, %v7753_v21  ;;  %v4812_v4 = vmul.f32 0.5, %v4684_v57  ;;  %7770 = vtanh.f32 %v4473_v1 }
 0x44e   : > { %v7757_v40 = vpop.eup %7756  ;;  %v4688_v45 = vadd.f32 1.0, %v7755_v39  ;;  %v4843_v28 = vmul.f32 0.5, %v4715_v38  ;;  %v4316_v39 = vadd.f32 %v9899_v25, %v4181_v17 }
 0x44f   : > { %5369 = vperm.xlu0 %7433, %v4835_v31   ;;  %v4312_v31 = vadd.f32 %v9899_v25, %v4177_v63  ;;  %v4721_v22 = vadd.f32 1.0, %v7757_v40  ;;  %v4212_v63 = vmul.f32 %v9893_v36, %v9644_v7  ;;  %v4810_v41 = vmul.f32 0.5, %v4682_v26  ;;  %v10747_v7 = vld [vmem:[#allocation23_spill] sm:$0xff] }
 0x450   : > { %v4179_v51 = vmul.f32 %v9893_v36, %v10747_v7  ;;  %v4816_v20 = vmul.f32 0.5, %v4688_v45  ;;  %v4444_v17 = vmul.f32 0.5, %v4316_v39 }
 0x451   : > { %v10076_v55 = vpop.xlane.xlu0 %4095  ;;  %v4440_v50 = vmul.f32 0.5, %v4312_v31  ;;  %v4438_v31 = vmul.f32 0.5, %v4310_v19  ;;  %v4347_v43 = vadd.f32 %v9899_v25, %v4212_v63  ;;  %v4216_v63 = vmul.f32 %v9893_v36, %v9718_v14 }
 0x453   : > { %5399 = vperm.xlu0 %7433, %v4841_v35   ;;  %v7759_v35 = vpop.eup %7758  ;;  %7772 = vtanh.f32 %v4440_v50  ;;  %v10748_v50 = vld [vmem:[#allocation25_spill] sm:$0xff] }
 0x454   : > { %v7761_v34 = vpop.eup %7760  ;;  %v4686_v27 = vadd.f32 1.0, %v7759_v35  ;;  %7774 = vtanh.f32 %v4471_v2  ;;  %v4185_v45 = vmul.f32 %v9893_v36, %v10748_v50  ;;  %v4475_v2 = vmul.f32 0.5, %v4347_v43 }
 0x455   : > { %v10087_v24 = vpop.xlane.xlu0 %4089  ;;  %v4719_v23 = vadd.f32 1.0, %v7761_v34  ;;  %v7763_v40 = vpop.eup %7762  ;;  %7776 = vtanh.f32 %v4438_v31  ;;  %v4314_v34 = vadd.f32 %v9899_v25, %v4179_v51 }
 0x456   : > { %v7765_v8 = vpop.eup %7764  ;;  %v4814_v29 = vmul.f32 0.5, %v4686_v27 }
 0x457   : > { %5389 = vperm.xlu0 %7433, %v4839_v11   ;;  %v10106_v11 = vld [vmem:[%s8069_s13 + $0xa0] sm:$0xff]  }
 0x458   : > { %v4935_v13 = vunpack.c.h.bf16 %v10106_v11 }
 0x45b   : > { %v10100_v30 = vpop.xlane.xlu1 %4086  ;;  %5419 = vperm.xlu0 %7433, %v4845_v6   ;;  %v4849_v6 = vmul.f32 0.5, %v4721_v22  ;;  %v4725_v22 = vadd.f32 1.0, %v7763_v40 }
 0x45d   : > { %5254 = vperm.xlu1 %7432, %v4812_v4   ;;  %v5240_v15 = vpop.permute.xlu0 %5239  ;;  %v4218_v4 = vmul.f32 %v9893_v36, %v9712_v33 }
 0x45e   : > { %v5705_v58 = vmul.f32 %v5240_v15, %v4937_v32  ;;  %v4477_v32 = vmul.f32 0.5, %v4349_v46  ;;  %v4847_v15 = vmul.f32 0.5, %v4719_v23  ;;  %v4442_v23 = vmul.f32 0.5, %v4314_v34 }
 0x45f   : > { %v10112_v57 = vpop.xlane.xlu1 %4080  ;;  %5409 = vperm.xlu0 %7433, %v4843_v28   ;;  %v7767_v28 = vpop.eup %7766  ;;  %v4353_v46 = vadd.f32 %v9899_v25, %v4218_v4 }
 0x460   : > { %v6946_v21 = vpack.c.bf16 %v5705_v58, %v5705_v58  ;;  %v7769_v33 = vpop.eup %7768  ;;  %v4692_v58 = vadd.f32 1.0, %v7765_v8  ;;  %7778 = vtanh.f32 %v4477_v32  ;;  %v4222_v32 = vmul.f32 %v9893_v36, %v9786_v5 }
 0x461   : > { %5244 = vperm.xlu1 %7432, %v4810_v41   ;;  %v5230_v38 = vpop.permute.xlu0 %5229  ;;  %7780 = vtanh.f32 %v4444_v17  ;;  %v7771_v39 = vpop.eup %7770  ;;  %v4690_v31 = vadd.f32 1.0, %v7769_v33  ;;  %v4481_v51 = vmul.f32 0.5, %v4353_v46 }
 0x462   : > { %6346 = vst.msk [vmem:[%s9345_s30 + $0xac] sm:$0xf] %vm6302_vm2, %v6946_v21  ;;  %v5703_v3 = vmul.f32 %v5230_v38, %v4935_v13  ;;  %v4723_v21 = vadd.f32 1.0, %v7767_v28  ;;  %v4320_v38 = vadd.f32 %v9899_v25, %v4185_v45  ;;  %v4820_v7 = vmul.f32 0.5, %v4692_v58  ;;  %v7773_v14 = vpop.eup %7772  ;;  %v10751_v45 = vld [vmem:[#allocation31_spill] sm:$0xff] }
 0x463   : > { %v5215_v26 = vpop.permute.xlu1 %5214  ;;  %5439 = vperm.xlu0 %7433, %v4849_v6   ;;  %v10749_v6 = vld [vmem:[#allocation27_spill] sm:$0xff]  ;;  %7782 = vtanh.f32 %v4475_v2  ;;  %v7775_v43 = vpop.eup %7774  ;;  %v4729_v8 = vadd.f32 1.0, %v7771_v39  ;;  %v4818_v17 = vmul.f32 0.5, %v4690_v31  ;;  %v4357_v5 = vadd.f32 %v9899_v25, %v4222_v32 }
 0x464   : > { %v6944_v1 = vpack.c.bf16 %v5703_v3, %v5703_v3  ;;  %v5700_v35 = vmul.f32 %v5215_v26, %v4932_v49  ;;  %v4853_v49 = vmul.f32 0.5, %v4725_v22  ;;  %v4183_v27 = vmul.f32 %v9893_v36, %v10749_v6  ;;  %v10750_v26 = vld [vmem:[#allocation29_spill] sm:$0xff]  ;;  %v7777_v22 = vpop.eup %7776 }
 0x465   : > { %5274 = vperm.xlu1 %7432, %v4816_v20   ;;  %v4351_v3 = vadd.f32 %v9899_v25, %v4216_v63  ;;  %v4189_v20 = vmul.f32 %v9893_v36, %v10750_v26  ;;  %v4851_v4 = vmul.f32 0.5, %v4723_v21  ;;  %7784 = vtanh.f32 %v4442_v23  ;;  %v10752_v6 = vld [vmem:[#allocation33_spill] sm:$0xff] }
 0x466   : > { %6344 = vst.msk [vmem:[%s9345_s30 + $0xa4] sm:$0xf] %vm6302_vm2, %v6944_v1  ;;  %v6941_v19 = vpack.c.bf16 %v5700_v35, %v5700_v35  ;;  %v4448_v1 = vmul.f32 0.5, %v4320_v38  ;;  %v4318_v35 = vadd.f32 %v9899_v25, %v4183_v27  ;;  %7786 = vtanh.f32 %v4481_v51 }
 0x467   : > { %v5205_v13 = vpop.permute.xlu1 %5204  ;;  %5429 = vperm.xlu0 %7433, %v4847_v15   ;;  %v4479_v15 = vmul.f32 0.5, %v4351_v3  ;;  %v4220_v28 = vmul.f32 %v9893_v36, %v9792_v16  ;;  %v4324_v50 = vadd.f32 %v9899_v25, %v4189_v20  ;;  %v4727_v33 = vadd.f32 1.0, %v7775_v43 }
 0x468   : > { %6341 = vst.msk [vmem:[%s9345_s30 + $0x98] sm:$0xf] %vm6302_vm2, %v6941_v19  ;;  %v5698_v41 = vmul.f32 %v5205_v13, %v4930_v48  ;;  %v4696_v48 = vadd.f32 1.0, %v7773_v14  ;;  %v4187_v19 = vmul.f32 %v9893_v36, %v10751_v45  ;;  %v4857_v58 = vmul.f32 0.5, %v4729_v8  ;;  %v10753_v8 = vld [vmem:[#allocation35_spill] sm:$0xff] }
 0x469   : > { %5264 = vperm.xlu1 %7432, %v4814_v29   ;;  %7788 = vtanh.f32 %v4448_v1  ;;  %v4446_v13 = vmul.f32 0.5, %v4318_v35  ;;  %v4694_v2 = vadd.f32 1.0, %v7777_v22  ;;  %v4485_v63 = vmul.f32 0.5, %v4357_v5 }
 0x46a   : > { %v6939_v40 = vpack.c.bf16 %v5698_v41, %v5698_v41  ;;  %v7779_v34 = vpop.eup %7778  ;;  %v4824_v46 = vmul.f32 0.5, %v4696_v48  ;;  %7790 = vtanh.f32 %v4479_v15  ;;  %v4355_v41 = vadd.f32 %v9899_v25, %v4220_v28  ;;  %v10754_v15 = vld [vmem:[#allocation37_spill] sm:$0xff] }
 0x46b   : > { %5459 = vperm.xlu0 %7433, %v4853_v49   ;;  %v7781_v29 = vpop.eup %7780  ;;  %v4226_v16 = vmul.f32 %v9893_v36, %v9860_v62  ;;  %v4452_v21 = vmul.f32 0.5, %v4324_v50  ;;  %v4322_v49 = vadd.f32 %v9899_v25, %v4187_v19  ;;  %v4733_v39 = vadd.f32 1.0, %v7779_v34 }
 0x46c   : > { %6339 = vst.msk [vmem:[%s9345_s30 + $0x90] sm:$0xf] %vm6302_vm2, %v6939_v40  ;;  %v4855_v23 = vmul.f32 0.5, %v4727_v33  ;;  %7792 = vtanh.f32 %v4446_v13  ;;  %v4193_v27 = vmul.f32 %v9893_v36, %v10752_v6  ;;  %v4700_v40 = vadd.f32 1.0, %v7781_v29  ;;  %v10755_v33 = vld [vmem:[#allocation39_spill] sm:$0xff] }
 0x46d   : > { %5294 = vperm.xlu1 %7432, %v4820_v7   ;;  %v7783_v38 = vpop.eup %7782  ;;  %v4822_v31 = vmul.f32 0.5, %v4694_v2  ;;  %7794 = vtanh.f32 %v4485_v63  ;;  %v4483_v14 = vmul.f32 0.5, %v4355_v41  ;;  %v4361_v51 = vadd.f32 %v9899_v25, %v4226_v16 }
 0x46e   : > { %v4224_v62 = vmul.f32 %v9893_v36, %v9866_v12  ;;  %7796 = vtanh.f32 %v4452_v21  ;;  %v4450_v3 = vmul.f32 0.5, %v4322_v49  ;;  %v4731_v32 = vadd.f32 1.0, %v7783_v38 }
 0x46f   : > { %5449 = vperm.xlu0 %7433, %v4851_v4   ;;  %v7785_v7 = vpop.eup %7784  ;;  %v4861_v43 = vmul.f32 0.5, %v4733_v39  ;;  %v4328_v20 = vadd.f32 %v9899_v25, %v4193_v27  ;;  %v4191_v4 = vmul.f32 %v9893_v36, %v10753_v8  ;;  %v4828_v35 = vmul.f32 0.5, %v4700_v40  ;;  %v10757_v8 = vld [vmem:[#allocation44_spill] sm:$0xff] }
 0x470   : > { %v7787_v26 = vpop.eup %7786  ;;  %v4698_v1 = vadd.f32 1.0, %v7785_v7  ;;  %7798 = vtanh.f32 %v4483_v14  ;;  %v4359_v22 = vadd.f32 %v9899_v25, %v4224_v62  ;;  %v4230_v12 = vmul.f32 %v9893_v36, %v9926_v52 }
 0x471   : > { %5284 = vperm.xlu1 %7432, %v4818_v17   ;;  %v4489_v17 = vmul.f32 0.5, %v4361_v51  ;;  %7800 = vtanh.f32 %v4450_v3  ;;  %v4197_v5 = vmul.f32 %v9893_v36, %v10754_v15  ;;  %v4737_v28 = vadd.f32 1.0, %v7787_v26  ;;  %v10756_v26 = vld [vmem:[#allocation41_spill] sm:$0xff] }
 0x472   : > { %v4859_v34 = vmul.f32 0.5, %v4731_v32  ;;  %v4456_v45 = vmul.f32 0.5, %v4328_v20  ;;  %v4326_v19 = vadd.f32 %v9899_v25, %v4191_v4  ;;  %v4228_v29 = vmul.f32 %v9893_v36, %v9932_v61  ;;  %v10185_v4 = vld [vmem:[#allocation3] ss:$0 sm:$0xff] }
 0x473   : > { %5479 = vperm.xlu0 %7433, %v4857_v58   ;;  %v7789_v48 = vpop.eup %7788  ;;  %v4195_v58 = vmul.f32 %v9893_v36, %v10755_v33  ;;  %v4826_v52 = vmul.f32 0.5, %v4698_v1  ;;  %7802 = vtanh.f32 %v4489_v17  ;;  %v4365_v63 = vadd.f32 %v9899_v25, %v4230_v12 }
 0x474   : > { %v7791_v50 = vpop.eup %7790  ;;  %v4704_v13 = vadd.f32 1.0, %v7789_v48  ;;  %v4332_v41 = vadd.f32 %v9899_v25, %v4197_v5  ;;  %v4865_v21 = vmul.f32 0.5, %v4737_v28  ;;  %7804 = vtanh.f32 %v4456_v45 }
 0x475   : > { %5314 = vperm.xlu1 %7432, %v4824_v46   ;;  %v4487_v46 = vmul.f32 0.5, %v4359_v22  ;;  %v4735_v16 = vadd.f32 1.0, %v7791_v50  ;;  %v4454_v39 = vmul.f32 0.5, %v4326_v19  ;;  %v4363_v61 = vadd.f32 %v9899_v25, %v4228_v29 }
 0x476   : > { %v7793_v2 = vpop.eup %7792  ;;  %v4234_v27 = vmul.f32 %v9893_v36, %v9996_v59  ;;  %v4832_v40 = vmul.f32 0.5, %v4704_v13  ;;  %v4460_v7 = vmul.f32 0.5, %v4332_v41 }
 0x477   : > { %5469 = vperm.xlu0 %7433, %v4855_v23   ;;  %v7795_v49 = vpop.eup %7794  ;;  %v4330_v23 = vadd.f32 %v9899_v25, %v4195_v58  ;;  %v4702_v6 = vadd.f32 1.0, %v7793_v2  ;;  %7806 = vtanh.f32 %v4487_v46  ;;  %v4863_v51 = vmul.f32 0.5, %v4735_v16 }
 0x478   : > { %v7797_v38 = vpop.eup %7796  ;;  %v4741_v14 = vadd.f32 1.0, %v7795_v49  ;;  %7808 = vtanh.f32 %v4454_v39  ;;  %v4491_v59 = vmul.f32 0.5, %v4363_v61  ;;  %v4369_v1 = vadd.f32 %v10185_v4, %v4234_v27  ;;  %v10759_v27 = vld [vmem:[#allocation46_spill] sm:$0xff] }
 0x479   : > { %5304 = vperm.xlu1 %7432, %v4822_v31   ;;  %v4493_v31 = vmul.f32 0.5, %v4365_v63  ;;  %v4708_v3 = vadd.f32 1.0, %v7797_v38  ;;  %v4458_v32 = vmul.f32 0.5, %v4330_v23 }
 0x47a   : > { %v7799_v62 = vpop.eup %7798  ;;  %v4869_v22 = vmul.f32 0.5, %v4741_v14 }
 0x47b   : > { %5499 = vperm.xlu0 %7433, %v4861_v43   ;;  %v10179_v43 = vld [vmem:[#allocation2] ss:$0 sm:$0xff]  ;;  %v7801_v20 = vpop.eup %7800  ;;  %7810 = vtanh.f32 %v4493_v31  ;;  %v4739_v17 = vadd.f32 1.0, %v7799_v62  ;;  %v4836_v50 = vmul.f32 0.5, %v4708_v3 }
 0x47c   : > { %v4201_v25 = vmul.f32 %v10179_v43, %v10756_v26  ;;  %v4199_v36 = vmul.f32 %v10179_v43, %v10757_v8  ;;  %v4232_v48 = vmul.f32 %v10179_v43, %v10005_v60  ;;  %7812 = vtanh.f32 %v4460_v7 }
 0x47d   : > { %5334 = vperm.xlu1 %7432, %v4828_v35   ;;  %v4830_v35 = vmul.f32 0.5, %v4702_v6  ;;  %v7803_v12 = vpop.eup %7802  ;;  %v4706_v15 = vadd.f32 1.0, %v7801_v20  ;;  %7814 = vtanh.f32 %v4458_v32  ;;  %v4238_v60 = vmul.f32 %v10179_v43, %v10100_v30 }
 0x47e   : > { %v4336_v5 = vadd.f32 %v10185_v4, %v4201_v25  ;;  %v4334_v28 = vadd.f32 %v10185_v4, %v4199_v36  ;;  %7816 = vtanh.f32 %v4491_v59  ;;  %v7805_v45 = vpop.eup %7804  ;;  %v4367_v19 = vadd.f32 %v10185_v4, %v4232_v48  ;;  %v10760_v36 = vld [vmem:[#allocation47_spill] sm:$0xff] }
 0x47f   : > { %5489 = vperm.xlu0 %7433, %v4859_v34   ;;  %v4497_v34 = vmul.f32 0.5, %v4369_v1  ;;  %v4745_v33 = vadd.f32 1.0, %v7803_v12  ;;  %v4867_v58 = vmul.f32 0.5, %v4739_v17  ;;  %v4712_v63 = vadd.f32 1.0, %v7805_v45  ;;  %v10212_v48 = vld [vmem:[%s8069_s13 + $0xb8] sm:$0xff]  }
 0x480   : > { %v4464_v29 = vmul.f32 0.5, %v4336_v5  ;;  %v4462_v41 = vmul.f32 0.5, %v4334_v28  ;;  %v4834_v16 = vmul.f32 0.5, %v4706_v15  ;;  %v4495_v49 = vmul.f32 0.5, %v4367_v19 }
 0x481   : > { %5324 = vperm.xlu1 %7432, %v4826_v52   ;;  %v7807_v13 = vpop.eup %7806  ;;  %v10758_v52 = vld [vmem:[#allocation45_spill] sm:$0xff]  ;;  %7818 = vtanh.f32 %v4497_v34  ;;  %v4373_v39 = vadd.f32 %v10185_v4, %v4238_v60  ;;  %v4236_v30 = vmul.f32 %v10179_v43, %v10112_v57  ;;  %v4873_v38 = vmul.f32 0.5, %v4745_v33  ;;  %v10761_v60 = vld [vmem:[#allocation48_spill] sm:$0xff] }
 0x482   : > { %v4205_v2 = vmul.f32 %v10179_v43, %v10758_v52  ;;  %v4743_v23 = vadd.f32 1.0, %v7807_v13  ;;  %7820 = vtanh.f32 %v4464_v29  ;;  %v4840_v14 = vmul.f32 0.5, %v4712_v63 }
 0x483   : > { %5519 = vperm.xlu0 %7433, %v4865_v21   ;;  %v7809_v21 = vpop.eup %7808  ;;  %7822 = vtanh.f32 %v4462_v41  ;;  %v4501_v62 = vmul.f32 0.5, %v4373_v39  ;;  %v4371_v57 = vadd.f32 %v10185_v4, %v4236_v30  ;;  %v4209_v59 = vmul.f32 %v10179_v43, %v10760_v36 }
 0x484   : > { %v4340_v61 = vadd.f32 %v10185_v4, %v4205_v2  ;;  %v4710_v7 = vadd.f32 1.0, %v7809_v21  ;;  %7824 = vtanh.f32 %v4495_v49  ;;  %v4871_v25 = vmul.f32 0.5, %v4743_v23  ;;  %v10221_v2 = vld [vmem:[%s8069_s13 + $0xb0] sm:$0xff]  }
 0x485   : > { %5354 = vperm.xlu1 %7432, %v4832_v40   ;;  %v7811_v6 = vpop.eup %7810  ;;  %v4203_v40 = vmul.f32 %v10179_v43, %v10759_v27  ;;  %v4941_v17 = vunpack.c.h.bf16 %v10212_v48  ;;  %7826 = vtanh.f32 %v4501_v62  ;;  %v4499_v15 = vmul.f32 0.5, %v4371_v57 }
 0x486   : > { %v7813_v31 = vpop.eup %7812  ;;  %v4749_v26 = vadd.f32 1.0, %v7811_v6  ;;  %v4468_v20 = vmul.f32 0.5, %v4340_v61  ;;  %v4344_v19 = vadd.f32 %v10185_v4, %v4209_v59  ;;  %v4207_v33 = vmul.f32 %v10179_v43, %v10761_v60 }
 0x487   : > { %5509 = vperm.xlu0 %7433, %v4863_v51   ;;  %v7815_v51 = vpop.eup %7814  ;;  %v4338_v8 = vadd.f32 %v10185_v4, %v4203_v40  ;;  %v4716_v1 = vadd.f32 1.0, %v7813_v31  ;;  %v4939_v63 = vunpack.c.h.bf16 %v10221_v2  ;;  %v4936_v61 = vunpack.c.l.bf16 %v10094_v54 }
 0x488   : > { %v7817_v32 = vpop.eup %7816  ;;  %7828 = vtanh.f32 %v4468_v20  ;;  %v4472_v40 = vmul.f32 0.5, %v4344_v19  ;;  %v4342_v31 = vadd.f32 %v10185_v4, %v4207_v33  ;;  %v4934_v20 = vunpack.c.l.bf16 %v10106_v11 }
 0x489   : > { %5344 = vperm.xlu1 %7432, %v4830_v35   ;;  %v4838_v35 = vmul.f32 0.5, %v4710_v7  ;;  %v4747_v12 = vadd.f32 1.0, %v7817_v32  ;;  %v4466_v45 = vmul.f32 0.5, %v4338_v8  ;;  %v4844_v52 = vmul.f32 0.5, %v4716_v1  ;;  %v10233_v32 = vld [vmem:[%s8069_s13 + $0xc8] sm:$0xff]  }
 0x48a   : > { %7830 = vtanh.f32 %v4499_v15  ;;  %v4213_v7 = vmul.f32 %v10179_v43, %v9517_v18  ;;  %v4945_v54 = vunpack.c.h.bf16 %v10233_v32 }
 0x48b   : > { %5539 = vperm.xlu0 %7433, %v4869_v22   ;;  %v4714_v22 = vadd.f32 1.0, %v7815_v51  ;;  %v7819_v28 = vpop.eup %7818  ;;  %v4875_v49 = vmul.f32 0.5, %v4747_v12  ;;  %7832 = vtanh.f32 %v4466_v45  ;;  %v4211_v12 = vmul.f32 %v10179_v43, %v9519_v10 }
 0x48c   : > { %v7821_v41 = vpop.eup %7820 }
 0x48d   : > { %5374 = vperm.xlu1 %7432, %v4836_v50   ;;  %v4877_v50 = vmul.f32 0.5, %v4749_v26  ;;  %v4842_v39 = vmul.f32 0.5, %v4714_v22  ;;  %v7823_v30 = vpop.eup %7822  ;;  %v4720_v51 = vadd.f32 1.0, %v7821_v41  ;;  %v4348_v22 = vadd.f32 %v10185_v4, %v4213_v7 }
 0x48e   : > { %v10197_v46 = vpop.xlane.xlu0 %4107  ;;  %v7825_v27 = vpop.eup %7824  ;;  %v4718_v26 = vadd.f32 1.0, %v7823_v30  ;;  %v4217_v41 = vmul.f32 %v10179_v43, %v9630_v42  ;;  %v10254_v30 = vld [vmem:[%s8069_s13 + $0xd8] sm:$0xff]   ;;  %v4215_v7 = vmul.f32 %v10179_v43, %v9632_v37 }
 0x48f   : > { %5529 = vperm.xlu0 %7433, %v4867_v58   ;;  %v4751_v18 = vadd.f32 1.0, %v7825_v27 }
 0x490   : > { %v4846_v60 = vmul.f32 0.5, %v4718_v26 }
 0x491   : > { %5364 = vperm.xlu1 %7432, %v4834_v16   ;;  %v4753_v16 = vadd.f32 1.0, %v7819_v28  ;;  %v4848_v28 = vmul.f32 0.5, %v4720_v51 }
 0x492   : > { %v10206_v3 = vpop.xlane.xlu0 %4101 }
 0x493   : > { %5559 = vperm.xlu0 %7433, %v4873_v38   ;;  %v4881_v8 = vmul.f32 0.5, %v4753_v16 }
 0x495   : > { %5394 = vperm.xlu1 %7432, %v4840_v14  }
 0x497   : > { %5549 = vperm.xlu0 %7433, %v4871_v25  }
 0x498   : > { %v4099_v5 = vpop.xlane.xlu1 %4098 }
 0x499   : > { %v4242_v34 = vmul.f32 %v10179_v43, %v4099_v5  ;;  %5384 = vperm.xlu1 %7432, %v4838_v35   ;;  %v7827_v35 = vpop.eup %7826 }
 0x49a   : > { %v5260_v58 = vpop.permute.xlu0 %5259  ;;  %v7829_v45 = vpop.eup %7828  ;;  %v4757_v33 = vadd.f32 1.0, %v7827_v35 }
 0x49b   : > { %v4377_v13 = vadd.f32 %v10185_v4, %v4242_v34  ;;  %v5709_v29 = vmul.f32 %v5260_v58, %v4941_v17  ;;  %5579 = vperm.xlu0 %7433, %v4877_v50   ;;  %v4470_v17 = vmul.f32 0.5, %v4342_v31  ;;  %v10243_v34 = vld [vmem:[%s8069_s13 + $0xc0] sm:$0xff]   ;;  %v4352_v31 = vadd.f32 %v10185_v4, %v4217_v41 }
 0x49c   : > { %v4093_v21 = vpop.xlane.xlu1 %4092  ;;  %v4943_v50 = vunpack.c.h.bf16 %v10243_v34  ;;  %v4885_v42 = vmul.f32 0.5, %v4757_v33  ;;  %v10283_v41 = vld [vmem:[%s8069_s13 + $0xe0] sm:$0xff]  }
 0x49d   : > { %v4505_v23 = vmul.f32 0.5, %v4377_v13  ;;  %v6950_v38 = vpack.c.bf16 %v5709_v29, %v5709_v29  ;;  %v4240_v6 = vmul.f32 %v10179_v43, %v4093_v21  ;;  %5414 = vperm.xlu1 %7432, %v4844_v52   ;;  %v4879_v13 = vmul.f32 0.5, %v4751_v18  ;;  %v7831_v29 = vpop.eup %7830 }
 0x49e   : > { %v5250_v14 = vpop.permute.xlu0 %5249  ;;  %v4476_v52 = vmul.f32 0.5, %v4348_v22  ;;  %v4724_v21 = vadd.f32 1.0, %v7829_v45  ;;  %v4480_v37 = vmul.f32 0.5, %v4352_v31 }
 0x49f   : > { %6350 = vst.msk [vmem:[%s9345_s30 + $0xbc] sm:$0xf] %vm6302_vm2, %v6950_v38  ;;  %v4375_v62 = vadd.f32 %v10185_v4, %v4240_v6  ;;  %v5707_v57 = vmul.f32 %v5250_v14, %v4939_v63  ;;  %5569 = vperm.xlu0 %7433, %v4875_v49   ;;  %7834 = vtanh.f32 %v4505_v23  ;;  %v4346_v63 = vadd.f32 %v10185_v4, %v4211_v12  ;;  %v7833_v38 = vpop.eup %7832 }
 0x4a0   : > { %v5235_v25 = vpop.permute.xlu1 %5234  ;;  %7836 = vtanh.f32 %v4472_v40  ;;  %v4949_v23 = vunpack.c.h.bf16 %v10254_v30  ;;  %v4755_v6 = vadd.f32 1.0, %v7831_v29  ;;  %v4722_v51 = vadd.f32 1.0, %v7833_v38 }
 0x4a1   : > { %v4503_v36 = vmul.f32 0.5, %v4375_v62  ;;  %v6948_v59 = vpack.c.bf16 %v5707_v57, %v5707_v57  ;;  %v5704_v1 = vmul.f32 %v5235_v25, %v4936_v61  ;;  %5404 = vperm.xlu1 %7432, %v4842_v39   ;;  %v4474_v40 = vmul.f32 0.5, %v4346_v63 }
 0x4a2   : > { %v5280_v15 = vpop.permute.xlu0 %5279  ;;  %v4852_v57 = vmul.f32 0.5, %v4724_v21  ;;  %v4883_v18 = vmul.f32 0.5, %v4755_v6  ;;  %v10764_v6 = vld [vmem:[#allocation8_spill] sm:$0xff] }
 0x4a3   : > { %6348 = vst.msk [vmem:[%s9345_s30 + $0xb4] sm:$0xf] %vm6302_vm2, %v6948_v59  ;;  %v6945_v11 = vpack.c.bf16 %v5704_v1, %v5704_v1  ;;  %v5713_v5 = vmul.f32 %v5280_v15, %v4945_v54  ;;  %5599 = vperm.xlu0 %7433, %v4881_v8   ;;  %7838 = vtanh.f32 %v4503_v36  ;;  %v10265_v54 = vld [vmem:[%s8069_s13 + $0xd0] sm:$0xff]   ;;  %v4350_v59 = vadd.f32 %v10185_v4, %v4215_v7  ;;  %v10762_v1 = vld [vmem:[#allocation4_spill] sm:$0xff]  ;;  %v10292_v7 = vld [vmem:[%s8069_s13 + $0xf8] sm:$0xff]  }
 0x4a4   : > { %v5225_v19 = vpop.permute.xlu1 %5224  ;;  %7840 = vtanh.f32 %v4470_v17  ;;  %v4947_v26 = vunpack.c.h.bf16 %v10265_v54  ;;  %v4221_v35 = vmul.f32 %v10179_v43, %v10762_v1  ;;  %v4850_v15 = vmul.f32 0.5, %v4722_v51 }
 0x4a5   : > { %6345 = vst.msk [vmem:[%s9345_s30 + $0xa8] sm:$0xf] %vm6302_vm2, %v6945_v11  ;;  %v6954_v10 = vpack.c.bf16 %v5713_v5, %v5713_v5  ;;  %v5702_v58 = vmul.f32 %v5225_v19, %v4934_v20  ;;  %5434 = vperm.xlu1 %7432, %v4848_v28   ;;  %7842 = vtanh.f32 %v4476_v52  ;;  %v10274_v11 = vld [vmem:[%s8069_s13 + $0xe8] sm:$0xff]  }
 0x4a6   : > { %v5270_v16 = vpop.permute.xlu0 %5269  ;;  %7844 = vtanh.f32 %v4474_v40  ;;  %v4953_v5 = vunpack.c.h.bf16 %v10274_v11  ;;  %v4356_v33 = vadd.f32 %v10185_v4, %v4221_v35 }
 0x4a7   : > { %6354 = vst.msk [vmem:[%s9345_s30 + $0xcc] sm:$0xf] %vm6302_vm2, %v6954_v10  ;;  %v6943_v49 = vpack.c.bf16 %v5702_v58, %v5702_v58  ;;  %v5711_v39 = vmul.f32 %v5270_v16, %v4943_v50  ;;  %5589 = vperm.xlu0 %7433, %v4879_v13   ;;  %7846 = vtanh.f32 %v4480_v37  ;;  %v10763_v10 = vld [vmem:[#allocation49_spill] sm:$0xff]  ;;  %v4951_v16 = vunpack.c.h.bf16 %v10283_v41 }
 0x4a8   : > { %v4219_v58 = vmul.f32 %v10179_v43, %v10763_v10  ;;  %v4227_v10 = vmul.f32 %v10179_v43, %v9854_v56 }
 0x4a9   : > { %6343 = vst.msk [vmem:[%s9345_s30 + $0xa0] sm:$0xf] %vm6302_vm2, %v6943_v49  ;;  %v6952_v61 = vpack.c.bf16 %v5711_v39, %v5711_v39  ;;  %5424 = vperm.xlu1 %7432, %v4846_v60   ;;  %v7835_v27 = vpop.eup %7834  ;;  %v4478_v60 = vmul.f32 0.5, %v4350_v59  ;;  %v10301_v59 = vld [vmem:[%s8069_s13 + $0xf0] sm:$0xff]  }
 0x4aa   : > { %v5300_v14 = vpop.permute.xlu0 %5299  ;;  %v7837_v25 = vpop.eup %7836  ;;  %v4761_v20 = vadd.f32 1.0, %v7835_v27  ;;  %v4354_v38 = vadd.f32 %v10185_v4, %v4219_v58  ;;  %v4955_v1 = vunpack.c.h.bf16 %v10301_v59  ;;  %v4362_v56 = vadd.f32 %v10185_v4, %v4227_v10 }
 0x4ab   : > { %6352 = vst.msk [vmem:[%s9345_s30 + $0xc4] sm:$0xf] %vm6302_vm2, %v6952_v61  ;;  %v5717_v62 = vmul.f32 %v5300_v14, %v4949_v23  ;;  %5619 = vperm.xlu0 %7433, %v4885_v42   ;;  %v4728_v22 = vadd.f32 1.0, %v7837_v25  ;;  %7848 = vtanh.f32 %v4478_v60  ;;  %v4484_v23 = vmul.f32 0.5, %v4356_v33  ;;  %v10765_v25 = vld [vmem:[#allocation10_spill] sm:$0xff] }
 0x4ac   : > { %v4889_v50 = vmul.f32 0.5, %v4761_v20  ;;  %v4225_v61 = vmul.f32 %v10179_v43, %v10764_v6  ;;  %v4957_v14 = vunpack.c.h.bf16 %v10292_v7  ;;  %v4223_v20 = vmul.f32 %v10179_v43, %v10765_v25 }
 0x4ad   : > { %v6958_v8 = vpack.c.bf16 %v5717_v62, %v5717_v62  ;;  %5454 = vperm.xlu1 %7432, %v4852_v57   ;;  %v7839_v36 = vpop.eup %7838  ;;  %v4856_v63 = vmul.f32 0.5, %v4728_v22  ;;  %7850 = vtanh.f32 %v4484_v23  ;;  %v4482_v57 = vmul.f32 0.5, %v4354_v38 }
 0x4ae   : > { %v5290_v17 = vpop.permute.xlu0 %5289  ;;  %v7841_v28 = vpop.eup %7840  ;;  %v4759_v45 = vadd.f32 1.0, %v7839_v36  ;;  %v4233_v6 = vmul.f32 %v10179_v43, %v9918_v0  ;;  %v4231_v0 = vmul.f32 %v10179_v43, %v9920_v47  ;;  %v4237_v47 = vmul.f32 %v10179_v43, %v9982_v9 }
 0x4af   : > { %6358 = vst.msk [vmem:[%s9345_s30 + $0xdc] sm:$0xf] %vm6302_vm2, %v6958_v8  ;;  %v5715_v12 = vmul.f32 %v5290_v17, %v4947_v26  ;;  %5609 = vperm.xlu0 %7433, %v4883_v18   ;;  %v4726_v29 = vadd.f32 1.0, %v7841_v28  ;;  %v7843_v21 = vpop.eup %7842  ;;  %v4360_v26 = vadd.f32 %v10185_v4, %v4225_v61  ;;  %7852 = vtanh.f32 %v4482_v57 }
 0x4b0   : > { %v4887_v49 = vmul.f32 0.5, %v4759_v45  ;;  %v4732_v27 = vadd.f32 1.0, %v7843_v21  ;;  %v7845_v51 = vpop.eup %7844  ;;  %v10319_v21 = vld [vmem:[%s8069_s13 + $0x100] sm:$0xff]  }
 0x4b1   : > { %v6956_v19 = vpack.c.bf16 %v5715_v12, %v5715_v12  ;;  %5444 = vperm.xlu1 %7432, %v4850_v15   ;;  %v4854_v31 = vmul.f32 0.5, %v4726_v29  ;;  %v4730_v18 = vadd.f32 1.0, %v7845_v51  ;;  %v7847_v35 = vpop.eup %7846  ;;  %v4488_v22 = vmul.f32 0.5, %v4360_v26 }
 0x4b2   : > { %v5320_v13 = vpop.permute.xlu0 %5319  ;;  %v4860_v37 = vmul.f32 0.5, %v4732_v27  ;;  %v4358_v12 = vadd.f32 %v10185_v4, %v4223_v20  ;;  %v4229_v15 = vmul.f32 %v10179_v43, %v9852_v53  ;;  %v4736_v28 = vadd.f32 1.0, %v7847_v35 }
 0x4b3   : > { %6356 = vst.msk [vmem:[%s9345_s30 + $0xd4] sm:$0xf] %vm6302_vm2, %v6956_v19  ;;  %v5721_v52 = vmul.f32 %v5320_v13, %v4953_v5  ;;  %5639 = vperm.xlu0 %7433, %v4889_v50   ;;  %v4858_v45 = vmul.f32 0.5, %v4730_v18  ;;  %v10310_v19 = vld [vmem:[%s8069_s13 + $0x108] sm:$0xff]   ;;  %7854 = vtanh.f32 %v4488_v22  ;;  %v4368_v26 = vadd.f32 %v10185_v4, %v4233_v6 }
 0x4b4   : > { %v4961_v60 = vunpack.c.h.bf16 %v10310_v19  ;;  %v4486_v53 = vmul.f32 0.5, %v4358_v12  ;;  %v4364_v13 = vadd.f32 %v10185_v4, %v4229_v15  ;;  %v4366_v22 = vadd.f32 %v10185_v4, %v4231_v0 }
 0x4b5   : > { %v6962_v39 = vpack.c.bf16 %v5721_v52, %v5721_v52  ;;  %5474 = vperm.xlu1 %7432, %v4856_v63   ;;  %v7849_v33 = vpop.eup %7848 }
 0x4b6   : > { %v5310_v42 = vpop.permute.xlu0 %5309  ;;  %v4734_v52 = vadd.f32 1.0, %v7849_v33  ;;  %7856 = vtanh.f32 %v4486_v53  ;;  %v4492_v38 = vmul.f32 0.5, %v4364_v13  ;;  %v4235_v33 = vmul.f32 %v10179_v43, %v9987_v44 }
 0x4b7   : > { %6362 = vst.msk [vmem:[%s9345_s30 + $0xec] sm:$0xf] %vm6302_vm2, %v6962_v39  ;;  %v5719_v40 = vmul.f32 %v5310_v42, %v4951_v16  ;;  %5629 = vperm.xlu0 %7433, %v4887_v49   ;;  %v4864_v16 = vmul.f32 0.5, %v4736_v28  ;;  %v4959_v49 = vunpack.c.h.bf16 %v10319_v21  ;;  %v7851_v39 = vpop.eup %7850  ;;  %v4494_v9 = vmul.f32 0.5, %v4366_v22 }
 0x4b8   : > { %v4740_v42 = vadd.f32 1.0, %v7851_v39  ;;  %7858 = vtanh.f32 %v4492_v38  ;;  %v4370_v44 = vadd.f32 %v10185_v4, %v4235_v33  ;;  %v4241_v39 = vmul.f32 %v10179_v43, %v10076_v55 }
 0x4b9   : > { %v6960_v62 = vpack.c.bf16 %v5719_v40, %v5719_v40  ;;  %5464 = vperm.xlu1 %7432, %v4854_v31   ;;  %v4862_v40 = vmul.f32 0.5, %v4734_v52  ;;  %v10328_v31 = vld [vmem:[%s8069_s13 + $0x118] sm:$0xff]   ;;  %v7853_v51 = vpop.eup %7852  ;;  %v4243_v33 = vmul.f32 %v10179_v43, %v10206_v3 }
 0x4ba   : > { %v5340_v8 = vpop.permute.xlu0 %5339  ;;  %v4738_v20 = vadd.f32 1.0, %v7853_v51  ;;  %v4868_v18 = vmul.f32 0.5, %v4740_v42  ;;  %v10365_v51 = vld [vmem:[%s8069_s13 + $0x138] sm:$0xff]   ;;  %v4498_v55 = vmul.f32 0.5, %v4370_v44  ;;  %v4376_v0 = vadd.f32 %v10185_v4, %v4241_v39 }
 0x4bb   : > { %6360 = vst.msk [vmem:[%s9345_s30 + $0xe4] sm:$0xf] %vm6302_vm2, %v6960_v62  ;;  %v5725_v36 = vmul.f32 %v5340_v8, %v4957_v14  ;;  %v4965_v14 = vunpack.c.h.bf16 %v10328_v31  ;;  %v4490_v62 = vmul.f32 0.5, %v4362_v56 }
 0x4bc   : > { %v4866_v28 = vmul.f32 0.5, %v4738_v20 }
 0x4bd   : > { %v6966_v17 = vpack.c.bf16 %v5725_v36, %v5725_v36  ;;  %5494 = vperm.xlu1 %7432, %v4860_v37   ;;  %v10337_v36 = vld [vmem:[%s8069_s13 + $0x110] sm:$0xff]   ;;  %7860 = vtanh.f32 %v4490_v62  ;;  %v4973_v62 = vunpack.c.h.bf16 %v10365_v51 }
 0x4be   : > { %v5330_v5 = vpop.permute.xlu0 %5329  ;;  %v4963_v37 = vunpack.c.h.bf16 %v10337_v36 }
 0x4bf   : > { %6366 = vst.msk [vmem:[%s9345_s30 + $0xfc] sm:$0xf] %vm6302_vm2, %v6966_v17  ;;  %v5723_v50 = vmul.f32 %v5330_v5, %v4955_v1  ;;  %v7855_v1 = vpop.eup %7854  ;;  %v4496_v17 = vmul.f32 0.5, %v4368_v26 }
 0x4c0   : > { %v4744_v15 = vadd.f32 1.0, %v7855_v1  ;;  %v4940_v1 = vunpack.c.l.bf16 %v10212_v48 }
 0x4c1   : > { %v6964_v58 = vpack.c.bf16 %v5723_v50, %v5723_v50  ;;  %5484 = vperm.xlu1 %7432, %v4858_v45   ;;  %v10346_v50 = vld [vmem:[%s8069_s13 + $0x128] sm:$0xff]   ;;  %7862 = vtanh.f32 %v4496_v17 }
 0x4c2   : > { %v5360_v29 = vpop.permute.xlu0 %5359  ;;  %v4969_v45 = vunpack.c.h.bf16 %v10346_v50  ;;  %v4872_v52 = vmul.f32 0.5, %v4744_v15  ;;  %7864 = vtanh.f32 %v4494_v9 }
 0x4c3   : > { %6364 = vst.msk [vmem:[%s9345_s30 + $0xf4] sm:$0xf] %vm6302_vm2, %v6964_v58  ;;  %v5729_v63 = vmul.f32 %v5360_v29, %v4961_v60  ;;  %v7857_v60 = vpop.eup %7856  ;;  %v4372_v58 = vadd.f32 %v10185_v4, %v4237_v47  ;;  %v10377_v47 = vld [vmem:[%s8069_s13 + $0x130] sm:$0xff]  }
 0x4c4   : > { %v4742_v13 = vadd.f32 1.0, %v7857_v60 }
 0x4c5   : > { %v6970_v23 = vpack.c.bf16 %v5729_v63, %v5729_v63  ;;  %5514 = vperm.xlu1 %7432, %v4864_v16   ;;  %v10355_v63 = vld [vmem:[%s8069_s13 + $0x120] sm:$0xff]   ;;  %v4500_v6 = vmul.f32 0.5, %v4372_v58 }
 0x4c6   : > { %v5350_v61 = vpop.permute.xlu0 %5349  ;;  %v4967_v16 = vunpack.c.h.bf16 %v10355_v63 }
 0x4c7   : > { %6370 = vst.msk [vmem:[%s9345_s30 + $0x10c] sm:$0xf] %vm6302_vm2, %v6970_v23  ;;  %v5727_v27 = vmul.f32 %v5350_v61, %v4959_v49  ;;  %v7859_v49 = vpop.eup %7858  ;;  %7866 = vtanh.f32 %v4500_v6 }
 0x4c8   : > { %v7861_v38 = vpop.eup %7860  ;;  %7868 = vtanh.f32 %v4498_v55 }
 0x4c9   : > { %v6968_v57 = vpack.c.bf16 %v5727_v27, %v5727_v27  ;;  %5504 = vperm.xlu1 %7432, %v4862_v40   ;;  %v4748_v27 = vadd.f32 1.0, %v7859_v49  ;;  %v4746_v26 = vadd.f32 1.0, %v7861_v38 }
 0x4ca   : > { %v5380_v25 = vpop.permute.xlu0 %5379 }
 0x4cb   : > { %6368 = vst.msk [vmem:[%s9345_s30 + $0x104] sm:$0xf] %vm6302_vm2, %v6968_v57  ;;  %v5733_v8 = vmul.f32 %v5380_v25, %v4965_v14  ;;  %v4870_v14 = vmul.f32 0.5, %v4742_v13  ;;  %v4239_v25 = vmul.f32 %v10179_v43, %v10087_v24  ;;  %v4876_v22 = vmul.f32 0.5, %v4748_v27  ;;  %v7863_v15 = vpop.eup %7862 }
 0x4cc   : > { %v4874_v60 = vmul.f32 0.5, %v4746_v26  ;;  %v4752_v13 = vadd.f32 1.0, %v7863_v15  ;;  %v7865_v49 = vpop.eup %7864 }
 0x4cd   : > { %v6974_v35 = vpack.c.bf16 %v5733_v8, %v5733_v8  ;;  %5534 = vperm.xlu1 %7432, %v4868_v18  }
 0x4ce   : > { %v5370_v12 = vpop.permute.xlu0 %5369 }
 0x4cf   : > { %6374 = vst.msk [vmem:[%s9345_s30 + $0x11c] sm:$0xf] %vm6302_vm2, %v6974_v35  ;;  %v5731_v5 = vmul.f32 %v5370_v12, %v4963_v37  ;;  %v4971_v12 = vunpack.c.h.bf16 %v10377_v47 }
 0x4d1   : > { %v6972_v10 = vpack.c.bf16 %v5731_v5, %v5731_v5  ;;  %5524 = vperm.xlu1 %7432, %v4866_v28   ;;  %v4504_v5 = vmul.f32 0.5, %v4376_v0  ;;  %v4374_v28 = vadd.f32 %v10185_v4, %v4239_v25 }
 0x4d2   : > { %v5400_v53 = vpop.permute.xlu0 %5399 }
 0x4d3   : > { %6372 = vst.msk [vmem:[%s9345_s30 + $0x114] sm:$0xf] %vm6302_vm2, %v6972_v10  ;;  %v5737_v29 = vmul.f32 %v5400_v53, %v4969_v45  ;;  %v4938_v53 = vunpack.c.l.bf16 %v10221_v2  ;;  %v4502_v3 = vmul.f32 0.5, %v4374_v28 }
 0x4d5   : > { %v6978_v56 = vpack.c.bf16 %v5737_v29, %v5737_v29  ;;  %v4111_v23 = vpop.xlane.xlu1 %4110  ;;  %5554 = vperm.xlu1 %7432, %v4872_v52   ;;  %v10388_v52 = vld [vmem:[%s8069_s13 + $0x148] sm:$0xff]  }
 0x4d6   : > { %v4246_v61 = vmul.f32 %v10179_v43, %v4111_v23  ;;  %v5390_v42 = vpop.permute.xlu0 %5389  ;;  %v4378_v23 = vadd.f32 %v10185_v4, %v4243_v33 }
 0x4d7   : > { %6378 = vst.msk [vmem:[%s9345_s30 + $0x12c] sm:$0xf] %vm6302_vm2, %v6978_v56  ;;  %v5735_v40 = vmul.f32 %v5390_v42, %v4967_v16  ;;  %v4977_v16 = vunpack.c.h.bf16 %v10388_v52  ;;  %v4245_v56 = vmul.f32 %v10179_v43, %v10197_v46  ;;  %v4750_v42 = vadd.f32 1.0, %v7865_v49 }
 0x4d8   : > { %v4381_v57 = vadd.f32 %v10185_v4, %v4246_v61  ;;  %v4944_v61 = vunpack.c.l.bf16 %v10233_v32  ;;  %v4506_v0 = vmul.f32 0.5, %v4378_v23 }
 0x4d9   : > { %v6976_v20 = vpack.c.bf16 %v5735_v40, %v5735_v40  ;;  %5544 = vperm.xlu1 %7432, %v4870_v14   ;;  %v4105_v8 = vpop.xlane.xlu1 %4104  ;;  %v4880_v40 = vmul.f32 0.5, %v4752_v13  ;;  %v10400_v14 = vld [vmem:[%s8069_s13 + $0x140] sm:$0xff]   ;;  %v4380_v32 = vadd.f32 %v10185_v4, %v4245_v56 }
 0x4da   : > { %v4244_v18 = vmul.f32 %v10179_v43, %v4105_v8  ;;  %v5420_v37 = vpop.permute.xlu0 %5419  ;;  %v4509_v35 = vmul.f32 0.5, %v4381_v57  ;;  %v7867_v43 = vpop.eup %7866  ;;  %v4942_v8 = vunpack.c.l.bf16 %v10243_v34 }
 0x4db   : > { %6376 = vst.msk [vmem:[%s9345_s30 + $0x124] sm:$0xf] %vm6302_vm2, %v6976_v20  ;;  %v5741_v17 = vmul.f32 %v5420_v37, %v4973_v62  ;;  %v4975_v62 = vunpack.c.h.bf16 %v10400_v14  ;;  %v7869_v26 = vpop.eup %7868  ;;  %v4508_v34 = vmul.f32 0.5, %v4380_v32  ;;  %v10437_v32 = vld [vmem:[%s8069_s13 + $0x160] sm:$0xff]  }
 0x4dc   : > { %v4379_v24 = vadd.f32 %v10185_v4, %v4244_v18  ;;  %7870 = vtanh.f32 %v4509_v35  ;;  %v4756_v18 = vadd.f32 1.0, %v7867_v43  ;;  %v10410_v35 = vld [vmem:[%s8069_s13 + $0x158] sm:$0xff]  }
 0x4dd   : > { %v6982_v45 = vpack.c.bf16 %v5741_v17, %v5741_v17  ;;  %5574 = vperm.xlu1 %7432, %v4876_v22   ;;  %v5255_v48 = vpop.permute.xlu1 %5254  ;;  %v4981_v17 = vunpack.c.h.bf16 %v10410_v35 }
 0x4de   : > { %v4507_v10 = vmul.f32 0.5, %v4379_v24  ;;  %v5708_v9 = vmul.f32 %v5255_v48, %v4940_v1  ;;  %v5410_v58 = vpop.permute.xlu0 %5409  ;;  %v4878_v1 = vmul.f32 0.5, %v4750_v42  ;;  %v4948_v48 = vunpack.c.l.bf16 %v10254_v30 }
 0x4df   : > { %6382 = vst.msk [vmem:[%s9345_s30 + $0x13c] sm:$0xf] %vm6302_vm2, %v6982_v45  ;;  %v5739_v29 = vmul.f32 %v5410_v58, %v4971_v12  ;;  %v4754_v12 = vadd.f32 1.0, %v7869_v26  ;;  %v10419_v58 = vld [vmem:[%s8069_s13 + $0x150] sm:$0xff]  }
 0x4e0   : > { %7872 = vtanh.f32 %v4507_v10  ;;  %v6949_v44 = vpack.c.bf16 %v5708_v9, %v5708_v9  ;;  %v4884_v9 = vmul.f32 0.5, %v4756_v18 }
 0x4e1   : > { %7874 = vtanh.f32 %v4504_v5  ;;  %v6980_v39 = vpack.c.bf16 %v5739_v29, %v5739_v29  ;;  %5564 = vperm.xlu1 %7432, %v4874_v60   ;;  %v5245_v2 = vpop.permute.xlu1 %5244 }
 0x4e2   : > { %6349 = vst.msk [vmem:[%s9345_s30 + $0xb8] sm:$0xf] %vm6302_vm2, %v6949_v44  ;;  %v5706_v38 = vmul.f32 %v5245_v2, %v4938_v53  ;;  %v5440_v6 = vpop.permute.xlu0 %5439  ;;  %7876 = vtanh.f32 %v4502_v3  ;;  %v4979_v53 = vunpack.c.h.bf16 %v10419_v58 }
 0x4e3   : > { %6380 = vst.msk [vmem:[%s9345_s30 + $0x134] sm:$0xf] %vm6302_vm2, %v6980_v39  ;;  %v5745_v27 = vmul.f32 %v5440_v6, %v4977_v16  ;;  %7878 = vtanh.f32 %v4506_v0  ;;  %v4946_v39 = vunpack.c.l.bf16 %v10265_v54  ;;  %v10428_v6 = vld [vmem:[%s8069_s13 + $0x168] sm:$0xff]   ;;  %v4983_v0 = vunpack.c.h.bf16 %v10437_v32 }
 0x4e4   : > { %v6947_v46 = vpack.c.bf16 %v5706_v38, %v5706_v38  ;;  %7880 = vtanh.f32 %v4508_v34  ;;  %v4882_v38 = vmul.f32 0.5, %v4754_v12  ;;  %v10446_v12 = vld [vmem:[%s8069_s13 + $0x178] sm:$0xff]  }
 0x4e5   : > { %v6986_v55 = vpack.c.bf16 %v5745_v27, %v5745_v27  ;;  %5594 = vperm.xlu1 %7432, %v4880_v40   ;;  %v5275_v57 = vpop.permute.xlu1 %5274 }
 0x4e6   : > { %6347 = vst.msk [vmem:[%s9345_s30 + $0xb0] sm:$0xf] %vm6302_vm2, %v6947_v46  ;;  %v5712_v25 = vmul.f32 %v5275_v57, %v4944_v61  ;;  %v5430_v20 = vpop.permute.xlu0 %5429  ;;  %v7871_v4 = vpop.eup %7870  ;;  %v4985_v61 = vunpack.c.h.bf16 %v10428_v6  ;;  %v4952_v46 = vunpack.c.l.bf16 %v10274_v11 }
 0x4e7   : > { %6386 = vst.msk [vmem:[%s9345_s30 + $0x14c] sm:$0xf] %vm6302_vm2, %v6986_v55  ;;  %v5743_v37 = vmul.f32 %v5430_v20, %v4975_v62  ;;  %v4765_v29 = vadd.f32 1.0, %v7871_v4 }
 0x4e8   : > { %v6953_v22 = vpack.c.bf16 %v5712_v25, %v5712_v25 }
 0x4e9   : > { %v6984_v15 = vpack.c.bf16 %v5743_v37, %v5743_v37  ;;  %5584 = vperm.xlu1 %7432, %v4878_v1   ;;  %v5265_v24 = vpop.permute.xlu1 %5264  ;;  %v4893_v27 = vmul.f32 0.5, %v4765_v29  ;;  %v4950_v1 = vunpack.c.l.bf16 %v10283_v41 }
 0x4ea   : > { %v7873_v5 = vpop.eup %7872  ;;  %6353 = vst.msk [vmem:[%s9345_s30 + $0xc8] sm:$0xf] %vm6302_vm2, %v6953_v22  ;;  %v5710_v28 = vmul.f32 %v5265_v24, %v4942_v8  ;;  %v5460_v45 = vpop.permute.xlu0 %5459 }
 0x4eb   : > { %v7875_v60 = vpop.eup %7874  ;;  %v4763_v33 = vadd.f32 1.0, %v7873_v5  ;;  %6384 = vst.msk [vmem:[%s9345_s30 + $0x144] sm:$0xf] %vm6302_vm2, %v6984_v15  ;;  %v5749_v10 = vmul.f32 %v5460_v45, %v4981_v17  ;;  %v4989_v15 = vunpack.c.h.bf16 %v10446_v12 }
 0x4ec   : > { %v6951_v13 = vpack.c.bf16 %v5710_v28, %v5710_v28  ;;  %v7877_v2 = vpop.eup %7876  ;;  %v4760_v56 = vadd.f32 1.0, %v7875_v60 }
 0x4ed   : > { %v4891_v16 = vmul.f32 0.5, %v4763_v33  ;;  %v6990_v49 = vpack.c.bf16 %v5749_v10, %v5749_v10  ;;  %5614 = vperm.xlu1 %7432, %v4884_v9   ;;  %v5295_v44 = vpop.permute.xlu1 %5294  ;;  %v4758_v57 = vadd.f32 1.0, %v7877_v2  ;;  %v7879_v25 = vpop.eup %7878  ;;  %v10455_v9 = vld [vmem:[%s8069_s13 + $0x170] sm:$0xff]  }
 0x4ee   : > { %6351 = vst.msk [vmem:[%s9345_s30 + $0xc0] sm:$0xf] %vm6302_vm2, %v6951_v13  ;;  %v5716_v30 = vmul.f32 %v5295_v44, %v4948_v48  ;;  %v5450_v3 = vpop.permute.xlu0 %5449  ;;  %v4888_v55 = vmul.f32 0.5, %v4760_v56  ;;  %v4762_v22 = vadd.f32 1.0, %v7879_v25  ;;  %v7881_v24 = vpop.eup %7880  ;;  %v4956_v48 = vunpack.c.l.bf16 %v10292_v7 }
 0x4ef   : > { %6390 = vst.msk [vmem:[%s9345_s30 + $0x15c] sm:$0xf] %vm6302_vm2, %v6990_v49  ;;  %v5747_v23 = vmul.f32 %v5450_v3, %v4979_v53  ;;  %5649 = vperm.xlu0 %7433, %v4891_v16   ;;  %v4886_v17 = vmul.f32 0.5, %v4758_v57  ;;  %v4764_v60 = vadd.f32 1.0, %v7881_v24  ;;  %v4987_v53 = vunpack.c.h.bf16 %v10455_v9 }
 0x4f0   : > { %v6957_v42 = vpack.c.bf16 %v5716_v30, %v5716_v30  ;;  %v4890_v33 = vmul.f32 0.5, %v4762_v22  ;;  %v4954_v44 = vunpack.c.l.bf16 %v10301_v59 }
 0x4f1   : > { %v6988_v40 = vpack.c.bf16 %v5747_v23, %v5747_v23  ;;  %5604 = vperm.xlu1 %7432, %v4882_v38   ;;  %v5285_v62 = vpop.permute.xlu1 %5284  ;;  %v4892_v30 = vmul.f32 0.5, %v4764_v60 }
 0x4f2   : > { %6357 = vst.msk [vmem:[%s9345_s30 + $0xd8] sm:$0xf] %vm6302_vm2, %v6957_v42  ;;  %v5714_v54 = vmul.f32 %v5285_v62, %v4946_v39  ;;  %v5480_v43 = vpop.permute.xlu0 %5479  ;;  %v10464_v39 = vld [vmem:[%s8069_s13 + $0x188] sm:$0xff]   ;;  %v4960_v42 = vunpack.c.l.bf16 %v10310_v19 }
 0x4f3   : > { %6388 = vst.msk [vmem:[%s9345_s30 + $0x154] sm:$0xf] %vm6302_vm2, %v6988_v40  ;;  %v5753_v26 = vmul.f32 %v5480_v43, %v4985_v61  ;;  %5659 = vperm.xlu0 %7433, %v4893_v27   ;;  %v4993_v2 = vunpack.c.h.bf16 %v10464_v39  ;;  %v10473_v40 = vld [vmem:[%s8069_s13 + $0x180] sm:$0xff]  }
 0x4f4   : > { %v6955_v20 = vpack.c.bf16 %v5714_v54, %v5714_v54  ;;  %v4991_v62 = vunpack.c.h.bf16 %v10473_v40 }
 0x4f5   : > { %v6994_v8 = vpack.c.bf16 %v5753_v26, %v5753_v26  ;;  %5634 = vperm.xlu1 %7432, %v4888_v55   ;;  %v5315_v18 = vpop.permute.xlu1 %5314  ;;  %v4958_v26 = vunpack.c.l.bf16 %v10319_v21 }
 0x4f6   : > { %6355 = vst.msk [vmem:[%s9345_s30 + $0xd0] sm:$0xf] %vm6302_vm2, %v6955_v20  ;;  %v5720_v11 = vmul.f32 %v5315_v18, %v4952_v46  ;;  %v5470_v37 = vpop.permute.xlu0 %5469 }
 0x4f7   : > { %6394 = vst.msk [vmem:[%s9345_s30 + $0x16c] sm:$0xf] %vm6302_vm2, %v6994_v8  ;;  %v5751_v4 = vmul.f32 %v5470_v37, %v4983_v0  ;;  %v10482_v0 = vld [vmem:[%s8069_s13 + $0x198] sm:$0xff]  }
 0x4f8   : > { %v6961_v5 = vpack.c.bf16 %v5720_v11, %v5720_v11  ;;  %v4997_v25 = vunpack.c.h.bf16 %v10482_v0 }
 0x4f9   : > { %v6992_v34 = vpack.c.bf16 %v5751_v4, %v5751_v4  ;;  %5624 = vperm.xlu1 %7432, %v4886_v17   ;;  %v5305_v28 = vpop.permute.xlu1 %5304  ;;  %v10491_v17 = vld [vmem:[%s8069_s13 + $0x190] sm:$0xff]  }
 0x4fa   : > { %6361 = vst.msk [vmem:[%s9345_s30 + $0xe8] sm:$0xf] %vm6302_vm2, %v6961_v5  ;;  %v5718_v41 = vmul.f32 %v5305_v28, %v4950_v1  ;;  %v5500_v45 = vpop.permute.xlu0 %5499  ;;  %v4964_v1 = vunpack.c.l.bf16 %v10328_v31  ;;  %v4995_v22 = vunpack.c.h.bf16 %v10491_v17  ;;  %v4962_v28 = vunpack.c.l.bf16 %v10337_v36 }
 0x4fb   : > { %6392 = vst.msk [vmem:[%s9345_s30 + $0x164] sm:$0xf] %vm6302_vm2, %v6992_v34  ;;  %v5757_v10 = vmul.f32 %v5500_v45, %v4989_v15 }
 0x4fc   : > { %v6959_v13 = vpack.c.bf16 %v5718_v41, %v5718_v41  ;;  %v10500_v41 = vld [vmem:[%s8069_s13 + $0x1a8] sm:$0xff]  }
 0x4fd   : > { %v6998_v29 = vpack.c.bf16 %v5757_v10, %v5757_v10  ;;  %5644 = vperm.xlu1 %7432, %v4890_v33   ;;  %v5335_v16 = vpop.permute.xlu1 %5334  ;;  %v5001_v45 = vunpack.c.h.bf16 %v10500_v41 }
 0x4fe   : > { %6359 = vst.msk [vmem:[%s9345_s30 + $0xe0] sm:$0xf] %vm6302_vm2, %v6959_v13  ;;  %v5724_v49 = vmul.f32 %v5335_v16, %v4956_v48  ;;  %v5490_v7 = vpop.permute.xlu0 %5489  ;;  %v4968_v13 = vunpack.c.l.bf16 %v10346_v50 }
 0x4ff   : > { %6398 = vst.msk [vmem:[%s9345_s30 + $0x17c] sm:$0xf] %vm6302_vm2, %v6998_v29  ;;  %v5755_v3 = vmul.f32 %v5490_v7, %v4987_v53  ;;  %v10509_v29 = vld [vmem:[%s8069_s13 + $0x1a0] sm:$0xff]  }
 0x500   : > { %v6965_v56 = vpack.c.bf16 %v5724_v49, %v5724_v49  ;;  %v4999_v16 = vunpack.c.h.bf16 %v10509_v29 }
 0x501   : > { %v6996_v23 = vpack.c.bf16 %v5755_v3, %v5755_v3  ;;  %5654 = vperm.xlu1 %7432, %v4892_v30   ;;  %v5325_v38 = vpop.permute.xlu1 %5324 }
 0x502   : > { %6365 = vst.msk [vmem:[%s9345_s30 + $0xf8] sm:$0xf] %vm6302_vm2, %v6965_v56  ;;  %v5722_v61 = vmul.f32 %v5325_v38, %v4954_v44  ;;  %v5520_v59 = vpop.permute.xlu0 %5519  ;;  %v10518_v56 = vld [vmem:[%s8069_s13 + $0x1b8] sm:$0xff]  }
 0x503   : > { %6396 = vst.msk [vmem:[%s9345_s30 + $0x174] sm:$0xf] %vm6302_vm2, %v6996_v23  ;;  %v5761_v27 = vmul.f32 %v5520_v59, %v4993_v2  ;;  %v4966_v2 = vunpack.c.l.bf16 %v10355_v63  ;;  %v5005_v23 = vunpack.c.h.bf16 %v10518_v56 }
 0x504   : > { %v6963_v54 = vpack.c.bf16 %v5722_v61, %v5722_v61 }
 0x505   : > { %v7002_v43 = vpack.c.bf16 %v5761_v27, %v5761_v27  ;;  %v5355_v46 = vpop.permute.xlu1 %5354 }
 0x506   : > { %6363 = vst.msk [vmem:[%s9345_s30 + $0xf0] sm:$0xf] %vm6302_vm2, %v6963_v54  ;;  %v5728_v55 = vmul.f32 %v5355_v46, %v4960_v42  ;;  %v5510_v57 = vpop.permute.xlu0 %5509  ;;  %v10527_v54 = vld [vmem:[%s8069_s13 + $0x1b0] sm:$0xff]  }
 0x507   : > { %6402 = vst.msk [vmem:[%s9345_s30 + $0x18c] sm:$0xf] %vm6302_vm2, %v7002_v43  ;;  %v5759_v19 = vmul.f32 %v5510_v57, %v4991_v62  ;;  %v4972_v62 = vunpack.c.l.bf16 %v10365_v51  ;;  %v5003_v43 = vunpack.c.h.bf16 %v10527_v54 }
 0x508   : > { %v6969_v20 = vpack.c.bf16 %v5728_v55, %v5728_v55 }
 0x509   : > { %v7000_v8 = vpack.c.bf16 %v5759_v19, %v5759_v19  ;;  %v5345_v18 = vpop.permute.xlu1 %5344 }
 0x50a   : > { %6369 = vst.msk [vmem:[%s9345_s30 + $0x108] sm:$0xf] %vm6302_vm2, %v6969_v20  ;;  %v5726_v11 = vmul.f32 %v5345_v18, %v4958_v26  ;;  %v5540_v37 = vpop.permute.xlu0 %5539  ;;  %v10536_v20 = vld [vmem:[%s8069_s13 + $0x1c8] sm:$0xff]  }
 0x50b   : > { %6400 = vst.msk [vmem:[%s9345_s30 + $0x184] sm:$0xf] %vm6302_vm2, %v7000_v8  ;;  %v5765_v21 = vmul.f32 %v5540_v37, %v4997_v25  ;;  %v4970_v25 = vunpack.c.l.bf16 %v10377_v47  ;;  %v5009_v8 = vunpack.c.h.bf16 %v10536_v20 }
 0x50c   : > { %v6967_v4 = vpack.c.bf16 %v5726_v11, %v5726_v11 }
 0x50d   : > { %v7006_v15 = vpack.c.bf16 %v5765_v21, %v5765_v21  ;;  %v5375_v24 = vpop.permute.xlu1 %5374 }
 0x50e   : > { %6367 = vst.msk [vmem:[%s9345_s30 + $0x100] sm:$0xf] %vm6302_vm2, %v6967_v4  ;;  %v5732_v5 = vmul.f32 %v5375_v24, %v4964_v1  ;;  %v5530_v34 = vpop.permute.xlu0 %5529  ;;  %v10545_v4 = vld [vmem:[%s8069_s13 + $0x1c0] sm:$0xff]  }
 0x50f   : > { %6406 = vst.msk [vmem:[%s9345_s30 + $0x19c] sm:$0xf] %vm6302_vm2, %v7006_v15  ;;  %v5763_v31 = vmul.f32 %v5530_v34, %v4995_v22  ;;  %v4976_v22 = vunpack.c.l.bf16 %v10388_v52  ;;  %v5007_v15 = vunpack.c.h.bf16 %v10545_v4 }
 0x510   : > { %v6973_v48 = vpack.c.bf16 %v5732_v5, %v5732_v5 }
 0x511   : > { %v7004_v60 = vpack.c.bf16 %v5763_v31, %v5763_v31  ;;  %v5365_v33 = vpop.permute.xlu1 %5364 }
 0x512   : > { %6373 = vst.msk [vmem:[%s9345_s30 + $0x118] sm:$0xf] %vm6302_vm2, %v6973_v48  ;;  %v5730_v10 = vmul.f32 %v5365_v33, %v4962_v28  ;;  %v5560_v53 = vpop.permute.xlu0 %5559  ;;  %v10554_v48 = vld [vmem:[%s8069_s13 + $0x1d8] sm:$0xff]  }
 0x513   : > { %6404 = vst.msk [vmem:[%s9345_s30 + $0x194] sm:$0xf] %vm6302_vm2, %v7004_v60  ;;  %v5769_v36 = vmul.f32 %v5560_v53, %v5001_v45  ;;  %v4974_v45 = vunpack.c.l.bf16 %v10400_v14  ;;  %v5013_v60 = vunpack.c.h.bf16 %v10554_v48 }
 0x514   : > { %v6971_v49 = vpack.c.bf16 %v5730_v10, %v5730_v10 }
 0x515   : > { %v7010_v7 = vpack.c.bf16 %v5769_v36, %v5769_v36  ;;  %v5395_v44 = vpop.permute.xlu1 %5394 }
 0x516   : > { %6371 = vst.msk [vmem:[%s9345_s30 + $0x110] sm:$0xf] %vm6302_vm2, %v6971_v49  ;;  %v5736_v30 = vmul.f32 %v5395_v44, %v4968_v13  ;;  %v5550_v3 = vpop.permute.xlu0 %5549  ;;  %v10563_v49 = vld [vmem:[%s8069_s13 + $0x1d0] sm:$0xff]  }
 0x517   : > { %6410 = vst.msk [vmem:[%s9345_s30 + $0x1ac] sm:$0xf] %vm6302_vm2, %v7010_v7  ;;  %v5767_v50 = vmul.f32 %v5550_v3, %v4999_v16  ;;  %v4980_v16 = vunpack.c.l.bf16 %v10410_v35  ;;  %v5011_v7 = vunpack.c.h.bf16 %v10563_v49 }
 0x518   : > { %v6977_v38 = vpack.c.bf16 %v5736_v30, %v5736_v30 }
 0x519   : > { %v7008_v61 = vpack.c.bf16 %v5767_v50, %v5767_v50  ;;  %v5385_v59 = vpop.permute.xlu1 %5384 }
 0x51a   : > { %6377 = vst.msk [vmem:[%s9345_s30 + $0x128] sm:$0xf] %vm6302_vm2, %v6977_v38  ;;  %v5734_v42 = vmul.f32 %v5385_v59, %v4966_v2  ;;  %v5580_v27 = vpop.permute.xlu0 %5579  ;;  %v10572_v38 = vld [vmem:[%s8069_s13 + $0x1e8] sm:$0xff]  }
 0x51b   : > { %6408 = vst.msk [vmem:[%s9345_s30 + $0x1a4] sm:$0xf] %vm6302_vm2, %v7008_v61  ;;  %v5773_v63 = vmul.f32 %v5580_v27, %v5005_v23  ;;  %v4978_v23 = vunpack.c.l.bf16 %v10419_v58  ;;  %v5017_v61 = vunpack.c.h.bf16 %v10572_v38 }
 0x51c   : > { %v6975_v46 = vpack.c.bf16 %v5734_v42, %v5734_v42 }
 0x51d   : > { %v7014_v55 = vpack.c.bf16 %v5773_v63, %v5773_v63  ;;  %v5415_v57 = vpop.permute.xlu1 %5414 }
 0x51e   : > { %6375 = vst.msk [vmem:[%s9345_s30 + $0x120] sm:$0xf] %vm6302_vm2, %v6975_v46  ;;  %v5740_v26 = vmul.f32 %v5415_v57, %v4972_v62  ;;  %v5570_v19 = vpop.permute.xlu0 %5569  ;;  %v10581_v46 = vld [vmem:[%s8069_s13 + $0x1e0] sm:$0xff]  }
 0x51f   : > { %6414 = vst.msk [vmem:[%s9345_s30 + $0x1bc] sm:$0xf] %vm6302_vm2, %v7014_v55  ;;  %v5771_v51 = vmul.f32 %v5570_v19, %v5003_v43  ;;  %v4984_v43 = vunpack.c.l.bf16 %v10428_v6  ;;  %v5015_v55 = vunpack.c.h.bf16 %v10581_v46 }
 0x520   : > { %v6981_v18 = vpack.c.bf16 %v5740_v26, %v5740_v26 }
 0x521   : > { %v7012_v11 = vpack.c.bf16 %v5771_v51, %v5771_v51  ;;  %v5405_v37 = vpop.permute.xlu1 %5404 }
 0x522   : > { %6381 = vst.msk [vmem:[%s9345_s30 + $0x138] sm:$0xf] %vm6302_vm2, %v6981_v18  ;;  %v5738_v1 = vmul.f32 %v5405_v37, %v4970_v25  ;;  %v5600_v21 = vpop.permute.xlu0 %5599 }
 0x523   : > { %6412 = vst.msk [vmem:[%s9345_s30 + $0x1b4] sm:$0xf] %vm6302_vm2, %v7012_v11  ;;  %v5777_v47 = vmul.f32 %v5600_v21, %v5009_v8  ;;  %v4982_v8 = vunpack.c.l.bf16 %v10437_v32  ;;  %v4988_v21 = vunpack.c.l.bf16 %v10446_v12 }
 0x524   : > { %v6979_v24 = vpack.c.bf16 %v5738_v1, %v5738_v1 }
 0x525   : > { %v7018_v5 = vpack.c.bf16 %v5777_v47, %v5777_v47  ;;  %v5435_v34 = vpop.permute.xlu1 %5434 }
 0x526   : > { %6379 = vst.msk [vmem:[%s9345_s30 + $0x130] sm:$0xf] %vm6302_vm2, %v6979_v24  ;;  %v5744_v28 = vmul.f32 %v5435_v34, %v4976_v22  ;;  %v5590_v31 = vpop.permute.xlu0 %5589 }
 0x527   : > { %6418 = vst.msk [vmem:[%s9345_s30 + $0x1cc] sm:$0xf] %vm6302_vm2, %v7018_v5  ;;  %v5775_v52 = vmul.f32 %v5590_v31, %v5007_v15  ;;  %v4986_v15 = vunpack.c.l.bf16 %v10455_v9 }
 0x528   : > { %v6985_v33 = vpack.c.bf16 %v5744_v28, %v5744_v28  ;;  %v4992_v28 = vunpack.c.l.bf16 %v10464_v39 }
 0x529   : > { %v7016_v10 = vpack.c.bf16 %v5775_v52, %v5775_v52  ;;  %v5425_v53 = vpop.permute.xlu1 %5424  ;;  %v4990_v52 = vunpack.c.l.bf16 %v10473_v40 }
 0x52a   : > { %6385 = vst.msk [vmem:[%s9345_s30 + $0x148] sm:$0xf] %vm6302_vm2, %v6985_v33  ;;  %v5742_v13 = vmul.f32 %v5425_v53, %v4974_v45  ;;  %v5620_v36 = vpop.permute.xlu0 %5619 }
 0x52b   : > { %6416 = vst.msk [vmem:[%s9345_s30 + $0x1c4] sm:$0xf] %vm6302_vm2, %v7016_v10  ;;  %v5781_v14 = vmul.f32 %v5620_v36, %v5013_v60  ;;  %v4996_v10 = vunpack.c.l.bf16 %v10482_v0  ;;  %v4994_v36 = vunpack.c.l.bf16 %v10491_v17 }
 0x52c   : > { %v6983_v44 = vpack.c.bf16 %v5742_v13, %v5742_v13 }
 0x52d   : > { %v7022_v30 = vpack.c.bf16 %v5781_v14, %v5781_v14  ;;  %v5455_v3 = vpop.permute.xlu1 %5454 }
 0x52e   : > { %6383 = vst.msk [vmem:[%s9345_s30 + $0x140] sm:$0xf] %vm6302_vm2, %v6983_v44  ;;  %v5748_v2 = vmul.f32 %v5455_v3, %v4980_v16  ;;  %v5610_v50 = vpop.permute.xlu0 %5609  ;;  %v4998_v3 = vunpack.c.l.bf16 %v10509_v29 }
 0x52f   : > { %6422 = vst.msk [vmem:[%s9345_s30 + $0x1dc] sm:$0xf] %vm6302_vm2, %v7022_v30  ;;  %v5779_v35 = vmul.f32 %v5610_v50, %v5011_v7  ;;  %v5000_v7 = vunpack.c.l.bf16 %v10500_v41 }
 0x530   : > { %v6989_v59 = vpack.c.bf16 %v5748_v2, %v5748_v2 }
 0x531   : > { %v7020_v42 = vpack.c.bf16 %v5779_v35, %v5779_v35  ;;  %v5445_v27 = vpop.permute.xlu1 %5444 }
 0x532   : > { %6389 = vst.msk [vmem:[%s9345_s30 + $0x158] sm:$0xf] %vm6302_vm2, %v6989_v59  ;;  %v5746_v62 = vmul.f32 %v5445_v27, %v4978_v23  ;;  %v5640_v63 = vpop.permute.xlu0 %5639  ;;  %v5004_v23 = vunpack.c.l.bf16 %v10518_v56  ;;  %v5002_v59 = vunpack.c.l.bf16 %v10527_v54 }
 0x533   : > { %6420 = vst.msk [vmem:[%s9345_s30 + $0x1d4] sm:$0xf] %vm6302_vm2, %v7020_v42  ;;  %v5785_v58 = vmul.f32 %v5640_v63, %v5017_v61 }
 0x534   : > { %v6987_v57 = vpack.c.bf16 %v5746_v62, %v5746_v62  ;;  %v5008_v62 = vunpack.c.l.bf16 %v10536_v20 }
 0x535   : > { %v7026_v26 = vpack.c.bf16 %v5785_v58, %v5785_v58  ;;  %v5475_v19 = vpop.permute.xlu1 %5474  ;;  %v5006_v58 = vunpack.c.l.bf16 %v10545_v4 }
 0x536   : > { %6387 = vst.msk [vmem:[%s9345_s30 + $0x150] sm:$0xf] %vm6302_vm2, %v6987_v57  ;;  %v5752_v25 = vmul.f32 %v5475_v19, %v4984_v43  ;;  %v5630_v51 = vpop.permute.xlu0 %5629  ;;  %v7966_v19 = vld [vmem:[%s8069_s13 + $0x1f0] sm:$0xff]  }
 0x537   : > { %6426 = vst.msk [vmem:[%s9345_s30 + $0x1ec] sm:$0xf] %vm6302_vm2, %v7026_v26  ;;  %v5783_v6 = vmul.f32 %v5630_v51, %v5015_v55  ;;  %v5012_v26 = vunpack.c.l.bf16 %v10554_v48 }
 0x538   : > { %v6993_v18 = vpack.c.bf16 %v5752_v25, %v5752_v25  ;;  %v5019_v25 = vunpack.c.h.bf16 %v7966_v19 }
 0x539   : > { %v7024_v11 = vpack.c.bf16 %v5783_v6, %v5783_v6  ;;  %v5465_v37 = vpop.permute.xlu1 %5464 }
 0x53a   : > { %6393 = vst.msk [vmem:[%s9345_s30 + $0x168] sm:$0xf] %vm6302_vm2, %v6993_v18  ;;  %v5750_v1 = vmul.f32 %v5465_v37, %v4982_v8  ;;  %v5010_v18 = vunpack.c.l.bf16 %v10563_v49 }
 0x53b   : > { %6424 = vst.msk [vmem:[%s9345_s30 + $0x1e4] sm:$0xf] %vm6302_vm2, %v7024_v11  ;;  %v7967_v11 = vld [vmem:[%s8069_s13 + $0x1f8] sm:$0xff]  }
 0x53c   : > { %v6991_v22 = vpack.c.bf16 %v5750_v1, %v5750_v1  ;;  %v5021_v37 = vunpack.c.h.bf16 %v7967_v11 }
 0x53d   : > { %v5495_v47 = vpop.permute.xlu1 %5494 }
 0x53e   : > { %6391 = vst.msk [vmem:[%s9345_s30 + $0x160] sm:$0xf] %vm6302_vm2, %v6991_v22  ;;  %v5756_v32 = vmul.f32 %v5495_v47, %v4988_v21 }
 0x540   : > { %v6997_v24 = vpack.c.bf16 %v5756_v32, %v5756_v32  ;;  %v5016_v32 = vunpack.c.l.bf16 %v10572_v38 }
 0x541   : > { %v5485_v5 = vpop.permute.xlu1 %5484 }
 0x542   : > { %6397 = vst.msk [vmem:[%s9345_s30 + $0x178] sm:$0xf] %vm6302_vm2, %v6997_v24  ;;  %v5754_v34 = vmul.f32 %v5485_v5, %v4986_v15 }
 0x544   : > { %v6995_v31 = vpack.c.bf16 %v5754_v34, %v5754_v34 }
 0x545   : > { %v5515_v12 = vpop.permute.xlu1 %5514 }
 0x546   : > { %6395 = vst.msk [vmem:[%s9345_s30 + $0x170] sm:$0xf] %vm6302_vm2, %v6995_v31  ;;  %v5760_v45 = vmul.f32 %v5515_v12, %v4992_v28  ;;  %v5014_v28 = vunpack.c.l.bf16 %v10581_v46 }
 0x548   : > { %v7001_v60 = vpack.c.bf16 %v5760_v45, %v5760_v45  ;;  %v5018_v45 = vunpack.c.l.bf16 %v7966_v19 }
 0x549   : > { %v5505_v33 = vpop.permute.xlu1 %5504 }
 0x54a   : > { %6401 = vst.msk [vmem:[%s9345_s30 + $0x188] sm:$0xf] %vm6302_vm2, %v7001_v60  ;;  %v5758_v9 = vmul.f32 %v5505_v33, %v4990_v52 }
 0x54c   : > { %v6999_v53 = vpack.c.bf16 %v5758_v9, %v5758_v9  ;;  %v5020_v9 = vunpack.c.l.bf16 %v7967_v11 }
 0x54d   : > { %v5535_v13 = vpop.permute.xlu1 %5534 }
 0x54e   : > { %6399 = vst.msk [vmem:[%s9345_s30 + $0x180] sm:$0xf] %vm6302_vm2, %v6999_v53  ;;  %v5764_v39 = vmul.f32 %v5535_v13, %v4996_v10 }
 0x550   : > { %v7005_v16 = vpack.c.bf16 %v5764_v39, %v5764_v39 }
 0x551   : > { %v5525_v14 = vpop.permute.xlu1 %5524 }
 0x552   : > { %6405 = vst.msk [vmem:[%s9345_s30 + $0x198] sm:$0xf] %vm6302_vm2, %v7005_v16  ;;  %v5762_v40 = vmul.f32 %v5525_v14, %v4994_v36 }
 0x554   : > { %v7003_v44 = vpack.c.bf16 %v5762_v40, %v5762_v40 }
 0x555   : > { %v5555_v30 = vpop.permute.xlu1 %5554 }
 0x556   : > { %6403 = vst.msk [vmem:[%s9345_s30 + $0x190] sm:$0xf] %vm6302_vm2, %v7003_v44  ;;  %v5768_v0 = vmul.f32 %v5555_v30, %v5000_v7 }
 0x558   : > { %v7009_v2 = vpack.c.bf16 %v5768_v0, %v5768_v0 }
 0x559   : > { %v5545_v50 = vpop.permute.xlu1 %5544 }
 0x55a   : > { %6409 = vst.msk [vmem:[%s9345_s30 + $0x1a8] sm:$0xf] %vm6302_vm2, %v7009_v2  ;;  %v5766_v17 = vmul.f32 %v5545_v50, %v4998_v3 }
 0x55c   : > { %v7007_v35 = vpack.c.bf16 %v5766_v17, %v5766_v17 }
 0x55d   : > { %v5575_v61 = vpop.permute.xlu1 %5574 }
 0x55e   : > { %6407 = vst.msk [vmem:[%s9345_s30 + $0x1a0] sm:$0xf] %vm6302_vm2, %v7007_v35  ;;  %v5772_v41 = vmul.f32 %v5575_v61, %v5004_v23 }
 0x560   : > { %v7013_v42 = vpack.c.bf16 %v5772_v41, %v5772_v41 }
 0x561   : > { %v5565_v27 = vpop.permute.xlu1 %5564 }
 0x562   : > { %6413 = vst.msk [vmem:[%s9345_s30 + $0x1b8] sm:$0xf] %vm6302_vm2, %v7013_v42  ;;  %v5770_v29 = vmul.f32 %v5565_v27, %v5002_v59 }
 0x564   : > { %v7011_v63 = vpack.c.bf16 %v5770_v29, %v5770_v29 }
 0x565   : > { %v5595_v43 = vpop.permute.xlu1 %5594 }
 0x566   : > { %6411 = vst.msk [vmem:[%s9345_s30 + $0x1b0] sm:$0xf] %vm6302_vm2, %v7011_v63  ;;  %v5776_v56 = vmul.f32 %v5595_v43, %v5008_v62 }
 0x568   : > { %v7017_v55 = vpack.c.bf16 %v5776_v56, %v5776_v56 }
 0x569   : > { %v5585_v57 = vpop.permute.xlu1 %5584 }
 0x56a   : > { %6417 = vst.msk [vmem:[%s9345_s30 + $0x1c8] sm:$0xf] %vm6302_vm2, %v7017_v55  ;;  %v5774_v54 = vmul.f32 %v5585_v57, %v5006_v58 }
 0x56c   : > { %v7015_v51 = vpack.c.bf16 %v5774_v54, %v5774_v54 }
 0x56d   : > { %v5615_v20 = vpop.permute.xlu1 %5614 }
 0x56e   : > { %6415 = vst.msk [vmem:[%s9345_s30 + $0x1c0] sm:$0xf] %vm6302_vm2, %v7015_v51  ;;  %v5780_v8 = vmul.f32 %v5615_v20, %v5012_v26  ;;  %v5650_v6 = vpop.permute.xlu0 %5649 }
 0x56f   : > { %v5787_v4 = vmul.f32 %v5650_v6, %v5019_v25 }
 0x570   : > { %v7021_v1 = vpack.c.bf16 %v5780_v8, %v5780_v8 }
 0x571   : > { %v7028_v21 = vpack.c.bf16 %v5787_v4, %v5787_v4  ;;  %v5605_v22 = vpop.permute.xlu1 %5604 }
 0x572   : > { %6421 = vst.msk [vmem:[%s9345_s30 + $0x1d8] sm:$0xf] %vm6302_vm2, %v7021_v1  ;;  %v5778_v48 = vmul.f32 %v5605_v22, %v5010_v18  ;;  %v5660_v47 = vpop.permute.xlu0 %5659 }
 0x573   : > { %6428 = vst.msk [vmem:[%s9345_s30 + $0x1f4] sm:$0xf] %vm6302_vm2, %v7028_v21  ;;  %v5789_v15 = vmul.f32 %v5660_v47, %v5021_v37 }
 0x574   : > { %v7019_v49 = vpack.c.bf16 %v5778_v48, %v5778_v48 }
 0x575   : > { %v7030_v24 = vpack.c.bf16 %v5789_v15, %v5789_v15  ;;  %v5635_v5 = vpop.permute.xlu1 %5634 }
 0x576   : > { %6419 = vst.msk [vmem:[%s9345_s30 + $0x1d0] sm:$0xf] %vm6302_vm2, %v7019_v49  ;;  %v5784_v34 = vmul.f32 %v5635_v5, %v5016_v32 }
 0x577   : > { %6430 = vst.msk [vmem:[%s9345_s30 + $0x1fc] sm:$0xf] %vm6302_vm2, %v7030_v24 }
 0x578   : > { %v7025_v31 = vpack.c.bf16 %v5784_v34, %v5784_v34 }
 0x579   : > { %v5625_v12 = vpop.permute.xlu1 %5624 }
 0x57a   : > { %6425 = vst.msk [vmem:[%s9345_s30 + $0x1e8] sm:$0xf] %vm6302_vm2, %v7025_v31  ;;  %v5782_v38 = vmul.f32 %v5625_v12, %v5014_v28 }
 0x57c   : > { %v7023_v52 = vpack.c.bf16 %v5782_v38, %v5782_v38 }
 0x57d   : > { %v5645_v60 = vpop.permute.xlu1 %5644 }
 0x57e   : > { %6423 = vst.msk [vmem:[%s9345_s30 + $0x1e0] sm:$0xf] %vm6302_vm2, %v7023_v52  ;;  %v5786_v33 = vmul.f32 %v5645_v60, %v5018_v45 }
 0x580   : > { %v7027_v10 = vpack.c.bf16 %v5786_v33, %v5786_v33 }
 0x581   : > { %v5655_v53 = vpop.permute.xlu1 %5654 }
 0x582   : > { %6427 = vst.msk [vmem:[%s9345_s30 + $0x1f0] sm:$0xf] %vm6302_vm2, %v7027_v10  ;;  %v5788_v46 = vmul.f32 %v5655_v53, %v5020_v9 }
 0x584   : > { %v7029_v13 = vpack.c.bf16 %v5788_v46, %v5788_v46 }
 0x586   : > { %6429 = vst.msk [vmem:[%s9345_s30 + $0x1f8] sm:$0xf] %vm6302_vm2, %v7029_v13 }
 0x587 PF: > { %s25_s21 = sadd.s32 1, %s7974_s21  }
 0x588   : > { %p22_p4 = scmp.ge.s32.totalorder %s25_s21, 4  }
 0x58a   :  { %24 = sbr.rel (!%p22_p4) target bundleno = 3 (0x3), region = 97 }

</bundles_post_ra>
